<compile_context>
chip_gen: v7x
topology: tpu7x:2x2x1
jax: 0.10.0
libtpu: 0.0.40
codegen_flags: <defaults>
</compile_context>

<pallas_src>
import functools

import jax
import jax.numpy as jnp
import numpy as np
from jax.experimental import pallas as pl
from jax.experimental.pallas import tpu as pltpu

EPS = 1e-5  # torch.nn.GroupNorm default eps


# --------------------------------------------------------------------------
# Generic tiled matmul + bias (time-embedding Linear, 1x1 shortcut conv)
# --------------------------------------------------------------------------
def _matmul_bias_kernel(x_ref, w_ref, b_ref, o_ref, acc_ref):
    @pl.when(pl.program_id(2) == 0)
    def _init():
        acc_ref[...] = jnp.zeros_like(acc_ref)

    acc_ref[...] += jnp.dot(x_ref[...], w_ref[...],
                            preferred_element_type=jnp.float32)

    @pl.when(pl.program_id(2) == pl.num_programs(2) - 1)
    def _done():
        o_ref[...] = acc_ref[...] + b_ref[...]


def matmul_bias(x, w, b, *, tm=256, tn=256, tk=512):
    """out = x @ w + b, tiled over (M, N, K) with an f32 VMEM accumulator.

    Tile defaults target v6e/v7x MXU alignment (multiples of 256 on N/K); on
    v5e multiples of 128 suffice.  Tiles are clipped to the array dims, so at
    the tiny shapes used here (time-emb Linear, 1x1 shortcut) the grid is 1x1x1
    while the same code scales to large shapes without exceeding scoped VMEM.
    """
    M, K = x.shape
    _, N = w.shape
    tm, tn, tk = min(tm, M), min(tn, N), min(tk, K)
    assert M % tm == 0 and N % tn == 0 and K % tk == 0
    return pl.pallas_call(
        _matmul_bias_kernel,
        out_shape=jax.ShapeDtypeStruct((M, N), jnp.float32),
        grid=(M // tm, N // tn, K // tk),
        in_specs=[
            pl.BlockSpec((tm, tk), lambda i, j, k: (i, k)),
            pl.BlockSpec((tk, tn), lambda i, j, k: (k, j)),
            pl.BlockSpec((1, tn), lambda i, j, k: (0, j)),
        ],
        out_specs=pl.BlockSpec((tm, tn), lambda i, j, k: (i, j)),
        scratch_shapes=[pltpu.VMEM((tm, tn), jnp.float32)],
        compiler_params=pltpu.CompilerParams(
            dimension_semantics=("parallel", "parallel", "arbitrary")),
    )(x.astype(jnp.bfloat16), w.astype(jnp.bfloat16), b.reshape(1, N))


# --------------------------------------------------------------------------
# Fused GroupNorm + SiLU + 3x3 conv + bias + epilogue add
# --------------------------------------------------------------------------
def _gn_silu_conv3x3_kernel(xpad_ref, gamma_ref, beta_ref, gmap_ref, gmapT_ref,
                            w_ref, b_ref, add_ref, o_ref, ypad_ref, *, n, H, W):
    Cin = xpad_ref.shape[-1]
    Cout = w_ref.shape[-1]
    xp = xpad_ref[...]                                   # (H+2, W+2, Cin) f32, pad==0

    # Valid-region mask: the 1px zero-pad border must stay exactly zero after
    # the (affine, nonlinear) normalization.
    row = jax.lax.broadcasted_iota(jnp.int32, (H + 2, W + 2, Cin), 0)
    col = jax.lax.broadcasted_iota(jnp.int32, (H + 2, W + 2, Cin), 1)
    valid = (row >= 1) & (row <= H) & (col >= 1) & (col <= W)

    # GroupNorm statistics (zero padding does not perturb the sums; divisor n
    # is the true count H*W*channels_per_group).  Two-pass (shifted) variance.
    s = jnp.sum(jnp.sum(xp, axis=0), axis=0, keepdims=True)             # (1, Cin)
    gs = jnp.dot(s, gmap_ref[...], preferred_element_type=jnp.float32)  # (1, G)
    mean_c = jnp.dot(gs * (1.0 / n), gmapT_ref[...],
                     preferred_element_type=jnp.float32)                # (1, Cin)
    d = jnp.where(valid, xp - mean_c, 0.0)
    ssd = jnp.sum(jnp.sum(d * d, axis=0), axis=0, keepdims=True)        # (1, Cin)
    gv = jnp.dot(ssd, gmap_ref[...], preferred_element_type=jnp.float32) * (1.0 / n)
    inv_c = jnp.dot(jax.lax.rsqrt(gv + EPS), gmapT_ref[...],
                    preferred_element_type=jnp.float32)                 # (1, Cin)

    y = d * (inv_c * gamma_ref[...]) + beta_ref[...]
    y = y * jax.nn.sigmoid(y)                            # SiLU
    ypad_ref[...] = jnp.where(valid, y, 0.0)             # zero-bordered, in VMEM

    # 3x3 conv = 9 shifted (HW, Cin) x (Cin, Cout) MXU matmuls (im2col fused in
    # VMEM: no 9x duplicated activation in HBM).
    acc = jnp.zeros((H * W, Cout), jnp.float32)
    for kh in range(3):
        for kw in range(3):
            patch = ypad_ref[kh:kh + H, kw:kw + W, :]
            patch = patch.reshape(H * W, Cin).astype(jnp.bfloat16)
            acc = acc + jnp.dot(patch, w_ref[kh * 3 + kw],
                                preferred_element_type=jnp.float32)

    # Fused epilogue: conv bias + (time-emb projection broadcast or residual).
    o_ref[...] = acc + b_ref[...] + add_ref[...]


def group_maps(C, G):
    """(C,G) one-hot channel->group map and its transpose (tiny, replaces a CxC kron)."""
    cs = C // G
    gmap = jnp.repeat(jnp.eye(G, dtype=jnp.float32), cs, axis=0)   # (C, G)
    return gmap, gmap.T


def gn_silu_conv3x3(x_bsc, gamma, beta, wm_bf16, bias, add, G, H, W):
    """GroupNorm + SiLU + 3x3 same-pad conv + bias + add.  x: (B, HW, Cin)."""
    B, HW, Cin = x_bsc.shape
    Cout = wm_bf16.shape[-1]
    cs = Cin // G
    xpad = jnp.pad(x_bsc.reshape(B, H, W, Cin), ((0, 0), (1, 1), (1, 1), (0, 0)))
    gmap, gmapT = group_maps(Cin, G)
    AM = add.shape[1]                                    # 1 (broadcast) or HW
    kern = functools.partial(_gn_silu_conv3x3_kernel,
                             n=float(HW * cs), H=H, W=W)
    return pl.pallas_call(
        kern,
        out_shape=jax.ShapeDtypeStruct((B, HW, Cout), jnp.float32),
        grid=(B,),
        in_specs=[
            pl.BlockSpec((None, H + 2, W + 2, Cin), lambda b: (b, 0, 0, 0)),
            pl.BlockSpec((1, Cin), lambda b: (0, 0)),
            pl.BlockSpec((1, Cin), lambda b: (0, 0)),
            pl.BlockSpec((Cin, G), lambda b: (0, 0)),
            pl.BlockSpec((G, Cin), lambda b: (0, 0)),
            pl.BlockSpec((9, Cin, Cout), lambda b: (0, 0, 0)),
            pl.BlockSpec((1, Cout), lambda b: (0, 0)),
            pl.BlockSpec((None, AM, Cout), lambda b: (b, 0, 0)),
        ],
        out_specs=pl.BlockSpec((None, HW, Cout), lambda b: (b, 0, 0)),
        scratch_shapes=[pltpu.VMEM((H + 2, W + 2, Cin), jnp.float32)],
        compiler_params=pltpu.CompilerParams(dimension_semantics=("parallel",)),
    )(xpad, gamma.reshape(1, Cin), beta.reshape(1, Cin), gmap, gmapT,
      wm_bf16, bias.reshape(1, Cout), add)


# --------------------------------------------------------------------------
# Fused GroupNorm + QKV projection (also emits normed x for the residual)
# --------------------------------------------------------------------------
def _gn_qkv_kernel(x_ref, gamma_ref, beta_ref, gmap_ref, gmapT_ref,
                   wqkv_ref, bqkv_ref, xn_ref, qkv_ref, *, n):
    x = x_ref[...]                                       # (HW, C) f32
    s = jnp.sum(x, axis=0, keepdims=True)                # (1, C)
    gs = jnp.dot(s, gmap_ref[...], preferred_element_type=jnp.float32)
    mean_c = jnp.dot(gs * (1.0 / n), gmapT_ref[...],
                     preferred_element_type=jnp.float32)
    d = x - mean_c
    ssd = jnp.sum(d * d, axis=0, keepdims=True)
    gv = jnp.dot(ssd, gmap_ref[...], preferred_element_type=jnp.float32) * (1.0 / n)
    inv_c = jnp.dot(jax.lax.rsqrt(gv + EPS), gmapT_ref[...],
                    preferred_element_type=jnp.float32)
    xn = d * (inv_c * gamma_ref[...]) + beta_ref[...]
    xn_ref[...] = xn
    qkv_ref[...] = jnp.dot(xn.astype(jnp.bfloat16), wqkv_ref[...],
                           preferred_element_type=jnp.float32) + bqkv_ref[...]


def gn_qkv(x, gamma, beta, wqkv_bf16, bqkv, G):
    B, HW, C = x.shape
    cs = C // G
    gmap, gmapT = group_maps(C, G)
    kern = functools.partial(_gn_qkv_kernel, n=float(HW * cs))
    return pl.pallas_call(
        kern,
        out_shape=(jax.ShapeDtypeStruct((B, HW, C), jnp.float32),
                   jax.ShapeDtypeStruct((B, HW, 3 * C), jnp.float32)),
        grid=(B,),
        in_specs=[
            pl.BlockSpec((None, HW, C), lambda b: (b, 0, 0)),
            pl.BlockSpec((1, C), lambda b: (0, 0)),
            pl.BlockSpec((1, C), lambda b: (0, 0)),
            pl.BlockSpec((C, G), lambda b: (0, 0)),
            pl.BlockSpec((G, C), lambda b: (0, 0)),
            pl.BlockSpec((C, 3 * C), lambda b: (0, 0)),
            pl.BlockSpec((1, 3 * C), lambda b: (0, 0)),
        ],
        out_specs=(pl.BlockSpec((None, HW, C), lambda b: (b, 0, 0)),
                   pl.BlockSpec((None, HW, 3 * C), lambda b: (b, 0, 0))),
        compiler_params=pltpu.CompilerParams(dimension_semantics=("parallel",)),
    )(x, gamma.reshape(1, C), beta.reshape(1, C), gmap, gmapT,
      wqkv_bf16, bqkv.reshape(1, 3 * C))


# --------------------------------------------------------------------------
# Fused attention + output projection + residual
# --------------------------------------------------------------------------
def _attn_out_kernel(qkv_ref, xn_ref, wo_ref, bo_ref, o_ref, *, scale, C):
    # Scale folded into q (HW*C elements) instead of the (HW,HW) score matrix.
    q = (qkv_ref[:, 0:C] * scale).astype(jnp.bfloat16)
    k = qkv_ref[:, C:2 * C].astype(jnp.bfloat16)
    v = qkv_ref[:, 2 * C:3 * C].astype(jnp.bfloat16)
    # q @ k^T without materializing the transpose (contract last dims).
    s = jax.lax.dot_general(q, k, (((1,), (1,)), ((), ())),
                            preferred_element_type=jnp.float32)     # (HW, HW)
    m = jnp.max(s, axis=-1, keepdims=True)
    p = jnp.exp(s - m)
    l = jnp.sum(p, axis=-1, keepdims=True)
    attn = (p * pl.reciprocal(l, approx=True)).astype(jnp.bfloat16)
    ctx = jnp.dot(attn, v, preferred_element_type=jnp.float32)       # (HW, C)
    out = jnp.dot(ctx.astype(jnp.bfloat16), wo_ref[...],
                  preferred_element_type=jnp.float32)
    # NB: the PyTorch module reassigns x = norm(x), so the residual is the NORMED x.
    o_ref[...] = out + bo_ref[...] + xn_ref[...]
    # TODO(synk): for large latents (HW >= 1024) switch to a KV-tiled flash-style
    # online-softmax loop instead of materializing the full (HW, HW) score matrix.


def attn_out(qkv, xn, wo_bf16, bo, scale):
    B, HW, C3 = qkv.shape
    C = C3 // 3
    kern = functools.partial(_attn_out_kernel, scale=scale, C=C)
    return pl.pallas_call(
        kern,
        out_shape=jax.ShapeDtypeStruct((B, HW, C), jnp.float32),
        grid=(B,),
        in_specs=[
            pl.BlockSpec((None, HW, 3 * C), lambda b: (b, 0, 0)),
            pl.BlockSpec((None, HW, C), lambda b: (b, 0, 0)),
            pl.BlockSpec((C, C), lambda b: (0, 0)),
            pl.BlockSpec((1, C), lambda b: (0, 0)),
        ],
        out_specs=pl.BlockSpec((None, HW, C), lambda b: (b, 0, 0)),
        compiler_params=pltpu.CompilerParams(dimension_semantics=("parallel",)),
    )(qkv, xn, wo_bf16, bo.reshape(1, C))


# --------------------------------------------------------------------------
# MiddleBlock forward (Pallas version)
# --------------------------------------------------------------------------
def _pack_block(p):
    """One-time weight re-layout (transposes + bf16 cast) for the kernels."""
    Cout, Cin = p["conv1_w"].shape[0], p["conv1_w"].shape[1]
    q = dict(p)
    q["conv1_wm"] = jnp.transpose(p["conv1_w"], (2, 3, 1, 0)).reshape(
        9, Cin, Cout).astype(jnp.bfloat16)
    q["conv2_wm"] = jnp.transpose(p["conv2_w"], (2, 3, 1, 0)).reshape(
        9, Cout, Cout).astype(jnp.bfloat16)
    q["lin_wm"] = p["lin_w"].T.astype(jnp.bfloat16)                  # (t_dim, Cout)
    q["sc_wm"] = (p["sc_w"].reshape(Cout, Cin).T.astype(jnp.bfloat16)
                  if p["sc_w"] is not None else None)
    wq = p["q_w"].reshape(Cout, Cout).T
    wk = p["k_w"].reshape(Cout, Cout).T
    wv = p["v_w"].reshape(Cout, Cout).T
    q["qkv_wm"] = jnp.concatenate([wq, wk, wv], axis=1).astype(jnp.bfloat16)
    q["qkv_bc"] = jnp.concatenate([p["q_b"], p["k_b"], p["v_b"]])
    q["o_wm"] = p["o_w"].reshape(Cout, Cout).T.astype(jnp.bfloat16)
    return q


def residual_block(x, proj, p, H, W, G):
    """x: (B, HW, Cin), proj: (B, Cout) time-embedding projection."""
    B, HW, Cin = x.shape
    Cout = p["conv1_w"].shape[0]
    # conv_block1 + fused "+ proj(t_emb)" epilogue
    h = gn_silu_conv3x3(x, p["gn1_g"], p["gn1_b"], p["conv1_wm"], p["conv1_b"],
                        add=proj.reshape(B, 1, Cout), G=G, H=H, W=W)
    # shortcut (1x1 conv, bias=False) or identity
    if p["sc_wm"] is not None:
        sc = matmul_bias(x.reshape(B * HW, Cin), p["sc_wm"],
                         jnp.zeros((Cout,), jnp.float32)).reshape(B, HW, Cout)
    else:
        sc = x
    # conv_block2 + fused residual epilogue
    return gn_silu_conv3x3(h, p["gn2_g"], p["gn2_b"], p["conv2_wm"], p["conv2_b"],
                           add=sc, G=G, H=H, W=W)
    # TODO(synk): nn.Dropout(p=0.0) is an identity and is omitted.


def attention_block(x, p, G):
    B, HW, C = x.shape
    xn, qkv = gn_qkv(x, p["attn_gn_g"], p["attn_gn_b"], p["qkv_wm"], p["qkv_bc"], G)
    return attn_out(qkv, xn, p["o_wm"], p["o_b"], scale=float(C) ** (-0.5))


def middle_block(x_nchw, t_emb, params, G=32):
    B, C, H, W = x_nchw.shape
    out = jnp.transpose(x_nchw, (0, 2, 3, 1)).reshape(B, H * W, C)
    t_act = jax.nn.silu(t_emb)
    for raw in params:
        p = _pack_block(raw)
        Cout = p["conv1_w"].shape[0]
        proj = matmul_bias(t_act, p["lin_wm"], p["lin_b"])            # (B, Cout)
        out = residual_block(out, proj, p, H, W, G)
        out = attention_block(out, p, G)
    Cout = out.shape[-1]
    return jnp.transpose(out.reshape(B, H, W, Cout), (0, 3, 1, 2))


# --------------------------------------------------------------------------
# Deterministic parameter init (synthetic; shapes follow the nn.Module)
# --------------------------------------------------------------------------
def init_params(key, in_ch, out_ch, t_dim, num_blocks):
    def nrm(k, shape, scale=0.1):
        return scale * jax.random.normal(k, shape, dtype=jnp.float32)

    params = []
    for i in range(num_blocks):
        cin = in_ch if i == 0 else out_ch
        keys = jax.random.split(key, 20)
        key = keys[0]
        blk = dict(
            gn1_g=1.0 + nrm(keys[16], (cin,)), gn1_b=nrm(keys[17], (cin,)),
            conv1_w=nrm(keys[1], (out_ch, cin, 3, 3)), conv1_b=nrm(keys[2], (out_ch,)),
            gn2_g=1.0 + nrm(keys[18], (out_ch,)), gn2_b=nrm(keys[19], (out_ch,)),
            conv2_w=nrm(keys[3], (out_ch, out_ch, 3, 3)), conv2_b=nrm(keys[4], (out_ch,)),
            lin_w=nrm(keys[5], (out_ch, t_dim)), lin_b=nrm(keys[6], (out_ch,)),
            sc_w=nrm(keys[7], (out_ch, cin, 1, 1)) if cin != out_ch else None,
            attn_gn_g=jnp.ones((out_ch,), jnp.float32),
            attn_gn_b=jnp.zeros((out_ch,), jnp.float32),
            q_w=nrm(keys[8], (out_ch, out_ch, 1, 1)), q_b=nrm(keys[9], (out_ch,)),
            k_w=nrm(keys[10], (out_ch, out_ch, 1, 1)), k_b=nrm(keys[11], (out_ch,)),
            v_w=nrm(keys[12], (out_ch, out_ch, 1, 1)), v_b=nrm(keys[13], (out_ch,)),
            o_w=nrm(keys[14], (out_ch, out_ch, 1, 1)), o_b=nrm(keys[15], (out_ch,)),
        )
        params.append(blk)
    return params


# --------------------------------------------------------------------------
# Pure-JAX reference (NCHW, same math as the PyTorch module)
# --------------------------------------------------------------------------
def ref_groupnorm(x, gamma, beta, G):
    B, C, H, W = x.shape
    xg = x.reshape(B, G, C // G, H, W)
    mean = xg.mean(axis=(2, 3, 4), keepdims=True)
    var = xg.var(axis=(2, 3, 4), keepdims=True)
    xg = (xg - mean) / jnp.sqrt(var + EPS)
    x = xg.reshape(B, C, H, W)
    return x * gamma[None, :, None, None] + beta[None, :, None, None]


def ref_conv(x, w, b=None, pad=0):
    out = jax.lax.conv_general_dilated(
        x, w, (1, 1), [(pad, pad), (pad, pad)],
        dimension_numbers=("NCHW", "OIHW", "NCHW"))
    if b is not None:
        out = out + b[None, :, None, None]
    return out


def ref_res_block(x, t, p, G):
    h = ref_conv(jax.nn.silu(ref_groupnorm(x, p["gn1_g"], p["gn1_b"], G)),
                 p["conv1_w"], p["conv1_b"], pad=1)
    h = h + (jax.nn.silu(t) @ p["lin_w"].T + p["lin_b"])[:, :, None, None]
    h = ref_conv(jax.nn.silu(ref_groupnorm(h, p["gn2_g"], p["gn2_b"], G)),
                 p["conv2_w"], p["conv2_b"], pad=1)
    sc = ref_conv(x, p["sc_w"], None, pad=0) if p["sc_w"] is not None else x
    return h + sc


def ref_attn_block(x, p, G):
    B, C, H, W = x.shape
    xn = ref_groupnorm(x, p["attn_gn_g"], p["attn_gn_b"], G)
    q = ref_conv(xn, p["q_w"], p["q_b"]).reshape(B, C, H * W).transpose(0, 2, 1)
    k = ref_conv(xn, p["k_w"], p["k_b"]).reshape(B, C, H * W)
    v = ref_conv(xn, p["v_w"], p["v_b"]).reshape(B, C, H * W).transpose(0, 2, 1)
    score = jnp.einsum("bqc,bck->bqk", q, k) * float(C) ** (-0.5)
    attn = jax.nn.softmax(score, axis=-1)
    out = jnp.einsum("bqk,bkc->bqc", attn, v).transpose(0, 2, 1).reshape(B, C, H, W)
    out = ref_conv(out, p["o_w"], p["o_b"])
    return out + xn


def ref_middle(x, t, params, G):
    out = x
    for p in params:
        out = ref_res_block(out, t, p, G)
        out = ref_attn_block(out, p, G)
    return out


# --------------------------------------------------------------------------
if __name__ == "__main__":
    B, in_ch, out_ch, H, W = 2, 64, 128, 8, 8
    t_dim, num_blocks, G = 32, 2, 32

    key = jax.random.PRNGKey(0)
    kx, kt, kp = jax.random.split(key, 3)
    x = jax.random.normal(kx, (B, in_ch, H, W), dtype=jnp.float32)
    t_emb = jax.random.normal(kt, (B, t_dim), dtype=jnp.float32)
    params = init_params(kp, in_ch, out_ch, t_dim, num_blocks)

    fwd = jax.jit(lambda xx, tt: middle_block(xx, tt, params, G))
    out = jax.block_until_ready(fwd(x, t_emb))
    assert out.shape == (B, out_ch, H, W)
    assert bool(jnp.all(jnp.isfinite(out)))

    ref = jax.block_until_ready(ref_middle(x, t_emb, params, G))
    np.testing.assert_allclose(np.asarray(out), np.asarray(ref),
                               rtol=5e-2, atol=5e-2)
    print("KERNEL_OK")
</pallas_src>

<mosaic_0001>
module attributes {stable_mosaic.version = 11 : i64} {
  func.func @_matmul_bias_kernel(%arg0: i32, %arg1: i32, %arg2: i32, %arg3: memref<2x32xbf16, #tpu.memory_space<vmem>>, %arg4: memref<32x128xbf16, #tpu.memory_space<vmem>>, %arg5: memref<1x128xf32, #tpu.memory_space<vmem>>, %arg6: memref<2x128xf32, #tpu.memory_space<vmem>>, %arg7: memref<2x128xf32, #tpu.memory_space<vmem>>) attributes {dimension_semantics = [#tpu.dimension_semantics<parallel>, #tpu.dimension_semantics<parallel>, #tpu.dimension_semantics<arbitrary>], iteration_bounds = array<i64: 1, 1, 1>, scalar_prefetch = 0 : i64, scratch_operands = 1 : i64, tpu.core_type = #tpu.core_type<tc>, window_params = [{transform_indices = @transform_0, window_bounds = array<i64: 2, 32>}, {transform_indices = @transform_1, window_bounds = array<i64: 32, 128>}, {transform_indices = @transform_2, window_bounds = array<i64: 1, 128>}, {transform_indices = @transform_3, window_bounds = array<i64: 2, 128>}]} {
    %c0_i32 = arith.constant 0 : i32
    %0 = arith.cmpi eq, %arg2, %c0_i32 : i32
    %1 = arith.extui %0 : i1 to i32
    %c0_i32_0 = arith.constant 0 : i32
    %2 = arith.cmpi ne, %1, %c0_i32_0 : i32
    scf.if %2 {
      %cst_10 = arith.constant 0.000000e+00 : f32
      %12 = vector.broadcast %cst_10 : f32 to vector<2x128xf32>
      %c0_11 = arith.constant 0 : index
      %c0_12 = arith.constant 0 : index
      %13 = vector.load %arg7[%c0_11, %c0_12] : memref<2x128xf32, #tpu.memory_space<vmem>>, vector<2x128xf32>
      tpu.vector_store %arg7[%c0_11, %c0_12], %12 {strides = array<i32>} : memref<2x128xf32, #tpu.memory_space<vmem>>, vector<2x128xf32>,
    } else {
    }
    %c0 = arith.constant 0 : index
    %c0_1 = arith.constant 0 : index
    %3 = vector.load %arg7[%c0, %c0_1] : memref<2x128xf32, #tpu.memory_space<vmem>>, vector<2x128xf32>
    %c0_2 = arith.constant 0 : index
    %c0_3 = arith.constant 0 : index
    %4 = vector.load %arg3[%c0_2, %c0_3] : memref<2x32xbf16, #tpu.memory_space<vmem>>, vector<2x32xbf16>
    %c0_4 = arith.constant 0 : index
    %c0_5 = arith.constant 0 : index
    %5 = vector.load %arg4[%c0_4, %c0_5] : memref<32x128xbf16, #tpu.memory_space<vmem>>, vector<32x128xbf16>
    %cst = arith.constant dense<0.000000e+00> : vector<2x128xf32>
    %6 = tpu.matmul %4, %5, %cst {dimension_numbers = #tpu.dot_dimension_numbers<[1], [0], [0], [1], [0, 0, 1, 1], [], []>} : vector<2x32xbf16>, vector<32x128xbf16>, vector<2x128xf32> -> vector<2x128xf32>
    %7 = arith.addf %3, %6 : vector<2x128xf32>
    %c0_6 = arith.constant 0 : index
    %c0_7 = arith.constant 0 : index
    %8 = vector.load %arg7[%c0_6, %c0_7] : memref<2x128xf32, #tpu.memory_space<vmem>>, vector<2x128xf32>
    tpu.vector_store %arg7[%c0_6, %c0_7], %7 {strides = array<i32>} : memref<2x128xf32, #tpu.memory_space<vmem>>, vector<2x128xf32>,
    %c0_i32_8 = arith.constant 0 : i32
    %9 = arith.cmpi eq, %arg2, %c0_i32_8 : i32
    %10 = arith.extui %9 : i1 to i32
    %c0_i32_9 = arith.constant 0 : i32
    %11 = arith.cmpi ne, %10, %c0_i32_9 : i32
    scf.if %11 {
      %c0_10 = arith.constant 0 : index
      %c0_11 = arith.constant 0 : index
      %12 = vector.load %arg7[%c0_10, %c0_11] : memref<2x128xf32, #tpu.memory_space<vmem>>, vector<2x128xf32>
      %c0_12 = arith.constant 0 : index
      %c0_13 = arith.constant 0 : index
      %13 = vector.load %arg5[%c0_12, %c0_13] : memref<1x128xf32, #tpu.memory_space<vmem>>, vector<1x128xf32>
      %14 = vector.broadcast %13 : vector<1x128xf32> to vector<2x128xf32>
      %15 = arith.addf %12, %14 : vector<2x128xf32>
      %c0_14 = arith.constant 0 : index
      %c0_15 = arith.constant 0 : index
      %16 = vector.load %arg6[%c0_14, %c0_15] : memref<2x128xf32, #tpu.memory_space<vmem>>, vector<2x128xf32>
      tpu.vector_store %arg6[%c0_14, %c0_15], %15 {strides = array<i32>} : memref<2x128xf32, #tpu.memory_space<vmem>>, vector<2x128xf32>,
    } else {
    }
    return
  }
  func.func @transform_0(%arg0: i32, %arg1: i32, %arg2: i32) -> (i32, i32) {
    %c0_i32 = arith.constant 0 : i32
    return %arg0, %arg2 : i32, i32
  }
  func.func @transform_1(%arg0: i32, %arg1: i32, %arg2: i32) -> (i32, i32) {
    %c0_i32 = arith.constant 0 : i32
    return %arg2, %arg1 : i32, i32
  }
  func.func @transform_2(%arg0: i32, %arg1: i32, %arg2: i32) -> (i32, i32) {
    %c0_i32 = arith.constant 0 : i32
    %c0_i32_0 = arith.constant 0 : i32
    return %c0_i32, %arg1 : i32, i32
  }
  func.func @transform_3(%arg0: i32, %arg1: i32, %arg2: i32) -> (i32, i32) {
    %c0_i32 = arith.constant 0 : i32
    return %arg0, %arg1 : i32, i32
  }
}

module attributes {stable_mosaic.version = 11 : i64} {
  func.func @_gn_silu_conv3x3_kernel(%arg0: i32, %arg1: memref<1x10x10x64xf32, #tpu.memory_space<vmem>>, %arg2: memref<1x64xf32, #tpu.memory_space<vmem>>, %arg3: memref<1x64xf32, #tpu.memory_space<vmem>>, %arg4: memref<64x32xf32, #tpu.memory_space<vmem>>, %arg5: memref<32x64xf32, #tpu.memory_space<vmem>>, %arg6: memref<9x64x128xbf16, #tpu.memory_space<vmem>>, %arg7: memref<1x128xf32, #tpu.memory_space<vmem>>, %arg8: memref<1x1x128xf32, #tpu.memory_space<vmem>>, %arg9: memref<1x64x128xf32, #tpu.memory_space<vmem>>, %arg10: memref<10x10x64xf32, #tpu.memory_space<vmem>>) attributes {dimension_semantics = [#tpu.dimension_semantics<parallel>], iteration_bounds = array<i64: 2>, scalar_prefetch = 0 : i64, scratch_operands = 1 : i64, tpu.core_type = #tpu.core_type<tc>, window_params = [{transform_indices = @transform_0, window_bounds = array<i64: 1, 10, 10, 64>}, {pipeline_mode = #tpu.pipeline_mode<synchronous>, transform_indices = @transform_1, window_bounds = array<i64: 1, 64>}, {pipeline_mode = #tpu.pipeline_mode<synchronous>, transform_indices = @transform_2, window_bounds = array<i64: 1, 64>}, {pipeline_mode = #tpu.pipeline_mode<synchronous>, transform_indices = @transform_3, window_bounds = array<i64: 64, 32>}, {pipeline_mode = #tpu.pipeline_mode<synchronous>, transform_indices = @transform_4, window_bounds = array<i64: 32, 64>}, {pipeline_mode = #tpu.pipeline_mode<synchronous>, transform_indices = @transform_5, window_bounds = array<i64: 9, 64, 128>}, {pipeline_mode = #tpu.pipeline_mode<synchronous>, transform_indices = @transform_6, window_bounds = array<i64: 1, 128>}, {transform_indices = @transform_7, window_bounds = array<i64: 1, 1, 128>}, {transform_indices = @transform_8, window_bounds = array<i64: 1, 64, 128>}]} {
    %c0 = arith.constant 0 : index
    %c0_0 = arith.constant 0 : index
    %c0_1 = arith.constant 0 : index
    %c0_2 = arith.constant 0 : index
    %0 = vector.load %arg1[%c0, %c0_0, %c0_1, %c0_2] : memref<1x10x10x64xf32, #tpu.memory_space<vmem>>, vector<1x10x10x64xf32>
    %1 = vector.shape_cast %0 : vector<1x10x10x64xf32> to vector<10x10x64xf32>
    %2 = tpu.iota {dimensions = array<i32: 0>} : vector<10x10x64xi32>
    %3 = tpu.iota {dimensions = array<i32: 1>} : vector<10x10x64xi32>
    %c1_i32 = arith.constant 1 : i32
    %4 = vector.broadcast %c1_i32 : i32 to vector<10x10x64xi32>
    %5 = arith.cmpi sge, %2, %4 : vector<10x10x64xi32>
    %c8_i32 = arith.constant 8 : i32
    %6 = vector.broadcast %c8_i32 : i32 to vector<10x10x64xi32>
    %7 = arith.cmpi sle, %2, %6 : vector<10x10x64xi32>
    %8 = arith.andi %5, %7 : vector<10x10x64xi1>
    %c1_i32_3 = arith.constant 1 : i32
    %9 = vector.broadcast %c1_i32_3 : i32 to vector<10x10x64xi32>
    %10 = arith.cmpi sge, %3, %9 : vector<10x10x64xi32>
    %11 = arith.andi %8, %10 : vector<10x10x64xi1>
    %c8_i32_4 = arith.constant 8 : i32
    %12 = vector.broadcast %c8_i32_4 : i32 to vector<10x10x64xi32>
    %13 = arith.cmpi sle, %3, %12 : vector<10x10x64xi32>
    %14 = arith.andi %11, %13 : vector<10x10x64xi1>
    %cst = arith.constant dense<0.000000e+00> : vector<10x64xf32>
    %15 = vector.multi_reduction <add>, %1, %cst [0] : vector<10x10x64xf32> to vector<10x64xf32>
    %cst_5 = arith.constant dense<0.000000e+00> : vector<64xf32>
    %16 = vector.multi_reduction <add>, %15, %cst_5 [0] : vector<10x64xf32> to vector<64xf32>
    %17 = vector.shape_cast %16 : vector<64xf32> to vector<1x64xf32>
    %c0_6 = arith.constant 0 : index
    %c0_7 = arith.constant 0 : index
    %18 = vector.load %arg4[%c0_6, %c0_7] : memref<64x32xf32, #tpu.memory_space<vmem>>, vector<64x32xf32>
    %cst_8 = arith.constant dense<0.000000e+00> : vector<1x32xf32>
    %19 = tpu.matmul %17, %18, %cst_8 {dimension_numbers = #tpu.dot_dimension_numbers<[1], [0], [0], [1], [0, 0, 1, 1], [], []>} : vector<1x64xf32>, vector<64x32xf32>, vector<1x32xf32> -> vector<1x32xf32>
    %cst_9 = arith.constant 7.812500e-03 : f32
    %20 = vector.broadcast %cst_9 : f32 to vector<1x32xf32>
    %21 = arith.mulf %19, %20 : vector<1x32xf32>
    %c0_10 = arith.constant 0 : index
    %c0_11 = arith.constant 0 : index
    %22 = vector.load %arg5[%c0_10, %c0_11] : memref<32x64xf32, #tpu.memory_space<vmem>>, vector<32x64xf32>
    %cst_12 = arith.constant dense<0.000000e+00> : vector<1x64xf32>
    %23 = tpu.matmul %21, %22, %cst_12 {dimension_numbers = #tpu.dot_dimension_numbers<[1], [0], [0], [1], [0, 0, 1, 1], [], []>} : vector<1x32xf32>, vector<32x64xf32>, vector<1x64xf32> -> vector<1x64xf32>
    %24 = vector.shape_cast %23 : vector<1x64xf32> to vector<1x1x64xf32>
    %25 = vector.broadcast %24 : vector<1x1x64xf32> to vector<10x10x64xf32>
    %26 = arith.subf %1, %25 : vector<10x10x64xf32>
    %cst_13 = arith.constant 0.000000e+00 : f32
    %27 = vector.broadcast %cst_13 : f32 to vector<10x10x64xf32>
    %28 = arith.select %14, %26, %27 : vector<10x10x64xi1>, vector<10x10x64xf32>
    %29 = arith.mulf %28, %28 : vector<10x10x64xf32>
    %cst_14 = arith.constant dense<0.000000e+00> : vector<10x64xf32>
    %30 = vector.multi_reduction <add>, %29, %cst_14 [0] : vector<10x10x64xf32> to vector<10x64xf32>
    %cst_15 = arith.constant dense<0.000000e+00> : vector<64xf32>
    %31 = vector.multi_reduction <add>, %30, %cst_15 [0] : vector<10x64xf32> to vector<64xf32>
    %32 = vector.shape_cast %31 : vector<64xf32> to vector<1x64xf32>
    %c0_16 = arith.constant 0 : index
    %c0_17 = arith.constant 0 : index
    %33 = vector.load %arg4[%c0_16, %c0_17] : memref<64x32xf32, #tpu.memory_space<vmem>>, vector<64x32xf32>
    %cst_18 = arith.constant dense<0.000000e+00> : vector<1x32xf32>
    %34 = tpu.matmul %32, %33, %cst_18 {dimension_numbers = #tpu.dot_dimension_numbers<[1], [0], [0], [1], [0, 0, 1, 1], [], []>} : vector<1x64xf32>, vector<64x32xf32>, vector<1x32xf32> -> vector<1x32xf32>
    %cst_19 = arith.constant 7.812500e-03 : f32
    %35 = vector.broadcast %cst_19 : f32 to vector<1x32xf32>
    %36 = arith.mulf %34, %35 : vector<1x32xf32>
    %cst_20 = arith.constant 9.99999974E-6 : f32
    %37 = vector.broadcast %cst_20 : f32 to vector<1x32xf32>
    %38 = arith.addf %36, %37 : vector<1x32xf32>
    %39 = math.rsqrt %38 : vector<1x32xf32>
    %c0_21 = arith.constant 0 : index
    %c0_22 = arith.constant 0 : index
    %40 = vector.load %arg5[%c0_21, %c0_22] : memref<32x64xf32, #tpu.memory_space<vmem>>, vector<32x64xf32>
    %cst_23 = arith.constant dense<0.000000e+00> : vector<1x64xf32>
    %41 = tpu.matmul %39, %40, %cst_23 {dimension_numbers = #tpu.dot_dimension_numbers<[1], [0], [0], [1], [0, 0, 1, 1], [], []>} : vector<1x32xf32>, vector<32x64xf32>, vector<1x64xf32> -> vector<1x64xf32>
    %c0_24 = arith.constant 0 : index
    %c0_25 = arith.constant 0 : index
    %42 = vector.load %arg2[%c0_24, %c0_25] : memref<1x64xf32, #tpu.memory_space<vmem>>, vector<1x64xf32>
    %43 = arith.mulf %41, %42 : vector<1x64xf32>
    %44 = vector.shape_cast %43 : vector<1x64xf32> to vector<1x1x64xf32>
    %45 = vector.broadcast %44 : vector<1x1x64xf32> to vector<10x10x64xf32>
    %46 = arith.mulf %28, %45 : vector<10x10x64xf32>
    %c0_26 = arith.constant 0 : index
    %c0_27 = arith.constant 0 : index
    %47 = vector.load %arg3[%c0_26, %c0_27] : memref<1x64xf32, #tpu.memory_space<vmem>>, vector<1x64xf32>
    %48 = vector.shape_cast %47 : vector<1x64xf32> to vector<1x1x64xf32>
    %49 = vector.broadcast %48 : vector<1x1x64xf32> to vector<10x10x64xf32>
    %50 = arith.addf %46, %49 : vector<10x10x64xf32>
    %51 = arith.negf %50 : vector<10x10x64xf32>
    %52 = math.exp %51 : vector<10x10x64xf32>
    %cst_28 = arith.constant 1.000000e+00 : f32
    %53 = vector.broadcast %cst_28 : f32 to vector<10x10x64xf32>
    %54 = arith.addf %53, %52 : vector<10x10x64xf32>
    %55 = arith.divf %53, %54 : vector<10x10x64xf32>
    %56 = arith.mulf %50, %55 : vector<10x10x64xf32>
    %cst_29 = arith.constant 0.000000e+00 : f32
    %57 = vector.broadcast %cst_29 : f32 to vector<10x10x64xf32>
    %58 = arith.select %14, %56, %57 : vector<10x10x64xi1>, vector<10x10x64xf32>
    %c0_30 = arith.constant 0 : index
    %c0_31 = arith.constant 0 : index
    %c0_32 = arith.constant 0 : index
    %59 = vector.load %arg10[%c0_30, %c0_31, %c0_32] : memref<10x10x64xf32, #tpu.memory_space<vmem>>, vector<10x10x64xf32>
    tpu.vector_store %arg10[%c0_30, %c0_31, %c0_32], %58 {strides = array<i32>} : memref<10x10x64xf32, #tpu.memory_space<vmem>>, vector<10x10x64xf32>,
    %cst_33 = arith.constant 0.000000e+00 : f32
    %60 = vector.broadcast %cst_33 : f32 to vector<64x128xf32>
    %c0_34 = arith.constant 0 : index
    %c0_35 = arith.constant 0 : index
    %c0_36 = arith.constant 0 : index
    %61 = vector.load %arg10[%c0_34, %c0_35, %c0_36] : memref<10x10x64xf32, #tpu.memory_space<vmem>>, vector<8x8x64xf32>
    %62 = vector.shape_cast %61 : vector<8x8x64xf32> to vector<64x64xf32>
    %63 = arith.truncf %62 : vector<64x64xf32> to vector<64x64xbf16>
    %c0_37 = arith.constant 0 : index
    %c0_38 = arith.constant 0 : index
    %c0_39 = arith.constant 0 : index
    %64 = vector.load %arg6[%c0_37, %c0_38, %c0_39] : memref<9x64x128xbf16, #tpu.memory_space<vmem>>, vector<1x64x128xbf16>
    %65 = vector.shape_cast %64 : vector<1x64x128xbf16> to vector<64x128xbf16>
    %cst_40 = arith.constant dense<0.000000e+00> : vector<64x128xf32>
    %66 = tpu.matmul %63, %65, %cst_40 {dimension_numbers = #tpu.dot_dimension_numbers<[1], [0], [0], [1], [0, 0, 1, 1], [], []>} : vector<64x64xbf16>, vector<64x128xbf16>, vector<64x128xf32> -> vector<64x128xf32>
    %67 = arith.addf %60, %66 : vector<64x128xf32>
    %c0_41 = arith.constant 0 : index
    %c1 = arith.constant 1 : index
    %c0_42 = arith.constant 0 : index
    %68 = vector.load %arg10[%c0_41, %c1, %c0_42] : memref<10x10x64xf32, #tpu.memory_space<vmem>>, vector<8x8x64xf32>
    %69 = vector.shape_cast %68 : vector<8x8x64xf32> to vector<64x64xf32>
    %70 = arith.truncf %69 : vector<64x64xf32> to vector<64x64xbf16>
    %c1_43 = arith.constant 1 : index
    %c0_44 = arith.constant 0 : index
    %c0_45 = arith.constant 0 : index
    %71 = vector.load %arg6[%c1_43, %c0_44, %c0_45] : memref<9x64x128xbf16, #tpu.memory_space<vmem>>, vector<1x64x128xbf16>
    %72 = vector.shape_cast %71 : vector<1x64x128xbf16> to vector<64x128xbf16>
    %cst_46 = arith.constant dense<0.000000e+00> : vector<64x128xf32>
    %73 = tpu.matmul %70, %72, %cst_46 {dimension_numbers = #tpu.dot_dimension_numbers<[1], [0], [0], [1], [0, 0, 1, 1], [], []>} : vector<64x64xbf16>, vector<64x128xbf16>, vector<64x128xf32> -> vector<64x128xf32>
    %74 = arith.addf %67, %73 : vector<64x128xf32>
    %c0_47 = arith.constant 0 : index
    %c2 = arith.constant 2 : index
    %c0_48 = arith.constant 0 : index
    %75 = vector.load %arg10[%c0_47, %c2, %c0_48] : memref<10x10x64xf32, #tpu.memory_space<vmem>>, vector<8x8x64xf32>
    %76 = vector.shape_cast %75 : vector<8x8x64xf32> to vector<64x64xf32>
    %77 = arith.truncf %76 : vector<64x64xf32> to vector<64x64xbf16>
    %c2_49 = arith.constant 2 : index
    %c0_50 = arith.constant 0 : index
    %c0_51 = arith.constant 0 : index
    %78 = vector.load %arg6[%c2_49, %c0_50, %c0_51] : memref<9x64x128xbf16, #tpu.memory_space<vmem>>, vector<1x64x128xbf16>
    %79 = vector.shape_cast %78 : vector<1x64x128xbf16> to vector<64x128xbf16>
    %cst_52 = arith.constant dense<0.000000e+00> : vector<64x128xf32>
    %80 = tpu.matmul %77, %79, %cst_52 {dimension_numbers = #tpu.dot_dimension_numbers<[1], [0], [0], [1], [0, 0, 1, 1], [], []>} : vector<64x64xbf16>, vector<64x128xbf16>, vector<64x128xf32> -> vector<64x128xf32>
    %81 = arith.addf %74, %80 : vector<64x128xf32>
    %c1_53 = arith.constant 1 : index
    %c0_54 = arith.constant 0 : index
    %c0_55 = arith.constant 0 : index
    %82 = vector.load %arg10[%c1_53, %c0_54, %c0_55] : memref<10x10x64xf32, #tpu.memory_space<vmem>>, vector<8x8x64xf32>
    %83 = vector.shape_cast %82 : vector<8x8x64xf32> to vector<64x64xf32>
    %84 = arith.truncf %83 : vector<64x64xf32> to vector<64x64xbf16>
    %c3 = arith.constant 3 : index
    %c0_56 = arith.constant 0 : index
    %c0_57 = arith.constant 0 : index
    %85 = vector.load %arg6[%c3, %c0_56, %c0_57] : memref<9x64x128xbf16, #tpu.memory_space<vmem>>, vector<1x64x128xbf16>
    %86 = vector.shape_cast %85 : vector<1x64x128xbf16> to vector<64x128xbf16>
    %cst_58 = arith.constant dense<0.000000e+00> : vector<64x128xf32>
    %87 = tpu.matmul %84, %86, %cst_58 {dimension_numbers = #tpu.dot_dimension_numbers<[1], [0], [0], [1], [0, 0, 1, 1], [], []>} : vector<64x64xbf16>, vector<64x128xbf16>, vector<64x128xf32> -> vector<64x128xf32>
    %88 = arith.addf %81, %87 : vector<64x128xf32>
    %c1_59 = arith.constant 1 : index
    %c1_60 = arith.constant 1 : index
    %c0_61 = arith.constant 0 : index
    %89 = vector.load %arg10[%c1_59, %c1_60, %c0_61] : memref<10x10x64xf32, #tpu.memory_space<vmem>>, vector<8x8x64xf32>
    %90 = vector.shape_cast %89 : vector<8x8x64xf32> to vector<64x64xf32>
    %91 = arith.truncf %90 : vector<64x64xf32> to vector<64x64xbf16>
    %c4 = arith.constant 4 : index
    %c0_62 = arith.constant 0 : index
    %c0_63 = arith.constant 0 : index
    %92 = vector.load %arg6[%c4, %c0_62, %c0_63] : memref<9x64x128xbf16, #tpu.memory_space<vmem>>, vector<1x64x128xbf16>
    %93 = vector.shape_cast %92 : vector<1x64x128xbf16> to vector<64x128xbf16>
    %cst_64 = arith.constant dense<0.000000e+00> : vector<64x128xf32>
    %94 = tpu.matmul %91, %93, %cst_64 {dimension_numbers = #tpu.dot_dimension_numbers<[1], [0], [0], [1], [0, 0, 1, 1], [], []>} : vector<64x64xbf16>, vector<64x128xbf16>, vector<64x128xf32> -> vector<64x128xf32>
    %95 = arith.addf %88, %94 : vector<64x128xf32>
    %c1_65 = arith.constant 1 : index
    %c2_66 = arith.constant 2 : index
    %c0_67 = arith.constant 0 : index
    %96 = vector.load %arg10[%c1_65, %c2_66, %c0_67] : memref<10x10x64xf32, #tpu.memory_space<vmem>>, vector<8x8x64xf32>
    %97 = vector.shape_cast %96 : vector<8x8x64xf32> to vector<64x64xf32>
    %98 = arith.truncf %97 : vector<64x64xf32> to vector<64x64xbf16>
    %c5 = arith.constant 5 : index
    %c0_68 = arith.constant 0 : index
    %c0_69 = arith.constant 0 : index
    %99 = vector.load %arg6[%c5, %c0_68, %c0_69] : memref<9x64x128xbf16, #tpu.memory_space<vmem>>, vector<1x64x128xbf16>
    %100 = vector.shape_cast %99 : vector<1x64x128xbf16> to vector<64x128xbf16>
    %cst_70 = arith.constant dense<0.000000e+00> : vector<64x128xf32>
    %101 = tpu.matmul %98, %100, %cst_70 {dimension_numbers = #tpu.dot_dimension_numbers<[1], [0], [0], [1], [0, 0, 1, 1], [], []>} : vector<64x64xbf16>, vector<64x128xbf16>, vector<64x128xf32> -> vector<64x128xf32>
    %102 = arith.addf %95, %101 : vector<64x128xf32>
    %c2_71 = arith.constant 2 : index
    %c0_72 = arith.constant 0 : index
    %c0_73 = arith.constant 0 : index
    %103 = vector.load %arg10[%c2_71, %c0_72, %c0_73] : memref<10x10x64xf32, #tpu.memory_space<vmem>>, vector<8x8x64xf32>
    %104 = vector.shape_cast %103 : vector<8x8x64xf32> to vector<64x64xf32>
    %105 = arith.truncf %104 : vector<64x64xf32> to vector<64x64xbf16>
    %c6 = arith.constant 6 : index
    %c0_74 = arith.constant 0 : index
    %c0_75 = arith.constant 0 : index
    %106 = vector.load %arg6[%c6, %c0_74, %c0_75] : memref<9x64x128xbf16, #tpu.memory_space<vmem>>, vector<1x64x128xbf16>
    %107 = vector.shape_cast %106 : vector<1x64x128xbf16> to vector<64x128xbf16>
    %cst_76 = arith.constant dense<0.000000e+00> : vector<64x128xf32>
    %108 = tpu.matmul %105, %107, %cst_76 {dimension_numbers = #tpu.dot_dimension_numbers<[1], [0], [0], [1], [0, 0, 1, 1], [], []>} : vector<64x64xbf16>, vector<64x128xbf16>, vector<64x128xf32> -> vector<64x128xf32>
    %109 = arith.addf %102, %108 : vector<64x128xf32>
    %c2_77 = arith.constant 2 : index
    %c1_78 = arith.constant 1 : index
    %c0_79 = arith.constant 0 : index
    %110 = vector.load %arg10[%c2_77, %c1_78, %c0_79] : memref<10x10x64xf32, #tpu.memory_space<vmem>>, vector<8x8x64xf32>
    %111 = vector.shape_cast %110 : vector<8x8x64xf32> to vector<64x64xf32>
    %112 = arith.truncf %111 : vector<64x64xf32> to vector<64x64xbf16>
    %c7 = arith.constant 7 : index
    %c0_80 = arith.constant 0 : index
    %c0_81 = arith.constant 0 : index
    %113 = vector.load %arg6[%c7, %c0_80, %c0_81] : memref<9x64x128xbf16, #tpu.memory_space<vmem>>, vector<1x64x128xbf16>
    %114 = vector.shape_cast %113 : vector<1x64x128xbf16> to vector<64x128xbf16>
    %cst_82 = arith.constant dense<0.000000e+00> : vector<64x128xf32>
    %115 = tpu.matmul %112, %114, %cst_82 {dimension_numbers = #tpu.dot_dimension_numbers<[1], [0], [0], [1], [0, 0, 1, 1], [], []>} : vector<64x64xbf16>, vector<64x128xbf16>, vector<64x128xf32> -> vector<64x128xf32>
    %116 = arith.addf %109, %115 : vector<64x128xf32>
    %c2_83 = arith.constant 2 : index
    %c2_84 = arith.constant 2 : index
    %c0_85 = arith.constant 0 : index
    %117 = vector.load %arg10[%c2_83, %c2_84, %c0_85] : memref<10x10x64xf32, #tpu.memory_space<vmem>>, vector<8x8x64xf32>
    %118 = vector.shape_cast %117 : vector<8x8x64xf32> to vector<64x64xf32>
    %119 = arith.truncf %118 : vector<64x64xf32> to vector<64x64xbf16>
    %c8 = arith.constant 8 : index
    %c0_86 = arith.constant 0 : index
    %c0_87 = arith.constant 0 : index
    %120 = vector.load %arg6[%c8, %c0_86, %c0_87] : memref<9x64x128xbf16, #tpu.memory_space<vmem>>, vector<1x64x128xbf16>
    %121 = vector.shape_cast %120 : vector<1x64x128xbf16> to vector<64x128xbf16>
    %cst_88 = arith.constant dense<0.000000e+00> : vector<64x128xf32>
    %122 = tpu.matmul %119, %121, %cst_88 {dimension_numbers = #tpu.dot_dimension_numbers<[1], [0], [0], [1], [0, 0, 1, 1], [], []>} : vector<64x64xbf16>, vector<64x128xbf16>, vector<64x128xf32> -> vector<64x128xf32>
    %123 = arith.addf %116, %122 : vector<64x128xf32>
    %c0_89 = arith.constant 0 : index
    %c0_90 = arith.constant 0 : index
    %124 = vector.load %arg7[%c0_89, %c0_90] : memref<1x128xf32, #tpu.memory_space<vmem>>, vector<1x128xf32>
    %125 = vector.broadcast %124 : vector<1x128xf32> to vector<64x128xf32>
    %126 = arith.addf %123, %125 : vector<64x128xf32>
    %c0_91 = arith.constant 0 : index
    %c0_92 = arith.constant 0 : index
    %c0_93 = arith.constant 0 : index
    %127 = vector.load %arg8[%c0_91, %c0_92, %c0_93] : memref<1x1x128xf32, #tpu.memory_space<vmem>>, vector<1x1x128xf32>
    %128 = vector.shape_cast %127 : vector<1x1x128xf32> to vector<1x128xf32>
    %129 = vector.broadcast %128 : vector<1x128xf32> to vector<64x128xf32>
    %130 = arith.addf %126, %129 : vector<64x128xf32>
    %c0_94 = arith.constant 0 : index
    %c0_95 = arith.constant 0 : index
    %c0_96 = arith.constant 0 : index
    %131 = vector.load %arg9[%c0_94, %c0_95, %c0_96] : memref<1x64x128xf32, #tpu.memory_space<vmem>>, vector<1x64x128xf32>
    %132 = vector.shape_cast %131 : vector<1x64x128xf32> to vector<64x128xf32>
    %133 = vector.shape_cast %130 : vector<64x128xf32> to vector<1x64x128xf32>
    tpu.vector_store %arg9[%c0_94, %c0_95, %c0_96], %133 {strides = array<i32>} : memref<1x64x128xf32, #tpu.memory_space<vmem>>, vector<1x64x128xf32>,
    return
  }
  func.func @transform_0(%arg0: i32) -> (i32, i32, i32, i32) {
    %c0_i32 = arith.constant 0 : i32
    %c0_i32_0 = arith.constant 0 : i32
    %c0_i32_1 = arith.constant 0 : i32
    %c0_i32_2 = arith.constant 0 : i32
    return %arg0, %c0_i32, %c0_i32_0, %c0_i32_1 : i32, i32, i32, i32
  }
  func.func @transform_1(%arg0: i32) -> (i32, i32) {
    %c0_i32 = arith.constant 0 : i32
    %c0_i32_0 = arith.constant 0 : i32
    %c0_i32_1 = arith.constant 0 : i32
    return %c0_i32, %c0_i32_0 : i32, i32
  }
  func.func @transform_2(%arg0: i32) -> (i32, i32) {
    %c0_i32 = arith.constant 0 : i32
    %c0_i32_0 = arith.constant 0 : i32
    %c0_i32_1 = arith.constant 0 : i32
    return %c0_i32, %c0_i32_0 : i32, i32
  }
  func.func @transform_3(%arg0: i32) -> (i32, i32) {
    %c0_i32 = arith.constant 0 : i32
    %c0_i32_0 = arith.constant 0 : i32
    %c0_i32_1 = arith.constant 0 : i32
    return %c0_i32, %c0_i32_0 : i32, i32
  }
  func.func @transform_4(%arg0: i32) -> (i32, i32) {
    %c0_i32 = arith.constant 0 : i32
    %c0_i32_0 = arith.constant 0 : i32
    %c0_i32_1 = arith.constant 0 : i32
    return %c0_i32, %c0_i32_0 : i32, i32
  }
  func.func @transform_5(%arg0: i32) -> (i32, i32, i32) {
    %c0_i32 = arith.constant 0 : i32
    %c0_i32_0 = arith.constant 0 : i32
    %c0_i32_1 = arith.constant 0 : i32
    %c0_i32_2 = arith.constant 0 : i32
    return %c0_i32, %c0_i32_0, %c0_i32_1 : i32, i32, i32
  }
  func.func @transform_6(%arg0: i32) -> (i32, i32) {
    %c0_i32 = arith.constant 0 : i32
    %c0_i32_0 = arith.constant 0 : i32
    %c0_i32_1 = arith.constant 0 : i32
    return %c0_i32, %c0_i32_0 : i32, i32
  }
  func.func @transform_7(%arg0: i32) -> (i32, i32, i32) {
    %c0_i32 = arith.constant 0 : i32
    %c0_i32_0 = arith.constant 0 : i32
    %c0_i32_1 = arith.constant 0 : i32
    return %arg0, %c0_i32, %c0_i32_0 : i32, i32, i32
  }
  func.func @transform_8(%arg0: i32) -> (i32, i32, i32) {
    %c0_i32 = arith.constant 0 : i32
    %c0_i32_0 = arith.constant 0 : i32
    %c0_i32_1 = arith.constant 0 : i32
    return %arg0, %c0_i32, %c0_i32_0 : i32, i32, i32
  }
}

module attributes {stable_mosaic.version = 11 : i64} {
  func.func @_matmul_bias_kernel(%arg0: i32, %arg1: i32, %arg2: i32, %arg3: memref<128x64xbf16, #tpu.memory_space<vmem>>, %arg4: memref<64x128xbf16, #tpu.memory_space<vmem>>, %arg5: memref<1x128xf32, #tpu.memory_space<vmem>>, %arg6: memref<128x128xf32, #tpu.memory_space<vmem>>, %arg7: memref<128x128xf32, #tpu.memory_space<vmem>>) attributes {dimension_semantics = [#tpu.dimension_semantics<parallel>, #tpu.dimension_semantics<parallel>, #tpu.dimension_semantics<arbitrary>], iteration_bounds = array<i64: 1, 1, 1>, scalar_prefetch = 0 : i64, scratch_operands = 1 : i64, tpu.core_type = #tpu.core_type<tc>, window_params = [{transform_indices = @transform_0, window_bounds = array<i64: 128, 64>}, {transform_indices = @transform_1, window_bounds = array<i64: 64, 128>}, {transform_indices = @transform_2, window_bounds = array<i64: 1, 128>}, {transform_indices = @transform_3, window_bounds = array<i64: 128, 128>}]} {
    %c0_i32 = arith.constant 0 : i32
    %0 = arith.cmpi eq, %arg2, %c0_i32 : i32
    %1 = arith.extui %0 : i1 to i32
    %c0_i32_0 = arith.constant 0 : i32
    %2 = arith.cmpi ne, %1, %c0_i32_0 : i32
    scf.if %2 {
      %cst_10 = arith.constant 0.000000e+00 : f32
      %12 = vector.broadcast %cst_10 : f32 to vector<128x128xf32>
      %c0_11 = arith.constant 0 : index
      %c0_12 = arith.constant 0 : index
      %13 = vector.load %arg7[%c0_11, %c0_12] : memref<128x128xf32, #tpu.memory_space<vmem>>, vector<128x128xf32>
      tpu.vector_store %arg7[%c0_11, %c0_12], %12 {strides = array<i32>} : memref<128x128xf32, #tpu.memory_space<vmem>>, vector<128x128xf32>,
    } else {
    }
    %c0 = arith.constant 0 : index
    %c0_1 = arith.constant 0 : index
    %3 = vector.load %arg7[%c0, %c0_1] : memref<128x128xf32, #tpu.memory_space<vmem>>, vector<128x128xf32>
    %c0_2 = arith.constant 0 : index
    %c0_3 = arith.constant 0 : index
    %4 = vector.load %arg3[%c0_2, %c0_3] : memref<128x64xbf16, #tpu.memory_space<vmem>>, vector<128x64xbf16>
    %c0_4 = arith.constant 0 : index
    %c0_5 = arith.constant 0 : index
    %5 = vector.load %arg4[%c0_4, %c0_5] : memref<64x128xbf16, #tpu.memory_space<vmem>>, vector<64x128xbf16>
    %cst = arith.constant dense<0.000000e+00> : vector<128x128xf32>
    %6 = tpu.matmul %4, %5, %cst {dimension_numbers = #tpu.dot_dimension_numbers<[1], [0], [0], [1], [0, 0, 1, 1], [], []>} : vector<128x64xbf16>, vector<64x128xbf16>, vector<128x128xf32> -> vector<128x128xf32>
    %7 = arith.addf %3, %6 : vector<128x128xf32>
    %c0_6 = arith.constant 0 : index
    %c0_7 = arith.constant 0 : index
    %8 = vector.load %arg7[%c0_6, %c0_7] : memref<128x128xf32, #tpu.memory_space<vmem>>, vector<128x128xf32>
    tpu.vector_store %arg7[%c0_6, %c0_7], %7 {strides = array<i32>} : memref<128x128xf32, #tpu.memory_space<vmem>>, vector<128x128xf32>,
    %c0_i32_8 = arith.constant 0 : i32
    %9 = arith.cmpi eq, %arg2, %c0_i32_8 : i32
    %10 = arith.extui %9 : i1 to i32
    %c0_i32_9 = arith.constant 0 : i32
    %11 = arith.cmpi ne, %10, %c0_i32_9 : i32
    scf.if %11 {
      %c0_10 = arith.constant 0 : index
      %c0_11 = arith.constant 0 : index
      %12 = vector.load %arg7[%c0_10, %c0_11] : memref<128x128xf32, #tpu.memory_space<vmem>>, vector<128x128xf32>
      %c0_12 = arith.constant 0 : index
      %c0_13 = arith.constant 0 : index
      %13 = vector.load %arg5[%c0_12, %c0_13] : memref<1x128xf32, #tpu.memory_space<vmem>>, vector<1x128xf32>
      %14 = vector.broadcast %13 : vector<1x128xf32> to vector<128x128xf32>
      %15 = arith.addf %12, %14 : vector<128x128xf32>
      %c0_14 = arith.constant 0 : index
      %c0_15 = arith.constant 0 : index
      %16 = vector.load %arg6[%c0_14, %c0_15] : memref<128x128xf32, #tpu.memory_space<vmem>>, vector<128x128xf32>
      tpu.vector_store %arg6[%c0_14, %c0_15], %15 {strides = array<i32>} : memref<128x128xf32, #tpu.memory_space<vmem>>, vector<128x128xf32>,
    } else {
    }
    return
  }
  func.func @transform_0(%arg0: i32, %arg1: i32, %arg2: i32) -> (i32, i32) {
    %c0_i32 = arith.constant 0 : i32
    return %arg0, %arg2 : i32, i32
  }
  func.func @transform_1(%arg0: i32, %arg1: i32, %arg2: i32) -> (i32, i32) {
    %c0_i32 = arith.constant 0 : i32
    return %arg2, %arg1 : i32, i32
  }
  func.func @transform_2(%arg0: i32, %arg1: i32, %arg2: i32) -> (i32, i32) {
    %c0_i32 = arith.constant 0 : i32
    %c0_i32_0 = arith.constant 0 : i32
    return %c0_i32, %arg1 : i32, i32
  }
  func.func @transform_3(%arg0: i32, %arg1: i32, %arg2: i32) -> (i32, i32) {
    %c0_i32 = arith.constant 0 : i32
    return %arg0, %arg1 : i32, i32
  }
}

module attributes {stable_mosaic.version = 11 : i64} {
  func.func @_gn_silu_conv3x3_kernel(%arg0: i32, %arg1: memref<1x10x10x128xf32, #tpu.memory_space<vmem>>, %arg2: memref<1x128xf32, #tpu.memory_space<vmem>>, %arg3: memref<1x128xf32, #tpu.memory_space<vmem>>, %arg4: memref<128x32xf32, #tpu.memory_space<vmem>>, %arg5: memref<32x128xf32, #tpu.memory_space<vmem>>, %arg6: memref<9x128x128xbf16, #tpu.memory_space<vmem>>, %arg7: memref<1x128xf32, #tpu.memory_space<vmem>>, %arg8: memref<1x64x128xf32, #tpu.memory_space<vmem>>, %arg9: memref<1x64x128xf32, #tpu.memory_space<vmem>>, %arg10: memref<10x10x128xf32, #tpu.memory_space<vmem>>) attributes {dimension_semantics = [#tpu.dimension_semantics<parallel>], iteration_bounds = array<i64: 2>, scalar_prefetch = 0 : i64, scratch_operands = 1 : i64, tpu.core_type = #tpu.core_type<tc>, window_params = [{transform_indices = @transform_0, window_bounds = array<i64: 1, 10, 10, 128>}, {pipeline_mode = #tpu.pipeline_mode<synchronous>, transform_indices = @transform_1, window_bounds = array<i64: 1, 128>}, {pipeline_mode = #tpu.pipeline_mode<synchronous>, transform_indices = @transform_2, window_bounds = array<i64: 1, 128>}, {pipeline_mode = #tpu.pipeline_mode<synchronous>, transform_indices = @transform_3, window_bounds = array<i64: 128, 32>}, {pipeline_mode = #tpu.pipeline_mode<synchronous>, transform_indices = @transform_4, window_bounds = array<i64: 32, 128>}, {pipeline_mode = #tpu.pipeline_mode<synchronous>, transform_indices = @transform_5, window_bounds = array<i64: 9, 128, 128>}, {pipeline_mode = #tpu.pipeline_mode<synchronous>, transform_indices = @transform_6, window_bounds = array<i64: 1, 128>}, {transform_indices = @transform_7, window_bounds = array<i64: 1, 64, 128>}, {transform_indices = @transform_8, window_bounds = array<i64: 1, 64, 128>}]} {
    %c0 = arith.constant 0 : index
    %c0_0 = arith.constant 0 : index
    %c0_1 = arith.constant 0 : index
    %c0_2 = arith.constant 0 : index
    %0 = vector.load %arg1[%c0, %c0_0, %c0_1, %c0_2] : memref<1x10x10x128xf32, #tpu.memory_space<vmem>>, vector<1x10x10x128xf32>
    %1 = vector.shape_cast %0 : vector<1x10x10x128xf32> to vector<10x10x128xf32>
    %2 = tpu.iota {dimensions = array<i32: 0>} : vector<10x10x128xi32>
    %3 = tpu.iota {dimensions = array<i32: 1>} : vector<10x10x128xi32>
    %c1_i32 = arith.constant 1 : i32
    %4 = vector.broadcast %c1_i32 : i32 to vector<10x10x128xi32>
    %5 = arith.cmpi sge, %2, %4 : vector<10x10x128xi32>
    %c8_i32 = arith.constant 8 : i32
    %6 = vector.broadcast %c8_i32 : i32 to vector<10x10x128xi32>
    %7 = arith.cmpi sle, %2, %6 : vector<10x10x128xi32>
    %8 = arith.andi %5, %7 : vector<10x10x128xi1>
    %c1_i32_3 = arith.constant 1 : i32
    %9 = vector.broadcast %c1_i32_3 : i32 to vector<10x10x128xi32>
    %10 = arith.cmpi sge, %3, %9 : vector<10x10x128xi32>
    %11 = arith.andi %8, %10 : vector<10x10x128xi1>
    %c8_i32_4 = arith.constant 8 : i32
    %12 = vector.broadcast %c8_i32_4 : i32 to vector<10x10x128xi32>
    %13 = arith.cmpi sle, %3, %12 : vector<10x10x128xi32>
    %14 = arith.andi %11, %13 : vector<10x10x128xi1>
    %cst = arith.constant dense<0.000000e+00> : vector<10x128xf32>
    %15 = vector.multi_reduction <add>, %1, %cst [0] : vector<10x10x128xf32> to vector<10x128xf32>
    %cst_5 = arith.constant dense<0.000000e+00> : vector<128xf32>
    %16 = vector.multi_reduction <add>, %15, %cst_5 [0] : vector<10x128xf32> to vector<128xf32>
    %17 = vector.shape_cast %16 : vector<128xf32> to vector<1x128xf32>
    %c0_6 = arith.constant 0 : index
    %c0_7 = arith.constant 0 : index
    %18 = vector.load %arg4[%c0_6, %c0_7] : memref<128x32xf32, #tpu.memory_space<vmem>>, vector<128x32xf32>
    %cst_8 = arith.constant dense<0.000000e+00> : vector<1x32xf32>
    %19 = tpu.matmul %17, %18, %cst_8 {dimension_numbers = #tpu.dot_dimension_numbers<[1], [0], [0], [1], [0, 0, 1, 1], [], []>} : vector<1x128xf32>, vector<128x32xf32>, vector<1x32xf32> -> vector<1x32xf32>
    %cst_9 = arith.constant 3.906250e-03 : f32
    %20 = vector.broadcast %cst_9 : f32 to vector<1x32xf32>
    %21 = arith.mulf %19, %20 : vector<1x32xf32>
    %c0_10 = arith.constant 0 : index
    %c0_11 = arith.constant 0 : index
    %22 = vector.load %arg5[%c0_10, %c0_11] : memref<32x128xf32, #tpu.memory_space<vmem>>, vector<32x128xf32>
    %cst_12 = arith.constant dense<0.000000e+00> : vector<1x128xf32>
    %23 = tpu.matmul %21, %22, %cst_12 {dimension_numbers = #tpu.dot_dimension_numbers<[1], [0], [0], [1], [0, 0, 1, 1], [], []>} : vector<1x32xf32>, vector<32x128xf32>, vector<1x128xf32> -> vector<1x128xf32>
    %24 = vector.shape_cast %23 : vector<1x128xf32> to vector<1x1x128xf32>
    %25 = vector.broadcast %24 : vector<1x1x128xf32> to vector<10x10x128xf32>
    %26 = arith.subf %1, %25 : vector<10x10x128xf32>
    %cst_13 = arith.constant 0.000000e+00 : f32
    %27 = vector.broadcast %cst_13 : f32 to vector<10x10x128xf32>
    %28 = arith.select %14, %26, %27 : vector<10x10x128xi1>, vector<10x10x128xf32>
    %29 = arith.mulf %28, %28 : vector<10x10x128xf32>
    %cst_14 = arith.constant dense<0.000000e+00> : vector<10x128xf32>
    %30 = vector.multi_reduction <add>, %29, %cst_14 [0] : vector<10x10x128xf32> to vector<10x128xf32>
    %cst_15 = arith.constant dense<0.000000e+00> : vector<128xf32>
    %31 = vector.multi_reduction <add>, %30, %cst_15 [0] : vector<10x128xf32> to vector<128xf32>
    %32 = vector.shape_cast %31 : vector<128xf32> to vector<1x128xf32>
    %c0_16 = arith.constant 0 : index
    %c0_17 = arith.constant 0 : index
    %33 = vector.load %arg4[%c0_16, %c0_17] : memref<128x32xf32, #tpu.memory_space<vmem>>, vector<128x32xf32>
    %cst_18 = arith.constant dense<0.000000e+00> : vector<1x32xf32>
    %34 = tpu.matmul %32, %33, %cst_18 {dimension_numbers = #tpu.dot_dimension_numbers<[1], [0], [0], [1], [0, 0, 1, 1], [], []>} : vector<1x128xf32>, vector<128x32xf32>, vector<1x32xf32> -> vector<1x32xf32>
    %cst_19 = arith.constant 3.906250e-03 : f32
    %35 = vector.broadcast %cst_19 : f32 to vector<1x32xf32>
    %36 = arith.mulf %34, %35 : vector<1x32xf32>
    %cst_20 = arith.constant 9.99999974E-6 : f32
    %37 = vector.broadcast %cst_20 : f32 to vector<1x32xf32>
    %38 = arith.addf %36, %37 : vector<1x32xf32>
    %39 = math.rsqrt %38 : vector<1x32xf32>
    %c0_21 = arith.constant 0 : index
    %c0_22 = arith.constant 0 : index
    %40 = vector.load %arg5[%c0_21, %c0_22] : memref<32x128xf32, #tpu.memory_space<vmem>>, vector<32x128xf32>
    %cst_23 = arith.constant dense<0.000000e+00> : vector<1x128xf32>
    %41 = tpu.matmul %39, %40, %cst_23 {dimension_numbers = #tpu.dot_dimension_numbers<[1], [0], [0], [1], [0, 0, 1, 1], [], []>} : vector<1x32xf32>, vector<32x128xf32>, vector<1x128xf32> -> vector<1x128xf32>
    %c0_24 = arith.constant 0 : index
    %c0_25 = arith.constant 0 : index
    %42 = vector.load %arg2[%c0_24, %c0_25] : memref<1x128xf32, #tpu.memory_space<vmem>>, vector<1x128xf32>
    %43 = arith.mulf %41, %42 : vector<1x128xf32>
    %44 = vector.shape_cast %43 : vector<1x128xf32> to vector<1x1x128xf32>
    %45 = vector.broadcast %44 : vector<1x1x128xf32> to vector<10x10x128xf32>
    %46 = arith.mulf %28, %45 : vector<10x10x128xf32>
    %c0_26 = arith.constant 0 : index
    %c0_27 = arith.constant 0 : index
    %47 = vector.load %arg3[%c0_26, %c0_27] : memref<1x128xf32, #tpu.memory_space<vmem>>, vector<1x128xf32>
    %48 = vector.shape_cast %47 : vector<1x128xf32> to vector<1x1x128xf32>
    %49 = vector.broadcast %48 : vector<1x1x128xf32> to vector<10x10x128xf32>
    %50 = arith.addf %46, %49 : vector<10x10x128xf32>
    %51 = arith.negf %50 : vector<10x10x128xf32>
    %52 = math.exp %51 : vector<10x10x128xf32>
    %cst_28 = arith.constant 1.000000e+00 : f32
    %53 = vector.broadcast %cst_28 : f32 to vector<10x10x128xf32>
    %54 = arith.addf %53, %52 : vector<10x10x128xf32>
    %55 = arith.divf %53, %54 : vector<10x10x128xf32>
    %56 = arith.mulf %50, %55 : vector<10x10x128xf32>
    %cst_29 = arith.constant 0.000000e+00 : f32
    %57 = vector.broadcast %cst_29 : f32 to vector<10x10x128xf32>
    %58 = arith.select %14, %56, %57 : vector<10x10x128xi1>, vector<10x10x128xf32>
    %c0_30 = arith.constant 0 : index
    %c0_31 = arith.constant 0 : index
    %c0_32 = arith.constant 0 : index
    %59 = vector.load %arg10[%c0_30, %c0_31, %c0_32] : memref<10x10x128xf32, #tpu.memory_space<vmem>>, vector<10x10x128xf32>
    tpu.vector_store %arg10[%c0_30, %c0_31, %c0_32], %58 {strides = array<i32>} : memref<10x10x128xf32, #tpu.memory_space<vmem>>, vector<10x10x128xf32>,
    %cst_33 = arith.constant 0.000000e+00 : f32
    %60 = vector.broadcast %cst_33 : f32 to vector<64x128xf32>
    %c0_34 = arith.constant 0 : index
    %c0_35 = arith.constant 0 : index
    %c0_36 = arith.constant 0 : index
    %61 = vector.load %arg10[%c0_34, %c0_35, %c0_36] : memref<10x10x128xf32, #tpu.memory_space<vmem>>, vector<8x8x128xf32>
    %62 = vector.shape_cast %61 : vector<8x8x128xf32> to vector<64x128xf32>
    %63 = arith.truncf %62 : vector<64x128xf32> to vector<64x128xbf16>
    %c0_37 = arith.constant 0 : index
    %c0_38 = arith.constant 0 : index
    %c0_39 = arith.constant 0 : index
    %64 = vector.load %arg6[%c0_37, %c0_38, %c0_39] : memref<9x128x128xbf16, #tpu.memory_space<vmem>>, vector<1x128x128xbf16>
    %65 = vector.shape_cast %64 : vector<1x128x128xbf16> to vector<128x128xbf16>
    %cst_40 = arith.constant dense<0.000000e+00> : vector<64x128xf32>
    %66 = tpu.matmul %63, %65, %cst_40 {dimension_numbers = #tpu.dot_dimension_numbers<[1], [0], [0], [1], [0, 0, 1, 1], [], []>} : vector<64x128xbf16>, vector<128x128xbf16>, vector<64x128xf32> -> vector<64x128xf32>
    %67 = arith.addf %60, %66 : vector<64x128xf32>
    %c0_41 = arith.constant 0 : index
    %c1 = arith.constant 1 : index
    %c0_42 = arith.constant 0 : index
    %68 = vector.load %arg10[%c0_41, %c1, %c0_42] : memref<10x10x128xf32, #tpu.memory_space<vmem>>, vector<8x8x128xf32>
    %69 = vector.shape_cast %68 : vector<8x8x128xf32> to vector<64x128xf32>
    %70 = arith.truncf %69 : vector<64x128xf32> to vector<64x128xbf16>
    %c1_43 = arith.constant 1 : index
    %c0_44 = arith.constant 0 : index
    %c0_45 = arith.constant 0 : index
    %71 = vector.load %arg6[%c1_43, %c0_44, %c0_45] : memref<9x128x128xbf16, #tpu.memory_space<vmem>>, vector<1x128x128xbf16>
    %72 = vector.shape_cast %71 : vector<1x128x128xbf16> to vector<128x128xbf16>
    %cst_46 = arith.constant dense<0.000000e+00> : vector<64x128xf32>
    %73 = tpu.matmul %70, %72, %cst_46 {dimension_numbers = #tpu.dot_dimension_numbers<[1], [0], [0], [1], [0, 0, 1, 1], [], []>} : vector<64x128xbf16>, vector<128x128xbf16>, vector<64x128xf32> -> vector<64x128xf32>
    %74 = arith.addf %67, %73 : vector<64x128xf32>
    %c0_47 = arith.constant 0 : index
    %c2 = arith.constant 2 : index
    %c0_48 = arith.constant 0 : index
    %75 = vector.load %arg10[%c0_47, %c2, %c0_48] : memref<10x10x128xf32, #tpu.memory_space<vmem>>, vector<8x8x128xf32>
    %76 = vector.shape_cast %75 : vector<8x8x128xf32> to vector<64x128xf32>
    %77 = arith.truncf %76 : vector<64x128xf32> to vector<64x128xbf16>
    %c2_49 = arith.constant 2 : index
    %c0_50 = arith.constant 0 : index
    %c0_51 = arith.constant 0 : index
    %78 = vector.load %arg6[%c2_49, %c0_50, %c0_51] : memref<9x128x128xbf16, #tpu.memory_space<vmem>>, vector<1x128x128xbf16>
    %79 = vector.shape_cast %78 : vector<1x128x128xbf16> to vector<128x128xbf16>
    %cst_52 = arith.constant dense<0.000000e+00> : vector<64x128xf32>
    %80 = tpu.matmul %77, %79, %cst_52 {dimension_numbers = #tpu.dot_dimension_numbers<[1], [0], [0], [1], [0, 0, 1, 1], [], []>} : vector<64x128xbf16>, vector<128x128xbf16>, vector<64x128xf32> -> vector<64x128xf32>
    %81 = arith.addf %74, %80 : vector<64x128xf32>
    %c1_53 = arith.constant 1 : index
    %c0_54 = arith.constant 0 : index
    %c0_55 = arith.constant 0 : index
    %82 = vector.load %arg10[%c1_53, %c0_54, %c0_55] : memref<10x10x128xf32, #tpu.memory_space<vmem>>, vector<8x8x128xf32>
    %83 = vector.shape_cast %82 : vector<8x8x128xf32> to vector<64x128xf32>
    %84 = arith.truncf %83 : vector<64x128xf32> to vector<64x128xbf16>
    %c3 = arith.constant 3 : index
    %c0_56 = arith.constant 0 : index
    %c0_57 = arith.constant 0 : index
    %85 = vector.load %arg6[%c3, %c0_56, %c0_57] : memref<9x128x128xbf16, #tpu.memory_space<vmem>>, vector<1x128x128xbf16>
    %86 = vector.shape_cast %85 : vector<1x128x128xbf16> to vector<128x128xbf16>
    %cst_58 = arith.constant dense<0.000000e+00> : vector<64x128xf32>
    %87 = tpu.matmul %84, %86, %cst_58 {dimension_numbers = #tpu.dot_dimension_numbers<[1], [0], [0], [1], [0, 0, 1, 1], [], []>} : vector<64x128xbf16>, vector<128x128xbf16>, vector<64x128xf32> -> vector<64x128xf32>
    %88 = arith.addf %81, %87 : vector<64x128xf32>
    %c1_59 = arith.constant 1 : index
    %c1_60 = arith.constant 1 : index
    %c0_61 = arith.constant 0 : index
    %89 = vector.load %arg10[%c1_59, %c1_60, %c0_61] : memref<10x10x128xf32, #tpu.memory_space<vmem>>, vector<8x8x128xf32>
    %90 = vector.shape_cast %89 : vector<8x8x128xf32> to vector<64x128xf32>
    %91 = arith.truncf %90 : vector<64x128xf32> to vector<64x128xbf16>
    %c4 = arith.constant 4 : index
    %c0_62 = arith.constant 0 : index
    %c0_63 = arith.constant 0 : index
    %92 = vector.load %arg6[%c4, %c0_62, %c0_63] : memref<9x128x128xbf16, #tpu.memory_space<vmem>>, vector<1x128x128xbf16>
    %93 = vector.shape_cast %92 : vector<1x128x128xbf16> to vector<128x128xbf16>
    %cst_64 = arith.constant dense<0.000000e+00> : vector<64x128xf32>
    %94 = tpu.matmul %91, %93, %cst_64 {dimension_numbers = #tpu.dot_dimension_numbers<[1], [0], [0], [1], [0, 0, 1, 1], [], []>} : vector<64x128xbf16>, vector<128x128xbf16>, vector<64x128xf32> -> vector<64x128xf32>
    %95 = arith.addf %88, %94 : vector<64x128xf32>
    %c1_65 = arith.constant 1 : index
    %c2_66 = arith.constant 2 : index
    %c0_67 = arith.constant 0 : index
    %96 = vector.load %arg10[%c1_65, %c2_66, %c0_67] : memref<10x10x128xf32, #tpu.memory_space<vmem>>, vector<8x8x128xf32>
    %97 = vector.shape_cast %96 : vector<8x8x128xf32> to vector<64x128xf32>
    %98 = arith.truncf %97 : vector<64x128xf32> to vector<64x128xbf16>
    %c5 = arith.constant 5 : index
    %c0_68 = arith.constant 0 : index
    %c0_69 = arith.constant 0 : index
    %99 = vector.load %arg6[%c5, %c0_68, %c0_69] : memref<9x128x128xbf16, #tpu.memory_space<vmem>>, vector<1x128x128xbf16>
    %100 = vector.shape_cast %99 : vector<1x128x128xbf16> to vector<128x128xbf16>
    %cst_70 = arith.constant dense<0.000000e+00> : vector<64x128xf32>
    %101 = tpu.matmul %98, %100, %cst_70 {dimension_numbers = #tpu.dot_dimension_numbers<[1], [0], [0], [1], [0, 0, 1, 1], [], []>} : vector<64x128xbf16>, vector<128x128xbf16>, vector<64x128xf32> -> vector<64x128xf32>
    %102 = arith.addf %95, %101 : vector<64x128xf32>
    %c2_71 = arith.constant 2 : index
    %c0_72 = arith.constant 0 : index
    %c0_73 = arith.constant 0 : index
    %103 = vector.load %arg10[%c2_71, %c0_72, %c0_73] : memref<10x10x128xf32, #tpu.memory_space<vmem>>, vector<8x8x128xf32>
    %104 = vector.shape_cast %103 : vector<8x8x128xf32> to vector<64x128xf32>
    %105 = arith.truncf %104 : vector<64x128xf32> to vector<64x128xbf16>
    %c6 = arith.constant 6 : index
    %c0_74 = arith.constant 0 : index
    %c0_75 = arith.constant 0 : index
    %106 = vector.load %arg6[%c6, %c0_74, %c0_75] : memref<9x128x128xbf16, #tpu.memory_space<vmem>>, vector<1x128x128xbf16>
    %107 = vector.shape_cast %106 : vector<1x128x128xbf16> to vector<128x128xbf16>
    %cst_76 = arith.constant dense<0.000000e+00> : vector<64x128xf32>
    %108 = tpu.matmul %105, %107, %cst_76 {dimension_numbers = #tpu.dot_dimension_numbers<[1], [0], [0], [1], [0, 0, 1, 1], [], []>} : vector<64x128xbf16>, vector<128x128xbf16>, vector<64x128xf32> -> vector<64x128xf32>
    %109 = arith.addf %102, %108 : vector<64x128xf32>
    %c2_77 = arith.constant 2 : index
    %c1_78 = arith.constant 1 : index
    %c0_79 = arith.constant 0 : index
    %110 = vector.load %arg10[%c2_77, %c1_78, %c0_79] : memref<10x10x128xf32, #tpu.memory_space<vmem>>, vector<8x8x128xf32>
    %111 = vector.shape_cast %110 : vector<8x8x128xf32> to vector<64x128xf32>
    %112 = arith.truncf %111 : vector<64x128xf32> to vector<64x128xbf16>
    %c7 = arith.constant 7 : index
    %c0_80 = arith.constant 0 : index
    %c0_81 = arith.constant 0 : index
    %113 = vector.load %arg6[%c7, %c0_80, %c0_81] : memref<9x128x128xbf16, #tpu.memory_space<vmem>>, vector<1x128x128xbf16>
    %114 = vector.shape_cast %113 : vector<1x128x128xbf16> to vector<128x128xbf16>
    %cst_82 = arith.constant dense<0.000000e+00> : vector<64x128xf32>
    %115 = tpu.matmul %112, %114, %cst_82 {dimension_numbers = #tpu.dot_dimension_numbers<[1], [0], [0], [1], [0, 0, 1, 1], [], []>} : vector<64x128xbf16>, vector<128x128xbf16>, vector<64x128xf32> -> vector<64x128xf32>
    %116 = arith.addf %109, %115 : vector<64x128xf32>
    %c2_83 = arith.constant 2 : index
    %c2_84 = arith.constant 2 : index
    %c0_85 = arith.constant 0 : index
    %117 = vector.load %arg10[%c2_83, %c2_84, %c0_85] : memref<10x10x128xf32, #tpu.memory_space<vmem>>, vector<8x8x128xf32>
    %118 = vector.shape_cast %117 : vector<8x8x128xf32> to vector<64x128xf32>
    %119 = arith.truncf %118 : vector<64x128xf32> to vector<64x128xbf16>
    %c8 = arith.constant 8 : index
    %c0_86 = arith.constant 0 : index
    %c0_87 = arith.constant 0 : index
    %120 = vector.load %arg6[%c8, %c0_86, %c0_87] : memref<9x128x128xbf16, #tpu.memory_space<vmem>>, vector<1x128x128xbf16>
    %121 = vector.shape_cast %120 : vector<1x128x128xbf16> to vector<128x128xbf16>
    %cst_88 = arith.constant dense<0.000000e+00> : vector<64x128xf32>
    %122 = tpu.matmul %119, %121, %cst_88 {dimension_numbers = #tpu.dot_dimension_numbers<[1], [0], [0], [1], [0, 0, 1, 1], [], []>} : vector<64x128xbf16>, vector<128x128xbf16>, vector<64x128xf32> -> vector<64x128xf32>
    %123 = arith.addf %116, %122 : vector<64x128xf32>
    %c0_89 = arith.constant 0 : index
    %c0_90 = arith.constant 0 : index
    %124 = vector.load %arg7[%c0_89, %c0_90] : memref<1x128xf32, #tpu.memory_space<vmem>>, vector<1x128xf32>
    %125 = vector.broadcast %124 : vector<1x128xf32> to vector<64x128xf32>
    %126 = arith.addf %123, %125 : vector<64x128xf32>
    %c0_91 = arith.constant 0 : index
    %c0_92 = arith.constant 0 : index
    %c0_93 = arith.constant 0 : index
    %127 = vector.load %arg8[%c0_91, %c0_92, %c0_93] : memref<1x64x128xf32, #tpu.memory_space<vmem>>, vector<1x64x128xf32>
    %128 = vector.shape_cast %127 : vector<1x64x128xf32> to vector<64x128xf32>
    %129 = arith.addf %126, %128 : vector<64x128xf32>
    %c0_94 = arith.constant 0 : index
    %c0_95 = arith.constant 0 : index
    %c0_96 = arith.constant 0 : index
    %130 = vector.load %arg9[%c0_94, %c0_95, %c0_96] : memref<1x64x128xf32, #tpu.memory_space<vmem>>, vector<1x64x128xf32>
    %131 = vector.shape_cast %130 : vector<1x64x128xf32> to vector<64x128xf32>
    %132 = vector.shape_cast %129 : vector<64x128xf32> to vector<1x64x128xf32>
    tpu.vector_store %arg9[%c0_94, %c0_95, %c0_96], %132 {strides = array<i32>} : memref<1x64x128xf32, #tpu.memory_space<vmem>>, vector<1x64x128xf32>,
    return
  }
  func.func @transform_0(%arg0: i32) -> (i32, i32, i32, i32) {
    %c0_i32 = arith.constant 0 : i32
    %c0_i32_0 = arith.constant 0 : i32
    %c0_i32_1 = arith.constant 0 : i32
    %c0_i32_2 = arith.constant 0 : i32
    return %arg0, %c0_i32, %c0_i32_0, %c0_i32_1 : i32, i32, i32, i32
  }
  func.func @transform_1(%arg0: i32) -> (i32, i32) {
    %c0_i32 = arith.constant 0 : i32
    %c0_i32_0 = arith.constant 0 : i32
    %c0_i32_1 = arith.constant 0 : i32
    return %c0_i32, %c0_i32_0 : i32, i32
  }
  func.func @transform_2(%arg0: i32) -> (i32, i32) {
    %c0_i32 = arith.constant 0 : i32
    %c0_i32_0 = arith.constant 0 : i32
    %c0_i32_1 = arith.constant 0 : i32
    return %c0_i32, %c0_i32_0 : i32, i32
  }
  func.func @transform_3(%arg0: i32) -> (i32, i32) {
    %c0_i32 = arith.constant 0 : i32
    %c0_i32_0 = arith.constant 0 : i32
    %c0_i32_1 = arith.constant 0 : i32
    return %c0_i32, %c0_i32_0 : i32, i32
  }
  func.func @transform_4(%arg0: i32) -> (i32, i32) {
    %c0_i32 = arith.constant 0 : i32
    %c0_i32_0 = arith.constant 0 : i32
    %c0_i32_1 = arith.constant 0 : i32
    return %c0_i32, %c0_i32_0 : i32, i32
  }
  func.func @transform_5(%arg0: i32) -> (i32, i32, i32) {
    %c0_i32 = arith.constant 0 : i32
    %c0_i32_0 = arith.constant 0 : i32
    %c0_i32_1 = arith.constant 0 : i32
    %c0_i32_2 = arith.constant 0 : i32
    return %c0_i32, %c0_i32_0, %c0_i32_1 : i32, i32, i32
  }
  func.func @transform_6(%arg0: i32) -> (i32, i32) {
    %c0_i32 = arith.constant 0 : i32
    %c0_i32_0 = arith.constant 0 : i32
    %c0_i32_1 = arith.constant 0 : i32
    return %c0_i32, %c0_i32_0 : i32, i32
  }
  func.func @transform_7(%arg0: i32) -> (i32, i32, i32) {
    %c0_i32 = arith.constant 0 : i32
    %c0_i32_0 = arith.constant 0 : i32
    %c0_i32_1 = arith.constant 0 : i32
    return %arg0, %c0_i32, %c0_i32_0 : i32, i32, i32
  }
  func.func @transform_8(%arg0: i32) -> (i32, i32, i32) {
    %c0_i32 = arith.constant 0 : i32
    %c0_i32_0 = arith.constant 0 : i32
    %c0_i32_1 = arith.constant 0 : i32
    return %arg0, %c0_i32, %c0_i32_0 : i32, i32, i32
  }
}

module attributes {stable_mosaic.version = 11 : i64} {
  func.func @_gn_qkv_kernel(%arg0: i32, %arg1: memref<1x64x128xf32, #tpu.memory_space<vmem>>, %arg2: memref<1x128xf32, #tpu.memory_space<vmem>>, %arg3: memref<1x128xf32, #tpu.memory_space<vmem>>, %arg4: memref<128x32xf32, #tpu.memory_space<vmem>>, %arg5: memref<32x128xf32, #tpu.memory_space<vmem>>, %arg6: memref<128x384xbf16, #tpu.memory_space<vmem>>, %arg7: memref<1x384xf32, #tpu.memory_space<vmem>>, %arg8: memref<1x64x128xf32, #tpu.memory_space<vmem>>, %arg9: memref<1x64x384xf32, #tpu.memory_space<vmem>>) attributes {dimension_semantics = [#tpu.dimension_semantics<parallel>], iteration_bounds = array<i64: 2>, scalar_prefetch = 0 : i64, scratch_operands = 0 : i64, tpu.core_type = #tpu.core_type<tc>, window_params = [{transform_indices = @transform_0, window_bounds = array<i64: 1, 64, 128>}, {pipeline_mode = #tpu.pipeline_mode<synchronous>, transform_indices = @transform_1, window_bounds = array<i64: 1, 128>}, {pipeline_mode = #tpu.pipeline_mode<synchronous>, transform_indices = @transform_2, window_bounds = array<i64: 1, 128>}, {pipeline_mode = #tpu.pipeline_mode<synchronous>, transform_indices = @transform_3, window_bounds = array<i64: 128, 32>}, {pipeline_mode = #tpu.pipeline_mode<synchronous>, transform_indices = @transform_4, window_bounds = array<i64: 32, 128>}, {pipeline_mode = #tpu.pipeline_mode<synchronous>, transform_indices = @transform_5, window_bounds = array<i64: 128, 384>}, {pipeline_mode = #tpu.pipeline_mode<synchronous>, transform_indices = @transform_6, window_bounds = array<i64: 1, 384>}, {transform_indices = @transform_7, window_bounds = array<i64: 1, 64, 128>}, {transform_indices = @transform_8, window_bounds = array<i64: 1, 64, 384>}]} {
    %c0 = arith.constant 0 : index
    %c0_0 = arith.constant 0 : index
    %c0_1 = arith.constant 0 : index
    %0 = vector.load %arg1[%c0, %c0_0, %c0_1] : memref<1x64x128xf32, #tpu.memory_space<vmem>>, vector<1x64x128xf32>
    %1 = vector.shape_cast %0 : vector<1x64x128xf32> to vector<64x128xf32>
    %cst = arith.constant dense<0.000000e+00> : vector<128xf32>
    %2 = vector.multi_reduction <add>, %1, %cst [0] : vector<64x128xf32> to vector<128xf32>
    %3 = vector.shape_cast %2 : vector<128xf32> to vector<1x128xf32>
    %c0_2 = arith.constant 0 : index
    %c0_3 = arith.constant 0 : index
    %4 = vector.load %arg4[%c0_2, %c0_3] : memref<128x32xf32, #tpu.memory_space<vmem>>, vector<128x32xf32>
    %cst_4 = arith.constant dense<0.000000e+00> : vector<1x32xf32>
    %5 = tpu.matmul %3, %4, %cst_4 {dimension_numbers = #tpu.dot_dimension_numbers<[1], [0], [0], [1], [0, 0, 1, 1], [], []>} : vector<1x128xf32>, vector<128x32xf32>, vector<1x32xf32> -> vector<1x32xf32>
    %cst_5 = arith.constant 3.906250e-03 : f32
    %6 = vector.broadcast %cst_5 : f32 to vector<1x32xf32>
    %7 = arith.mulf %5, %6 : vector<1x32xf32>
    %c0_6 = arith.constant 0 : index
    %c0_7 = arith.constant 0 : index
    %8 = vector.load %arg5[%c0_6, %c0_7] : memref<32x128xf32, #tpu.memory_space<vmem>>, vector<32x128xf32>
    %cst_8 = arith.constant dense<0.000000e+00> : vector<1x128xf32>
    %9 = tpu.matmul %7, %8, %cst_8 {dimension_numbers = #tpu.dot_dimension_numbers<[1], [0], [0], [1], [0, 0, 1, 1], [], []>} : vector<1x32xf32>, vector<32x128xf32>, vector<1x128xf32> -> vector<1x128xf32>
    %10 = vector.broadcast %9 : vector<1x128xf32> to vector<64x128xf32>
    %11 = arith.subf %1, %10 : vector<64x128xf32>
    %12 = arith.mulf %11, %11 : vector<64x128xf32>
    %cst_9 = arith.constant dense<0.000000e+00> : vector<128xf32>
    %13 = vector.multi_reduction <add>, %12, %cst_9 [0] : vector<64x128xf32> to vector<128xf32>
    %14 = vector.shape_cast %13 : vector<128xf32> to vector<1x128xf32>
    %c0_10 = arith.constant 0 : index
    %c0_11 = arith.constant 0 : index
    %15 = vector.load %arg4[%c0_10, %c0_11] : memref<128x32xf32, #tpu.memory_space<vmem>>, vector<128x32xf32>
    %cst_12 = arith.constant dense<0.000000e+00> : vector<1x32xf32>
    %16 = tpu.matmul %14, %15, %cst_12 {dimension_numbers = #tpu.dot_dimension_numbers<[1], [0], [0], [1], [0, 0, 1, 1], [], []>} : vector<1x128xf32>, vector<128x32xf32>, vector<1x32xf32> -> vector<1x32xf32>
    %cst_13 = arith.constant 3.906250e-03 : f32
    %17 = vector.broadcast %cst_13 : f32 to vector<1x32xf32>
    %18 = arith.mulf %16, %17 : vector<1x32xf32>
    %cst_14 = arith.constant 9.99999974E-6 : f32
    %19 = vector.broadcast %cst_14 : f32 to vector<1x32xf32>
    %20 = arith.addf %18, %19 : vector<1x32xf32>
    %21 = math.rsqrt %20 : vector<1x32xf32>
    %c0_15 = arith.constant 0 : index
    %c0_16 = arith.constant 0 : index
    %22 = vector.load %arg5[%c0_15, %c0_16] : memref<32x128xf32, #tpu.memory_space<vmem>>, vector<32x128xf32>
    %cst_17 = arith.constant dense<0.000000e+00> : vector<1x128xf32>
    %23 = tpu.matmul %21, %22, %cst_17 {dimension_numbers = #tpu.dot_dimension_numbers<[1], [0], [0], [1], [0, 0, 1, 1], [], []>} : vector<1x32xf32>, vector<32x128xf32>, vector<1x128xf32> -> vector<1x128xf32>
    %c0_18 = arith.constant 0 : index
    %c0_19 = arith.constant 0 : index
    %24 = vector.load %arg2[%c0_18, %c0_19] : memref<1x128xf32, #tpu.memory_space<vmem>>, vector<1x128xf32>
    %25 = arith.mulf %23, %24 : vector<1x128xf32>
    %26 = vector.broadcast %25 : vector<1x128xf32> to vector<64x128xf32>
    %27 = arith.mulf %11, %26 : vector<64x128xf32>
    %c0_20 = arith.constant 0 : index
    %c0_21 = arith.constant 0 : index
    %28 = vector.load %arg3[%c0_20, %c0_21] : memref<1x128xf32, #tpu.memory_space<vmem>>, vector<1x128xf32>
    %29 = vector.broadcast %28 : vector<1x128xf32> to vector<64x128xf32>
    %30 = arith.addf %27, %29 : vector<64x128xf32>
    %c0_22 = arith.constant 0 : index
    %c0_23 = arith.constant 0 : index
    %c0_24 = arith.constant 0 : index
    %31 = vector.load %arg8[%c0_22, %c0_23, %c0_24] : memref<1x64x128xf32, #tpu.memory_space<vmem>>, vector<1x64x128xf32>
    %32 = vector.shape_cast %31 : vector<1x64x128xf32> to vector<64x128xf32>
    %33 = vector.shape_cast %30 : vector<64x128xf32> to vector<1x64x128xf32>
    tpu.vector_store %arg8[%c0_22, %c0_23, %c0_24], %33 {strides = array<i32>} : memref<1x64x128xf32, #tpu.memory_space<vmem>>, vector<1x64x128xf32>,
    %34 = arith.truncf %30 : vector<64x128xf32> to vector<64x128xbf16>
    %c0_25 = arith.constant 0 : index
    %c0_26 = arith.constant 0 : index
    %35 = vector.load %arg6[%c0_25, %c0_26] : memref<128x384xbf16, #tpu.memory_space<vmem>>, vector<128x384xbf16>
    %cst_27 = arith.constant dense<0.000000e+00> : vector<64x384xf32>
    %36 = tpu.matmul %34, %35, %cst_27 {dimension_numbers = #tpu.dot_dimension_numbers<[1], [0], [0], [1], [0, 0, 1, 1], [], []>} : vector<64x128xbf16>, vector<128x384xbf16>, vector<64x384xf32> -> vector<64x384xf32>
    %c0_28 = arith.constant 0 : index
    %c0_29 = arith.constant 0 : index
    %37 = vector.load %arg7[%c0_28, %c0_29] : memref<1x384xf32, #tpu.memory_space<vmem>>, vector<1x384xf32>
    %38 = vector.broadcast %37 : vector<1x384xf32> to vector<64x384xf32>
    %39 = arith.addf %36, %38 : vector<64x384xf32>
    %c0_30 = arith.constant 0 : index
    %c0_31 = arith.constant 0 : index
    %c0_32 = arith.constant 0 : index
    %40 = vector.load %arg9[%c0_30, %c0_31, %c0_32] : memref<1x64x384xf32, #tpu.memory_space<vmem>>, vector<1x64x384xf32>
    %41 = vector.shape_cast %40 : vector<1x64x384xf32> to vector<64x384xf32>
    %42 = vector.shape_cast %39 : vector<64x384xf32> to vector<1x64x384xf32>
    tpu.vector_store %arg9[%c0_30, %c0_31, %c0_32], %42 {strides = array<i32>} : memref<1x64x384xf32, #tpu.memory_space<vmem>>, vector<1x64x384xf32>,
    return
  }
  func.func @transform_0(%arg0: i32) -> (i32, i32, i32) {
    %c0_i32 = arith.constant 0 : i32
    %c0_i32_0 = arith.constant 0 : i32
    %c0_i32_1 = arith.constant 0 : i32
    return %arg0, %c0_i32, %c0_i32_0 : i32, i32, i32
  }
  func.func @transform_1(%arg0: i32) -> (i32, i32) {
    %c0_i32 = arith.constant 0 : i32
    %c0_i32_0 = arith.constant 0 : i32
    %c0_i32_1 = arith.constant 0 : i32
    return %c0_i32, %c0_i32_0 : i32, i32
  }
  func.func @transform_2(%arg0: i32) -> (i32, i32) {
    %c0_i32 = arith.constant 0 : i32
    %c0_i32_0 = arith.constant 0 : i32
    %c0_i32_1 = arith.constant 0 : i32
    return %c0_i32, %c0_i32_0 : i32, i32
  }
  func.func @transform_3(%arg0: i32) -> (i32, i32) {
    %c0_i32 = arith.constant 0 : i32
    %c0_i32_0 = arith.constant 0 : i32
    %c0_i32_1 = arith.constant 0 : i32
    return %c0_i32, %c0_i32_0 : i32, i32
  }
  func.func @transform_4(%arg0: i32) -> (i32, i32) {
    %c0_i32 = arith.constant 0 : i32
    %c0_i32_0 = arith.constant 0 : i32
    %c0_i32_1 = arith.constant 0 : i32
    return %c0_i32, %c0_i32_0 : i32, i32
  }
  func.func @transform_5(%arg0: i32) -> (i32, i32) {
    %c0_i32 = arith.constant 0 : i32
    %c0_i32_0 = arith.constant 0 : i32
    %c0_i32_1 = arith.constant 0 : i32
    return %c0_i32, %c0_i32_0 : i32, i32
  }
  func.func @transform_6(%arg0: i32) -> (i32, i32) {
    %c0_i32 = arith.constant 0 : i32
    %c0_i32_0 = arith.constant 0 : i32
    %c0_i32_1 = arith.constant 0 : i32
    return %c0_i32, %c0_i32_0 : i32, i32
  }
  func.func @transform_7(%arg0: i32) -> (i32, i32, i32) {
    %c0_i32 = arith.constant 0 : i32
    %c0_i32_0 = arith.constant 0 : i32
    %c0_i32_1 = arith.constant 0 : i32
    return %arg0, %c0_i32, %c0_i32_0 : i32, i32, i32
  }
  func.func @transform_8(%arg0: i32) -> (i32, i32, i32) {
    %c0_i32 = arith.constant 0 : i32
    %c0_i32_0 = arith.constant 0 : i32
    %c0_i32_1 = arith.constant 0 : i32
    return %arg0, %c0_i32, %c0_i32_0 : i32, i32, i32
  }
}

module attributes {stable_mosaic.version = 11 : i64} {
  func.func @_attn_out_kernel(%arg0: i32, %arg1: memref<1x64x384xf32, #tpu.memory_space<vmem>>, %arg2: memref<1x64x128xf32, #tpu.memory_space<vmem>>, %arg3: memref<128x128xbf16, #tpu.memory_space<vmem>>, %arg4: memref<1x128xf32, #tpu.memory_space<vmem>>, %arg5: memref<1x64x128xf32, #tpu.memory_space<vmem>>) attributes {dimension_semantics = [#tpu.dimension_semantics<parallel>], iteration_bounds = array<i64: 2>, scalar_prefetch = 0 : i64, scratch_operands = 0 : i64, tpu.core_type = #tpu.core_type<tc>, window_params = [{transform_indices = @transform_0, window_bounds = array<i64: 1, 64, 384>}, {transform_indices = @transform_1, window_bounds = array<i64: 1, 64, 128>}, {pipeline_mode = #tpu.pipeline_mode<synchronous>, transform_indices = @transform_2, window_bounds = array<i64: 128, 128>}, {pipeline_mode = #tpu.pipeline_mode<synchronous>, transform_indices = @transform_3, window_bounds = array<i64: 1, 128>}, {transform_indices = @transform_4, window_bounds = array<i64: 1, 64, 128>}]} {
    %c0 = arith.constant 0 : index
    %c0_0 = arith.constant 0 : index
    %c0_1 = arith.constant 0 : index
    %0 = vector.load %arg1[%c0, %c0_0, %c0_1] : memref<1x64x384xf32, #tpu.memory_space<vmem>>, vector<1x64x128xf32>
    %1 = vector.shape_cast %0 : vector<1x64x128xf32> to vector<64x128xf32>
    %cst = arith.constant 0.0883883461 : f32
    %2 = vector.broadcast %cst : f32 to vector<64x128xf32>
    %3 = arith.mulf %1, %2 : vector<64x128xf32>
    %4 = arith.truncf %3 : vector<64x128xf32> to vector<64x128xbf16>
    %c0_2 = arith.constant 0 : index
    %c0_3 = arith.constant 0 : index
    %c128 = arith.constant 128 : index
    %5 = vector.load %arg1[%c0_2, %c0_3, %c128] : memref<1x64x384xf32, #tpu.memory_space<vmem>>, vector<1x64x128xf32>
    %6 = vector.shape_cast %5 : vector<1x64x128xf32> to vector<64x128xf32>
    %7 = arith.truncf %6 : vector<64x128xf32> to vector<64x128xbf16>
    %c0_4 = arith.constant 0 : index
    %c0_5 = arith.constant 0 : index
    %c256 = arith.constant 256 : index
    %8 = vector.load %arg1[%c0_4, %c0_5, %c256] : memref<1x64x384xf32, #tpu.memory_space<vmem>>, vector<1x64x128xf32>
    %9 = vector.shape_cast %8 : vector<1x64x128xf32> to vector<64x128xf32>
    %10 = arith.truncf %9 : vector<64x128xf32> to vector<64x128xbf16>
    %cst_6 = arith.constant dense<0.000000e+00> : vector<64x64xf32>
    %11 = tpu.matmul %4, %7, %cst_6 {dimension_numbers = #tpu.dot_dimension_numbers<[1], [1], [0], [0], [0, 0, 1, 0], [], []>} : vector<64x128xbf16>, vector<64x128xbf16>, vector<64x64xf32> -> vector<64x64xf32>
    %cst_7 = arith.constant dense<0xFF800000> : vector<64xf32>
    %12 = vector.multi_reduction <maximumf>, %11, %cst_7 [1] : vector<64x64xf32> to vector<64xf32>
    %13 = vector.shape_cast %12 : vector<64xf32> to vector<64x1xf32>
    %14 = vector.broadcast %13 : vector<64x1xf32> to vector<64x64xf32>
    %15 = arith.subf %11, %14 : vector<64x64xf32>
    %16 = math.exp %15 : vector<64x64xf32>
    %cst_8 = arith.constant dense<0.000000e+00> : vector<64xf32>
    %17 = vector.multi_reduction <add>, %16, %cst_8 [1] : vector<64x64xf32> to vector<64xf32>
    %18 = vector.shape_cast %17 : vector<64xf32> to vector<64x1xf32>
    %19 = tpu.reciprocal %18 {approx = true} : vector<64x1xf32> -> vector<64x1xf32>
    %20 = vector.broadcast %19 : vector<64x1xf32> to vector<64x64xf32>
    %21 = arith.mulf %16, %20 : vector<64x64xf32>
    %22 = arith.truncf %21 : vector<64x64xf32> to vector<64x64xbf16>
    %cst_9 = arith.constant dense<0.000000e+00> : vector<64x128xf32>
    %23 = tpu.matmul %22, %10, %cst_9 {dimension_numbers = #tpu.dot_dimension_numbers<[1], [0], [0], [1], [0, 0, 1, 1], [], []>} : vector<64x64xbf16>, vector<64x128xbf16>, vector<64x128xf32> -> vector<64x128xf32>
    %24 = arith.truncf %23 : vector<64x128xf32> to vector<64x128xbf16>
    %c0_10 = arith.constant 0 : index
    %c0_11 = arith.constant 0 : index
    %25 = vector.load %arg3[%c0_10, %c0_11] : memref<128x128xbf16, #tpu.memory_space<vmem>>, vector<128x128xbf16>
    %cst_12 = arith.constant dense<0.000000e+00> : vector<64x128xf32>
    %26 = tpu.matmul %24, %25, %cst_12 {dimension_numbers = #tpu.dot_dimension_numbers<[1], [0], [0], [1], [0, 0, 1, 1], [], []>} : vector<64x128xbf16>, vector<128x128xbf16>, vector<64x128xf32> -> vector<64x128xf32>
    %c0_13 = arith.constant 0 : index
    %c0_14 = arith.constant 0 : index
    %27 = vector.load %arg4[%c0_13, %c0_14] : memref<1x128xf32, #tpu.memory_space<vmem>>, vector<1x128xf32>
    %28 = vector.broadcast %27 : vector<1x128xf32> to vector<64x128xf32>
    %29 = arith.addf %26, %28 : vector<64x128xf32>
    %c0_15 = arith.constant 0 : index
    %c0_16 = arith.constant 0 : index
    %c0_17 = arith.constant 0 : index
    %30 = vector.load %arg2[%c0_15, %c0_16, %c0_17] : memref<1x64x128xf32, #tpu.memory_space<vmem>>, vector<1x64x128xf32>
    %31 = vector.shape_cast %30 : vector<1x64x128xf32> to vector<64x128xf32>
    %32 = arith.addf %29, %31 : vector<64x128xf32>
    %c0_18 = arith.constant 0 : index
    %c0_19 = arith.constant 0 : index
    %c0_20 = arith.constant 0 : index
    %33 = vector.load %arg5[%c0_18, %c0_19, %c0_20] : memref<1x64x128xf32, #tpu.memory_space<vmem>>, vector<1x64x128xf32>
    %34 = vector.shape_cast %33 : vector<1x64x128xf32> to vector<64x128xf32>
    %35 = vector.shape_cast %32 : vector<64x128xf32> to vector<1x64x128xf32>
    tpu.vector_store %arg5[%c0_18, %c0_19, %c0_20], %35 {strides = array<i32>} : memref<1x64x128xf32, #tpu.memory_space<vmem>>, vector<1x64x128xf32>,
    return
  }
  func.func @transform_0(%arg0: i32) -> (i32, i32, i32) {
    %c0_i32 = arith.constant 0 : i32
    %c0_i32_0 = arith.constant 0 : i32
    %c0_i32_1 = arith.constant 0 : i32
    return %arg0, %c0_i32, %c0_i32_0 : i32, i32, i32
  }
  func.func @transform_1(%arg0: i32) -> (i32, i32, i32) {
    %c0_i32 = arith.constant 0 : i32
    %c0_i32_0 = arith.constant 0 : i32
    %c0_i32_1 = arith.constant 0 : i32
    return %arg0, %c0_i32, %c0_i32_0 : i32, i32, i32
  }
  func.func @transform_2(%arg0: i32) -> (i32, i32) {
    %c0_i32 = arith.constant 0 : i32
    %c0_i32_0 = arith.constant 0 : i32
    %c0_i32_1 = arith.constant 0 : i32
    return %c0_i32, %c0_i32_0 : i32, i32
  }
  func.func @transform_3(%arg0: i32) -> (i32, i32) {
    %c0_i32 = arith.constant 0 : i32
    %c0_i32_0 = arith.constant 0 : i32
    %c0_i32_1 = arith.constant 0 : i32
    return %c0_i32, %c0_i32_0 : i32, i32
  }
  func.func @transform_4(%arg0: i32) -> (i32, i32, i32) {
    %c0_i32 = arith.constant 0 : i32
    %c0_i32_0 = arith.constant 0 : i32
    %c0_i32_1 = arith.constant 0 : i32
    return %arg0, %c0_i32, %c0_i32_0 : i32, i32, i32
  }
}

module attributes {stable_mosaic.version = 11 : i64} {
  func.func @_attn_out_kernel(%arg0: i32, %arg1: memref<1x64x384xf32, #tpu.memory_space<vmem>>, %arg2: memref<1x64x128xf32, #tpu.memory_space<vmem>>, %arg3: memref<128x128xbf16, #tpu.memory_space<vmem>>, %arg4: memref<1x128xf32, #tpu.memory_space<vmem>>, %arg5: memref<1x64x128xf32, #tpu.memory_space<vmem>>) attributes {dimension_semantics = [#tpu.dimension_semantics<parallel>], iteration_bounds = array<i64: 2>, scalar_prefetch = 0 : i64, scratch_operands = 0 : i64, tpu.core_type = #tpu.core_type<tc>, window_params = [{transform_indices = @transform_0, window_bounds = array<i64: 1, 64, 384>}, {transform_indices = @transform_1, window_bounds = array<i64: 1, 64, 128>}, {pipeline_mode = #tpu.pipeline_mode<synchronous>, transform_indices = @transform_2, window_bounds = array<i64: 128, 128>}, {pipeline_mode = #tpu.pipeline_mode<synchronous>, transform_indices = @transform_3, window_bounds = array<i64: 1, 128>}, {transform_indices = @transform_4, window_bounds = array<i64: 1, 64, 128>}]} {
    %c0 = arith.constant 0 : index
    %c0_0 = arith.constant 0 : index
    %c0_1 = arith.constant 0 : index
    %0 = vector.load %arg1[%c0, %c0_0, %c0_1] : memref<1x64x384xf32, #tpu.memory_space<vmem>>, vector<1x64x128xf32>
    %1 = vector.shape_cast %0 : vector<1x64x128xf32> to vector<64x128xf32>
    %cst = arith.constant 0.0883883461 : f32
    %2 = vector.broadcast %cst : f32 to vector<64x128xf32>
    %3 = arith.mulf %1, %2 : vector<64x128xf32>
    %4 = arith.truncf %3 : vector<64x128xf32> to vector<64x128xbf16>
    %c0_2 = arith.constant 0 : index
    %c0_3 = arith.constant 0 : index
    %c128 = arith.constant 128 : index
    %5 = vector.load %arg1[%c0_2, %c0_3, %c128] : memref<1x64x384xf32, #tpu.memory_space<vmem>>, vector<1x64x128xf32>
    %6 = vector.shape_cast %5 : vector<1x64x128xf32> to vector<64x128xf32>
    %7 = arith.truncf %6 : vector<64x128xf32> to vector<64x128xbf16>
    %c0_4 = arith.constant 0 : index
    %c0_5 = arith.constant 0 : index
    %c256 = arith.constant 256 : index
    %8 = vector.load %arg1[%c0_4, %c0_5, %c256] : memref<1x64x384xf32, #tpu.memory_space<vmem>>, vector<1x64x128xf32>
    %9 = vector.shape_cast %8 : vector<1x64x128xf32> to vector<64x128xf32>
    %10 = arith.truncf %9 : vector<64x128xf32> to vector<64x128xbf16>
    %cst_6 = arith.constant dense<0.000000e+00> : vector<64x64xf32>
    %11 = tpu.matmul %4, %7, %cst_6 {dimension_numbers = #tpu.dot_dimension_numbers<[1], [1], [0], [0], [0, 0, 1, 0], [], []>} : vector<64x128xbf16>, vector<64x128xbf16>, vector<64x64xf32> -> vector<64x64xf32>
    %cst_7 = arith.constant dense<0xFF800000> : vector<64xf32>
    %12 = vector.multi_reduction <maximumf>, %11, %cst_7 [1] : vector<64x64xf32> to vector<64xf32>
    %13 = vector.shape_cast %12 : vector<64xf32> to vector<64x1xf32>
    %14 = vector.broadcast %13 : vector<64x1xf32> to vector<64x64xf32>
    %15 = arith.subf %11, %14 : vector<64x64xf32>
    %16 = math.exp %15 : vector<64x64xf32>
    %cst_8 = arith.constant dense<0.000000e+00> : vector<64xf32>
    %17 = vector.multi_reduction <add>, %16, %cst_8 [1] : vector<64x64xf32> to vector<64xf32>
    %18 = vector.shape_cast %17 : vector<64xf32> to vector<64x1xf32>
    %19 = tpu.reciprocal %18 {approx = true} : vector<64x1xf32> -> vector<64x1xf32>
    %20 = vector.broadcast %19 : vector<64x1xf32> to vector<64x64xf32>
    %21 = arith.mulf %16, %20 : vector<64x64xf32>
    %22 = arith.truncf %21 : vector<64x64xf32> to vector<64x64xbf16>
    %cst_9 = arith.constant dense<0.000000e+00> : vector<64x128xf32>
    %23 = tpu.matmul %22, %10, %cst_9 {dimension_numbers = #tpu.dot_dimension_numbers<[1], [0], [0], [1], [0, 0, 1, 1], [], []>} : vector<64x64xbf16>, vector<64x128xbf16>, vector<64x128xf32> -> vector<64x128xf32>
    %24 = arith.truncf %23 : vector<64x128xf32> to vector<64x128xbf16>
    %c0_10 = arith.constant 0 : index
    %c0_11 = arith.constant 0 : index
    %25 = vector.load %arg3[%c0_10, %c0_11] : memref<128x128xbf16, #tpu.memory_space<vmem>>, vector<128x128xbf16>
    %cst_12 = arith.constant dense<0.000000e+00> : vector<64x128xf32>
    %26 = tpu.matmul %24, %25, %cst_12 {dimension_numbers = #tpu.dot_dimension_numbers<[1], [0], [0], [1], [0, 0, 1, 1], [], []>} : vector<64x128xbf16>, vector<128x128xbf16>, vector<64x128xf32> -> vector<64x128xf32>
    %c0_13 = arith.constant 0 : index
    %c0_14 = arith.constant 0 : index
    %27 = vector.load %arg4[%c0_13, %c0_14] : memref<1x128xf32, #tpu.memory_space<vmem>>, vector<1x128xf32>
    %28 = vector.broadcast %27 : vector<1x128xf32> to vector<64x128xf32>
    %29 = arith.addf %26, %28 : vector<64x128xf32>
    %c0_15 = arith.constant 0 : index
    %c0_16 = arith.constant 0 : index
    %c0_17 = arith.constant 0 : index
    %30 = vector.load %arg2[%c0_15, %c0_16, %c0_17] : memref<1x64x128xf32, #tpu.memory_space<vmem>>, vector<1x64x128xf32>
    %31 = vector.shape_cast %30 : vector<1x64x128xf32> to vector<64x128xf32>
    %32 = arith.addf %29, %31 : vector<64x128xf32>
    %c0_18 = arith.constant 0 : index
    %c0_19 = arith.constant 0 : index
    %c0_20 = arith.constant 0 : index
    %33 = vector.load %arg5[%c0_18, %c0_19, %c0_20] : memref<1x64x128xf32, #tpu.memory_space<vmem>>, vector<1x64x128xf32>
    %34 = vector.shape_cast %33 : vector<1x64x128xf32> to vector<64x128xf32>
    %35 = vector.shape_cast %32 : vector<64x128xf32> to vector<1x64x128xf32>
    tpu.vector_store %arg5[%c0_18, %c0_19, %c0_20], %35 {strides = array<i32>} : memref<1x64x128xf32, #tpu.memory_space<vmem>>, vector<1x64x128xf32>,
    return
  }
  func.func @transform_0(%arg0: i32) -> (i32, i32, i32) {
    %c0_i32 = arith.constant 0 : i32
    %c0_i32_0 = arith.constant 0 : i32
    %c0_i32_1 = arith.constant 0 : i32
    return %arg0, %c0_i32, %c0_i32_0 : i32, i32, i32
  }
  func.func @transform_1(%arg0: i32) -> (i32, i32, i32) {
    %c0_i32 = arith.constant 0 : i32
    %c0_i32_0 = arith.constant 0 : i32
    %c0_i32_1 = arith.constant 0 : i32
    return %arg0, %c0_i32, %c0_i32_0 : i32, i32, i32
  }
  func.func @transform_2(%arg0: i32) -> (i32, i32) {
    %c0_i32 = arith.constant 0 : i32
    %c0_i32_0 = arith.constant 0 : i32
    %c0_i32_1 = arith.constant 0 : i32
    return %c0_i32, %c0_i32_0 : i32, i32
  }
  func.func @transform_3(%arg0: i32) -> (i32, i32) {
    %c0_i32 = arith.constant 0 : i32
    %c0_i32_0 = arith.constant 0 : i32
    %c0_i32_1 = arith.constant 0 : i32
    return %c0_i32, %c0_i32_0 : i32, i32
  }
  func.func @transform_4(%arg0: i32) -> (i32, i32, i32) {
    %c0_i32 = arith.constant 0 : i32
    %c0_i32_0 = arith.constant 0 : i32
    %c0_i32_1 = arith.constant 0 : i32
    return %arg0, %c0_i32, %c0_i32_0 : i32, i32, i32
  }
}

module attributes {stable_mosaic.version = 11 : i64} {
  func.func @_gn_silu_conv3x3_kernel(%arg0: i32, %arg1: memref<1x10x10x128xf32, #tpu.memory_space<vmem>>, %arg2: memref<1x128xf32, #tpu.memory_space<vmem>>, %arg3: memref<1x128xf32, #tpu.memory_space<vmem>>, %arg4: memref<128x32xf32, #tpu.memory_space<vmem>>, %arg5: memref<32x128xf32, #tpu.memory_space<vmem>>, %arg6: memref<9x128x128xbf16, #tpu.memory_space<vmem>>, %arg7: memref<1x128xf32, #tpu.memory_space<vmem>>, %arg8: memref<1x1x128xf32, #tpu.memory_space<vmem>>, %arg9: memref<1x64x128xf32, #tpu.memory_space<vmem>>, %arg10: memref<10x10x128xf32, #tpu.memory_space<vmem>>) attributes {dimension_semantics = [#tpu.dimension_semantics<parallel>], iteration_bounds = array<i64: 2>, scalar_prefetch = 0 : i64, scratch_operands = 1 : i64, tpu.core_type = #tpu.core_type<tc>, window_params = [{transform_indices = @transform_0, window_bounds = array<i64: 1, 10, 10, 128>}, {pipeline_mode = #tpu.pipeline_mode<synchronous>, transform_indices = @transform_1, window_bounds = array<i64: 1, 128>}, {pipeline_mode = #tpu.pipeline_mode<synchronous>, transform_indices = @transform_2, window_bounds = array<i64: 1, 128>}, {pipeline_mode = #tpu.pipeline_mode<synchronous>, transform_indices = @transform_3, window_bounds = array<i64: 128, 32>}, {pipeline_mode = #tpu.pipeline_mode<synchronous>, transform_indices = @transform_4, window_bounds = array<i64: 32, 128>}, {pipeline_mode = #tpu.pipeline_mode<synchronous>, transform_indices = @transform_5, window_bounds = array<i64: 9, 128, 128>}, {pipeline_mode = #tpu.pipeline_mode<synchronous>, transform_indices = @transform_6, window_bounds = array<i64: 1, 128>}, {transform_indices = @transform_7, window_bounds = array<i64: 1, 1, 128>}, {transform_indices = @transform_8, window_bounds = array<i64: 1, 64, 128>}]} {
    %c0 = arith.constant 0 : index
    %c0_0 = arith.constant 0 : index
    %c0_1 = arith.constant 0 : index
    %c0_2 = arith.constant 0 : index
    %0 = vector.load %arg1[%c0, %c0_0, %c0_1, %c0_2] : memref<1x10x10x128xf32, #tpu.memory_space<vmem>>, vector<1x10x10x128xf32>
    %1 = vector.shape_cast %0 : vector<1x10x10x128xf32> to vector<10x10x128xf32>
    %2 = tpu.iota {dimensions = array<i32: 0>} : vector<10x10x128xi32>
    %3 = tpu.iota {dimensions = array<i32: 1>} : vector<10x10x128xi32>
    %c1_i32 = arith.constant 1 : i32
    %4 = vector.broadcast %c1_i32 : i32 to vector<10x10x128xi32>
    %5 = arith.cmpi sge, %2, %4 : vector<10x10x128xi32>
    %c8_i32 = arith.constant 8 : i32
    %6 = vector.broadcast %c8_i32 : i32 to vector<10x10x128xi32>
    %7 = arith.cmpi sle, %2, %6 : vector<10x10x128xi32>
    %8 = arith.andi %5, %7 : vector<10x10x128xi1>
    %c1_i32_3 = arith.constant 1 : i32
    %9 = vector.broadcast %c1_i32_3 : i32 to vector<10x10x128xi32>
    %10 = arith.cmpi sge, %3, %9 : vector<10x10x128xi32>
    %11 = arith.andi %8, %10 : vector<10x10x128xi1>
    %c8_i32_4 = arith.constant 8 : i32
    %12 = vector.broadcast %c8_i32_4 : i32 to vector<10x10x128xi32>
    %13 = arith.cmpi sle, %3, %12 : vector<10x10x128xi32>
    %14 = arith.andi %11, %13 : vector<10x10x128xi1>
    %cst = arith.constant dense<0.000000e+00> : vector<10x128xf32>
    %15 = vector.multi_reduction <add>, %1, %cst [0] : vector<10x10x128xf32> to vector<10x128xf32>
    %cst_5 = arith.constant dense<0.000000e+00> : vector<128xf32>
    %16 = vector.multi_reduction <add>, %15, %cst_5 [0] : vector<10x128xf32> to vector<128xf32>
    %17 = vector.shape_cast %16 : vector<128xf32> to vector<1x128xf32>
    %c0_6 = arith.constant 0 : index
    %c0_7 = arith.constant 0 : index
    %18 = vector.load %arg4[%c0_6, %c0_7] : memref<128x32xf32, #tpu.memory_space<vmem>>, vector<128x32xf32>
    %cst_8 = arith.constant dense<0.000000e+00> : vector<1x32xf32>
    %19 = tpu.matmul %17, %18, %cst_8 {dimension_numbers = #tpu.dot_dimension_numbers<[1], [0], [0], [1], [0, 0, 1, 1], [], []>} : vector<1x128xf32>, vector<128x32xf32>, vector<1x32xf32> -> vector<1x32xf32>
    %cst_9 = arith.constant 3.906250e-03 : f32
    %20 = vector.broadcast %cst_9 : f32 to vector<1x32xf32>
    %21 = arith.mulf %19, %20 : vector<1x32xf32>
    %c0_10 = arith.constant 0 : index
    %c0_11 = arith.constant 0 : index
    %22 = vector.load %arg5[%c0_10, %c0_11] : memref<32x128xf32, #tpu.memory_space<vmem>>, vector<32x128xf32>
    %cst_12 = arith.constant dense<0.000000e+00> : vector<1x128xf32>
    %23 = tpu.matmul %21, %22, %cst_12 {dimension_numbers = #tpu.dot_dimension_numbers<[1], [0], [0], [1], [0, 0, 1, 1], [], []>} : vector<1x32xf32>, vector<32x128xf32>, vector<1x128xf32> -> vector<1x128xf32>
    %24 = vector.shape_cast %23 : vector<1x128xf32> to vector<1x1x128xf32>
    %25 = vector.broadcast %24 : vector<1x1x128xf32> to vector<10x10x128xf32>
    %26 = arith.subf %1, %25 : vector<10x10x128xf32>
    %cst_13 = arith.constant 0.000000e+00 : f32
    %27 = vector.broadcast %cst_13 : f32 to vector<10x10x128xf32>
    %28 = arith.select %14, %26, %27 : vector<10x10x128xi1>, vector<10x10x128xf32>
    %29 = arith.mulf %28, %28 : vector<10x10x128xf32>
    %cst_14 = arith.constant dense<0.000000e+00> : vector<10x128xf32>
    %30 = vector.multi_reduction <add>, %29, %cst_14 [0] : vector<10x10x128xf32> to vector<10x128xf32>
    %cst_15 = arith.constant dense<0.000000e+00> : vector<128xf32>
    %31 = vector.multi_reduction <add>, %30, %cst_15 [0] : vector<10x128xf32> to vector<128xf32>
    %32 = vector.shape_cast %31 : vector<128xf32> to vector<1x128xf32>
    %c0_16 = arith.constant 0 : index
    %c0_17 = arith.constant 0 : index
    %33 = vector.load %arg4[%c0_16, %c0_17] : memref<128x32xf32, #tpu.memory_space<vmem>>, vector<128x32xf32>
    %cst_18 = arith.constant dense<0.000000e+00> : vector<1x32xf32>
    %34 = tpu.matmul %32, %33, %cst_18 {dimension_numbers = #tpu.dot_dimension_numbers<[1], [0], [0], [1], [0, 0, 1, 1], [], []>} : vector<1x128xf32>, vector<128x32xf32>, vector<1x32xf32> -> vector<1x32xf32>
    %cst_19 = arith.constant 3.906250e-03 : f32
    %35 = vector.broadcast %cst_19 : f32 to vector<1x32xf32>
    %36 = arith.mulf %34, %35 : vector<1x32xf32>
    %cst_20 = arith.constant 9.99999974E-6 : f32
    %37 = vector.broadcast %cst_20 : f32 to vector<1x32xf32>
    %38 = arith.addf %36, %37 : vector<1x32xf32>
    %39 = math.rsqrt %38 : vector<1x32xf32>
    %c0_21 = arith.constant 0 : index
    %c0_22 = arith.constant 0 : index
    %40 = vector.load %arg5[%c0_21, %c0_22] : memref<32x128xf32, #tpu.memory_space<vmem>>, vector<32x128xf32>
    %cst_23 = arith.constant dense<0.000000e+00> : vector<1x128xf32>
    %41 = tpu.matmul %39, %40, %cst_23 {dimension_numbers = #tpu.dot_dimension_numbers<[1], [0], [0], [1], [0, 0, 1, 1], [], []>} : vector<1x32xf32>, vector<32x128xf32>, vector<1x128xf32> -> vector<1x128xf32>
    %c0_24 = arith.constant 0 : index
    %c0_25 = arith.constant 0 : index
    %42 = vector.load %arg2[%c0_24, %c0_25] : memref<1x128xf32, #tpu.memory_space<vmem>>, vector<1x128xf32>
    %43 = arith.mulf %41, %42 : vector<1x128xf32>
    %44 = vector.shape_cast %43 : vector<1x128xf32> to vector<1x1x128xf32>
    %45 = vector.broadcast %44 : vector<1x1x128xf32> to vector<10x10x128xf32>
    %46 = arith.mulf %28, %45 : vector<10x10x128xf32>
    %c0_26 = arith.constant 0 : index
    %c0_27 = arith.constant 0 : index
    %47 = vector.load %arg3[%c0_26, %c0_27] : memref<1x128xf32, #tpu.memory_space<vmem>>, vector<1x128xf32>
    %48 = vector.shape_cast %47 : vector<1x128xf32> to vector<1x1x128xf32>
    %49 = vector.broadcast %48 : vector<1x1x128xf32> to vector<10x10x128xf32>
    %50 = arith.addf %46, %49 : vector<10x10x128xf32>
    %51 = arith.negf %50 : vector<10x10x128xf32>
    %52 = math.exp %51 : vector<10x10x128xf32>
    %cst_28 = arith.constant 1.000000e+00 : f32
    %53 = vector.broadcast %cst_28 : f32 to vector<10x10x128xf32>
    %54 = arith.addf %53, %52 : vector<10x10x128xf32>
    %55 = arith.divf %53, %54 : vector<10x10x128xf32>
    %56 = arith.mulf %50, %55 : vector<10x10x128xf32>
    %cst_29 = arith.constant 0.000000e+00 : f32
    %57 = vector.broadcast %cst_29 : f32 to vector<10x10x128xf32>
    %58 = arith.select %14, %56, %57 : vector<10x10x128xi1>, vector<10x10x128xf32>
    %c0_30 = arith.constant 0 : index
    %c0_31 = arith.constant 0 : index
    %c0_32 = arith.constant 0 : index
    %59 = vector.load %arg10[%c0_30, %c0_31, %c0_32] : memref<10x10x128xf32, #tpu.memory_space<vmem>>, vector<10x10x128xf32>
    tpu.vector_store %arg10[%c0_30, %c0_31, %c0_32], %58 {strides = array<i32>} : memref<10x10x128xf32, #tpu.memory_space<vmem>>, vector<10x10x128xf32>,
    %cst_33 = arith.constant 0.000000e+00 : f32
    %60 = vector.broadcast %cst_33 : f32 to vector<64x128xf32>
    %c0_34 = arith.constant 0 : index
    %c0_35 = arith.constant 0 : index
    %c0_36 = arith.constant 0 : index
    %61 = vector.load %arg10[%c0_34, %c0_35, %c0_36] : memref<10x10x128xf32, #tpu.memory_space<vmem>>, vector<8x8x128xf32>
    %62 = vector.shape_cast %61 : vector<8x8x128xf32> to vector<64x128xf32>
    %63 = arith.truncf %62 : vector<64x128xf32> to vector<64x128xbf16>
    %c0_37 = arith.constant 0 : index
    %c0_38 = arith.constant 0 : index
    %c0_39 = arith.constant 0 : index
    %64 = vector.load %arg6[%c0_37, %c0_38, %c0_39] : memref<9x128x128xbf16, #tpu.memory_space<vmem>>, vector<1x128x128xbf16>
    %65 = vector.shape_cast %64 : vector<1x128x128xbf16> to vector<128x128xbf16>
    %cst_40 = arith.constant dense<0.000000e+00> : vector<64x128xf32>
    %66 = tpu.matmul %63, %65, %cst_40 {dimension_numbers = #tpu.dot_dimension_numbers<[1], [0], [0], [1], [0, 0, 1, 1], [], []>} : vector<64x128xbf16>, vector<128x128xbf16>, vector<64x128xf32> -> vector<64x128xf32>
    %67 = arith.addf %60, %66 : vector<64x128xf32>
    %c0_41 = arith.constant 0 : index
    %c1 = arith.constant 1 : index
    %c0_42 = arith.constant 0 : index
    %68 = vector.load %arg10[%c0_41, %c1, %c0_42] : memref<10x10x128xf32, #tpu.memory_space<vmem>>, vector<8x8x128xf32>
    %69 = vector.shape_cast %68 : vector<8x8x128xf32> to vector<64x128xf32>
    %70 = arith.truncf %69 : vector<64x128xf32> to vector<64x128xbf16>
    %c1_43 = arith.constant 1 : index
    %c0_44 = arith.constant 0 : index
    %c0_45 = arith.constant 0 : index
    %71 = vector.load %arg6[%c1_43, %c0_44, %c0_45] : memref<9x128x128xbf16, #tpu.memory_space<vmem>>, vector<1x128x128xbf16>
    %72 = vector.shape_cast %71 : vector<1x128x128xbf16> to vector<128x128xbf16>
    %cst_46 = arith.constant dense<0.000000e+00> : vector<64x128xf32>
    %73 = tpu.matmul %70, %72, %cst_46 {dimension_numbers = #tpu.dot_dimension_numbers<[1], [0], [0], [1], [0, 0, 1, 1], [], []>} : vector<64x128xbf16>, vector<128x128xbf16>, vector<64x128xf32> -> vector<64x128xf32>
    %74 = arith.addf %67, %73 : vector<64x128xf32>
    %c0_47 = arith.constant 0 : index
    %c2 = arith.constant 2 : index
    %c0_48 = arith.constant 0 : index
    %75 = vector.load %arg10[%c0_47, %c2, %c0_48] : memref<10x10x128xf32, #tpu.memory_space<vmem>>, vector<8x8x128xf32>
    %76 = vector.shape_cast %75 : vector<8x8x128xf32> to vector<64x128xf32>
    %77 = arith.truncf %76 : vector<64x128xf32> to vector<64x128xbf16>
    %c2_49 = arith.constant 2 : index
    %c0_50 = arith.constant 0 : index
    %c0_51 = arith.constant 0 : index
    %78 = vector.load %arg6[%c2_49, %c0_50, %c0_51] : memref<9x128x128xbf16, #tpu.memory_space<vmem>>, vector<1x128x128xbf16>
    %79 = vector.shape_cast %78 : vector<1x128x128xbf16> to vector<128x128xbf16>
    %cst_52 = arith.constant dense<0.000000e+00> : vector<64x128xf32>
    %80 = tpu.matmul %77, %79, %cst_52 {dimension_numbers = #tpu.dot_dimension_numbers<[1], [0], [0], [1], [0, 0, 1, 1], [], []>} : vector<64x128xbf16>, vector<128x128xbf16>, vector<64x128xf32> -> vector<64x128xf32>
    %81 = arith.addf %74, %80 : vector<64x128xf32>
    %c1_53 = arith.constant 1 : index
    %c0_54 = arith.constant 0 : index
    %c0_55 = arith.constant 0 : index
    %82 = vector.load %arg10[%c1_53, %c0_54, %c0_55] : memref<10x10x128xf32, #tpu.memory_space<vmem>>, vector<8x8x128xf32>
    %83 = vector.shape_cast %82 : vector<8x8x128xf32> to vector<64x128xf32>
    %84 = arith.truncf %83 : vector<64x128xf32> to vector<64x128xbf16>
    %c3 = arith.constant 3 : index
    %c0_56 = arith.constant 0 : index
    %c0_57 = arith.constant 0 : index
    %85 = vector.load %arg6[%c3, %c0_56, %c0_57] : memref<9x128x128xbf16, #tpu.memory_space<vmem>>, vector<1x128x128xbf16>
    %86 = vector.shape_cast %85 : vector<1x128x128xbf16> to vector<128x128xbf16>
    %cst_58 = arith.constant dense<0.000000e+00> : vector<64x128xf32>
    %87 = tpu.matmul %84, %86, %cst_58 {dimension_numbers = #tpu.dot_dimension_numbers<[1], [0], [0], [1], [0, 0, 1, 1], [], []>} : vector<64x128xbf16>, vector<128x128xbf16>, vector<64x128xf32> -> vector<64x128xf32>
    %88 = arith.addf %81, %87 : vector<64x128xf32>
    %c1_59 = arith.constant 1 : index
    %c1_60 = arith.constant 1 : index
    %c0_61 = arith.constant 0 : index
    %89 = vector.load %arg10[%c1_59, %c1_60, %c0_61] : memref<10x10x128xf32, #tpu.memory_space<vmem>>, vector<8x8x128xf32>
    %90 = vector.shape_cast %89 : vector<8x8x128xf32> to vector<64x128xf32>
    %91 = arith.truncf %90 : vector<64x128xf32> to vector<64x128xbf16>
    %c4 = arith.constant 4 : index
    %c0_62 = arith.constant 0 : index
    %c0_63 = arith.constant 0 : index
    %92 = vector.load %arg6[%c4, %c0_62, %c0_63] : memref<9x128x128xbf16, #tpu.memory_space<vmem>>, vector<1x128x128xbf16>
    %93 = vector.shape_cast %92 : vector<1x128x128xbf16> to vector<128x128xbf16>
    %cst_64 = arith.constant dense<0.000000e+00> : vector<64x128xf32>
    %94 = tpu.matmul %91, %93, %cst_64 {dimension_numbers = #tpu.dot_dimension_numbers<[1], [0], [0], [1], [0, 0, 1, 1], [], []>} : vector<64x128xbf16>, vector<128x128xbf16>, vector<64x128xf32> -> vector<64x128xf32>
    %95 = arith.addf %88, %94 : vector<64x128xf32>
    %c1_65 = arith.constant 1 : index
    %c2_66 = arith.constant 2 : index
    %c0_67 = arith.constant 0 : index
    %96 = vector.load %arg10[%c1_65, %c2_66, %c0_67] : memref<10x10x128xf32, #tpu.memory_space<vmem>>, vector<8x8x128xf32>
    %97 = vector.shape_cast %96 : vector<8x8x128xf32> to vector<64x128xf32>
    %98 = arith.truncf %97 : vector<64x128xf32> to vector<64x128xbf16>
    %c5 = arith.constant 5 : index
    %c0_68 = arith.constant 0 : index
    %c0_69 = arith.constant 0 : index
    %99 = vector.load %arg6[%c5, %c0_68, %c0_69] : memref<9x128x128xbf16, #tpu.memory_space<vmem>>, vector<1x128x128xbf16>
    %100 = vector.shape_cast %99 : vector<1x128x128xbf16> to vector<128x128xbf16>
    %cst_70 = arith.constant dense<0.000000e+00> : vector<64x128xf32>
    %101 = tpu.matmul %98, %100, %cst_70 {dimension_numbers = #tpu.dot_dimension_numbers<[1], [0], [0], [1], [0, 0, 1, 1], [], []>} : vector<64x128xbf16>, vector<128x128xbf16>, vector<64x128xf32> -> vector<64x128xf32>
    %102 = arith.addf %95, %101 : vector<64x128xf32>
    %c2_71 = arith.constant 2 : index
    %c0_72 = arith.constant 0 : index
    %c0_73 = arith.constant 0 : index
    %103 = vector.load %arg10[%c2_71, %c0_72, %c0_73] : memref<10x10x128xf32, #tpu.memory_space<vmem>>, vector<8x8x128xf32>
    %104 = vector.shape_cast %103 : vector<8x8x128xf32> to vector<64x128xf32>
    %105 = arith.truncf %104 : vector<64x128xf32> to vector<64x128xbf16>
    %c6 = arith.constant 6 : index
    %c0_74 = arith.constant 0 : index
    %c0_75 = arith.constant 0 : index
    %106 = vector.load %arg6[%c6, %c0_74, %c0_75] : memref<9x128x128xbf16, #tpu.memory_space<vmem>>, vector<1x128x128xbf16>
    %107 = vector.shape_cast %106 : vector<1x128x128xbf16> to vector<128x128xbf16>
    %cst_76 = arith.constant dense<0.000000e+00> : vector<64x128xf32>
    %108 = tpu.matmul %105, %107, %cst_76 {dimension_numbers = #tpu.dot_dimension_numbers<[1], [0], [0], [1], [0, 0, 1, 1], [], []>} : vector<64x128xbf16>, vector<128x128xbf16>, vector<64x128xf32> -> vector<64x128xf32>
    %109 = arith.addf %102, %108 : vector<64x128xf32>
    %c2_77 = arith.constant 2 : index
    %c1_78 = arith.constant 1 : index
    %c0_79 = arith.constant 0 : index
    %110 = vector.load %arg10[%c2_77, %c1_78, %c0_79] : memref<10x10x128xf32, #tpu.memory_space<vmem>>, vector<8x8x128xf32>
    %111 = vector.shape_cast %110 : vector<8x8x128xf32> to vector<64x128xf32>
    %112 = arith.truncf %111 : vector<64x128xf32> to vector<64x128xbf16>
    %c7 = arith.constant 7 : index
    %c0_80 = arith.constant 0 : index
    %c0_81 = arith.constant 0 : index
    %113 = vector.load %arg6[%c7, %c0_80, %c0_81] : memref<9x128x128xbf16, #tpu.memory_space<vmem>>, vector<1x128x128xbf16>
    %114 = vector.shape_cast %113 : vector<1x128x128xbf16> to vector<128x128xbf16>
    %cst_82 = arith.constant dense<0.000000e+00> : vector<64x128xf32>
    %115 = tpu.matmul %112, %114, %cst_82 {dimension_numbers = #tpu.dot_dimension_numbers<[1], [0], [0], [1], [0, 0, 1, 1], [], []>} : vector<64x128xbf16>, vector<128x128xbf16>, vector<64x128xf32> -> vector<64x128xf32>
    %116 = arith.addf %109, %115 : vector<64x128xf32>
    %c2_83 = arith.constant 2 : index
    %c2_84 = arith.constant 2 : index
    %c0_85 = arith.constant 0 : index
    %117 = vector.load %arg10[%c2_83, %c2_84, %c0_85] : memref<10x10x128xf32, #tpu.memory_space<vmem>>, vector<8x8x128xf32>
    %118 = vector.shape_cast %117 : vector<8x8x128xf32> to vector<64x128xf32>
    %119 = arith.truncf %118 : vector<64x128xf32> to vector<64x128xbf16>
    %c8 = arith.constant 8 : index
    %c0_86 = arith.constant 0 : index
    %c0_87 = arith.constant 0 : index
    %120 = vector.load %arg6[%c8, %c0_86, %c0_87] : memref<9x128x128xbf16, #tpu.memory_space<vmem>>, vector<1x128x128xbf16>
    %121 = vector.shape_cast %120 : vector<1x128x128xbf16> to vector<128x128xbf16>
    %cst_88 = arith.constant dense<0.000000e+00> : vector<64x128xf32>
    %122 = tpu.matmul %119, %121, %cst_88 {dimension_numbers = #tpu.dot_dimension_numbers<[1], [0], [0], [1], [0, 0, 1, 1], [], []>} : vector<64x128xbf16>, vector<128x128xbf16>, vector<64x128xf32> -> vector<64x128xf32>
    %123 = arith.addf %116, %122 : vector<64x128xf32>
    %c0_89 = arith.constant 0 : index
    %c0_90 = arith.constant 0 : index
    %124 = vector.load %arg7[%c0_89, %c0_90] : memref<1x128xf32, #tpu.memory_space<vmem>>, vector<1x128xf32>
    %125 = vector.broadcast %124 : vector<1x128xf32> to vector<64x128xf32>
    %126 = arith.addf %123, %125 : vector<64x128xf32>
    %c0_91 = arith.constant 0 : index
    %c0_92 = arith.constant 0 : index
    %c0_93 = arith.constant 0 : index
    %127 = vector.load %arg8[%c0_91, %c0_92, %c0_93] : memref<1x1x128xf32, #tpu.memory_space<vmem>>, vector<1x1x128xf32>
    %128 = vector.shape_cast %127 : vector<1x1x128xf32> to vector<1x128xf32>
    %129 = vector.broadcast %128 : vector<1x128xf32> to vector<64x128xf32>
    %130 = arith.addf %126, %129 : vector<64x128xf32>
    %c0_94 = arith.constant 0 : index
    %c0_95 = arith.constant 0 : index
    %c0_96 = arith.constant 0 : index
    %131 = vector.load %arg9[%c0_94, %c0_95, %c0_96] : memref<1x64x128xf32, #tpu.memory_space<vmem>>, vector<1x64x128xf32>
    %132 = vector.shape_cast %131 : vector<1x64x128xf32> to vector<64x128xf32>
    %133 = vector.shape_cast %130 : vector<64x128xf32> to vector<1x64x128xf32>
    tpu.vector_store %arg9[%c0_94, %c0_95, %c0_96], %133 {strides = array<i32>} : memref<1x64x128xf32, #tpu.memory_space<vmem>>, vector<1x64x128xf32>,
    return
  }
  func.func @transform_0(%arg0: i32) -> (i32, i32, i32, i32) {
    %c0_i32 = arith.constant 0 : i32
    %c0_i32_0 = arith.constant 0 : i32
    %c0_i32_1 = arith.constant 0 : i32
    %c0_i32_2 = arith.constant 0 : i32
    return %arg0, %c0_i32, %c0_i32_0, %c0_i32_1 : i32, i32, i32, i32
  }
  func.func @transform_1(%arg0: i32) -> (i32, i32) {
    %c0_i32 = arith.constant 0 : i32
    %c0_i32_0 = arith.constant 0 : i32
    %c0_i32_1 = arith.constant 0 : i32
    return %c0_i32, %c0_i32_0 : i32, i32
  }
  func.func @transform_2(%arg0: i32) -> (i32, i32) {
    %c0_i32 = arith.constant 0 : i32
    %c0_i32_0 = arith.constant 0 : i32
    %c0_i32_1 = arith.constant 0 : i32
    return %c0_i32, %c0_i32_0 : i32, i32
  }
  func.func @transform_3(%arg0: i32) -> (i32, i32) {
    %c0_i32 = arith.constant 0 : i32
    %c0_i32_0 = arith.constant 0 : i32
    %c0_i32_1 = arith.constant 0 : i32
    return %c0_i32, %c0_i32_0 : i32, i32
  }
  func.func @transform_4(%arg0: i32) -> (i32, i32) {
    %c0_i32 = arith.constant 0 : i32
    %c0_i32_0 = arith.constant 0 : i32
    %c0_i32_1 = arith.constant 0 : i32
    return %c0_i32, %c0_i32_0 : i32, i32
  }
  func.func @transform_5(%arg0: i32) -> (i32, i32, i32) {
    %c0_i32 = arith.constant 0 : i32
    %c0_i32_0 = arith.constant 0 : i32
    %c0_i32_1 = arith.constant 0 : i32
    %c0_i32_2 = arith.constant 0 : i32
    return %c0_i32, %c0_i32_0, %c0_i32_1 : i32, i32, i32
  }
  func.func @transform_6(%arg0: i32) -> (i32, i32) {
    %c0_i32 = arith.constant 0 : i32
    %c0_i32_0 = arith.constant 0 : i32
    %c0_i32_1 = arith.constant 0 : i32
    return %c0_i32, %c0_i32_0 : i32, i32
  }
  func.func @transform_7(%arg0: i32) -> (i32, i32, i32) {
    %c0_i32 = arith.constant 0 : i32
    %c0_i32_0 = arith.constant 0 : i32
    %c0_i32_1 = arith.constant 0 : i32
    return %arg0, %c0_i32, %c0_i32_0 : i32, i32, i32
  }
  func.func @transform_8(%arg0: i32) -> (i32, i32, i32) {
    %c0_i32 = arith.constant 0 : i32
    %c0_i32_0 = arith.constant 0 : i32
    %c0_i32_1 = arith.constant 0 : i32
    return %arg0, %c0_i32, %c0_i32_0 : i32, i32, i32
  }
}

</mosaic_0001>

<bundles_post_ra>
// kernel: _lambda_.11
= control target key start
LH: loop header
LB: loop body
LE: loop exit
PB: predicated region body
PF: predicated region fallthrough
CT: control target
= control target key end

     0   :  { %v120_v0 = vmov 0.0   ;;  %vm121_vm0 = vmmov 0   ;;  %vm38_vm1 = vcmask 261120   ;;  %s157_s1 = inlined_call_operand.vmem [shape: bf16[32,128], index: 1, kind: input, shape index: {}]   ;;  %s158_s0 = inlined_call_operand.vmem [shape: bf16[2,32], index: 0, kind: input, shape index: {}]   ;;  %s159_s2 = inlined_call_operand.vmem [shape: f32[1,128], index: 2, kind: input, shape index: {}]   ;;  %s160_s3 = inlined_call_operand.vmem [shape: f32[2,128], index: 3, kind: output, shape index: {}]  }
   0x1   :  { %108 = vmatprep.subr.bf16.mxu0 %v120_v0  ;;  %19 = vst [vmem:[#allocation2] sm:$0x3] %v120_v0  ;;  %v118_v1 = vld [vmem:[%s157_s1] sm:$0xff]   ;;  %112 = vmatprep.mubr.msk.bf16.mxu0 %vm121_vm0, %v120_v0  ;;  %v119_v2 = vld [vmem:[%s157_s1 + $0x8] sm:$0xff]  }
   0x2   :  { %109 = vmatpush3.bf16.msra.mxu0 %v118_v1  ;;  %v21_v3 = vld [vmem:[%s158_s0] sm:$0x1] }
   0x3   :  { %110 = vmatprep.subr.bf16.mxu0 %v120_v0  ;;  %v104_v10 = vld [vmem:[%s159_s2] ss:$0 sm:$0xff] }
   0x6   :  { %111 = vmatpush3.bf16.msra.mxu0 %v119_v2 }
   0x8   :  { %v20_v4 = vld [vmem:[#allocation2] sm:$0x3] }
   0x9   :  { %113 = vmatmul.mubr.msk.bf16.vlgmr.msra.gmra.mrb[0].mxu0 %vm38_vm1, %v21_v3 }
  0xdc   :  { %v76_v5 = vpop.f32.mrb[0].mxu0 }
  0xdd   :  { %v82_v6 = vadd.f32 %v76_v5, %v20_v4  ;;  %v114_v7 = vpop.f32.mrb[1].mxu0 }
  0xde   :  { %v79_v8 = vpop.f32.mrb[2].mxu0 }
  0xdf   :  { %83 = vst [vmem:[#allocation2] sm:$0x3] %v82_v6  ;;  %v115_v9 = vpop.f32.mrb[3].mxu0 }
  0xe6   :  { %v87_v11 = vld [vmem:[#allocation2] sm:$0x3] }
  0xe7   :  { %v95_v12 = vadd.f32 %v104_v10, %v87_v11 }
  0xe9   :  { %96 = vst [vmem:[%s160_s3] sm:$0x3] %v95_v12 }

// kernel: _lambda_.13
= control target key start
LH: loop header
LB: loop body
LE: loop exit
PB: predicated region body
PF: predicated region fallthrough
CT: control target
= control target key end

     0   :  { %vm139_vm0 = vcmask 523264   ;;  %s547_s1 = inlined_call_operand.vmem [shape: bf16[64,128], index: 1, kind: input, shape index: {}]   ;;  %s548_s0 = inlined_call_operand.vmem [shape: bf16[128,64], index: 0, kind: input, shape index: {}]   ;;  %s549_s2 = inlined_call_operand.vmem [shape: f32[1,128], index: 2, kind: input, shape index: {}]   ;;  %s550_s3 = inlined_call_operand.vmem [shape: f32[128,128], index: 3, kind: output, shape index: {}]  }
   0x1   :  { %v420_v0 = vld [vmem:[%s547_s1] sm:$0xff]   ;;  %v421_v1 = vld [vmem:[%s547_s1 + $0x8] sm:$0xff]   ;;  %v422_v2 = vld [vmem:[%s547_s1 + $0x10] sm:$0xff]  }
   0x2   :  { %388 = vmatprep.subr.bf16.mxu0 %v420_v0  ;;  %412 = vmatprep.subr.bf16.mxu1 %v420_v0  ;;  %v424_v3 = vld [vmem:[%s548_s0] sm:$0xff]   ;;  %v423_v5 = vld [vmem:[%s547_s1 + $0x18] sm:$0xff]   ;;  %v426_v6 = vld [vmem:[%s548_s0 + $0x8] sm:$0xff]  }
   0x3   :  { %389 = vmatpush3.bf16.msra.mxu0 %v420_v0  ;;  %416 = vmatpush3.bf16.msra.mxu1 %v420_v0  ;;  %v425_v4 = vld [vmem:[%s548_s0 + $0x20] sm:$0xff]   ;;  %v427_v7 = vld [vmem:[%s548_s0 + $0x28] sm:$0xff]   ;;  %v428_v8 = vld [vmem:[%s548_s0 + $0x10] sm:$0xff]  }
   0x4   :  { %390 = vmatprep.subr.bf16.mxu0 %v421_v1  ;;  %413 = vmatprep.subr.bf16.mxu1 %v421_v1  ;;  %v429_v9 = vld [vmem:[%s548_s0 + $0x30] sm:$0xff]   ;;  %v430_v10 = vld [vmem:[%s548_s0 + $0x18] sm:$0xff]   ;;  %v375_v12 = vld [vmem:[%s549_s2] ss:$0 sm:$0xff] }
   0x5   :  { %396 = vmatprep.mubr.msk.bf16.mxu0 %vm139_vm0, %v424_v3  ;;  %404 = vmatprep.mubr.msk.bf16.mxu1 %vm139_vm0, %v425_v4  ;;  %v431_v11 = vld [vmem:[%s548_s0 + $0x38] sm:$0xff]  }
   0x7   :  { %391 = vmatpush3.bf16.msra.mxu0 %v421_v1  ;;  %417 = vmatpush3.bf16.msra.mxu1 %v421_v1 }
   0x8   :  { %392 = vmatprep.subr.bf16.mxu0 %v422_v2  ;;  %414 = vmatprep.subr.bf16.mxu1 %v422_v2 }
   0xb   :  { %393 = vmatpush3.bf16.msra.mxu0 %v422_v2  ;;  %418 = vmatpush3.bf16.msra.mxu1 %v422_v2 }
   0xc   :  { %394 = vmatprep.subr.bf16.mxu0 %v423_v5  ;;  %415 = vmatprep.subr.bf16.mxu1 %v423_v5 }
   0xf   :  { %395 = vmatpush3.bf16.msra.mxu0 %v423_v5  ;;  %419 = vmatpush3.bf16.msra.mxu1 %v423_v5 }
  0x12   :  { %397 = vmatmul.mubr.msk.bf16.vlgmr.msra.gmra.mrb[0].mxu0 %vm139_vm0, %v426_v6  ;;  %405 = vmatmul.mubr.msk.bf16.vlgmr.msra.gmra.mrb[0].mxu1 %vm139_vm0, %v427_v7 }
  0x13   :  { %400 = vmatprep.mubr.msk.bf16.mxu0 %vm139_vm0, %v428_v8  ;;  %408 = vmatprep.mubr.msk.bf16.mxu1 %vm139_vm0, %v429_v9 }
  0x1a   :  { %401 = vmatmul.mubr.msk.bf16.gmra.mrb[4].mxu0 %vm139_vm0, %v430_v10  ;;  %409 = vmatmul.mubr.msk.bf16.gmra.mrb[4].mxu1 %vm139_vm0, %v431_v11 }
  0xe5   :  { %v398_v13 = vpop.f32.mrb[0].mxu0  ;;  %v406_v14 = vpop.f32.mrb[0].mxu1 }
  0xe6   :  { %v321_v15 = vadd.f32 %v398_v13, %v375_v12  ;;  %v329_v16 = vadd.f32 %v406_v14, %v375_v12  ;;  %v198_v17 = vpop.f32.mrb[1].mxu0  ;;  %v230_v18 = vpop.f32.mrb[1].mxu1 }
  0xe7   :  { %v319_v19 = vadd.f32 %v375_v12, %v198_v17  ;;  %v327_v20 = vadd.f32 %v375_v12, %v230_v18  ;;  %v399_v21 = vpop.f32.mrb[2].mxu0  ;;  %v407_v22 = vpop.f32.mrb[2].mxu1 }
  0xe8   :  { %337 = vst [vmem:[%s550_s3 + $0x10] sm:$0xff] %v321_v15  ;;  %345 = vst [vmem:[%s550_s3 + $0x50] sm:$0xff] %v329_v16  ;;  %v322_v23 = vadd.f32 %v399_v21, %v375_v12  ;;  %v330_v24 = vadd.f32 %v407_v22, %v375_v12  ;;  %v201_v25 = vpop.f32.mrb[3].mxu0  ;;  %v233_v26 = vpop.f32.mrb[3].mxu1 }
  0xe9   :  { %335 = vst [vmem:[%s550_s3] sm:$0xff] %v319_v19  ;;  %343 = vst [vmem:[%s550_s3 + $0x40] sm:$0xff] %v327_v20  ;;  %v320_v27 = vadd.f32 %v375_v12, %v201_v25  ;;  %v328_v28 = vadd.f32 %v375_v12, %v233_v26 }
  0xea   :  { %338 = vst [vmem:[%s550_s3 + $0x18] sm:$0xff] %v322_v23  ;;  %346 = vst [vmem:[%s550_s3 + $0x58] sm:$0xff] %v330_v24 }
  0xeb   :  { %336 = vst [vmem:[%s550_s3 + $0x8] sm:$0xff] %v320_v27  ;;  %344 = vst [vmem:[%s550_s3 + $0x48] sm:$0xff] %v328_v28 }
  0xed   :  { %v402_v29 = vpop.f32.mrb[4].mxu0  ;;  %v410_v30 = vpop.f32.mrb[4].mxu1 }
  0xee   :  { %v325_v31 = vadd.f32 %v402_v29, %v375_v12  ;;  %v333_v32 = vadd.f32 %v410_v30, %v375_v12  ;;  %v214_v33 = vpop.f32.mrb[5].mxu0  ;;  %v246_v34 = vpop.f32.mrb[5].mxu1 }
  0xef   :  { %v323_v35 = vadd.f32 %v375_v12, %v214_v33  ;;  %v331_v36 = vadd.f32 %v375_v12, %v246_v34  ;;  %v403_v37 = vpop.f32.mrb[6].mxu0  ;;  %v411_v38 = vpop.f32.mrb[6].mxu1 }
  0xf0   :  { %341 = vst [vmem:[%s550_s3 + $0x30] sm:$0xff] %v325_v31  ;;  %349 = vst [vmem:[%s550_s3 + $0x70] sm:$0xff] %v333_v32  ;;  %v326_v39 = vadd.f32 %v403_v37, %v375_v12  ;;  %v334_v40 = vadd.f32 %v411_v38, %v375_v12  ;;  %v217_v41 = vpop.f32.mrb[7].mxu0  ;;  %v249_v42 = vpop.f32.mrb[7].mxu1 }
  0xf1   :  { %339 = vst [vmem:[%s550_s3 + $0x20] sm:$0xff] %v323_v35  ;;  %347 = vst [vmem:[%s550_s3 + $0x60] sm:$0xff] %v331_v36  ;;  %v324_v43 = vadd.f32 %v375_v12, %v217_v41  ;;  %v332_v44 = vadd.f32 %v375_v12, %v249_v42 }
  0xf2   :  { %342 = vst [vmem:[%s550_s3 + $0x38] sm:$0xff] %v326_v39  ;;  %350 = vst [vmem:[%s550_s3 + $0x78] sm:$0xff] %v334_v40 }
  0xf3   :  { %340 = vst [vmem:[%s550_s3 + $0x28] sm:$0xff] %v324_v43  ;;  %348 = vst [vmem:[%s550_s3 + $0x68] sm:$0xff] %v332_v44 }

// kernel: _lambda_.12
= control target key start
LH: loop header
LB: loop body
LE: loop exit
PB: predicated region body
PF: predicated region fallthrough
CT: control target
= control target key end

     0   :  { %s3063_s27 = smov 0   ;;  %s3839_s0 = inlined_call_operand.vmem [shape: f32[2,10,10,64], index: 0, kind: input, shape index: {}]   ;;  %s3840_s1 = inlined_call_operand.vmem [shape: f32[1,64], index: 1, kind: input, shape index: {}]   ;;  %s3841_s2 = inlined_call_operand.vmem [shape: f32[1,64], index: 2, kind: input, shape index: {}]   ;;  %s3842_s3 = inlined_call_operand.vmem [shape: f32[64,32], index: 3, kind: input, shape index: {}]   ;;  %s3843_s4 = inlined_call_operand.vmem [shape: f32[32,64], index: 4, kind: input, shape index: {}]   ;;  %s3844_s5 = inlined_call_operand.vmem [shape: bf16[9,64,128], index: 5, kind: input, shape index: {}]   ;;  %s3845_s6 = inlined_call_operand.vmem [shape: f32[1,128], index: 6, kind: input, shape index: {}]   ;;  %s3846_s7 = inlined_call_operand.vmem [shape: f32[2,1,128], index: 7, kind: input, shape index: {}]   ;;  %s3847_s8 = inlined_call_operand.vmem [shape: f32[2,64,128], index: 8, kind: output, shape index: {}]  }
   0x1 LB: > { %s2315_s28 = sadd.s32 4294967295, %s3013_s27   ;;  %p2319_p0 = scmp.ge.s32.totalorder %s3013_s27, 1  ;;  %s3013_s27 = sphi %s3063_s27, %s18_s27  }
   0x2   : > { %p270_p1 = scmp.lt.s32.totalorder %s3013_s27, 3 }
   0x4   : > { %p271_p2 = pnand %p2319_p0, %p270_p1 }
   0x5   : > { %v405_v0 = vld [vmem:[%s3842_s3] sm:$0xff] (!%p271_p2)  ;;  %v406_v1 = vld [vmem:[%s3842_s3 + $0x8] sm:$0xff] (!%p271_p2)  ;;  %v407_v2 = vld [vmem:[%s3842_s3 + $0x10] sm:$0xff] (!%p271_p2)  ;;  %vm356_vm0 = vcmask (!%p271_p2), 523264   ;;  %v3015_v3 = vmov (!%p271_p2), 0.0|0.0   ;;  %vm376_vm1 = vcmask (!%p271_p2), 517120  }
   0x6   : > { %274 = sbr.rel (%p271_p2) target bundleno = 1340 (0x53c), region = 52  ;;  %2793 = vmatprep.subr.bf16.mxu1 (!%p271_p2), %v3015_v3  ;;  %v3081_v4 = vpack.c.bf16 (!%p271_p2), %v406_v1, %v405_v0  ;;  %v408_v5 = vld [vmem:[%s3842_s3 + $0x18] sm:$0xff] (!%p271_p2)  ;;  %p307_p3 = scmp.lt.s32.totalorder (!%p271_p2), %s2315_s28, 1  ;;  %v409_v6 = vld [vmem:[%s3842_s3 + $0x20] sm:$0xff] (!%p271_p2)  ;;  %vm3016_vm2 = vmmov (!%p271_p2), 0   ;;  %v3017_v7 = vmov (!%p271_p2), 0.0  }
   0x7   : > { %2605 = vmatprep.mubr.msk.f32.mxu1 (!%p271_p2), %vm3016_vm2, %v3017_v7  ;;  %1038 = vst.msk [vmem:[#allocation2] sm:$0xff] (!%p271_p2), %vm356_vm0, %v3017_v7  ;;  %1056 = vst.msk [vmem:[#allocation2 + $0x90] sm:$0xff] (!%p271_p2), %vm356_vm0, %v3017_v7  ;;  %v3100_v8 = vpack.c.bf16 (!%p271_p2), %v408_v5, %v407_v2  ;;  %v410_v9 = vld [vmem:[%s3842_s3 + $0x28] sm:$0xff] (!%p271_p2)  ;;  %v411_v10 = vld [vmem:[%s3842_s3 + $0x30] sm:$0xff] (!%p271_p2)  ;;  %vm491_vm3 = vcmask (!%p271_p2), 261120  }
   0x8   : > { %1039 = vst.msk [vmem:[#allocation2 + $0x8] sm:$0x3] (!%p271_p2), %vm376_vm1, %v3017_v7  ;;  %1057 = vst.msk [vmem:[#allocation2 + $0x98] sm:$0x3] (!%p271_p2), %vm376_vm1, %v3017_v7  ;;  %2795 = vmatpush3.bf16.msra.mxu1 (!%p271_p2), %v3081_v4  ;;  %v3113_v11 = vpack.c.bf16 (!%p271_p2), %v410_v9, %v409_v6  ;;  %v412_v12 = vld [vmem:[%s3842_s3 + $0x38] sm:$0xff] (!%p271_p2) }
   0x9   : > { %2796 = vmatprep.subr.bf16.mxu1 (!%p271_p2), %v3015_v3  ;;  %v3147_v23 = vpack.c.bf16 (!%p271_p2), %v412_v12, %v411_v10 }
   0xc   : > { %2798 = vmatpush3.bf16.msra.mxu1 (!%p271_p2), %v3100_v8 }
   0xd   : > { %s3849_s28 = smov (!%p307_p3, %s2315_s28), 1  ;;  %2799 = vmatprep.subr.bf16.mxu1 %v3015_v3 }
   0xe   : > { %s2893_s19 = smul.u32 160, %s3849_s28  ;;  %s314_s13 = scalar_lea.vmem %s3846_s7, %s3849_s28 }
   0xf   : > { %s2488_s16 = sshll.u32 %s3849_s28, 6 }
  0x10   : > { %s3118_s24 = scalar_lea.vmem %s3839_s0, %s2893_s19  ;;  %2801 = vmatpush3.bf16.msra.mxu1 %v3113_v11  ;;  %s3826_s19 = scalar_lea.vmem %s3847_s8, %s2488_s16 }
  0x11   : > { %v321_v13 = vld [vmem:[%s3118_s24] sm:$0xff]  ;;  %v3126_v14 = vld [vmem:[%s3118_s24 + $0x10] sm:$0xff]  ;;  %v322_v15 = vld [vmem:[%s3118_s24 + $0x8] sm:$0x3]  ;;  %2802 = vmatprep.subr.bf16.mxu1 %v3015_v3 }
  0x12   : > { %v3130_v16 = vld [vmem:[%s3118_s24 + $0x20] sm:$0xff]  ;;  %v357_v17 = vsel %vm356_vm0, %v321_v13, 0.0  ;;  %v3134_v18 = vld [vmem:[%s3118_s24 + $0x18] sm:$0x3]  ;;  %v3137_v19 = vld [vmem:[%s3118_s24 + $0x30] sm:$0xff]  ;;  %v358_v21 = vsel %vm356_vm0, %v3126_v14, 0.0 }
  0x13   : > { %v3140_v20 = vld [vmem:[%s3118_s24 + $0x40] sm:$0xff]  ;;  %v360_v22 = vsel %vm356_vm0, %v3130_v16, 0.0  ;;  %v3150_v24 = vld [vmem:[%s3118_s24 + $0x28] sm:$0x3]  ;;  %v3153_v25 = vld [vmem:[%s3118_s24 + $0x38] sm:$0x3]  ;;  %v359_v27 = vadd.f32 %v358_v21, %v357_v17 }
  0x14   : > { %v3156_v26 = vld [vmem:[%s3118_s24 + $0x50] sm:$0xff]  ;;  %v3160_v28 = vld [vmem:[%s3118_s24 + $0x48] sm:$0x3]  ;;  %v3163_v29 = vld [vmem:[%s3118_s24 + $0x58] sm:$0x3]  ;;  %v362_v32 = vsel %vm356_vm0, %v3137_v19, 0.0  ;;  %2804 = vmatpush3.bf16.msra.mxu1 %v3147_v23 }
  0x15   : > { %v3166_v30 = vld [vmem:[%s3118_s24 + $0x60] sm:$0xff]  ;;  %v3169_v31 = vld [vmem:[%s3118_s24 + $0x70] sm:$0xff]  ;;  %v3174_v33 = vld [vmem:[%s3118_s24 + $0x68] sm:$0x3]  ;;  %v361_v36 = vadd.f32 %v360_v22, %v359_v27  ;;  %v364_v37 = vsel %vm356_vm0, %v3140_v20, 0.0  ;;  %v366_v40 = vsel %vm356_vm0, %v3156_v26, 0.0  ;;  %2805 = vmatprep.subr.bf16.mxu1 %v3015_v3 }
  0x16   : > { %v3177_v34 = vld [vmem:[%s3118_s24 + $0x78] sm:$0x3]  ;;  %v3180_v35 = vld [vmem:[%s3118_s24 + $0x80] sm:$0xff]  ;;  %v3185_v38 = vld [vmem:[%s3118_s24 + $0x88] sm:$0x3]  ;;  %v368_v41 = vsel %vm356_vm0, %v3166_v30, 0.0 }
  0x17   : > { %v339_v39 = vld [vmem:[%s3118_s24 + $0x90] sm:$0xff]  ;;  %v377_v42 = vsel %vm376_vm1, %v322_v15, 0.0  ;;  %v363_v43 = vadd.f32 %v362_v32, %v361_v36  ;;  %v370_v44 = vsel %vm356_vm0, %v3169_v31, 0.0  ;;  %v378_v45 = vsel %vm376_vm1, %v3134_v18, 0.0  ;;  %v340_v63 = vld [vmem:[%s3118_s24 + $0x98] sm:$0x3] }
  0x18   : > { %v380_v46 = vsel %vm376_vm1, %v3150_v24, 0.0  ;;  %v372_v47 = vsel %vm356_vm0, %v3180_v35, 0.0  ;;  %v374_v48 = vsel %vm356_vm0, %v339_v39, 0.0  ;;  %v379_v49 = vadd.f32 %v378_v45, %v377_v42  ;;  %v487_v36 = vld [vmem:[%s3843_s4] sm:$0xff]  ;;  %v489_v42 = vld [vmem:[%s3843_s4 + $0x10] sm:$0xff] }
  0x19   : > { %v382_v50 = vsel %vm376_vm1, %v3153_v25, 0.0  ;;  %v365_v51 = vadd.f32 %v364_v37, %v363_v43  ;;  %v384_v52 = vsel %vm376_vm1, %v3160_v28, 0.0  ;;  %v386_v53 = vsel %vm376_vm1, %v3163_v29, 0.0  ;;  %v488_v37 = vld [vmem:[%s3843_s4 + $0x8] sm:$0xff]  ;;  %v490_v43 = vld [vmem:[%s3843_s4 + $0x18] sm:$0xff] }
  0x1a   : > { %v388_v54 = vsel %vm376_vm1, %v3174_v33, 0.0  ;;  %v381_v55 = vadd.f32 %v380_v46, %v379_v49  ;;  %v390_v56 = vsel %vm376_vm1, %v3177_v34, 0.0  ;;  %v392_v57 = vsel %vm376_vm1, %v3185_v38, 0.0 }
  0x1b   : > { %v367_v58 = vadd.f32 %v366_v40, %v365_v51  ;;  %v394_v9 = vsel %vm376_vm1, %v340_v63, 0.0  ;;  %v3226_v40 = vpack.c.bf16 %v488_v37, %v487_v36 }
  0x1c   : > { %v383_v59 = vadd.f32 %v382_v50, %v381_v55 }
  0x1d   : > { %v369_v60 = vadd.f32 %v368_v41, %v367_v58 }
  0x1e   : > { %v385_v61 = vadd.f32 %v384_v52, %v383_v59 }
  0x1f   : > { %v371_v62 = vadd.f32 %v370_v44, %v369_v60  ;;  %v3239_v44 = vpack.c.bf16 %v490_v43, %v489_v42 }
  0x20   : > { %v387_v0 = vadd.f32 %v386_v53, %v385_v61 }
  0x21   : > { %v373_v1 = vadd.f32 %v372_v47, %v371_v62 }
  0x22   : > { %v389_v2 = vadd.f32 %v388_v54, %v387_v0 }
  0x23   : > { %v375_v5 = vadd.f32 %v374_v48, %v373_v1  ;;  %v341_v48 = vlaneseq }
  0x24   : > { %v391_v6 = vadd.f32 %v390_v56, %v389_v2 }
  0x25   : > { %v396_v10 = vsel %vm356_vm0, %v375_v5, 0.0  ;;  %v3254_v49 = vshrl.u32 %v341_v48, 7 }
  0x26   : > { %v393_v12 = vadd.f32 %v392_v57, %v391_v6 }
  0x27   : > { %v3262_v52 = vadd.s32 8, %v3254_v49  ;;  %vm344_vm4 = vcmp.ge.s32.totalorder %v3254_v49, 1 }
  0x28   : > { %v395_v13 = vadd.f32 %v394_v9, %v393_v12 }
  0x29   : > { %vm351_vm5 = vcmp.le.s32.totalorder %v3262_v52, 8 }
  0x2a   : > { %v397_v15 = vsel %vm376_vm1, %v395_v13, 0.0 }
  0x2b   : > { %v398_v17 = vadd.f32 %v397_v15, %v396_v10 }
  0x2d   : > { %v399_v21 = vrot.slane %v398_v17, 4 }
  0x2f   : > { %v400_v22 = vadd.f32 %v399_v21, %v398_v17 }
  0x31   : > { %v401_v27 = vrot.slane %v400_v22, 2 }
  0x33   : > { %v402_v32 = vadd.f32 %v401_v27, %v400_v22 }
  0x35   : > { %v403_v39 = vrot.slane %v402_v32, 1 }
  0x37   : > { %v404_v41 = vadd.f32 %v403_v39, %v402_v32 }
  0x39   : > { %2606 = vmatmul.mubr.msk.f32.vlgmr.msra.gmra.mrb[0].mxu1 %vm356_vm0, %v404_v41 }
  0x3a   : > { %2807 = vmatpush3.bf16.msra.mxu1 %v3226_v40  ;;  %2616 = vmatprep.mubr.msk.f32.mxu1 %vm3016_vm2, %v3017_v7 }
  0x3b   : > { %2808 = vmatprep.subr.bf16.mxu1 %v3015_v3 }
  0x3e   : > { %2810 = vmatpush3.bf16.msra.mxu1 %v3239_v44 }
  0x3f   : > { %2811 = vmatprep.subr.bf16.mxu1 %v3015_v3 }
 0x10c   : > { %v482_v45 = vpop.f32.mrb[0].mxu1 }
 0x10d   : > { %v486_v46 = vmul.f32 0.0078125, %v482_v45  ;;  %v2607_v47 = vpop.f32.mrb[1].mxu1 }
 0x10f   : > { %2617 = vmatmul.mubr.msk.f32.vlgmr.msra.gmra.mrb[2].mxu1 %vm491_vm3, %v486_v46 }
 0x110   : > { %2813 = vmatpush3.bf16.msra.mxu1 %v3081_v4  ;;  %2635 = vmatprep.mubr.msk.f32.mxu1 %vm3016_vm2, %v3017_v7  ;;  %v567_v4 = vsub.s32 0, %v3254_v49 }
 0x111   : > { %2814 = vmatprep.subr.bf16.mxu1 %v3015_v3 }
 0x114   : > { %2816 = vmatpush3.bf16.msra.mxu1 %v3100_v8 }
 0x115   : > { %2817 = vmatprep.subr.bf16.mxu1 %v3015_v3 }
 0x118   : > { %2819 = vmatpush3.bf16.msra.mxu1 %v3113_v11 }
 0x119   : > { %2820 = vmatprep.subr.bf16.mxu1 %v3015_v3 }
 0x11c   : > { %2822 = vmatpush3.bf16.msra.mxu1 %v3147_v23 }
 0x11d   : > { %2823 = vmatprep.subr.bf16.mxu1 %v3015_v3 }
 0x1e2   : > { %v561_v50 = vpop.f32.mrb[2].mxu1 }
 0x1e3   : > { %v3259_v51 = vrot.slane %v561_v50, %v567_v4  ;;  %v2618_v8 = vpop.f32.mrb[3].mxu1 }
 0x1e5   : > { %v571_v11 = vsub.f32 %v3126_v14, %v3259_v51  ;;  %v573_v23 = vsub.f32 %v3130_v16, %v3259_v51  ;;  %v572_v53 = vsub.f32 %v3134_v18, %v3259_v51  ;;  %v574_v54 = vsub.f32 %v3150_v24, %v3259_v51 }
 0x1e6   : > { %v575_v55 = vsub.f32 %v3137_v19, %v3259_v51  ;;  %v576_v56 = vsub.f32 %v3153_v25, %v3259_v51  ;;  %v577_v14 = vsub.f32 %v3140_v20, %v3259_v51  ;;  %v578_v24 = vsub.f32 %v3160_v28, %v3259_v51 }
 0x1e7   : > { %v3282_v16 = vsel %vm344_vm4, %v571_v11, 0.0  ;;  %v3286_v18 = vsel %vm344_vm4, %v573_v23, 0.0  ;;  %v579_v19 = vsub.f32 %v3156_v26, %v3259_v51  ;;  %v3294_v25 = vsel %vm351_vm5, %v572_v53, 0.0 }
 0x1e8   : > { %v3298_v20 = vsel %vm351_vm5, %v574_v54, 0.0  ;;  %v3302_v57 = vsel %vm344_vm4, %v575_v55, 0.0  ;;  %v580_v58 = vsub.f32 %v3163_v29, %v3259_v51  ;;  %v581_v28 = vsub.f32 %v3166_v30, %v3259_v51 }
 0x1e9   : > { %v611_v26 = vmul.f32 %v3282_v16, %v3282_v16  ;;  %v613_v59 = vmul.f32 %v3286_v18, %v3286_v18  ;;  %v582_v60 = vsub.f32 %v3174_v33, %v3259_v51  ;;  %v583_v61 = vsub.f32 %v3169_v31, %v3259_v51 }
 0x1ea   : > { %v3318_v62 = vsel %vm351_vm5, %v576_v56, 0.0  ;;  %v3322_v29 = vsel %vm344_vm4, %v577_v14, 0.0  ;;  %v3326_v30 = vsel %vm351_vm5, %v578_v24, 0.0  ;;  %v612_v63 = vmul.f32 %v3294_v25, %v3294_v25 }
 0x1eb   : > { %v614_v33 = vmul.f32 %v3298_v20, %v3298_v20  ;;  %v615_v31 = vmul.f32 %v3302_v57, %v3302_v57  ;;  %v584_v0 = vsub.f32 %v3177_v34, %v3259_v51  ;;  %v585_v1 = vsub.f32 %v3180_v35, %v3259_v51 }
 0x1ec   : > { %v586_v2 = vsub.f32 %v3185_v38, %v3259_v51  ;;  %v3342_v5 = vsel %vm344_vm4, %v579_v19, 0.0  ;;  %v616_v6 = vmul.f32 %v3318_v62, %v3318_v62  ;;  %v617_v9 = vmul.f32 %v3322_v29, %v3322_v29 }
 0x1ed   : > { %v630_v10 = vsel %vm356_vm0, %v611_v26, 0.0  ;;  %v632_v34 = vsel %vm356_vm0, %v613_v59, 0.0  ;;  %v3352_v35 = vsel %vm351_vm5, %v580_v58, 0.0  ;;  %v3356_v38 = vsel %vm344_vm4, %v581_v28, 0.0 }
 0x1ee   : > { %v618_v12 = vmul.f32 %v3326_v30, %v3326_v30  ;;  %v633_v13 = vadd.f32 %v632_v34, %v630_v10  ;;  %v619_v15 = vmul.f32 %v3342_v5, %v3342_v5  ;;  %v634_v17 = vsel %vm356_vm0, %v615_v31, 0.0 }
 0x1ef   : > { %v649_v21 = vsel %vm376_vm1, %v612_v63, 0.0  ;;  %v651_v22 = vsel %vm376_vm1, %v614_v33, 0.0  ;;  %v3367_v27 = vsel %vm351_vm5, %v582_v60, 0.0  ;;  %v3371_v32 = vsel %vm344_vm4, %v583_v61, 0.0 }
 0x1f0   : > { %v635_v36 = vadd.f32 %v634_v17, %v633_v13  ;;  %v652_v37 = vadd.f32 %v651_v22, %v649_v21  ;;  %v620_v39 = vmul.f32 %v3352_v35, %v3352_v35  ;;  %v621_v41 = vmul.f32 %v3356_v38, %v3356_v38 }
 0x1f1   : > { %v636_v42 = vsel %vm356_vm0, %v617_v9, 0.0  ;;  %v653_v43 = vsel %vm376_vm1, %v616_v6, 0.0  ;;  %v3381_v45 = vsel %vm351_vm5, %v584_v0, 0.0  ;;  %v3385_v46 = vsel %vm344_vm4, %v585_v1, 0.0 }
 0x1f2   : > { %v637_v47 = vadd.f32 %v636_v42, %v635_v36  ;;  %v654_v48 = vadd.f32 %v653_v43, %v652_v37  ;;  %v622_v50 = vmul.f32 %v3367_v27, %v3367_v27  ;;  %v623_v51 = vmul.f32 %v3371_v32, %v3371_v32  ;;  %v2905_v42 = vld [vmem:[%s3844_s5 + $0x60] sm:$0xff]   ;;  %v2910_v43 = vld [vmem:[%s3844_s5 + $0x30] sm:$0xff]  }
 0x1f3   : > { %v638_v8 = vsel %vm356_vm0, %v619_v15, 0.0  ;;  %v655_v11 = vsel %vm376_vm1, %v618_v12, 0.0  ;;  %v3395_v23 = vsel %vm351_vm5, %v586_v2, 0.0  ;;  %v624_v55 = vmul.f32 %v3381_v45, %v3381_v45  ;;  %2697 = vmatprep.subr.bf16.mxu0 %v2905_v42 }
 0x1f4   : > { %v639_v53 = vadd.f32 %v638_v8, %v637_v47  ;;  %v656_v54 = vadd.f32 %v655_v11, %v654_v48  ;;  %v625_v56 = vmul.f32 %v3385_v46, %v3385_v46  ;;  %v640_v14 = vsel %vm356_vm0, %v621_v41, 0.0  ;;  %2698 = vmatpush3.bf16.msra.mxu0 %v2905_v42  ;;  %v2911_v47 = vld [vmem:[%s3844_s5 + $0x78] sm:$0xff]   ;;  %v825_v8 = vld [vmem:[%s3840_s1] sm:$0x1] }
 0x1f5   : > { %v657_v24 = vsel %vm376_vm1, %v620_v39, 0.0  ;;  %v626_v28 = vmul.f32 %v3395_v23, %v3395_v23  ;;  %v642_v26 = vsel %vm356_vm0, %v623_v51, 0.0  ;;  %v659_v59 = vsel %vm376_vm1, %v622_v50, 0.0  ;;  %v2912_v48 = vld [vmem:[%s3844_s5 + $0x38] sm:$0xff]   ;;  %v3446_v50 = vld [vmem:[%s3844_s5 + $0x80] sm:$0xff]  }
 0x1f6   : > { %v641_v19 = vadd.f32 %v640_v14, %v639_v53  ;;  %v658_v58 = vadd.f32 %v657_v24, %v656_v54  ;;  %v644_v63 = vsel %vm356_vm0, %v625_v56, 0.0  ;;  %v661_v33 = vsel %vm376_vm1, %v624_v55, 0.0  ;;  %v3452_v51 = vld [vmem:[%s3844_s5] sm:$0xff]  }
 0x1f7   : > { %v663_v1 = vsel %vm376_vm1, %v626_v28, 0.0  ;;  %v3465_v56 = vld [vmem:[%s3841_s2] ss:$0 sm:$0xff] }
 0x1f8   : > { %v643_v60 = vadd.f32 %v642_v26, %v641_v19  ;;  %v660_v61 = vadd.f32 %v659_v59, %v658_v58 }
 0x1fa   : > { %v645_v31 = vadd.f32 %v644_v63, %v643_v60  ;;  %v662_v0 = vadd.f32 %v661_v33, %v660_v61 }
 0x1fc   : > { %v664_v2 = vadd.f32 %v663_v1, %v662_v0  ;;  %v667_v6 = vsel %vm356_vm0, %v645_v31, 0.0 }
 0x1fe   : > { %v668_v9 = vsel %vm376_vm1, %v664_v2, 0.0 }
 0x1ff   : > { %v669_v10 = vadd.f32 %v668_v9, %v667_v6 }
 0x201   : > { %v670_v34 = vrot.slane %v669_v10, 4 }
 0x203   : > { %v671_v12 = vadd.f32 %v670_v34, %v669_v10 }
 0x205   : > { %v672_v13 = vrot.slane %v671_v12, 2 }
 0x207   : > { %v673_v15 = vadd.f32 %v672_v13, %v671_v12 }
 0x209   : > { %v674_v17 = vrot.slane %v673_v15, 1 }
 0x20b   : > { %v675_v21 = vadd.f32 %v674_v17, %v673_v15 }
 0x20d   : > { %2636 = vmatmul.mubr.msk.f32.vlgmr.msra.gmra.mrb[4].mxu1 %vm356_vm0, %v675_v21 }
 0x20e   : > { %2825 = vmatpush3.bf16.msra.mxu1 %v3226_v40  ;;  %2646 = vmatprep.mubr.msk.f32.mxu1 %vm3016_vm2, %v3017_v7  ;;  %v2906_v7 = vld [vmem:[%s3844_s5 + $0x20] sm:$0xff]   ;;  %v2908_v40 = vld [vmem:[%s3844_s5 + $0x28] sm:$0xff]  }
 0x20f   : > { %2826 = vmatprep.subr.bf16.mxu1 %v3015_v3  ;;  %v2907_v3 = vld [vmem:[%s3844_s5 + $0x68] sm:$0xff]  }
 0x210   : > { %2699 = vmatprep.subr.bf16.mxu0 %v2907_v3 }
 0x211   : > { %2700 = vmatpush3.bf16.msra.mxu0 %v2907_v3 }
 0x212   : > { %2828 = vmatpush3.bf16.msra.mxu1 %v3239_v44  ;;  %v2909_v44 = vld [vmem:[%s3844_s5 + $0x70] sm:$0xff]  }
 0x213   : > { %2649 = vmatprep.subr.bf16.mxu1 %v2906_v7  ;;  %2701 = vmatprep.subr.bf16.mxu0 %v2909_v44 }
 0x215   : > { %2702 = vmatpush3.bf16.msra.mxu0 %v2909_v44 }
 0x216   : > { %2703 = vmatprep.subr.bf16.mxu0 %v2911_v47 }
 0x219   : > { %2704 = vmatpush3.bf16.msra.mxu0 %v2911_v47 }
 0x21a   : > { %2713 = vmatprep.subr.bf16.mxu0 %v3446_v50 }
 0x2e0   : > { %v745_v22 = vpop.f32.mrb[4].mxu1 }
 0x2e1   : > { %v749_v36 = vmul.f32 0.0078125, %v745_v22  ;;  %v2637_v37 = vpop.f32.mrb[5].mxu1 }
 0x2e3   : > { %v750_v39 = vadd.f32 1e-05, %v749_v36 }
 0x2e5   : > { %2941 = vrsqrt.f32 %v750_v39 }
 0x2ef   : > { %v2942_v41 = vpop.eup %2941 }
 0x2f0   : > { %2647 = vmatmul.mubr.msk.f32.vlgmr.msra.gmra.mrb[6].mxu1 %vm491_vm3, %v2942_v41 }
 0x2f1   : > { %2650 = vmatpush3.bf16.msra.mxu1 %v2906_v7 }
 0x2f2   : > { %2651 = vmatprep.subr.bf16.mxu1 %v2908_v40 }
 0x2f5   : > { %2652 = vmatpush3.bf16.msra.mxu1 %v2908_v40 }
 0x2f6   : > { %2653 = vmatprep.subr.bf16.mxu1 %v2910_v43 }
 0x2f9   : > { %2654 = vmatpush3.bf16.msra.mxu1 %v2910_v43 }
 0x2fa   : > { %2655 = vmatprep.subr.bf16.mxu1 %v2912_v48 }
 0x2fd   : > { %2656 = vmatpush3.bf16.msra.mxu1 %v2912_v48 }
 0x2fe   : > { %2665 = vmatprep.subr.bf16.mxu1 %v3452_v51 }
 0x3c3   : > { %v821_v11 = vpop.f32.mrb[6].mxu1 }
 0x3c4   : > { %v826_v53 = vmul.f32 %v825_v8, %v821_v11  ;;  %v2648_v54 = vpop.f32.mrb[7].mxu1 }
 0x3c6   : > { %v3460_v55 = vrot.slane %v826_v53, %v567_v4 }
 0x3c8   : > { %v833_v14 = vmul.f32 %v3460_v55, %v3282_v16  ;;  %v834_v24 = vmul.f32 %v3460_v55, %v3294_v25  ;;  %v835_v19 = vmul.f32 %v3460_v55, %v3286_v18  ;;  %v836_v58 = vmul.f32 %v3460_v55, %v3298_v20 }
 0x3c9   : > { %v837_v4 = vmul.f32 %v3460_v55, %v3302_v57  ;;  %v838_v28 = vmul.f32 %v3460_v55, %v3318_v62  ;;  %v839_v26 = vmul.f32 %v3460_v55, %v3322_v29  ;;  %v840_v16 = vmul.f32 %v3460_v55, %v3326_v30 }
 0x3ca   : > { %v3484_v25 = vadd.f32 %v3465_v56, %v833_v14  ;;  %v3487_v18 = vadd.f32 %v3465_v56, %v834_v24  ;;  %v3490_v20 = vadd.f32 %v3465_v56, %v835_v19  ;;  %v3493_v57 = vadd.f32 %v3465_v56, %v836_v58 }
 0x3cb   : > { %v3496_v62 = vadd.f32 %v3465_v56, %v837_v4  ;;  %v3499_v29 = vadd.f32 %v3465_v56, %v838_v28  ;;  %v3502_v30 = vadd.f32 %v3465_v56, %v839_v26  ;;  %v841_v59 = vmul.f32 %v3460_v55, %v3342_v5 }
 0x3cc   : > { %v2330_v60 = vmul.f32 -1.442695, %v3484_v25  ;;  %v2331_v61 = vmul.f32 -1.442695, %v3487_v18  ;;  %v2332_v63 = vmul.f32 -1.442695, %v3490_v20  ;;  %v842_v33 = vmul.f32 %v3460_v55, %v3352_v35 }
 0x3cd   : > { %v2333_v31 = vmul.f32 -1.442695, %v3493_v57  ;;  %v3513_v0 = vadd.f32 %v3465_v56, %v840_v16  ;;  %v2334_v1 = vmul.f32 -1.442695, %v3496_v62  ;;  %v2335_v2 = vmul.f32 -1.442695, %v3499_v29 }
 0x3ce   : > { %2943 = vpow2.f32 %v2330_v60  ;;  %v3518_v5 = vadd.f32 %v3465_v56, %v841_v59  ;;  %v3521_v6 = vadd.f32 %v3465_v56, %v842_v33  ;;  %v843_v35 = vmul.f32 %v3460_v55, %v3356_v38 }
 0x3cf   : > { %2945 = vpow2.f32 %v2331_v61  ;;  %v844_v9 = vmul.f32 %v3460_v55, %v3367_v27  ;;  %v2336_v10 = vmul.f32 -1.442695, %v3502_v30  ;;  %v845_v34 = vmul.f32 %v3460_v55, %v3371_v32 }
 0x3d0   : > { %2947 = vpow2.f32 %v2332_v63  ;;  %v2337_v12 = vmul.f32 -1.442695, %v3513_v0  ;;  %v3532_v13 = vadd.f32 %v3465_v56, %v843_v35  ;;  %v2338_v38 = vmul.f32 -1.442695, %v3518_v5 }
 0x3d1   : > { %2949 = vpow2.f32 %v2333_v31  ;;  %v3535_v15 = vadd.f32 %v3465_v56, %v844_v9  ;;  %v3539_v27 = vadd.f32 %v3465_v56, %v845_v34  ;;  %v2339_v17 = vmul.f32 -1.442695, %v3521_v6 }
 0x3d2   : > { %2951 = vpow2.f32 %v2334_v1  ;;  %v2340_v32 = vmul.f32 -1.442695, %v3532_v13  ;;  %v846_v7 = vmul.f32 %v3460_v55, %v3381_v45  ;;  %v847_v8 = vmul.f32 %v3460_v55, %v3385_v46 }
 0x3d3   : > { %2953 = vpow2.f32 %v2335_v2  ;;  %v2341_v21 = vmul.f32 -1.442695, %v3535_v15  ;;  %v2342_v22 = vmul.f32 -1.442695, %v3539_v27  ;;  %v848_v45 = vmul.f32 %v3460_v55, %v3395_v23 }
 0x3d4   : > { %2955 = vpow2.f32 %v2336_v10  ;;  %v3550_v54 = vadd.f32 %v3465_v56, %v846_v7  ;;  %v3555_v46 = vadd.f32 %v3465_v56, %v847_v8 }
 0x3d5   : > { %2957 = vpow2.f32 %v2337_v12  ;;  %v3559_v60 = vadd.f32 %v3465_v56, %v848_v45 }
 0x3d6   : > { %2959 = vpow2.f32 %v2338_v38  ;;  %v2343_v59 = vmul.f32 -1.442695, %v3550_v54  ;;  %v2344_v1 = vmul.f32 -1.442695, %v3555_v46 }
 0x3d7   : > { %2961 = vpow2.f32 %v2339_v17  ;;  %v2345_v9 = vmul.f32 -1.442695, %v3559_v60 }
 0x3d8   : > { %v2944_v36 = vpop.eup %2943  ;;  %2963 = vpow2.f32 %v2340_v32 }
 0x3d9   : > { %v2946_v37 = vpop.eup %2945  ;;  %v940_v39 = vadd.f32 1.0, %v2944_v36  ;;  %2965 = vpow2.f32 %v2341_v21 }
 0x3da   : > { %v2948_v41 = vpop.eup %2947  ;;  %v941_v42 = vadd.f32 1.0, %v2946_v37  ;;  %2967 = vpow2.f32 %v2342_v22 }
 0x3db   : > { %v2950_v3 = vpop.eup %2949  ;;  %2969 = vrcp.f32 %v940_v39  ;;  %v942_v40 = vadd.f32 1.0, %v2948_v41 }
 0x3dc   : > { %v2952_v44 = vpop.eup %2951  ;;  %2971 = vrcp.f32 %v941_v42  ;;  %v943_v43 = vadd.f32 1.0, %v2950_v3 }
 0x3dd   : > { %v2954_v47 = vpop.eup %2953  ;;  %2973 = vrcp.f32 %v942_v40  ;;  %v944_v48 = vadd.f32 1.0, %v2952_v44 }
 0x3de   : > { %v2956_v11 = vpop.eup %2955  ;;  %v945_v53 = vadd.f32 1.0, %v2954_v47  ;;  %2975 = vrcp.f32 %v943_v43  ;;  %v1078_v43 = vld [vmem:[#allocation2 + $0x1] sm:$0xff] }
 0x3df   : > { %v2958_v14 = vpop.eup %2957  ;;  %2977 = vrcp.f32 %v944_v48  ;;  %v946_v24 = vadd.f32 1.0, %v2956_v11 }
 0x3e0   : > { %v2960_v19 = vpop.eup %2959  ;;  %2979 = vrcp.f32 %v945_v53  ;;  %v947_v58 = vadd.f32 1.0, %v2958_v14 }
 0x3e1   : > { %v2962_v4 = vpop.eup %2961  ;;  %2981 = vrcp.f32 %v946_v24  ;;  %v948_v28 = vadd.f32 1.0, %v2960_v19 }
 0x3e2   : > { %v2964_v26 = vpop.eup %2963  ;;  %v949_v16 = vadd.f32 1.0, %v2962_v4  ;;  %2983 = vrcp.f32 %v947_v58 }
 0x3e3   : > { %v2966_v23 = vpop.eup %2965  ;;  %2985 = vrcp.f32 %v948_v28  ;;  %v950_v55 = vadd.f32 1.0, %v2964_v26 }
 0x3e4   : > { %v2968_v61 = vpop.eup %2967  ;;  %2987 = vrcp.f32 %v949_v16  ;;  %v951_v63 = vadd.f32 1.0, %v2966_v23 }
 0x3e5   : > { %v2970_v33 = vpop.eup %2969  ;;  %2989 = vrcp.f32 %v950_v55  ;;  %v952_v31 = vadd.f32 1.0, %v2968_v61 }
 0x3e6   : > { %v2972_v2 = vpop.eup %2971  ;;  %v1000_v35 = vmul.f32 %v2970_v33, %v3484_v25  ;;  %2991 = vpow2.f32 %v2343_v59 }
 0x3e7   : > { %v2974_v10 = vpop.eup %2973  ;;  %v1001_v56 = vmul.f32 %v2972_v2, %v3487_v18  ;;  %2993 = vrcp.f32 %v951_v63 }
 0x3e8   : > { %v2976_v34 = vpop.eup %2975  ;;  %v1020_v12 = vsel %vm344_vm4, %v1000_v35, 0.0  ;;  %v1002_v38 = vmul.f32 %v2974_v10, %v3490_v20  ;;  %2995 = vrcp.f32 %v952_v31 }
 0x3e9   : > { %v2978_v17 = vpop.eup %2977  ;;  %v1021_v32 = vsel %vm351_vm5, %v1001_v56, 0.0  ;;  %1040 = vst.msk [vmem:[#allocation2 + $0x10] sm:$0xff] %vm356_vm0, %v1020_v12  ;;  %v1003_v25 = vmul.f32 %v2976_v34, %v3493_v57  ;;  %2997 = vpow2.f32 %v2344_v1  ;;  %v2916_v1 = vld [vmem:[%s3844_s5 + $0x8] sm:$0xff]  }
 0x3ea   : > { %v2980_v21 = vpop.eup %2979  ;;  %1041 = vst.msk [vmem:[#allocation2 + $0x18] sm:$0x3] %vm376_vm1, %v1021_v32  ;;  %v1022_v18 = vsel %vm344_vm4, %v1002_v38, 0.0  ;;  %v1004_v22 = vmul.f32 %v2978_v17, %v3496_v62  ;;  %2999 = vpow2.f32 %v2345_v9  ;;  %v2915_v9 = vld [vmem:[%s3844_s5 + $0x88] sm:$0xff]   ;;  %v2918_v38 = vld [vmem:[%s3844_s5 + $0x10] sm:$0xff]  }
 0x3eb   : > { %v2982_v20 = vpop.eup %2981  ;;  %1042 = vst.msk [vmem:[#allocation2 + $0x20] sm:$0xff] %vm356_vm0, %v1022_v18  ;;  %v1005_v36 = vmul.f32 %v2980_v21, %v3499_v29  ;;  %v1023_v37 = vsel %vm351_vm5, %v1003_v25, 0.0  ;;  %v2920_v25 = vld [vmem:[%s3844_s5 + $0x18] sm:$0xff]  }
 0x3ec   : > { %v2984_v39 = vpop.eup %2983  ;;  %v1024_v57 = vsel %vm344_vm4, %v1004_v22, 0.0  ;;  %1043 = vst.msk [vmem:[#allocation2 + $0x28] sm:$0x3] %vm376_vm1, %v1023_v37  ;;  %v1006_v41 = vmul.f32 %v2982_v20, %v3502_v30  ;;  %v2919_v21 = vld [vmem:[%s3844_s5 + $0x98] sm:$0xff]  }
 0x3ed   : > { %v2986_v42 = vpop.eup %2985  ;;  %v1025_v62 = vsel %vm351_vm5, %v1005_v36, 0.0  ;;  %1044 = vst.msk [vmem:[#allocation2 + $0x30] sm:$0xff] %vm356_vm0, %v1024_v57  ;;  %v1007_v7 = vmul.f32 %v2984_v39, %v3513_v0  ;;  %v2921_v57 = vld [vmem:[%s3844_s5 + $0xa0] sm:$0xff]  }
 0x3ee   : > { %v2988_v29 = vpop.eup %2987  ;;  %1045 = vst.msk [vmem:[#allocation2 + $0x38] sm:$0x3] %vm376_vm1, %v1025_v62  ;;  %v1026_v3 = vsel %vm344_vm4, %v1006_v41, 0.0  ;;  %v1008_v40 = vmul.f32 %v2986_v42, %v3518_v5 }
 0x3ef   : > { %v2990_v44 = vpop.eup %2989  ;;  %1046 = vst.msk [vmem:[#allocation2 + $0x40] sm:$0xff] %vm356_vm0, %v1026_v3  ;;  %v1009_v30 = vmul.f32 %v2988_v29, %v3521_v6  ;;  %v1027_v47 = vsel %vm351_vm5, %v1007_v7, 0.0 }
 0x3f0   : > { %v2992_v48 = vpop.eup %2991  ;;  %v3596_v8 = vld [vmem:[#allocation2 + $0x10] sm:$0xff]  ;;  %v1028_v0 = vsel %vm344_vm4, %v1008_v40, 0.0  ;;  %1047 = vst.msk [vmem:[#allocation2 + $0x48] sm:$0x3] %vm376_vm1, %v1027_v47  ;;  %v1010_v11 = vmul.f32 %v2990_v44, %v3532_v13  ;;  %v2924_v44 = vld [vmem:[%s3844_s5 + $0x48] sm:$0xff]  }
 0x3f1   : > { %v2994_v5 = vpop.eup %2993  ;;  %v3602_v53 = vld [vmem:[#allocation2 + $0x11] sm:$0xff]  ;;  %v1029_v45 = vsel %vm351_vm5, %v1009_v30, 0.0  ;;  %1048 = vst.msk [vmem:[#allocation2 + $0x50] sm:$0xff] %vm356_vm0, %v1028_v0  ;;  %v953_v6 = vadd.f32 1.0, %v2992_v48  ;;  %v2923_v47 = vld [vmem:[%s3844_s5 + $0xa8] sm:$0xff]  }
 0x3f2   : > { %v2996_v14 = vpop.eup %2995  ;;  %v1086_v24 = vpack.c.bf16 %v3602_v53, %v1078_v43  ;;  %v3608_v19 = vld [vmem:[#allocation2 + $0x20] sm:$0xff]  ;;  %1049 = vst.msk [vmem:[#allocation2 + $0x58] sm:$0x3] %vm376_vm1, %v1029_v45  ;;  %v1030_v58 = vsel %vm344_vm4, %v1010_v11, 0.0  ;;  %v1011_v13 = vmul.f32 %v2994_v5, %v3535_v15  ;;  %v2925_v0 = vld [vmem:[%s3844_s5 + $0xb0] sm:$0xff]  }
 0x3f3   : > { %v2998_v4 = vpop.eup %2997  ;;  %v1440_v28 = vpack.c.bf16 %v3608_v19, %v3596_v8  ;;  %v3616_v26 = vld [vmem:[#allocation2 + $0x21] sm:$0xff]  ;;  %1050 = vst.msk [vmem:[#allocation2 + $0x60] sm:$0xff] %vm356_vm0, %v1030_v58  ;;  %3001 = vrcp.f32 %v953_v6  ;;  %v1012_v16 = vmul.f32 %v2996_v14, %v3539_v27  ;;  %v1302_v5 = vld [vmem:[#allocation2 + $0x12] sm:$0xff] }
 0x3f4   : > { %v3000_v59 = vpop.eup %2999  ;;  %2657 = vmatprep.mubr.msk.bf16.mxu1 %vm356_vm0, %v1086_v24  ;;  %v3621_v23 = vld [vmem:[#allocation2 + $0x30] sm:$0xff]  ;;  %v1031_v55 = vsel %vm351_vm5, %v1011_v13, 0.0  ;;  %v954_v15 = vadd.f32 1.0, %v2998_v4  ;;  %v1570_v3 = vpack.c.bf16 %v3616_v26, %v3602_v53  ;;  %v1301_v11 = vld [vmem:[#allocation2 + $0x2] sm:$0xff]  ;;  %v2928_v6 = vld [vmem:[%s3844_s5 + $0x58] sm:$0xff]  }
 0x3f5   : > { %2705 = vmatprep.mubr.msk.bf16.mxu0 %vm356_vm0, %v1440_v28  ;;  %v3626_v61 = vld [vmem:[#allocation2 + $0x31] sm:$0xff]  ;;  %v1032_v63 = vsel %vm344_vm4, %v1012_v16, 0.0  ;;  %1051 = vst.msk [vmem:[#allocation2 + $0x68] sm:$0x3] %vm376_vm1, %v1031_v55  ;;  %v955_v33 = vadd.f32 1.0, %v3000_v59  ;;  %v3710_v40 = vpack.c.bf16 %v3621_v23, %v3608_v19  ;;  %v1693_v14 = vld [vmem:[#allocation2 + $0x22] sm:$0xff]  ;;  %v1309_v24 = vpack.c.bf16 %v1302_v5, %v1301_v11 }
 0x3f6   : > { %v3633_v27 = vpack.c.bf16 %v3626_v61, %v3616_v26  ;;  %v3635_v31 = vld [vmem:[#allocation2 + $0x40] sm:$0xff]  ;;  %1052 = vst.msk [vmem:[#allocation2 + $0x70] sm:$0xff] %vm356_vm0, %v1032_v63  ;;  %3003 = vrcp.f32 %v954_v15  ;;  %v2927_v58 = vld [vmem:[%s3844_s5 + $0xb8] sm:$0xff]   ;;  %v1700_v13 = vpack.c.bf16 %v1693_v14, %v1302_v5 }
 0x3f7   : > { %v1441_v2 = vpack.c.bf16 %v3635_v31, %v3621_v23  ;;  %v3643_v35 = vld [vmem:[#allocation2 + $0x41] sm:$0xff]  ;;  %3005 = vrcp.f32 %v955_v33  ;;  %v1304_v4 = vld [vmem:[#allocation2 + $0x32] sm:$0xff] }
 0x3f8   : > { %2658 = vmatmul.mubr.msk.bf16.vlgmr.msra.gmra.mrb[8].mxu1 %vm356_vm0, %v3633_v27  ;;  %v1436_v10 = vld [vmem:[#allocation2 + $0x50] sm:$0xff]  ;;  %v1571_v30 = vpack.c.bf16 %v3643_v35, %v3626_v61  ;;  %v1695_v28 = vld [vmem:[#allocation2 + $0x42] sm:$0xff]  ;;  %v1310_v59 = vpack.c.bf16 %v1304_v4, %v1693_v14 }
 0x3f9   : > { %2706 = vmatmul.mubr.msk.bf16.vlgmr.msra.gmra.mrb[0].mxu0 %vm356_vm0, %v1441_v2  ;;  %v3651_v56 = vld [vmem:[#allocation2 + $0x51] sm:$0xff]  ;;  %2666 = vmatpush3.bf16.msra.mxu1 %v3452_v51  ;;  %v3716_v43 = vpack.c.bf16 %v1436_v10, %v3635_v31  ;;  %v2929_v16 = vld [vmem:[%s3844_s5 + $0xc0] sm:$0xff]   ;;  %v1701_v15 = vpack.c.bf16 %v1695_v28, %v1304_v4  ;;  %v2930_v61 = vld [vmem:[%s3844_s5 + $0xc8] sm:$0xff]  }
 0x3fa   : > { %2714 = vmatpush3.bf16.msra.mxu0 %v3446_v50  ;;  %v3657_v34 = vpack.c.bf16 %v3651_v56, %v3643_v35  ;;  %v3659_v12 = vld [vmem:[#allocation2 + $0x60] sm:$0xff]  ;;  %2667 = vmatprep.subr.bf16.mxu1 %v2916_v1  ;;  %v2917_v51 = vld [vmem:[%s3844_s5 + $0x90] sm:$0xff]  }
 0x3fb   : > { %v1442_v17 = vpack.c.bf16 %v3659_v12, %v1436_v10  ;;  %2715 = vmatprep.subr.bf16.mxu0 %v2915_v9  ;;  %v1306_v26 = vld [vmem:[#allocation2 + $0x52] sm:$0xff]  ;;  %v2933_v10 = vld [vmem:[%s3844_s5 + $0xe0] sm:$0xff]  }
 0x3fc   : > { %2661 = vmatprep.mubr.msk.bf16.mxu1 %vm356_vm0, %v3657_v34  ;;  %v1084_v41 = vld [vmem:[#allocation2 + $0x61] sm:$0xff]  ;;  %v3753_v23 = vpack.c.bf16 %v1306_v26, %v1695_v28  ;;  %v2931_v31 = vld [vmem:[%s3844_s5 + $0xd0] sm:$0xff]  }
 0x3fd   : > { %v3002_v50 = vpop.eup %3001  ;;  %2709 = vmatprep.mubr.msk.bf16.mxu0 %vm356_vm0, %v1442_v17  ;;  %2668 = vmatpush3.bf16.msra.mxu1 %v2916_v1  ;;  %v1438_v62 = vld [vmem:[#allocation2 + $0x70] sm:$0xff]  ;;  %v1572_v48 = vpack.c.bf16 %v1084_v41, %v3651_v56  ;;  %v1697_v55 = vld [vmem:[#allocation2 + $0x62] sm:$0xff] }
 0x3fe   : > { %2716 = vmatpush3.bf16.msra.mxu0 %v2915_v9  ;;  %v1013_v32 = vmul.f32 %v3002_v50, %v3550_v54  ;;  %2669 = vmatprep.subr.bf16.mxu1 %v2918_v38  ;;  %v2922_v54 = vld [vmem:[%s3844_s5 + $0x40] sm:$0xff]   ;;  %v1069_v53 = vpack.c.bf16 %v1438_v62, %v3659_v12  ;;  %v1702_v63 = vpack.c.bf16 %v1697_v55, %v1306_v26  ;;  %v2932_v9 = vld [vmem:[%s3844_s5 + $0xd8] sm:$0xff]   ;;  %v2934_v56 = vld [vmem:[%s3844_s5 + $0xe8] sm:$0xff]  }
 0x3ff   : > { %2717 = vmatprep.subr.bf16.mxu0 %v2917_v51  ;;  %v2935_v12 = vld [vmem:[%s3844_s5 + $0xf0] sm:$0xff]   ;;  %v2937_v50 = vld [vmem:[%s3844_s5 + $0x100] sm:$0xff]  }
 0x400   : > { %v3004_v18 = vpop.eup %3003  ;;  %v1033_v22 = vsel %vm351_vm5, %v1013_v32, 0.0  ;;  %v2938_v32 = vld [vmem:[%s3844_s5 + $0x108] sm:$0xff]  }
 0x401   : > { %v3006_v20 = vpop.eup %3005  ;;  %1053 = vst.msk [vmem:[#allocation2 + $0x78] sm:$0x3] %vm376_vm1, %v1033_v22  ;;  %v1014_v36 = vmul.f32 %v3004_v18, %v3555_v46  ;;  %2670 = vmatpush3.bf16.msra.mxu1 %v2918_v38  ;;  %v1830_v38 = vld [vmem:[#allocation2 + $0x90] sm:$0xff]  ;;  %v2940_v18 = vld [vmem:[%s3844_s5 + $0x118] sm:$0xff]  }
 0x402   : > { %2718 = vmatpush3.bf16.msra.mxu0 %v2917_v51  ;;  %2671 = vmatprep.subr.bf16.mxu1 %v2920_v25  ;;  %v1015_v37 = vmul.f32 %v3006_v20, %v3559_v60  ;;  %v1058_v60 = vld [vmem:[#allocation2] sm:$0xff]  ;;  %v2936_v51 = vld [vmem:[%s3844_s5 + $0xf8] sm:$0xff]  }
 0x403   : > { %v1034_v39 = vsel %vm344_vm4, %v1014_v36, 0.0  ;;  %2719 = vmatprep.subr.bf16.mxu0 %v2919_v21  ;;  %v1066_v7 = vpack.c.bf16 %v3596_v8, %v1058_v60  ;;  %v2926_v8 = vld [vmem:[%s3844_s5 + $0x50] sm:$0xff]  }
 0x404   : > { %1054 = vst.msk [vmem:[#allocation2 + $0x80] sm:$0xff] %vm356_vm0, %v1034_v39  ;;  %v1035_v46 = vsel %vm351_vm5, %v1015_v37, 0.0 }
 0x405   : > { %2672 = vmatpush3.bf16.msra.mxu1 %v2920_v25  ;;  %1055 = vst.msk [vmem:[#allocation2 + $0x88] sm:$0x3] %vm376_vm1, %v1035_v46  ;;  %v1960_v25 = vld [vmem:[#allocation2 + $0x91] sm:$0xff] }
 0x406   : > { %2720 = vmatpush3.bf16.msra.mxu0 %v2919_v21  ;;  %2681 = vmatprep.subr.bf16.mxu1 %v2922_v54 }
 0x407   : > { %2729 = vmatprep.subr.bf16.mxu0 %v2921_v57 }
 0x408   : > { %v1085_v49 = vld [vmem:[#allocation2 + $0x71] sm:$0xff] }
 0x409   : > { %v3695_v42 = vpack.c.bf16 %v1085_v49, %v1084_v41  ;;  %v1308_v33 = vld [vmem:[#allocation2 + $0x72] sm:$0xff] }
 0x40a   : > { %v1312_v1 = vpack.c.bf16 %v1308_v33, %v1697_v55 }
 0x40b   : > { %2662 = vmatmul.mubr.msk.bf16.gmra.mrb[12].mxu1 %vm356_vm0, %v3695_v42  ;;  %v3700_v29 = vld [vmem:[#allocation2 + $0x80] sm:$0xff] }
 0x40c   : > { %v1443_v52 = vpack.c.bf16 %v3700_v29, %v1438_v62  ;;  %2673 = vmatprep.mubr.msk.bf16.mxu1 %vm356_vm0, %v1066_v7  ;;  %v3737_v45 = vld [vmem:[#allocation2 + $0x81] sm:$0xff]  ;;  %v1834_v17 = vpack.c.bf16 %v1830_v38, %v3700_v29  ;;  %v2485_v7 = vld [vmem:[%s314_s13] ss:$0 sm:$0xff] }
 0x40d   : > { %v1573_v19 = vpack.c.bf16 %v3737_v45, %v1085_v49  ;;  %v1699_v2 = vld [vmem:[#allocation2 + $0x82] sm:$0xff]  ;;  %v1964_v21 = vpack.c.bf16 %v1960_v25, %v3737_v45  ;;  %v2484_v49 = vld [vmem:[%s3845_s6] ss:$0 sm:$0xff] }
 0x40e   : > { %2710 = vmatmul.mubr.msk.bf16.gmra.mrb[4].mxu0 %vm356_vm0, %v1443_v52  ;;  %v1703_v35 = vpack.c.bf16 %v1699_v2, %v1308_v33 }
 0x40f   : > { %2721 = vmatprep.mubr.msk.bf16.mxu0 %vm356_vm0, %v1570_v3 }
 0x413   : > { %2674 = vmatmul.mubr.msk.bf16.vlgmr.msra.gmra.mrb[8].mxu1 %vm356_vm0, %v3710_v40 }
 0x414   : > { %2677 = vmatprep.mubr.msk.bf16.mxu1 %vm356_vm0, %v3716_v43  ;;  %2682 = vmatpush3.bf16.msra.mxu1 %v2922_v54 }
 0x415   : > { %2683 = vmatprep.subr.bf16.mxu1 %v2924_v44 }
 0x416   : > { %2722 = vmatmul.mubr.msk.bf16.vlgmr.msra.gmra.mrb[0].mxu0 %vm356_vm0, %v1571_v30 }
 0x417   : > { %2730 = vmatpush3.bf16.msra.mxu0 %v2921_v57  ;;  %2725 = vmatprep.mubr.msk.bf16.mxu0 %vm356_vm0, %v1572_v48 }
 0x418   : > { %2731 = vmatprep.subr.bf16.mxu0 %v2923_v47  ;;  %2684 = vmatpush3.bf16.msra.mxu1 %v2924_v44 }
 0x419   : > { %2685 = vmatprep.subr.bf16.mxu1 %v2926_v8 }
 0x41b   : > { %2732 = vmatpush3.bf16.msra.mxu0 %v2923_v47  ;;  %2678 = vmatmul.mubr.msk.bf16.gmra.mrb[12].mxu1 %vm356_vm0, %v1069_v53 }
 0x41c   : > { %2733 = vmatprep.subr.bf16.mxu0 %v2925_v0  ;;  %2686 = vmatpush3.bf16.msra.mxu1 %v2926_v8 }
 0x41d   : > { %2689 = vmatprep.mubr.msk.bf16.mxu1 %vm356_vm0, %v1309_v24  ;;  %2687 = vmatprep.subr.bf16.mxu1 %v2928_v6 }
 0x41e   : > { %2726 = vmatmul.mubr.msk.bf16.gmra.mrb[4].mxu0 %vm356_vm0, %v1573_v19 }
 0x41f   : > { %2734 = vmatpush3.bf16.msra.mxu0 %v2925_v0  ;;  %2737 = vmatprep.mubr.msk.bf16.mxu0 %vm356_vm0, %v1700_v13 }
 0x420   : > { %2735 = vmatprep.subr.bf16.mxu0 %v2927_v58  ;;  %2688 = vmatpush3.bf16.msra.mxu1 %v2928_v6 }
 0x423   : > { %2736 = vmatpush3.bf16.msra.mxu0 %v2927_v58  ;;  %2690 = vmatmul.mubr.msk.bf16.vlgmr.msra.gmra.mrb[8].mxu1 %vm356_vm0, %v1310_v59 }
 0x424   : > { %2745 = vmatprep.subr.bf16.mxu0 %v2929_v16  ;;  %2693 = vmatprep.mubr.msk.bf16.mxu1 %vm356_vm0, %v3753_v23 }
 0x426   : > { %2738 = vmatmul.mubr.msk.bf16.vlgmr.msra.gmra.mrb[0].mxu0 %vm356_vm0, %v1701_v15 }
 0x427   : > { %2746 = vmatpush3.bf16.msra.mxu0 %v2929_v16  ;;  %2741 = vmatprep.mubr.msk.bf16.mxu0 %vm356_vm0, %v1702_v63 }
 0x428   : > { %2747 = vmatprep.subr.bf16.mxu0 %v2930_v61 }
 0x42b   : > { %2748 = vmatpush3.bf16.msra.mxu0 %v2930_v61  ;;  %2694 = vmatmul.mubr.msk.bf16.gmra.mrb[12].mxu1 %vm356_vm0, %v1312_v1 }
 0x42c   : > { %2749 = vmatprep.subr.bf16.mxu0 %v2931_v31 }
 0x42e   : > { %2742 = vmatmul.mubr.msk.bf16.gmra.mrb[4].mxu0 %vm356_vm0, %v1703_v35 }
 0x42f   : > { %2750 = vmatpush3.bf16.msra.mxu0 %v2931_v31  ;;  %2753 = vmatprep.mubr.msk.bf16.mxu0 %vm356_vm0, %v3710_v40 }
 0x430   : > { %2751 = vmatprep.subr.bf16.mxu0 %v2932_v9 }
 0x433   : > { %2752 = vmatpush3.bf16.msra.mxu0 %v2932_v9 }
 0x434   : > { %2761 = vmatprep.subr.bf16.mxu0 %v2933_v10 }
 0x436   : > { %2754 = vmatmul.mubr.msk.bf16.vlgmr.msra.gmra.mrb[0].mxu0 %vm356_vm0, %v3716_v43 }
 0x437   : > { %2762 = vmatpush3.bf16.msra.mxu0 %v2933_v10  ;;  %2757 = vmatprep.mubr.msk.bf16.mxu0 %vm356_vm0, %v1069_v53 }
 0x438   : > { %2763 = vmatprep.subr.bf16.mxu0 %v2934_v56 }
 0x43b   : > { %2764 = vmatpush3.bf16.msra.mxu0 %v2934_v56 }
 0x43c   : > { %2765 = vmatprep.subr.bf16.mxu0 %v2935_v12 }
 0x43e   : > { %2758 = vmatmul.mubr.msk.bf16.gmra.mrb[4].mxu0 %vm356_vm0, %v1834_v17 }
 0x43f   : > { %2766 = vmatpush3.bf16.msra.mxu0 %v2935_v12  ;;  %2769 = vmatprep.mubr.msk.bf16.mxu0 %vm356_vm0, %v3633_v27  ;;  %v2939_v27 = vld [vmem:[%s3844_s5 + $0x110] sm:$0xff]  }
 0x440   : > { %2767 = vmatprep.subr.bf16.mxu0 %v2936_v51 }
 0x443   : > { %2768 = vmatpush3.bf16.msra.mxu0 %v2936_v51 }
 0x444   : > { %2777 = vmatprep.subr.bf16.mxu0 %v2937_v50 }
 0x446   : > { %2770 = vmatmul.mubr.msk.bf16.vlgmr.msra.gmra.mrb[0].mxu0 %vm356_vm0, %v3657_v34  ;;  %v2090_v34 = vld [vmem:[#allocation2 + $0x92] sm:$0xff] }
 0x447   : > { %2778 = vmatpush3.bf16.msra.mxu0 %v2937_v50  ;;  %2773 = vmatprep.mubr.msk.bf16.mxu0 %vm356_vm0, %v3695_v42  ;;  %v2094_v22 = vpack.c.bf16 %v2090_v34, %v1699_v2 }
 0x448   : > { %2779 = vmatprep.subr.bf16.mxu0 %v2938_v32 }
 0x44b   : > { %2780 = vmatpush3.bf16.msra.mxu0 %v2938_v32 }
 0x44c   : > { %2781 = vmatprep.subr.bf16.mxu0 %v2939_v27 }
 0x44e   : > { %2774 = vmatmul.mubr.msk.bf16.gmra.mrb[4].mxu0 %vm356_vm0, %v1964_v21 }
 0x44f   : > { %2782 = vmatpush3.bf16.msra.mxu0 %v2939_v27  ;;  %2785 = vmatprep.mubr.msk.bf16.mxu0 %vm356_vm0, %v1310_v59 }
 0x450   : > { %2783 = vmatprep.subr.bf16.mxu0 %v2940_v18 }
 0x453   : > { %2784 = vmatpush3.bf16.msra.mxu0 %v2940_v18 }
 0x456   : > { %2786 = vmatmul.mubr.msk.bf16.vlgmr.msra.gmra.mrb[0].mxu0 %vm356_vm0, %v3753_v23 }
 0x457   : > { %2789 = vmatprep.mubr.msk.bf16.mxu0 %vm356_vm0, %v1312_v1 }
 0x45e   : > { %2790 = vmatmul.mubr.msk.bf16.gmra.mrb[4].mxu0 %vm356_vm0, %v2094_v22 }
 0x4f6   : > { %v2691_v20 = vpop.f32.mrb[8].mxu1 }
 0x4f7   : > { %v1392_v36 = vpop.f32.mrb[9].mxu1 }
 0x4f8   : > { %v2692_v54 = vpop.f32.mrb[10].mxu1 }
 0x4f9   : > { %v1395_v37 = vpop.f32.mrb[11].mxu1 }
 0x4fe   : > { %v2695_v39 = vpop.f32.mrb[12].mxu1 }
 0x4ff   : > { %v1408_v57 = vpop.f32.mrb[13].mxu1 }
 0x500   : > { %v2696_v46 = vpop.f32.mrb[14].mxu1 }
 0x501   : > { %v1411_v41 = vpop.f32.mrb[15].mxu1 }
 0x529   : > { %v2787_v60 = vpop.f32.mrb[0].mxu0 }
 0x52a   : > { %v2829_v42 = vadd.f32 %v2787_v60, %v2691_v20  ;;  %v2174_v62 = vpop.f32.mrb[1].mxu0 }
 0x52b   : > { %v2830_v29 = vadd.f32 %v2174_v62, %v1392_v36  ;;  %v2788_v52 = vpop.f32.mrb[2].mxu0 }
 0x52c   : > { %v2222_v3 = vadd.f32 %v2829_v42, %v2484_v49  ;;  %v2831_v40 = vadd.f32 %v2788_v52, %v2692_v54  ;;  %v2177_v44 = vpop.f32.mrb[3].mxu0 }
 0x52d   : > { %v2220_v43 = vadd.f32 %v2830_v29, %v2484_v49  ;;  %v2832_v30 = vadd.f32 %v2177_v44, %v1395_v37 }
 0x52e   : > { %v2237_v47 = vadd.f32 %v2485_v7, %v2222_v3  ;;  %v2223_v48 = vadd.f32 %v2831_v40, %v2484_v49 }
 0x52f   : > { %v2235_v8 = vadd.f32 %v2485_v7, %v2220_v43  ;;  %v2221_v0 = vadd.f32 %v2832_v30, %v2484_v49 }
 0x530   : > { %2245 = vst [vmem:[%s3826_s19 + $0x10] sm:$0xff] %v2237_v47  ;;  %v2238_v11 = vadd.f32 %v2485_v7, %v2223_v48 }
 0x531   : > { %2243 = vst [vmem:[%s3826_s19] sm:$0xff] %v2235_v8  ;;  %v2236_v5 = vadd.f32 %v2485_v7, %v2221_v0  ;;  %v2791_v53 = vpop.f32.mrb[4].mxu0 }
 0x532   : > { %2246 = vst [vmem:[%s3826_s19 + $0x18] sm:$0xff] %v2238_v11  ;;  %v2833_v45 = vadd.f32 %v2791_v53, %v2695_v39  ;;  %v2190_v6 = vpop.f32.mrb[5].mxu0 }
 0x533   : > { %2244 = vst [vmem:[%s3826_s19 + $0x8] sm:$0xff] %v2236_v5  ;;  %v2834_v14 = vadd.f32 %v2190_v6, %v1408_v57  ;;  %v2792_v24 = vpop.f32.mrb[6].mxu0 }
 0x534   : > { %v2226_v19 = vadd.f32 %v2833_v45, %v2484_v49  ;;  %v2835_v58 = vadd.f32 %v2792_v24, %v2696_v46  ;;  %v2193_v13 = vpop.f32.mrb[7].mxu0 }
 0x535   : > { %v2224_v4 = vadd.f32 %v2834_v14, %v2484_v49  ;;  %v2836_v28 = vadd.f32 %v2193_v13, %v1411_v41 }
 0x536   : > { %v2241_v26 = vadd.f32 %v2485_v7, %v2226_v19  ;;  %v2227_v16 = vadd.f32 %v2835_v58, %v2484_v49 }
 0x537   : > { %v2239_v59 = vadd.f32 %v2485_v7, %v2224_v4  ;;  %v2225_v23 = vadd.f32 %v2836_v28, %v2484_v49 }
 0x538   : > { %2249 = vst [vmem:[%s3826_s19 + $0x30] sm:$0xff] %v2241_v26  ;;  %v2242_v55 = vadd.f32 %v2485_v7, %v2227_v16 }
 0x539   : > { %2247 = vst [vmem:[%s3826_s19 + $0x20] sm:$0xff] %v2239_v59  ;;  %v2240_v15 = vadd.f32 %v2485_v7, %v2225_v23 }
 0x53a   : > { %2250 = vst [vmem:[%s3826_s19 + $0x38] sm:$0xff] %v2242_v55 }
 0x53b   : > { %2248 = vst [vmem:[%s3826_s19 + $0x28] sm:$0xff] %v2240_v15 }
 0x53c PF: > { %s18_s27 = sadd.s32 1, %s3013_s27  }
 0x53d   : > { %p15_p4 = scmp.ge.s32.totalorder %s18_s27, 4  }
 0x53f   :  { %17 = sbr.rel (!%p15_p4) target bundleno = 1 (0x1), region = 95 }

// kernel: _lambda_.16
= control target key start
LH: loop header
LB: loop body
LE: loop exit
PB: predicated region body
PF: predicated region fallthrough
CT: control target
= control target key end

     0   :  { %s922_s15 = smov 0   ;;  %s1067_s0 = inlined_call_operand.vmem [shape: f32[2,64,384], index: 0, kind: input, shape index: {}]   ;;  %s1068_s1 = inlined_call_operand.vmem [shape: f32[2,64,128], index: 1, kind: input, shape index: {}]   ;;  %s1069_s2 = inlined_call_operand.vmem [shape: bf16[128,128], index: 2, kind: input, shape index: {}]   ;;  %s1070_s3 = inlined_call_operand.vmem [shape: f32[1,128], index: 3, kind: input, shape index: {}]   ;;  %s1071_s4 = inlined_call_operand.vmem [shape: f32[2,64,128], index: 4, kind: output, shape index: {}]  }
   0x1 LB: > { %s729_s16 = sadd.s32 4294967295, %s895_s15   ;;  %p733_p0 = scmp.ge.s32.totalorder %s895_s15, 1  ;;  %s895_s15 = sphi %s922_s15, %s14_s15  }
   0x2   : > { %p172_p1 = scmp.lt.s32.totalorder %s895_s15, 3 }
   0x4   : > { %p173_p2 = pnand %p733_p0, %p172_p1 }
   0x5   : > { %p203_p3 = scmp.lt.s32.totalorder (!%p173_p2), %s729_s16, 1  ;;  %vm328_vm0 = vcmask (!%p173_p2), 523264  }
   0x6   : > { %176 = sbr.rel (%p173_p2) target bundleno = 1035 (0x40b), region = 36 }
   0xd   : > { %s1073_s16 = smov (!%p203_p3, %s729_s16), 1 }
   0xe   : > { %s840_s17 = smul.u32 192, %s1073_s16  ;;  %s754_s11 = sshll.u32 %s1073_s16, 6 }
   0xf   : > { %s1038_s14 = scalar_lea.vmem %s1068_s1, %s754_s11 }
  0x10   : > { %s936_s20 = scalar_lea.vmem %s1067_s0, %s840_s17 }
  0x11   : > { %v239_v0 = vld [vmem:[%s936_s20 + $0x8] sm:$0xff]  ;;  %v240_v1 = vld [vmem:[%s936_s20 + $0x20] sm:$0xff]  ;;  %v241_v2 = vld [vmem:[%s936_s20 + $0x38] sm:$0xff] }
  0x12   : > { %v247_v3 = vpack.c.bf16 %v240_v1, %v239_v0  ;;  %v242_v4 = vld [vmem:[%s936_s20 + $0x50] sm:$0xff]  ;;  %v219_v6 = vld [vmem:[%s936_s20] sm:$0xff]  ;;  %v220_v7 = vld [vmem:[%s936_s20 + $0x18] sm:$0xff] }
  0x13   : > { %v248_v5 = vpack.c.bf16 %v242_v4, %v241_v2  ;;  %v227_v8 = vmul.f32 0.088388346, %v219_v6  ;;  %v228_v9 = vmul.f32 0.088388346, %v220_v7  ;;  %v243_v10 = vld [vmem:[%s936_s20 + $0x68] sm:$0xff]  ;;  %v244_v11 = vld [vmem:[%s936_s20 + $0x80] sm:$0xff] }
  0x14   : > { %784 = vmatprep.subr.bf16.mxu0 %v247_v3  ;;  %v249_v13 = vpack.c.bf16 %v244_v11, %v243_v10  ;;  %v245_v14 = vld [vmem:[%s936_s20 + $0x98] sm:$0xff]  ;;  %v246_v15 = vld [vmem:[%s936_s20 + $0xb0] sm:$0xff]  ;;  %v222_v18 = vld [vmem:[%s936_s20 + $0x48] sm:$0xff] }
  0x15   : > { %785 = vmatpush3.bf16.xpose.msra.mxu0 %v247_v3  ;;  %v235_v12 = vpack.c.bf16 %v228_v9, %v227_v8  ;;  %v250_v16 = vpack.c.bf16 %v246_v15, %v245_v14  ;;  %v221_v17 = vld [vmem:[%s936_s20 + $0x30] sm:$0xff]  ;;  %v223_v19 = vld [vmem:[%s936_s20 + $0x60] sm:$0xff]  ;;  %v224_v20 = vld [vmem:[%s936_s20 + $0x78] sm:$0xff]  ;;  %v230_v22 = vmul.f32 0.088388346, %v222_v18 }
  0x16   : > { %786 = vmatprep.subr.bf16.mxu0 %v248_v5  ;;  %v229_v21 = vmul.f32 0.088388346, %v221_v17  ;;  %v231_v23 = vmul.f32 0.088388346, %v223_v19  ;;  %v232_v24 = vmul.f32 0.088388346, %v224_v20 }
  0x17   : > { %792 = vmatprep.mubr.bf16.mxu0 %v235_v12  ;;  %v225_v27 = vld [vmem:[%s936_s20 + $0x90] sm:$0xff]  ;;  %v226_v28 = vld [vmem:[%s936_s20 + $0xa8] sm:$0xff] }
  0x18   : > { %v236_v25 = vpack.c.bf16 %v230_v22, %v229_v21  ;;  %v237_v26 = vpack.c.bf16 %v232_v24, %v231_v23  ;;  %v233_v29 = vmul.f32 0.088388346, %v225_v27  ;;  %v234_v30 = vmul.f32 0.088388346, %v226_v28  ;;  %v251_v24 = vld [vmem:[%s936_s20 + $0x10] sm:$0xff]  ;;  %v253_v27 = vld [vmem:[%s936_s20 + $0x40] sm:$0xff] }
  0x19   : > { %v254_v28 = vld [vmem:[%s936_s20 + $0x58] sm:$0xff] }
  0x1a   : > { %v238_v31 = vpack.c.bf16 %v234_v30, %v233_v29  ;;  %v260_v29 = vpack.c.bf16 %v254_v28, %v253_v27  ;;  %v255_v30 = vld [vmem:[%s936_s20 + $0x70] sm:$0xff]  ;;  %v641_v28 = vld [vmem:[%s1038_s14 + $0x18] sm:$0xff] }
  0x1d   : > { %787 = vmatpush3.bf16.xpose.msra.mxu0 %v248_v5 }
  0x1e   : > { %788 = vmatprep.subr.bf16.mxu0 %v249_v13 }
  0x25   : > { %789 = vmatpush3.bf16.xpose.msra.mxu0 %v249_v13 }
  0x26   : > { %790 = vmatprep.subr.bf16.mxu0 %v250_v16 }
  0x2d   : > { %791 = vmatpush3.bf16.xpose.msra.mxu0 %v250_v16 }
  0x34   : > { %793 = vmatmul.mubr.bf16.vlgmr.msra.gmra.mrb[0].mxu0 %v236_v25  ;;  %v252_v25 = vld [vmem:[%s936_s20 + $0x28] sm:$0xff] }
  0x35   : > { %796 = vmatprep.mubr.bf16.mxu0 %v237_v26  ;;  %v259_v26 = vpack.c.bf16 %v252_v25, %v251_v24  ;;  %v638_v25 = vld [vmem:[%s1038_s14] sm:$0xff] }
  0x37   : > { %800 = vmatprep.subr.bf16.mxu1 %v259_v26 }
  0x38   : > { %801 = vmatpush3.bf16.msra.mxu1 %v259_v26 }
  0x39   : > { %802 = vmatprep.subr.bf16.mxu1 %v260_v29 }
  0x3c   : > { %797 = vmatmul.mubr.bf16.gmra.mrb[4].mxu0 %v238_v31  ;;  %803 = vmatpush3.bf16.msra.mxu1 %v260_v29  ;;  %v256_v31 = vld [vmem:[%s936_s20 + $0x88] sm:$0xff] }
 0x107   : > { %v794_v32 = vpop.f32.mrb[0].mxu0 }
 0x108   : > { %v297_v33 = vpop.f32.mrb[1].mxu0  ;;  %v335_v34 = vsel %vm328_vm0, %v794_v32, -inf }
 0x109   : > { %336 = vmax.xlane.f32.xlu1 %v335_v34  ;;  %v795_v35 = vpop.f32.mrb[2].mxu0  ;;  %v329_v36 = vsel %vm328_vm0, %v297_v33, -inf  ;;  %v258_v34 = vld [vmem:[%s936_s20 + $0xb8] sm:$0xff] }
 0x10a   : > { %330 = vmax.xlane.f32.xlu0 %v329_v36  ;;  %v300_v37 = vpop.f32.mrb[3].mxu0  ;;  %v338_v38 = vsel %vm328_vm0, %v795_v35, -inf  ;;  %v849_v36 = vld [vmem:[%s1069_s2] sm:$0xff]  }
 0x10b   : > { %v332_v39 = vsel %vm328_vm0, %v300_v37, -inf }
 0x10d   : > { %339 = vmax.xlane.f32.xlu1 %v338_v38 }
 0x10e   : > { %333 = vmax.xlane.f32.xlu0 %v332_v39 }
 0x10f   : > { %v798_v40 = vpop.f32.mrb[4].mxu0 }
 0x110   : > { %v313_v41 = vpop.f32.mrb[5].mxu0  ;;  %v347_v46 = vsel %vm328_vm0, %v798_v40, -inf }
 0x111   : > { %v799_v42 = vpop.f32.mrb[6].mxu0  ;;  %v341_v43 = vsel %vm328_vm0, %v313_v41, -inf }
 0x112   : > { %342 = vmax.xlane.f32.xlu0 %v341_v43  ;;  %v316_v44 = vpop.f32.mrb[7].mxu0  ;;  %v350_v47 = vsel %vm328_vm0, %v799_v42, -inf }
 0x113   : > { %v344_v45 = vsel %vm328_vm0, %v316_v44, -inf }
 0x114   : > { %345 = vmax.xlane.f32.xlu1 %v344_v45 }
 0x116   : > { %348 = vmax.xlane.f32.xlu0 %v347_v46 }
 0x118   : > { %351 = vmax.xlane.f32.xlu1 %v350_v47 }
 0x196   : > { %v337_v48 = vpop.xlane.xlu1 %336 }
 0x197   : > { %v355_v49 = vsub.f32 %v794_v32, %v337_v48  ;;  %v331_v50 = vpop.xlane.xlu0 %330  ;;  %v261_v32 = vpack.c.bf16 %v256_v31, %v255_v30 }
 0x198   : > { %v353_v51 = vsub.f32 %v297_v33, %v331_v50  ;;  %v257_v33 = vld [vmem:[%s936_s20 + $0xa0] sm:$0xff]  ;;  %s1048_s20 = scalar_lea.vmem %s1071_s4, %s754_s11 }
 0x199   : > { %v365_v52 = vmul.f32 1.442695, %v355_v49  ;;  %804 = vmatprep.subr.bf16.mxu1 %v261_v32 }
 0x19a   : > { %v361_v53 = vmul.f32 1.442695, %v353_v51  ;;  %v340_v54 = vpop.xlane.xlu1 %339  ;;  %805 = vmatpush3.bf16.msra.mxu1 %v261_v32  ;;  %v639_v32 = vld [vmem:[%s1038_s14 + $0x8] sm:$0xff] }
 0x19b   : > { %v356_v55 = vsub.f32 %v795_v35, %v340_v54  ;;  %v334_v56 = vpop.xlane.xlu0 %333  ;;  %v262_v35 = vpack.c.bf16 %v258_v34, %v257_v33 }
 0x19c   : > { %857 = vpow2.f32 %v361_v53  ;;  %v354_v57 = vsub.f32 %v300_v37, %v334_v56  ;;  %v850_v56 = vld [vmem:[%s1069_s2 + $0x8] sm:$0xff]  }
 0x19d   : > { %859 = vpow2.f32 %v365_v52  ;;  %v367_v58 = vmul.f32 1.442695, %v356_v55  ;;  %806 = vmatprep.subr.bf16.mxu1 %v262_v35 }
 0x19e   : > { %v363_v59 = vmul.f32 1.442695, %v354_v57  ;;  %807 = vmatpush3.bf16.msra.mxu1 %v262_v35 }
 0x19f   : > { %v343_v60 = vpop.xlane.xlu0 %342  ;;  %816 = vmatprep.subr.bf16.mxu1 %v849_v36 }
 0x1a0   : > { %861 = vpow2.f32 %v363_v59  ;;  %v357_v61 = vsub.f32 %v313_v41, %v343_v60 }
 0x1a1   : > { %v346_v62 = vpop.xlane.xlu1 %345  ;;  %863 = vpow2.f32 %v367_v58 }
 0x1a2   : > { %v369_v63 = vmul.f32 1.442695, %v357_v61  ;;  %v358_v0 = vsub.f32 %v316_v44, %v346_v62 }
 0x1a3   : > { %v349_v1 = vpop.xlane.xlu0 %348 }
 0x1a4   : > { %865 = vpow2.f32 %v369_v63  ;;  %v371_v2 = vmul.f32 1.442695, %v358_v0  ;;  %v359_v3 = vsub.f32 %v798_v40, %v349_v1  ;;  %v851_v63 = vld [vmem:[%s1069_s2 + $0x10] sm:$0xff]  }
 0x1a5   : > { %v352_v4 = vpop.xlane.xlu1 %351 }
 0x1a6   : > { %v962_v5 = vpop.eup %857  ;;  %867 = vpow2.f32 %v371_v2  ;;  %v373_v6 = vmul.f32 1.442695, %v359_v3  ;;  %v360_v7 = vsub.f32 %v799_v42, %v352_v4  ;;  %v852_v3 = vld [vmem:[%s1069_s2 + $0x18] sm:$0xff]   ;;  %v853_v4 = vld [vmem:[%s1069_s2 + $0x20] sm:$0xff]  }
 0x1a7   : > { %v377_v8 = vsel %vm328_vm0, %v962_v5, 0.0  ;;  %v966_v9 = vpop.eup %859 }
 0x1a8   : > { %869 = vpow2.f32 %v373_v6  ;;  %v375_v10 = vmul.f32 1.442695, %v360_v7  ;;  %378 = vadd.xlane.f32.xlu0 %v377_v8  ;;  %v383_v12 = vsel %vm328_vm0, %v966_v9, 0.0  ;;  %v855_v6 = vld [vmem:[%s1069_s2 + $0x30] sm:$0xff]   ;;  %v856_v7 = vld [vmem:[%s1069_s2 + $0x38] sm:$0xff]  }
 0x1aa   : > { %v862_v11 = vpop.eup %861  ;;  %871 = vpow2.f32 %v375_v10 }
 0x1ab   : > { %v380_v13 = vsel %vm328_vm0, %v862_v11, 0.0  ;;  %v971_v14 = vpop.eup %863 }
 0x1ac   : > { %384 = vadd.xlane.f32.xlu0 %v383_v12  ;;  %381 = vadd.xlane.f32.xlu1 %v380_v13  ;;  %v386_v17 = vsel %vm328_vm0, %v971_v14, 0.0 }
 0x1ae   : > { %v973_v15 = vpop.eup %865 }
 0x1af   : > { %v389_v16 = vsel %vm328_vm0, %v973_v15, 0.0 }
 0x1b0   : > { %v979_v18 = vpop.eup %867  ;;  %390 = vadd.xlane.f32.xlu0 %v389_v16  ;;  %387 = vadd.xlane.f32.xlu1 %v386_v17 }
 0x1b1   : > { %v392_v21 = vsel %vm328_vm0, %v979_v18, 0.0 }
 0x1b2   : > { %v981_v19 = vpop.eup %869 }
 0x1b3   : > { %v395_v20 = vsel %vm328_vm0, %v981_v19, 0.0 }
 0x1b4   : > { %v987_v22 = vpop.eup %871  ;;  %396 = vadd.xlane.f32.xlu0 %v395_v20  ;;  %393 = vadd.xlane.f32.xlu1 %v392_v21  ;;  %v743_v20 = vld [vmem:[%s1070_s3] ss:$0 sm:$0xff] }
 0x1b5   : > { %v398_v23 = vsel %vm328_vm0, %v987_v22, 0.0 }
 0x1b8   : > { %399 = vadd.xlane.f32.xlu1 %v398_v23 }
 0x235   : > { %v379_v37 = vpop.xlane.xlu0 %378 }
 0x236   : > { %873 = vrcp.f32 %v379_v37 }
 0x239   : > { %v385_v38 = vpop.xlane.xlu0 %384  ;;  %v382_v39 = vpop.xlane.xlu1 %381 }
 0x23a   : > { %875 = vrcp.f32 %v382_v39 }
 0x23b   : > { %877 = vrcp.f32 %v385_v38  ;;  %v644_v38 = vld [vmem:[%s1038_s14 + $0x30] sm:$0xff] }
 0x23d   : > { %v391_v40 = vpop.xlane.xlu0 %390  ;;  %v388_v41 = vpop.xlane.xlu1 %387 }
 0x23e   : > { %879 = vrcp.f32 %v388_v41  ;;  %v642_v41 = vld [vmem:[%s1038_s14 + $0x20] sm:$0xff] }
 0x23f   : > { %881 = vrcp.f32 %v391_v40 }
 0x240   : > { %v874_v44 = vpop.eup %873 }
 0x241   : > { %v397_v42 = vpop.xlane.xlu0 %396  ;;  %v394_v43 = vpop.xlane.xlu1 %393  ;;  %v409_v47 = vmul.f32 %v874_v44, %v962_v5  ;;  %v854_v5 = vld [vmem:[%s1069_s2 + $0x28] sm:$0xff]   ;;  %v645_v44 = vld [vmem:[%s1038_s14 + $0x38] sm:$0xff] }
 0x242   : > { %883 = vrcp.f32 %v394_v43 }
 0x243   : > { %885 = vrcp.f32 %v397_v42 }
 0x244   : > { %v876_v45 = vpop.eup %875 }
 0x245   : > { %v400_v46 = vpop.xlane.xlu1 %399  ;;  %v410_v48 = vmul.f32 %v876_v45, %v862_v11  ;;  %v878_v49 = vpop.eup %877 }
 0x246   : > { %887 = vrcp.f32 %v400_v46  ;;  %v411_v52 = vmul.f32 %v878_v49, %v966_v9 }
 0x247   : > { %v417_v50 = vpack.c.bf16 %v410_v48, %v409_v47  ;;  %v643_v48 = vld [vmem:[%s1038_s14 + $0x28] sm:$0xff] }
 0x248   : > { %v880_v51 = vpop.eup %879 }
 0x249   : > { %808 = vmatprep.mubr.msk.bf16.mxu1 %vm328_vm0, %v417_v50  ;;  %v412_v53 = vmul.f32 %v880_v51, %v971_v14  ;;  %v882_v54 = vpop.eup %881 }
 0x24a   : > { %v413_v59 = vmul.f32 %v882_v54, %v973_v15 }
 0x24b   : > { %v418_v55 = vpack.c.bf16 %v412_v53, %v411_v52 }
 0x24c   : > { %v884_v57 = vpop.eup %883 }
 0x24d   : > { %v886_v58 = vpop.eup %885  ;;  %809 = vmatmul.mubr.msk.bf16.vlgmr.msra.gmra.mrb[0].mxu1 %vm328_vm0, %v418_v55  ;;  %v414_v60 = vmul.f32 %v884_v57, %v979_v18 }
 0x24e   : > { %817 = vmatpush3.bf16.msra.mxu1 %v849_v36  ;;  %v415_v0 = vmul.f32 %v886_v58, %v981_v19 }
 0x24f   : > { %v419_v62 = vpack.c.bf16 %v414_v60, %v413_v59  ;;  %818 = vmatprep.subr.bf16.mxu1 %v850_v56 }
 0x250   : > { %v888_v61 = vpop.eup %887 }
 0x251   : > { %v416_v1 = vmul.f32 %v888_v61, %v987_v22  ;;  %812 = vmatprep.mubr.msk.bf16.mxu1 %vm328_vm0, %v419_v62  ;;  %v640_v22 = vld [vmem:[%s1038_s14 + $0x10] sm:$0xff] }
 0x252   : > { %819 = vmatpush3.bf16.msra.mxu1 %v850_v56 }
 0x253   : > { %v420_v2 = vpack.c.bf16 %v416_v1, %v415_v0  ;;  %820 = vmatprep.subr.bf16.mxu1 %v851_v63 }
 0x255   : > { %813 = vmatmul.mubr.msk.bf16.gmra.mrb[4].mxu1 %vm328_vm0, %v420_v2 }
 0x256   : > { %821 = vmatpush3.bf16.msra.mxu1 %v851_v63 }
 0x257   : > { %822 = vmatprep.subr.bf16.mxu1 %v852_v3 }
 0x25a   : > { %823 = vmatpush3.bf16.msra.mxu1 %v852_v3 }
 0x25b   : > { %824 = vmatprep.subr.bf16.mxu1 %v853_v4 }
 0x25e   : > { %825 = vmatpush3.bf16.msra.mxu1 %v853_v4 }
 0x25f   : > { %826 = vmatprep.subr.bf16.mxu1 %v854_v5 }
 0x262   : > { %827 = vmatpush3.bf16.msra.mxu1 %v854_v5 }
 0x263   : > { %828 = vmatprep.subr.bf16.mxu1 %v855_v6 }
 0x266   : > { %829 = vmatpush3.bf16.msra.mxu1 %v855_v6 }
 0x267   : > { %830 = vmatprep.subr.bf16.mxu1 %v856_v7 }
 0x26a   : > { %831 = vmatpush3.bf16.msra.mxu1 %v856_v7 }
 0x320   : > { %v810_v8 = vpop.f32.mrb[0].mxu1 }
 0x321   : > { %v467_v9 = vpop.f32.mrb[1].mxu1 }
 0x322   : > { %v811_v10 = vpop.f32.mrb[2].mxu1 }
 0x323   : > { %v499_v11 = vpack.c.bf16 %v811_v10, %v810_v8  ;;  %v470_v12 = vpop.f32.mrb[3].mxu1 }
 0x324   : > { %v498_v13 = vpack.c.bf16 %v470_v12, %v467_v9 }
 0x326   : > { %832 = vmatprep.mubr.bf16.mxu1 %v498_v13 }
 0x327   : > { %833 = vmatmul.mubr.bf16.vlgmr.msra.gmra.mrb[8].mxu1 %v499_v11 }
 0x328   : > { %v814_v14 = vpop.f32.mrb[4].mxu1 }
 0x329   : > { %v483_v15 = vpop.f32.mrb[5].mxu1 }
 0x32a   : > { %v815_v16 = vpop.f32.mrb[6].mxu1 }
 0x32b   : > { %v501_v17 = vpack.c.bf16 %v815_v16, %v814_v14  ;;  %v486_v18 = vpop.f32.mrb[7].mxu1 }
 0x32c   : > { %v500_v19 = vpack.c.bf16 %v486_v18, %v483_v15 }
 0x32e   : > { %836 = vmatprep.mubr.bf16.mxu1 %v500_v19 }
 0x32f   : > { %837 = vmatmul.mubr.bf16.gmra.mrb[12].mxu1 %v501_v17 }
 0x3fa   : > { %v834_v21 = vpop.f32.mrb[8].mxu1 }
 0x3fb   : > { %v616_v23 = vadd.f32 %v834_v21, %v743_v20  ;;  %v607_v24 = vpop.f32.mrb[9].mxu1 }
 0x3fc   : > { %v608_v26 = vadd.f32 %v743_v20, %v607_v24  ;;  %v835_v27 = vpop.f32.mrb[10].mxu1 }
 0x3fd   : > { %v648_v29 = vadd.f32 %v640_v22, %v616_v23  ;;  %v619_v30 = vadd.f32 %v835_v27, %v743_v20  ;;  %v610_v31 = vpop.f32.mrb[11].mxu1 }
 0x3fe   : > { %v646_v33 = vadd.f32 %v638_v25, %v608_v26  ;;  %v611_v34 = vadd.f32 %v743_v20, %v610_v31 }
 0x3ff   : > { %656 = vst [vmem:[%s1048_s20 + $0x10] sm:$0xff] %v648_v29  ;;  %v649_v35 = vadd.f32 %v641_v28, %v619_v30 }
 0x400   : > { %654 = vst [vmem:[%s1048_s20] sm:$0xff] %v646_v33  ;;  %v647_v36 = vadd.f32 %v639_v32, %v611_v34 }
 0x401   : > { %657 = vst [vmem:[%s1048_s20 + $0x18] sm:$0xff] %v649_v35 }
 0x402   : > { %655 = vst [vmem:[%s1048_s20 + $0x8] sm:$0xff] %v647_v36  ;;  %v838_v37 = vpop.f32.mrb[12].mxu1 }
 0x403   : > { %v632_v39 = vadd.f32 %v838_v37, %v743_v20  ;;  %v623_v40 = vpop.f32.mrb[13].mxu1 }
 0x404   : > { %v624_v42 = vadd.f32 %v743_v20, %v623_v40  ;;  %v839_v43 = vpop.f32.mrb[14].mxu1 }
 0x405   : > { %v652_v45 = vadd.f32 %v644_v38, %v632_v39  ;;  %v635_v46 = vadd.f32 %v839_v43, %v743_v20  ;;  %v626_v47 = vpop.f32.mrb[15].mxu1 }
 0x406   : > { %v650_v49 = vadd.f32 %v642_v41, %v624_v42  ;;  %v627_v50 = vadd.f32 %v743_v20, %v626_v47 }
 0x407   : > { %660 = vst [vmem:[%s1048_s20 + $0x30] sm:$0xff] %v652_v45  ;;  %v653_v51 = vadd.f32 %v645_v44, %v635_v46 }
 0x408   : > { %658 = vst [vmem:[%s1048_s20 + $0x20] sm:$0xff] %v650_v49  ;;  %v651_v52 = vadd.f32 %v643_v48, %v627_v50 }
 0x409   : > { %661 = vst [vmem:[%s1048_s20 + $0x38] sm:$0xff] %v653_v51 }
 0x40a   : > { %659 = vst [vmem:[%s1048_s20 + $0x28] sm:$0xff] %v651_v52 }
 0x40b PF: > { %s14_s15 = sadd.s32 1, %s895_s15  }
 0x40c   : > { %p11_p4 = scmp.ge.s32.totalorder %s14_s15, 4  }
 0x40e   :  { %13 = sbr.rel (!%p11_p4) target bundleno = 1 (0x1), region = 69 }

// kernel: _lambda_.15
= control target key start
LH: loop header
LB: loop body
LE: loop exit
PB: predicated region body
PF: predicated region fallthrough
CT: control target
= control target key end

     0   :  { %s1530_s27 = smov 0   ;;  %s1877_s0 = inlined_call_operand.vmem [shape: f32[2,64,128], index: 0, kind: input, shape index: {}]   ;;  %s1878_s1 = inlined_call_operand.vmem [shape: f32[1,128], index: 1, kind: input, shape index: {}]   ;;  %s1879_s2 = inlined_call_operand.vmem [shape: f32[1,128], index: 2, kind: input, shape index: {}]   ;;  %s1880_s3 = inlined_call_operand.vmem [shape: f32[128,32], index: 3, kind: input, shape index: {}]   ;;  %s1881_s4 = inlined_call_operand.vmem [shape: f32[32,128], index: 4, kind: input, shape index: {}]   ;;  %s1882_s5 = inlined_call_operand.vmem [shape: bf16[128,384], index: 5, kind: input, shape index: {}]   ;;  %s1883_s6 = inlined_call_operand.vmem [shape: f32[1,384], index: 6, kind: input, shape index: {}]   ;;  %s1884_s7 = inlined_call_operand.vmem [shape: f32[2,64,128], index: 7, kind: output, shape index: {0}]   ;;  %s1885_s8 = inlined_call_operand.vmem [shape: f32[2,64,384], index: 8, kind: output, shape index: {1}]  }
   0x1 LB: > { %s1153_s28 = sadd.s32 4294967295, %s1479_s27   ;;  %p1157_p0 = scmp.ge.s32.totalorder %s1479_s27, 1  ;;  %s1479_s27 = sphi %s1530_s27, %s19_s27  }
   0x2   : > { %p265_p1 = scmp.lt.s32.totalorder %s1479_s27, 3 }
   0x4   : > { %p266_p2 = pnand %p1157_p0, %p265_p1 }
   0x5   : > { %v341_v0 = vld [vmem:[%s1880_s3] sm:$0xff] (!%p266_p2)  ;;  %v342_v1 = vld [vmem:[%s1880_s3 + $0x8] sm:$0xff] (!%p266_p2)  ;;  %v343_v2 = vld [vmem:[%s1880_s3 + $0x10] sm:$0xff] (!%p266_p2)  ;;  %v1481_v3 = vmov (!%p266_p2), 0.0|0.0   ;;  %vm1482_vm0 = vmmov (!%p266_p2), 0   ;;  %v1483_v6 = vmov (!%p266_p2), 0.0   ;;  %v506_v56 = vlaneseq (!%p266_p2) }
   0x6   : > { %269 = sbr.rel (%p266_p2) target bundleno = 1192 (0x4a8), region = 48  ;;  %1366 = vmatprep.subr.bf16.mxu0 (!%p266_p2), %v1481_v3  ;;  %v1548_v4 = vpack.c.bf16 (!%p266_p2), %v342_v1, %v341_v0  ;;  %v344_v5 = vld [vmem:[%s1880_s3 + $0x18] sm:$0xff] (!%p266_p2)  ;;  %1282 = vmatprep.mubr.msk.f32.mxu0 (!%p266_p2), %vm1482_vm0, %v1483_v6  ;;  %p304_p3 = scmp.lt.s32.totalorder (!%p266_p2), %s1153_s28, 1  ;;  %v345_v8 = vld [vmem:[%s1880_s3 + $0x20] sm:$0xff] (!%p266_p2)  ;;  %v346_v9 = vld [vmem:[%s1880_s3 + $0x28] sm:$0xff] (!%p266_p2)  ;;  %vm432_vm1 = vcmask (!%p266_p2), 261120  }
   0x7   : > { %1390 = vmatprep.subr.bf16.mxu1 (!%p266_p2), %v1481_v3  ;;  %1293 = vmatprep.mubr.msk.f32.mxu1 (!%p266_p2), %vm1482_vm0, %v1483_v6  ;;  %v1559_v7 = vpack.c.bf16 (!%p266_p2), %v344_v5, %v343_v2  ;;  %v428_v10 = vld [vmem:[%s1881_s4] sm:$0xff] (!%p266_p2)  ;;  %v429_v11 = vld [vmem:[%s1881_s4 + $0x8] sm:$0xff] (!%p266_p2)  ;;  %v1585_v13 = vpack.c.bf16 (!%p266_p2), %v346_v9, %v345_v8  ;;  %v347_v17 = vld [vmem:[%s1880_s3 + $0x30] sm:$0xff] (!%p266_p2)  ;;  %v1674_v57 = vshrl.u32 (!%p266_p2), %v506_v56, 7  ;;  %v1484_v56 = vmov (!%p266_p2), 0  }
   0x8   : > { %1368 = vmatpush3.bf16.msra.mxu0 (!%p266_p2), %v1548_v4  ;;  %v1582_v12 = vpack.c.bf16 (!%p266_p2), %v429_v11, %v428_v10  ;;  %v348_v18 = vld [vmem:[%s1880_s3 + $0x38] sm:$0xff] (!%p266_p2)  ;;  %v349_v22 = vld [vmem:[%s1880_s3 + $0x40] sm:$0xff] (!%p266_p2)  ;;  %v350_v23 = vld [vmem:[%s1880_s3 + $0x48] sm:$0xff] (!%p266_p2) }
   0x9   : > { %1369 = vmatprep.subr.bf16.mxu0 (!%p266_p2), %v1481_v3  ;;  %v1376_v25 = vpack.c.bf16 (!%p266_p2), %v348_v18, %v347_v17  ;;  %v351_v29 = vld [vmem:[%s1880_s3 + $0x50] sm:$0xff] (!%p266_p2)  ;;  %v352_v30 = vld [vmem:[%s1880_s3 + $0x58] sm:$0xff] (!%p266_p2)  ;;  %v1379_v32 = vpack.c.bf16 (!%p266_p2), %v350_v23, %v349_v22  ;;  %v353_v37 = vld [vmem:[%s1880_s3 + $0x60] sm:$0xff] (!%p266_p2)  ;;  %v1677_v58 = vsub.s32 (!%p266_p2), 0, %v1674_v57 }
   0xa   : > { %1392 = vmatpush3.bf16.msra.mxu1 (!%p266_p2), %v1582_v12  ;;  %v1382_v36 = vpack.c.bf16 (!%p266_p2), %v352_v30, %v351_v29  ;;  %v354_v38 = vld [vmem:[%s1880_s3 + $0x68] sm:$0xff] (!%p266_p2)  ;;  %v355_v42 = vld [vmem:[%s1880_s3 + $0x70] sm:$0xff] (!%p266_p2)  ;;  %v356_v43 = vld [vmem:[%s1880_s3 + $0x78] sm:$0xff] (!%p266_p2) }
   0xb   : > { %1393 = vmatprep.subr.bf16.mxu1 (!%p266_p2), %v1481_v3  ;;  %v1385_v41 = vpack.c.bf16 (!%p266_p2), %v354_v38, %v353_v37  ;;  %v1388_v46 = vpack.c.bf16 (!%p266_p2), %v356_v43, %v355_v42  ;;  %v430_v50 = vld [vmem:[%s1881_s4 + $0x10] sm:$0xff] (!%p266_p2)  ;;  %v431_v51 = vld [vmem:[%s1881_s4 + $0x18] sm:$0xff] (!%p266_p2)  ;;  %v1439_v30 = vld [vmem:[%s1882_s5] ss:$12 sps:$4 sm:$0xff] (!%p266_p2)  }
   0xc   : > { %1371 = vmatpush3.bf16.msra.mxu0 (!%p266_p2), %v1559_v7  ;;  %v1656_v52 = vpack.c.bf16 (!%p266_p2), %v431_v51, %v430_v50  ;;  %v1455_v37 = vld [vmem:[%s1882_s5 + $0x60] ss:$12 sps:$4 sm:$0xff] (!%p266_p2)   ;;  %v1461_v38 = vld [vmem:[%s1882_s5 + $0x7c] ss:$12 sps:$4 sm:$0xff] (!%p266_p2)  }
   0xd   : > { %s1887_s28 = smov (!%p304_p3, %s1153_s28), 1  ;;  %1372 = vmatprep.subr.bf16.mxu0 %v1481_v3  ;;  %v1465_v50 = vld [vmem:[%s1882_s5 + $0x94] ss:$12 sps:$4 sm:$0xff]   ;;  %v1463_v51 = vld [vmem:[%s1882_s5 + $0x90] ss:$12 sps:$4 sm:$0xff]  }
   0xe   : > { %s1192_s19 = sshll.u32 %s1887_s28, 6  ;;  %1395 = vmatpush3.bf16.msra.mxu1 %v1656_v52  ;;  %s1426_s11 = smul.u32 192, %s1887_s28 }
   0xf   : > { %s308_s26 = scalar_lea.vmem %s1877_s0, %s1192_s19  ;;  %1396 = vmatprep.subr.bf16.mxu1 %v1481_v3  ;;  %s313_s9 = scalar_lea.vmem %s1884_s7, %s1192_s19 }
  0x10   : > { %v1587_v14 = vld [vmem:[%s308_s26] sm:$0xff]  ;;  %v1589_v15 = vld [vmem:[%s308_s26 + $0x8] sm:$0xff]  ;;  %v1591_v16 = vld [vmem:[%s308_s26 + $0x10] sm:$0xff]  ;;  %1374 = vmatpush3.bf16.msra.mxu0 %v1585_v13  ;;  %s1832_s14 = scalar_lea.vmem %s1885_s8, %s1426_s11 }
  0x11   : > { %v328_v19 = vadd.f32 %v1589_v15, %v1587_v14  ;;  %v1603_v20 = vld [vmem:[%s308_s26 + $0x18] sm:$0xff]  ;;  %v1605_v21 = vld [vmem:[%s308_s26 + $0x20] sm:$0xff]  ;;  %v1616_v26 = vld [vmem:[%s308_s26 + $0x28] sm:$0xff]  ;;  %1375 = vmatprep.subr.bf16.mxu0 %v1481_v3 }
  0x12   : > { %v1620_v28 = vld [vmem:[%s308_s26 + $0x30] sm:$0xff]  ;;  %v1629_v33 = vld [vmem:[%s308_s26 + $0x38] sm:$0xff] }
  0x13   : > { %v329_v24 = vadd.f32 %v328_v19, %v1591_v16 }
  0x14   : > { %1377 = vmatpush3.bf16.msra.mxu0 %v1376_v25 }
  0x15   : > { %v330_v27 = vadd.f32 %v329_v24, %v1603_v20  ;;  %1378 = vmatprep.subr.bf16.mxu0 %v1481_v3 }
  0x17   : > { %v331_v31 = vadd.f32 %v330_v27, %v1605_v21 }
  0x18   : > { %1380 = vmatpush3.bf16.msra.mxu0 %v1379_v32 }
  0x19   : > { %v332_v34 = vadd.f32 %v331_v31, %v1616_v26  ;;  %1381 = vmatprep.subr.bf16.mxu0 %v1481_v3  ;;  %v1441_v31 = vld [vmem:[%s1882_s5 + $0x4] ss:$12 sps:$4 sm:$0xff]  }
  0x1b   : > { %v333_v35 = vadd.f32 %v332_v34, %v1620_v28  ;;  %v1453_v34 = vld [vmem:[%s1882_s5 + $0x4c] ss:$12 sps:$4 sm:$0xff]  }
  0x1c   : > { %1383 = vmatpush3.bf16.msra.mxu0 %v1382_v36 }
  0x1d   : > { %v334_v39 = vadd.f32 %v333_v35, %v1629_v33  ;;  %1384 = vmatprep.subr.bf16.mxu0 %v1481_v3  ;;  %v1451_v35 = vld [vmem:[%s1882_s5 + $0x48] ss:$12 sps:$4 sm:$0xff]  }
  0x1f   : > { %v335_v40 = vrot.slane %v334_v39, 4 }
  0x20   : > { %1386 = vmatpush3.bf16.msra.mxu0 %v1385_v41 }
  0x21   : > { %v336_v44 = vadd.f32 %v335_v40, %v334_v39  ;;  %1387 = vmatprep.subr.bf16.mxu0 %v1481_v3  ;;  %v1459_v39 = vld [vmem:[%s1882_s5 + $0x78] ss:$12 sps:$4 sm:$0xff]  }
  0x23   : > { %v337_v45 = vrot.slane %v336_v44, 2 }
  0x24   : > { %1389 = vmatpush3.bf16.msra.mxu0 %v1388_v46 }
  0x25   : > { %v338_v47 = vadd.f32 %v337_v45, %v336_v44  ;;  %903 = vmatprep.subr.bf16.mxu0 %v1441_v31  ;;  %v1446_v44 = vld [vmem:[%s1882_s5 + $0x20] ss:$12 sps:$4 sm:$0xff]  }
  0x27   : > { %v339_v48 = vrot.slane %v338_v47, 1 }
  0x29   : > { %v340_v49 = vadd.f32 %v339_v48, %v338_v47  ;;  %v1454_v47 = vld [vmem:[%s1882_s5 + $0x50] ss:$12 sps:$4 sm:$0xff]   ;;  %v1458_v48 = vld [vmem:[%s1882_s5 + $0x68] ss:$12 sps:$4 sm:$0xff]  }
  0x2b   : > { %1283 = vmatmul.mubr.f32.vlgmr.msra.gmra.mrb[0].mxu0 %v340_v49  ;;  %v1462_v49 = vld [vmem:[%s1882_s5 + $0x80] ss:$12 sps:$4 sm:$0xff]  }
  0x2c   : > { %904 = vmatpush1.bf16.msra.mxu0 %v1439_v30  ;;  %935 = vmatprep.mubr.bf16.mxu0 %v1484_v56 }
  0xfe   : > { %v423_v53 = vpop.f32.mrb[0].mxu0 }
  0xff   : > { %v427_v54 = vmul.f32 0.00390625, %v423_v53  ;;  %v1284_v55 = vpop.f32.mrb[1].mxu0  ;;  %v1469_v53 = vld [vmem:[%s1882_s5 + $0xac] ss:$12 sps:$4 sm:$0xff]  }
 0x100   : > { %v1467_v55 = vld [vmem:[%s1882_s5 + $0xa8] ss:$12 sps:$4 sm:$0xff]  }
 0x101   : > { %1294 = vmatmul.mubr.msk.f32.vlgmr.msra.gmra.mrb[0].mxu1 %vm432_vm1, %v427_v54  ;;  %v1470_v54 = vld [vmem:[%s1882_s5 + $0xb0] ss:$12 sps:$4 sm:$0xff]  }
 0x102   : > { %1398 = vmatpush3.bf16.msra.mxu1 %v1548_v4  ;;  %1328 = vmatprep.mubr.msk.f32.mxu1 %vm1482_vm0, %v1483_v6 }
 0x103   : > { %1399 = vmatprep.subr.bf16.mxu1 %v1481_v3 }
 0x106   : > { %1401 = vmatpush3.bf16.msra.mxu1 %v1559_v7 }
 0x107   : > { %1402 = vmatprep.subr.bf16.mxu1 %v1481_v3 }
 0x10a   : > { %1404 = vmatpush3.bf16.msra.mxu1 %v1585_v13 }
 0x10b   : > { %1405 = vmatprep.subr.bf16.mxu1 %v1481_v3 }
 0x10e   : > { %1407 = vmatpush3.bf16.msra.mxu1 %v1376_v25 }
 0x10f   : > { %1408 = vmatprep.subr.bf16.mxu1 %v1481_v3 }
 0x112   : > { %1410 = vmatpush3.bf16.msra.mxu1 %v1379_v32  ;;  %v1442_v32 = vld [vmem:[%s1882_s5 + $0x8] ss:$12 sps:$4 sm:$0xff]  }
 0x113   : > { %1411 = vmatprep.subr.bf16.mxu1 %v1481_v3 }
 0x116   : > { %1413 = vmatpush3.bf16.msra.mxu1 %v1382_v36  ;;  %v1457_v36 = vld [vmem:[%s1882_s5 + $0x64] ss:$12 sps:$4 sm:$0xff]  }
 0x117   : > { %1414 = vmatprep.subr.bf16.mxu1 %v1481_v3 }
 0x11a   : > { %1416 = vmatpush3.bf16.msra.mxu1 %v1385_v41 }
 0x11b   : > { %1417 = vmatprep.subr.bf16.mxu1 %v1481_v3 }
 0x11e   : > { %1419 = vmatpush3.bf16.msra.mxu1 %v1388_v46  ;;  %v1450_v46 = vld [vmem:[%s1882_s5 + $0x38] ss:$12 sps:$4 sm:$0xff]  }
 0x11f   : > { %1420 = vmatprep.subr.bf16.mxu1 %v1481_v3 }
 0x1d4   : > { %v502_v59 = vpop.f32.mrb[0].mxu1 }
 0x1d5   : > { %v509_v60 = vrot.slane %v502_v59, %v1677_v58  ;;  %v1295_v61 = vpop.f32.mrb[1].mxu1  ;;  %v685_v59 = vld [vmem:[%s1878_s1] sm:$0x1] }
 0x1d7   : > { %v1681_v62 = vsub.f32 %v1587_v14, %v509_v60  ;;  %v1684_v63 = vsub.f32 %v1589_v15, %v509_v60  ;;  %v1687_v0 = vsub.f32 %v1591_v16, %v509_v60  ;;  %v1690_v1 = vsub.f32 %v1603_v20, %v509_v60 }
 0x1d8   : > { %v1697_v5 = vsub.f32 %v1605_v21, %v509_v60  ;;  %v1702_v9 = vsub.f32 %v1616_v26, %v509_v60  ;;  %v1707_v13 = vsub.f32 %v1620_v28, %v509_v60  ;;  %v1712_v16 = vsub.f32 %v1629_v33, %v509_v60  ;;  %v1447_v33 = vld [vmem:[%s1882_s5 + $0x30] ss:$12 sps:$4 sm:$0xff]  }
 0x1d9   : > { %v518_v2 = vmul.f32 %v1681_v62, %v1681_v62  ;;  %v519_v4 = vmul.f32 %v1684_v63, %v1684_v63  ;;  %v520_v7 = vmul.f32 %v1687_v0, %v1687_v0  ;;  %v521_v10 = vmul.f32 %v1690_v1, %v1690_v1 }
 0x1da   : > { %v522_v14 = vmul.f32 %v1697_v5, %v1697_v5  ;;  %v523_v17 = vmul.f32 %v1702_v9, %v1702_v9  ;;  %v524_v19 = vmul.f32 %v1707_v13, %v1707_v13  ;;  %v525_v21 = vmul.f32 %v1712_v16, %v1712_v16 }
 0x1db   : > { %v526_v8 = vadd.f32 %v519_v4, %v518_v2 }
 0x1dd   : > { %v527_v11 = vadd.f32 %v526_v8, %v520_v7  ;;  %v1165_v7 = vld [vmem:[%s1879_s2] ss:$0 sm:$0xff] }
 0x1df   : > { %v528_v15 = vadd.f32 %v527_v11, %v521_v10 }
 0x1e1   : > { %v529_v18 = vadd.f32 %v528_v15, %v522_v14 }
 0x1e3   : > { %v530_v20 = vadd.f32 %v529_v18, %v523_v17 }
 0x1e5   : > { %v531_v22 = vadd.f32 %v530_v20, %v524_v19 }
 0x1e7   : > { %v532_v23 = vadd.f32 %v531_v22, %v525_v21 }
 0x1e9   : > { %v533_v24 = vrot.slane %v532_v23, 4 }
 0x1eb   : > { %v534_v25 = vadd.f32 %v533_v24, %v532_v23 }
 0x1ed   : > { %v535_v26 = vrot.slane %v534_v25, 2 }
 0x1ef   : > { %v536_v27 = vadd.f32 %v535_v26, %v534_v25  ;;  %v766_v25 = vsub.s32 1, %v1674_v57  ;;  %v770_v26 = vsub.s32 2, %v1674_v57 }
 0x1f1   : > { %v537_v28 = vrot.slane %v536_v27, 1 }
 0x1f3   : > { %v538_v29 = vadd.f32 %v537_v28, %v536_v27 }
 0x1f5   : > { %1329 = vmatmul.mubr.f32.vlgmr.msra.gmra.mrb[2].mxu1 %v538_v29 }
 0x1f6   : > { %1422 = vmatpush3.bf16.msra.mxu1 %v1582_v12  ;;  %1339 = vmatprep.mubr.msk.f32.mxu1 %vm1482_vm0, %v1483_v6  ;;  %v1445_v6 = vld [vmem:[%s1882_s5 + $0x1c] ss:$12 sps:$4 sm:$0xff]   ;;  %v1449_v12 = vld [vmem:[%s1882_s5 + $0x34] ss:$12 sps:$4 sm:$0xff]  }
 0x1f7   : > { %1423 = vmatprep.subr.bf16.mxu1 %v1481_v3  ;;  %v1443_v3 = vld [vmem:[%s1882_s5 + $0x18] ss:$12 sps:$4 sm:$0xff]   ;;  %905 = vmatprep.subr.bf16.mxu0 %v1445_v6 }
 0x1f8   : > { %906 = vmatpush1.bf16.msra.mxu0 %v1443_v3 }
 0x1f9   : > { %907 = vmatprep.subr.bf16.mxu0 %v1449_v12 }
 0x1fa   : > { %1425 = vmatpush3.bf16.msra.mxu1 %v1656_v52  ;;  %v1466_v52 = vld [vmem:[%s1882_s5 + $0x98] ss:$12 sps:$4 sm:$0xff]  }
 0x1fb   : > { %1342 = vmatprep.subr.bf16.mxu1 %v1442_v32 }
 0x1fc   : > { %908 = vmatpush1.bf16.msra.mxu0 %v1447_v33 }
 0x1fd   : > { %909 = vmatprep.subr.bf16.mxu0 %v1453_v34 }
 0x200   : > { %910 = vmatpush1.bf16.msra.mxu0 %v1451_v35 }
 0x201   : > { %911 = vmatprep.subr.bf16.mxu0 %v1457_v36 }
 0x204   : > { %912 = vmatpush1.bf16.msra.mxu0 %v1455_v37 }
 0x205   : > { %913 = vmatprep.subr.bf16.mxu0 %v1461_v38 }
 0x208   : > { %914 = vmatpush1.bf16.msra.mxu0 %v1459_v39 }
 0x209   : > { %915 = vmatprep.subr.bf16.mxu0 %v1465_v50 }
 0x20c   : > { %916 = vmatpush1.bf16.msra.mxu0 %v1463_v51 }
 0x20d   : > { %917 = vmatprep.subr.bf16.mxu0 %v1469_v53 }
 0x210   : > { %918 = vmatpush1.bf16.msra.mxu0 %v1467_v55 }
 0x2c8   : > { %v605_v40 = vpop.f32.mrb[2].mxu1 }
 0x2c9   : > { %v609_v41 = vmul.f32 0.00390625, %v605_v40  ;;  %v1330_v42 = vpop.f32.mrb[3].mxu1 }
 0x2cb   : > { %v610_v43 = vadd.f32 1e-05, %v609_v41 }
 0x2cd   : > { %1471 = vrsqrt.f32 %v610_v43 }
 0x2d7   : > { %v1472_v45 = vpop.eup %1471 }
 0x2d8   : > { %1340 = vmatmul.mubr.msk.f32.vlgmr.msra.gmra.mrb[4].mxu1 %vm432_vm1, %v1472_v45 }
 0x2d9   : > { %1343 = vmatpush3.bf16.msra.mxu1 %v1442_v32 }
 0x2da   : > { %1344 = vmatprep.subr.bf16.mxu1 %v1446_v44 }
 0x2dd   : > { %1345 = vmatpush3.bf16.msra.mxu1 %v1446_v44 }
 0x2de   : > { %1346 = vmatprep.subr.bf16.mxu1 %v1450_v46 }
 0x2e1   : > { %1347 = vmatpush3.bf16.msra.mxu1 %v1450_v46 }
 0x2e2   : > { %1348 = vmatprep.subr.bf16.mxu1 %v1454_v47 }
 0x2e5   : > { %1349 = vmatpush3.bf16.msra.mxu1 %v1454_v47 }
 0x2e6   : > { %1350 = vmatprep.subr.bf16.mxu1 %v1458_v48 }
 0x2e9   : > { %1351 = vmatpush3.bf16.msra.mxu1 %v1458_v48 }
 0x2ea   : > { %1352 = vmatprep.subr.bf16.mxu1 %v1462_v49 }
 0x2ed   : > { %1353 = vmatpush3.bf16.msra.mxu1 %v1462_v49 }
 0x2ee   : > { %1354 = vmatprep.subr.bf16.mxu1 %v1466_v52 }
 0x2f1   : > { %1355 = vmatpush3.bf16.msra.mxu1 %v1466_v52 }
 0x2f2   : > { %1356 = vmatprep.subr.bf16.mxu1 %v1470_v54 }
 0x2f5   : > { %1357 = vmatpush3.bf16.msra.mxu1 %v1470_v54 }
 0x3ab   : > { %v681_v60 = vpop.f32.mrb[4].mxu1 }
 0x3ac   : > { %v686_v61 = vmul.f32 %v685_v59, %v681_v60  ;;  %v1341_v2 = vpop.f32.mrb[5].mxu1 }
 0x3ae   : > { %v690_v4 = vrot.slane %v686_v61, %v1677_v58 }
 0x3b0   : > { %v691_v8 = vmul.f32 %v690_v4, %v1681_v62  ;;  %v692_v10 = vmul.f32 %v690_v4, %v1684_v63  ;;  %v693_v11 = vmul.f32 %v690_v4, %v1687_v0  ;;  %v694_v14 = vmul.f32 %v690_v4, %v1690_v1 }
 0x3b1   : > { %v695_v15 = vmul.f32 %v690_v4, %v1697_v5  ;;  %v696_v17 = vmul.f32 %v690_v4, %v1702_v9  ;;  %v697_v18 = vmul.f32 %v690_v4, %v1707_v13  ;;  %v698_v19 = vmul.f32 %v690_v4, %v1712_v16  ;;  %v758_v16 = vld [vmem:[%s1883_s6] sm:$0x7] }
 0x3b2   : > { %v706_v62 = vadd.f32 %v1165_v7, %v691_v8  ;;  %v707_v20 = vadd.f32 %v1165_v7, %v692_v10  ;;  %v708_v63 = vadd.f32 %v1165_v7, %v693_v11  ;;  %v709_v21 = vadd.f32 %v1165_v7, %v694_v14 }
 0x3b3   : > { %v710_v0 = vadd.f32 %v1165_v7, %v695_v15  ;;  %v711_v22 = vadd.f32 %v1165_v7, %v696_v17  ;;  %v712_v1 = vadd.f32 %v1165_v7, %v697_v18  ;;  %v713_v23 = vadd.f32 %v1165_v7, %v698_v19 }
 0x3b4   : > { %714 = vst [vmem:[%s313_s9] sm:$0xff] %v706_v62  ;;  %715 = vst [vmem:[%s313_s9 + $0x8] sm:$0xff] %v707_v20  ;;  %v722_v24 = vpack.c.bf16 %v707_v20, %v706_v62  ;;  %v723_v5 = vpack.c.bf16 %v709_v21, %v708_v63  ;;  %v1825_v27 = vrot.slane %v758_v16, %v1677_v58 }
 0x3b5   : > { %716 = vst [vmem:[%s313_s9 + $0x10] sm:$0xff] %v708_v63  ;;  %717 = vst [vmem:[%s313_s9 + $0x18] sm:$0xff] %v709_v21  ;;  %v724_v9 = vpack.c.bf16 %v711_v22, %v710_v0  ;;  %v725_v13 = vpack.c.bf16 %v713_v23, %v712_v1  ;;  %v1827_v28 = vrot.slane %v758_v16, %v766_v25 }
 0x3b6   : > { %718 = vst [vmem:[%s313_s9 + $0x20] sm:$0xff] %v710_v0  ;;  %719 = vst [vmem:[%s313_s9 + $0x28] sm:$0xff] %v711_v22  ;;  %936 = vmatmul.mubr.bf16.vlgmr.msra.gmra.mrb[4].mxu0 %v722_v24  ;;  %1358 = vmatprep.mubr.bf16.mxu1 %v722_v24  ;;  %v771_v29 = vrot.slane %v758_v16, %v770_v26 }
 0x3b7   : > { %720 = vst [vmem:[%s313_s9 + $0x30] sm:$0xff] %v712_v1  ;;  %721 = vst [vmem:[%s313_s9 + $0x38] sm:$0xff] %v713_v23  ;;  %1359 = vmatmul.mubr.bf16.vlgmr.msra.gmra.mrb[8].mxu1 %v723_v5  ;;  %945 = vmatprep.mubr.bf16.mxu0 %v1484_v56 }
 0x3b8   : > { %1362 = vmatprep.mubr.bf16.mxu1 %v724_v9 }
 0x3be   : > { %946 = vmatmul.mubr.bf16.gmra.mrb[8].mxu0 %v723_v5 }
 0x3bf   : > { %1363 = vmatmul.mubr.bf16.gmra.mrb[12].mxu1 %v725_v13  ;;  %955 = vmatprep.mubr.bf16.mxu0 %v1484_v56 }
 0x3c6   : > { %956 = vmatmul.mubr.bf16.gmra.mrb[12].mxu0 %v724_v9 }
 0x3c7   : > { %965 = vmatprep.mubr.bf16.mxu0 %v1484_v56 }
 0x3ce   : > { %966 = vmatmul.mubr.bf16.gmra.mrb[16].mxu0 %v725_v13 }
 0x489   : > { %v937_v30 = vpop.f32.mrb[4].mxu0 }
 0x48a   : > { %v938_v31 = vadd.f32 %v937_v30, %v1825_v27  ;;  %v939_v32 = vpop.f32.mrb[5].mxu0  ;;  %v1360_v57 = vpop.f32.mrb[8].mxu1 }
 0x48b   : > { %v940_v58 = vadd.f32 %v939_v32, %v1827_v28  ;;  %v1019_v6 = vadd.f32 %v1360_v57, %v771_v29  ;;  %v941_v3 = vpop.f32.mrb[6].mxu0  ;;  %v1010_v12 = vpop.f32.mrb[9].mxu1 }
 0x48c   : > { %1041 = vst [vmem:[%s1832_s14] sm:$0xff] %v938_v31  ;;  %v942_v33 = vadd.f32 %v941_v3, %v1825_v27  ;;  %v1011_v34 = vadd.f32 %v1010_v12, %v771_v29  ;;  %v943_v35 = vpop.f32.mrb[7].mxu0  ;;  %v1361_v36 = vpop.f32.mrb[10].mxu1 }
 0x48d   : > { %1042 = vst [vmem:[%s1832_s14 + $0x8] sm:$0xff] %v940_v58  ;;  %1049 = vst [vmem:[%s1832_s14 + $0x40] sm:$0xff] %v1019_v6  ;;  %v944_v37 = vadd.f32 %v943_v35, %v1827_v28  ;;  %v1022_v38 = vadd.f32 %v1361_v36, %v771_v29  ;;  %v1013_v39 = vpop.f32.mrb[11].mxu1 }
 0x48e   : > { %1044 = vst [vmem:[%s1832_s14 + $0x18] sm:$0xff] %v942_v33  ;;  %1043 = vst [vmem:[%s1832_s14 + $0x10] sm:$0xff] %v1011_v34  ;;  %v1014_v40 = vadd.f32 %v1013_v39, %v771_v29 }
 0x48f   : > { %1045 = vst [vmem:[%s1832_s14 + $0x20] sm:$0xff] %v944_v37  ;;  %1052 = vst [vmem:[%s1832_s14 + $0x58] sm:$0xff] %v1022_v38 }
 0x490   : > { %1046 = vst [vmem:[%s1832_s14 + $0x28] sm:$0xff] %v1014_v40 }
 0x491   : > { %v947_v41 = vpop.f32.mrb[8].mxu0 }
 0x492   : > { %v948_v42 = vadd.f32 %v947_v41, %v1825_v27  ;;  %v949_v43 = vpop.f32.mrb[9].mxu0  ;;  %v1364_v44 = vpop.f32.mrb[12].mxu1 }
 0x493   : > { %v950_v45 = vadd.f32 %v949_v43, %v1827_v28  ;;  %v1035_v46 = vadd.f32 %v1364_v44, %v771_v29  ;;  %v951_v47 = vpop.f32.mrb[10].mxu0  ;;  %v1026_v48 = vpop.f32.mrb[13].mxu1 }
 0x494   : > { %1047 = vst [vmem:[%s1832_s14 + $0x30] sm:$0xff] %v948_v42  ;;  %v952_v49 = vadd.f32 %v951_v47, %v1825_v27  ;;  %v1027_v50 = vadd.f32 %v1026_v48, %v771_v29  ;;  %v953_v51 = vpop.f32.mrb[11].mxu0  ;;  %v1365_v52 = vpop.f32.mrb[14].mxu1 }
 0x495   : > { %1048 = vst [vmem:[%s1832_s14 + $0x38] sm:$0xff] %v950_v45  ;;  %1061 = vst [vmem:[%s1832_s14 + $0xa0] sm:$0xff] %v1035_v46  ;;  %v954_v53 = vadd.f32 %v953_v51, %v1827_v28  ;;  %v1038_v54 = vadd.f32 %v1365_v52, %v771_v29  ;;  %v1029_v55 = vpop.f32.mrb[15].mxu1 }
 0x496   : > { %1050 = vst [vmem:[%s1832_s14 + $0x48] sm:$0xff] %v952_v49  ;;  %1055 = vst [vmem:[%s1832_s14 + $0x70] sm:$0xff] %v1027_v50  ;;  %v1030_v56 = vadd.f32 %v1029_v55, %v771_v29 }
 0x497   : > { %1051 = vst [vmem:[%s1832_s14 + $0x50] sm:$0xff] %v954_v53  ;;  %1064 = vst [vmem:[%s1832_s14 + $0xb8] sm:$0xff] %v1038_v54 }
 0x498   : > { %1058 = vst [vmem:[%s1832_s14 + $0x88] sm:$0xff] %v1030_v56 }
 0x499   : > { %v957_v59 = vpop.f32.mrb[12].mxu0 }
 0x49a   : > { %v958_v60 = vadd.f32 %v957_v59, %v1825_v27  ;;  %v959_v61 = vpop.f32.mrb[13].mxu0 }
 0x49b   : > { %v960_v2 = vadd.f32 %v959_v61, %v1827_v28  ;;  %v961_v4 = vpop.f32.mrb[14].mxu0 }
 0x49c   : > { %1053 = vst [vmem:[%s1832_s14 + $0x60] sm:$0xff] %v958_v60  ;;  %v962_v7 = vadd.f32 %v961_v4, %v1825_v27  ;;  %v963_v8 = vpop.f32.mrb[15].mxu0 }
 0x49d   : > { %1054 = vst [vmem:[%s1832_s14 + $0x68] sm:$0xff] %v960_v2  ;;  %v964_v10 = vadd.f32 %v963_v8, %v1827_v28 }
 0x49e   : > { %1056 = vst [vmem:[%s1832_s14 + $0x78] sm:$0xff] %v962_v7 }
 0x49f   : > { %1057 = vst [vmem:[%s1832_s14 + $0x80] sm:$0xff] %v964_v10 }
 0x4a1   : > { %v967_v11 = vpop.f32.mrb[16].mxu0 }
 0x4a2   : > { %v968_v14 = vadd.f32 %v967_v11, %v1825_v27  ;;  %v969_v15 = vpop.f32.mrb[17].mxu0 }
 0x4a3   : > { %v970_v17 = vadd.f32 %v969_v15, %v1827_v28  ;;  %v971_v18 = vpop.f32.mrb[18].mxu0 }
 0x4a4   : > { %1059 = vst [vmem:[%s1832_s14 + $0x90] sm:$0xff] %v968_v14  ;;  %v972_v19 = vadd.f32 %v971_v18, %v1825_v27  ;;  %v973_v62 = vpop.f32.mrb[19].mxu0 }
 0x4a5   : > { %1060 = vst [vmem:[%s1832_s14 + $0x98] sm:$0xff] %v970_v17  ;;  %v974_v20 = vadd.f32 %v973_v62, %v1827_v28 }
 0x4a6   : > { %1062 = vst [vmem:[%s1832_s14 + $0xa8] sm:$0xff] %v972_v19 }
 0x4a7   : > { %1063 = vst [vmem:[%s1832_s14 + $0xb0] sm:$0xff] %v974_v20 }
 0x4a8 PF: > { %s19_s27 = sadd.s32 1, %s1479_s27  }
 0x4a9   : > { %p16_p4 = scmp.ge.s32.totalorder %s19_s27, 4  }
 0x4ab   :  { %18 = sbr.rel (!%p16_p4) target bundleno = 1 (0x1), region = 90 }

// kernel: _lambda_.14
= control target key start
LH: loop header
LB: loop body
LE: loop exit
PB: predicated region body
PF: predicated region fallthrough
CT: control target
= control target key end

     0   :  { %s3550_s27 = smov 0   ;;  %s4474_s0 = inlined_call_operand.vmem [shape: f32[2,10,10,128], index: 0, kind: input, shape index: {}]   ;;  %s4475_s1 = inlined_call_operand.vmem [shape: f32[1,128], index: 1, kind: input, shape index: {}]   ;;  %s4476_s2 = inlined_call_operand.vmem [shape: f32[1,128], index: 2, kind: input, shape index: {}]   ;;  %s4477_s3 = inlined_call_operand.vmem [shape: f32[128,32], index: 3, kind: input, shape index: {}]   ;;  %s4478_s4 = inlined_call_operand.vmem [shape: f32[32,128], index: 4, kind: input, shape index: {}]   ;;  %s4479_s5 = inlined_call_operand.vmem [shape: bf16[9,128,128], index: 5, kind: input, shape index: {}]   ;;  %s4480_s6 = inlined_call_operand.vmem [shape: f32[1,128], index: 6, kind: input, shape index: {}]   ;;  %s4481_s7 = inlined_call_operand.vmem [shape: f32[2,64,128], index: 7, kind: input, shape index: {}]   ;;  %s4482_s8 = inlined_call_operand.vmem [shape: f32[2,64,128], index: 8, kind: output, shape index: {}]  }
   0x1 LB: > { %s2484_s28 = sadd.s32 4294967295, %s3499_s27   ;;  %p2488_p0 = scmp.ge.s32.totalorder %s3499_s27, 1  ;;  %s3499_s27 = sphi %s3550_s27, %s18_s27  }
   0x2   : > { %p272_p1 = scmp.lt.s32.totalorder %s3499_s27, 3 }
   0x4   : > { %p273_p2 = pnand %p2488_p0, %p272_p1 }
   0x5   : > { %v399_v0 = vld [vmem:[%s4477_s3] sm:$0xff] (!%p273_p2)  ;;  %v400_v1 = vld [vmem:[%s4477_s3 + $0x8] sm:$0xff] (!%p273_p2)  ;;  %v401_v2 = vld [vmem:[%s4477_s3 + $0x10] sm:$0xff] (!%p273_p2)  ;;  %v3501_v3 = vmov (!%p273_p2), 0.0|0.0   ;;  %vm3502_vm0 = vmmov (!%p273_p2), 0   ;;  %v3503_v6 = vmov (!%p273_p2), 0.0  }
   0x6   : > { %276 = sbr.rel (%p273_p2) target bundleno = 1394 (0x572), region = 52  ;;  %3182 = vmatprep.subr.bf16.mxu1 (!%p273_p2), %v3501_v3  ;;  %v3568_v4 = vpack.c.bf16 (!%p273_p2), %v400_v1, %v399_v0  ;;  %v402_v5 = vld [vmem:[%s4477_s3 + $0x18] sm:$0xff] (!%p273_p2)  ;;  %2906 = vmatprep.mubr.msk.f32.mxu1 (!%p273_p2), %vm3502_vm0, %v3503_v6  ;;  %1023 = vst [vmem:[#allocation2] sm:$0xff] (!%p273_p2), %v3503_v6  ;;  %1024 = vst [vmem:[#allocation2 + $0x8] sm:$0x3] (!%p273_p2), %v3503_v6  ;;  %p311_p3 = scmp.lt.s32.totalorder (!%p273_p2), %s2484_s28, 1 }
   0x7   : > { %1041 = vst [vmem:[#allocation2 + $0x90] sm:$0xff] (!%p273_p2), %v3503_v6  ;;  %1042 = vst [vmem:[#allocation2 + $0x98] sm:$0x3] (!%p273_p2), %v3503_v6  ;;  %v3580_v7 = vpack.c.bf16 (!%p273_p2), %v402_v5, %v401_v2  ;;  %v403_v8 = vld [vmem:[%s4477_s3 + $0x20] sm:$0xff] (!%p273_p2)  ;;  %v404_v9 = vld [vmem:[%s4477_s3 + $0x28] sm:$0xff] (!%p273_p2)  ;;  %vm371_vm1 = vcmask (!%p273_p2), 1041408  }
   0x8   : > { %3184 = vmatpush3.bf16.msra.mxu1 (!%p273_p2), %v3568_v4  ;;  %v405_v10 = vld [vmem:[%s4477_s3 + $0x30] sm:$0xff] (!%p273_p2)  ;;  %v406_v11 = vld [vmem:[%s4477_s3 + $0x38] sm:$0xff] (!%p273_p2)  ;;  %v3599_v12 = vpack.c.bf16 (!%p273_p2), %v404_v9, %v403_v8  ;;  %v407_v13 = vld [vmem:[%s4477_s3 + $0x40] sm:$0xff] (!%p273_p2)  ;;  %vm490_vm2 = vcmask (!%p273_p2), 261120   ;;  %vm3504_vm6 = vmmov (!%p273_p2), 1  }
   0x9   : > { %3185 = vmatprep.subr.bf16.mxu1 (!%p273_p2), %v3501_v3  ;;  %v408_v22 = vld [vmem:[%s4477_s3 + $0x48] sm:$0xff] (!%p273_p2)  ;;  %v3640_v27 = vpack.c.bf16 (!%p273_p2), %v406_v11, %v405_v10  ;;  %v409_v41 = vld [vmem:[%s4477_s3 + $0x50] sm:$0xff] (!%p273_p2)  ;;  %v410_v42 = vld [vmem:[%s4477_s3 + $0x58] sm:$0xff] (!%p273_p2) }
   0xa   : > { %v3658_v35 = vpack.c.bf16 (!%p273_p2), %v408_v22, %v407_v13  ;;  %v411_v56 = vld [vmem:[%s4477_s3 + $0x60] sm:$0xff] (!%p273_p2)  ;;  %v412_v57 = vld [vmem:[%s4477_s3 + $0x68] sm:$0xff] (!%p273_p2)  ;;  %v3198_v59 = vpack.c.bf16 (!%p273_p2), %v410_v42, %v409_v41  ;;  %v413_v1 = vld [vmem:[%s4477_s3 + $0x70] sm:$0xff] (!%p273_p2) }
   0xb   : > { %v414_v2 = vld [vmem:[%s4477_s3 + $0x78] sm:$0xff] (!%p273_p2)  ;;  %v3201_v5 = vpack.c.bf16 (!%p273_p2), %v412_v57, %v411_v56  ;;  %v488_v41 = vld [vmem:[%s4478_s4 + $0x10] sm:$0xff] (!%p273_p2) }
   0xc   : > { %3187 = vmatpush3.bf16.msra.mxu1 (!%p273_p2), %v3580_v7  ;;  %v3204_v13 = vpack.c.bf16 (!%p273_p2), %v414_v2, %v413_v1  ;;  %v489_v42 = vld [vmem:[%s4478_s4 + $0x18] sm:$0xff] (!%p273_p2) }
   0xd   : > { %s4486_s28 = smov (!%p311_p3, %s2484_s28), 1  ;;  %3188 = vmatprep.subr.bf16.mxu1 %v3501_v3 }
   0xe   : > { %s3306_s19 = smul.u32 160, %s4486_s28 }
  0x10   : > { %s3604_s26 = scalar_lea.vmem %s4474_s0, %s3306_s19  ;;  %3190 = vmatpush3.bf16.msra.mxu1 %v3599_v12  ;;  %s2720_s19 = sshll.u32 %s4486_s28, 6 }
  0x11   : > { %v327_v14 = vld [vmem:[%s3604_s26] sm:$0xff]  ;;  %v328_v15 = vld [vmem:[%s3604_s26 + $0x8] sm:$0x3]  ;;  %v3613_v16 = vld [vmem:[%s3604_s26 + $0x10] sm:$0xff]  ;;  %3191 = vmatprep.subr.bf16.mxu1 %v3501_v3  ;;  %s4445_s22 = scalar_lea.vmem %s4481_s7, %s2720_s19 }
  0x12   : > { %v3616_v17 = vld [vmem:[%s3604_s26 + $0x18] sm:$0x3]  ;;  %v3619_v18 = vld [vmem:[%s3604_s26 + $0x20] sm:$0xff]  ;;  %v3622_v19 = vld [vmem:[%s3604_s26 + $0x28] sm:$0x3]  ;;  %v362_v20 = vadd.f32 %v3613_v16, %v327_v14  ;;  %v372_v21 = vsel %vm371_vm1, %v328_v15, 0.0 }
  0x13   : > { %v3630_v23 = vld [vmem:[%s3604_s26 + $0x30] sm:$0xff]  ;;  %v3633_v24 = vld [vmem:[%s3604_s26 + $0x38] sm:$0x3]  ;;  %v373_v25 = vsel %vm371_vm1, %v3616_v17, 0.0  ;;  %v375_v26 = vsel %vm371_vm1, %v3622_v19, 0.0  ;;  %v3651_v32 = vld [vmem:[%s3604_s26 + $0x40] sm:$0xff] }
  0x14   : > { %v3643_v28 = vld [vmem:[%s3604_s26 + $0x48] sm:$0x3]  ;;  %v3646_v29 = vld [vmem:[%s3604_s26 + $0x58] sm:$0x3]  ;;  %v363_v30 = vadd.f32 %v362_v20, %v3619_v18  ;;  %v374_v31 = vadd.f32 %v373_v25, %v372_v21  ;;  %v377_v34 = vsel %vm371_vm1, %v3633_v24, 0.0  ;;  %v3661_v36 = vld [vmem:[%s3604_s26 + $0x50] sm:$0xff]  ;;  %3193 = vmatpush3.bf16.msra.mxu1 %v3640_v27 }
  0x15   : > { %v3654_v33 = vld [vmem:[%s3604_s26 + $0x68] sm:$0x3]  ;;  %v3664_v37 = vld [vmem:[%s3604_s26 + $0x78] sm:$0x3]  ;;  %v3677_v43 = vld [vmem:[%s3604_s26 + $0x60] sm:$0xff]  ;;  %v379_v45 = vsel %vm371_vm1, %v3643_v28, 0.0  ;;  %3194 = vmatprep.subr.bf16.mxu1 %v3501_v3 }
  0x16   : > { %v3667_v38 = vld [vmem:[%s3604_s26 + $0x88] sm:$0x3]  ;;  %v364_v39 = vadd.f32 %v363_v30, %v3630_v23  ;;  %v376_v40 = vadd.f32 %v375_v26, %v374_v31  ;;  %v346_v44 = vld [vmem:[%s3604_s26 + $0x98] sm:$0x3]  ;;  %v381_v46 = vsel %vm371_vm1, %v3646_v29, 0.0  ;;  %v383_v47 = vsel %vm371_vm1, %v3654_v33, 0.0 }
  0x17   : > { %v385_v48 = vsel %vm371_vm1, %v3664_v37, 0.0  ;;  %v387_v51 = vsel %vm371_vm1, %v3667_v38, 0.0  ;;  %v389_v52 = vsel %vm371_vm1, %v346_v44, 0.0  ;;  %v3695_v53 = vld [vmem:[%s3604_s26 + $0x70] sm:$0xff]  ;;  %v3705_v58 = vld [vmem:[%s3604_s26 + $0x80] sm:$0xff]  ;;  %v487_v30 = vld [vmem:[%s4478_s4 + $0x8] sm:$0xff]  ;;  %v3741_v44 = vpack.c.bf16 %v489_v42, %v488_v41 }
  0x18   : > { %v365_v49 = vadd.f32 %v364_v39, %v3651_v32  ;;  %v378_v50 = vadd.f32 %v377_v34, %v376_v40  ;;  %3196 = vmatpush3.bf16.msra.mxu1 %v3658_v35  ;;  %v345_v62 = vld [vmem:[%s3604_s26 + $0x90] sm:$0xff]  ;;  %v486_v26 = vld [vmem:[%s4478_s4] sm:$0xff]  ;;  %s4455_s26 = scalar_lea.vmem %s4482_s8, %s2720_s19 }
  0x19   : > { %3197 = vmatprep.subr.bf16.mxu1 %v3501_v3  ;;  %v3729_v39 = vpack.c.bf16 %v487_v30, %v486_v26 }
  0x1a   : > { %v366_v54 = vadd.f32 %v365_v49, %v3661_v36  ;;  %v380_v55 = vadd.f32 %v379_v45, %v378_v50 }
  0x1c   : > { %v367_v60 = vadd.f32 %v366_v54, %v3677_v43  ;;  %v382_v61 = vadd.f32 %v381_v46, %v380_v55  ;;  %3199 = vmatpush3.bf16.msra.mxu1 %v3198_v59 }
  0x1d   : > { %3200 = vmatprep.subr.bf16.mxu1 %v3501_v3 }
  0x1e   : > { %v368_v63 = vadd.f32 %v367_v60, %v3695_v53  ;;  %v384_v0 = vadd.f32 %v383_v47, %v382_v61 }
  0x20   : > { %v369_v8 = vadd.f32 %v368_v63, %v3705_v58  ;;  %v386_v9 = vadd.f32 %v385_v48, %v384_v0  ;;  %3202 = vmatpush3.bf16.msra.mxu1 %v3201_v5 }
  0x21   : > { %3203 = vmatprep.subr.bf16.mxu1 %v3501_v3 }
  0x22   : > { %v388_v10 = vadd.f32 %v387_v51, %v386_v9  ;;  %v370_v11 = vadd.f32 %v369_v8, %v345_v62 }
  0x24   : > { %v390_v14 = vadd.f32 %v389_v52, %v388_v10  ;;  %3205 = vmatpush3.bf16.msra.mxu1 %v3204_v13 }
  0x25   : > { %3206 = vmatprep.subr.bf16.mxu1 %v3501_v3 }
  0x26   : > { %v391_v15 = vsel %vm371_vm1, %v390_v14, 0.0 }
  0x27   : > { %v392_v20 = vadd.f32 %v391_v15, %v370_v11 }
  0x29   : > { %v393_v21 = vrot.slane %v392_v20, 4 }
  0x2b   : > { %v394_v22 = vadd.f32 %v393_v21, %v392_v20 }
  0x2d   : > { %v395_v25 = vrot.slane %v394_v22, 2 }
  0x2f   : > { %v396_v31 = vadd.f32 %v395_v25, %v394_v22 }
  0x31   : > { %v397_v34 = vrot.slane %v396_v31, 1 }
  0x33   : > { %v398_v40 = vadd.f32 %v397_v34, %v396_v31 }
  0x35   : > { %2907 = vmatmul.mubr.f32.vlgmr.msra.gmra.mrb[0].mxu1 %v398_v40 }
  0x36   : > { %3208 = vmatpush3.bf16.msra.mxu1 %v3729_v39  ;;  %2917 = vmatprep.mubr.msk.f32.mxu1 %vm3502_vm0, %v3503_v6 }
  0x37   : > { %3209 = vmatprep.subr.bf16.mxu1 %v3501_v3 }
  0x3a   : > { %3211 = vmatpush3.bf16.msra.mxu1 %v3741_v44 }
  0x3b   : > { %3212 = vmatprep.subr.bf16.mxu1 %v3501_v3 }
 0x108   : > { %v481_v45 = vpop.f32.mrb[0].mxu1 }
 0x109   : > { %v485_v46 = vmul.f32 0.00390625, %v481_v45  ;;  %v2908_v47 = vpop.f32.mrb[1].mxu1 }
 0x10b   : > { %2918 = vmatmul.mubr.msk.f32.vlgmr.msra.gmra.mrb[2].mxu1 %vm490_vm2, %v485_v46 }
 0x10c   : > { %3214 = vmatpush3.bf16.msra.mxu1 %v3568_v4  ;;  %2952 = vmatprep.mubr.msk.f32.mxu1 %vm3502_vm0, %v3503_v6  ;;  %v347_v4 = vlaneseq }
 0x10d   : > { %3215 = vmatprep.subr.bf16.mxu1 %v3501_v3 }
 0x110   : > { %3217 = vmatpush3.bf16.msra.mxu1 %v3580_v7  ;;  %v3761_v7 = vshrl.u32 %v347_v4, 7 }
 0x111   : > { %3218 = vmatprep.subr.bf16.mxu1 %v3501_v3 }
 0x112   : > { %v3765_v48 = vadd.s32 8, %v3761_v7  ;;  %vm350_vm3 = vcmp.ge.s32.totalorder %v3761_v7, 1 }
 0x113   : > { %vm4115_vm5 = vmpackc.low %vm350_vm3, %vm350_vm3 }
 0x114   : > { %3220 = vmatpush3.bf16.msra.mxu1 %v3599_v12  ;;  %v566_v12 = vsub.s32 0, %v3761_v7  ;;  %vm357_vm4 = vcmp.le.s32.totalorder %v3765_v48, 8  ;;  %vm3469_vm7 = vmpackc.low %vm350_vm3, %vm3504_vm6  ;;  %v3379_v7 = vld [vmem:[%s4479_s5 + $0x1e8] sm:$0xff]  }
 0x115   : > { %3221 = vmatprep.subr.bf16.mxu1 %v3501_v3  ;;  %vm3490_vm8 = vmpackc.low %vm3504_vm6, %vm350_vm3 }
 0x118   : > { %3223 = vmatpush3.bf16.msra.mxu1 %v3640_v27 }
 0x119   : > { %3224 = vmatprep.subr.bf16.mxu1 %v3501_v3 }
 0x11c   : > { %3226 = vmatpush3.bf16.msra.mxu1 %v3658_v35 }
 0x11d   : > { %3227 = vmatprep.subr.bf16.mxu1 %v3501_v3 }
 0x120   : > { %3229 = vmatpush3.bf16.msra.mxu1 %v3198_v59 }
 0x121   : > { %3230 = vmatprep.subr.bf16.mxu1 %v3501_v3 }
 0x124   : > { %3232 = vmatpush3.bf16.msra.mxu1 %v3201_v5 }
 0x125   : > { %3233 = vmatprep.subr.bf16.mxu1 %v3501_v3 }
 0x128   : > { %3235 = vmatpush3.bf16.msra.mxu1 %v3204_v13 }
 0x129   : > { %3236 = vmatprep.subr.bf16.mxu1 %v3501_v3 }
 0x1de   : > { %v560_v27 = vpop.f32.mrb[2].mxu1 }
 0x1df   : > { %v3769_v35 = vrot.slane %v560_v27, %v566_v12  ;;  %v2919_v49 = vpop.f32.mrb[3].mxu1 }
 0x1e1   : > { %v570_v50 = vsub.f32 %v3613_v16, %v3769_v35  ;;  %v571_v51 = vsub.f32 %v3616_v17, %v3769_v35  ;;  %v572_v52 = vsub.f32 %v3619_v18, %v3769_v35  ;;  %v573_v54 = vsub.f32 %v3622_v19, %v3769_v35 }
 0x1e2   : > { %v574_v55 = vsub.f32 %v3630_v23, %v3769_v35  ;;  %v575_v56 = vsub.f32 %v3633_v24, %v3769_v35  ;;  %v577_v16 = vsub.f32 %v3643_v28, %v3769_v35  ;;  %v576_v24 = vsub.f32 %v3651_v32, %v3769_v35 }
 0x1e3   : > { %v3789_v17 = vsel %vm350_vm3, %v570_v50, 0.0  ;;  %v3793_v18 = vsel %vm357_vm4, %v571_v51, 0.0  ;;  %v3797_v19 = vsel %vm350_vm3, %v572_v52, 0.0  ;;  %v3801_v23 = vsel %vm357_vm4, %v573_v54, 0.0 }
 0x1e4   : > { %v579_v28 = vsub.f32 %v3646_v29, %v3769_v35  ;;  %v3809_v57 = vsel %vm350_vm3, %v574_v55, 0.0  ;;  %v3813_v59 = vsel %vm357_vm4, %v575_v56, 0.0  ;;  %v610_v60 = vmul.f32 %v3789_v17, %v3789_v17 }
 0x1e5   : > { %v611_v61 = vmul.f32 %v3793_v18, %v3793_v18  ;;  %v612_v32 = vmul.f32 %v3797_v19, %v3797_v19  ;;  %v613_v29 = vmul.f32 %v3801_v23, %v3801_v23  ;;  %v578_v62 = vsub.f32 %v3661_v36, %v3769_v35 }
 0x1e6   : > { %v581_v63 = vsub.f32 %v3654_v33, %v3769_v35  ;;  %v3829_v0 = vsel %vm357_vm4, %v577_v16, 0.0  ;;  %v580_v1 = vsub.f32 %v3677_v43, %v3769_v35  ;;  %v582_v2 = vsub.f32 %v3695_v53, %v3769_v35 }
 0x1e7   : > { %v615_v5 = vmul.f32 %v3813_v59, %v3813_v59  ;;  %v583_v8 = vsub.f32 %v3664_v37, %v3769_v35  ;;  %v3841_v36 = vsel %vm350_vm3, %v576_v24, 0.0  ;;  %v3845_v33 = vsel %vm357_vm4, %v579_v28, 0.0 }
 0x1e8   : > { %v614_v43 = vmul.f32 %v3809_v57, %v3809_v57  ;;  %v617_v53 = vmul.f32 %v3829_v0, %v3829_v0  ;;  %v629_v9 = vadd.f32 %v612_v32, %v610_v60  ;;  %v638_v10 = vsel %vm371_vm1, %v611_v61, 0.0 }
 0x1e9   : > { %v640_v11 = vsel %vm371_vm1, %v613_v29, 0.0  ;;  %v585_v37 = vsub.f32 %v3667_v38, %v3769_v35  ;;  %v3857_v13 = vsel %vm350_vm3, %v578_v62, 0.0  ;;  %v3861_v14 = vsel %vm357_vm4, %v581_v63, 0.0 }
 0x1ea   : > { %v641_v15 = vadd.f32 %v640_v11, %v638_v10  ;;  %v616_v20 = vmul.f32 %v3841_v36, %v3841_v36  ;;  %v619_v21 = vmul.f32 %v3845_v33, %v3845_v33  ;;  %v630_v22 = vadd.f32 %v629_v9, %v614_v43 }
 0x1eb   : > { %v642_v25 = vsel %vm371_vm1, %v615_v5, 0.0  ;;  %v3870_v38 = vsel %vm350_vm3, %v580_v1, 0.0  ;;  %v3874_v26 = vsel %vm357_vm4, %v583_v8, 0.0  ;;  %v618_v31 = vmul.f32 %v3857_v13, %v3857_v13 }
 0x1ec   : > { %v643_v30 = vadd.f32 %v642_v25, %v641_v15  ;;  %v621_v34 = vmul.f32 %v3861_v14, %v3861_v14  ;;  %v631_v40 = vadd.f32 %v630_v22, %v616_v20  ;;  %v644_v41 = vsel %vm371_vm1, %v617_v53, 0.0  ;;  %v3318_v20 = vld [vmem:[%s4479_s5 + $0x40] sm:$0xff]   ;;  %v3324_v22 = vld [vmem:[%s4479_s5 + $0x58] sm:$0xff]  }
 0x1ed   : > { %v584_v42 = vsub.f32 %v3705_v58, %v3769_v35  ;;  %v3885_v45 = vsel %vm350_vm3, %v582_v2, 0.0  ;;  %v3889_v46 = vsel %vm357_vm4, %v585_v37, 0.0  ;;  %v620_v4 = vmul.f32 %v3870_v38, %v3870_v38  ;;  %v3325_v25 = vld [vmem:[%s4479_s5 + $0xd8] sm:$0xff]  }
 0x1ee   : > { %v645_v47 = vadd.f32 %v644_v41, %v643_v30  ;;  %v623_v27 = vmul.f32 %v3874_v26, %v3874_v26  ;;  %v632_v49 = vadd.f32 %v631_v40, %v618_v31  ;;  %v646_v50 = vsel %vm371_vm1, %v619_v21, 0.0  ;;  %v3323_v21 = vld [vmem:[%s4479_s5 + $0xd0] sm:$0xff]   ;;  %v3326_v30 = vld [vmem:[%s4479_s5 + $0x60] sm:$0xff]   ;;  %v3329_v40 = vld [vmem:[%s4479_s5 + $0xe8] sm:$0xff]  }
 0x1ef   : > { %v622_v58 = vmul.f32 %v3885_v45, %v3885_v45  ;;  %v625_v35 = vmul.f32 %v3889_v46, %v3889_v46  ;;  %v648_v54 = vsel %vm371_vm1, %v621_v34, 0.0  ;;  %v3903_v55 = vsel %vm350_vm3, %v584_v42, 0.0  ;;  %v3327_v31 = vld [vmem:[%s4479_s5 + $0xe0] sm:$0xff]   ;;  %v3328_v34 = vld [vmem:[%s4479_s5 + $0x68] sm:$0xff]   ;;  %v3330_v41 = vld [vmem:[%s4479_s5 + $0x70] sm:$0xff]  }
 0x1f0   : > { %v647_v51 = vadd.f32 %v646_v50, %v645_v47  ;;  %v633_v52 = vadd.f32 %v632_v49, %v620_v4  ;;  %v650_v24 = vsel %vm371_vm1, %v623_v27, 0.0  ;;  %v624_v60 = vmul.f32 %v3903_v55, %v3903_v55  ;;  %v3331_v42 = vld [vmem:[%s4479_s5 + $0xf0] sm:$0xff]   ;;  %v3332_v47 = vld [vmem:[%s4479_s5 + $0x78] sm:$0xff]   ;;  %v3967_v27 = vld [vmem:[%s4479_s5 + $0x100] sm:$0xff]  }
 0x1f1   : > { %v652_v61 = vsel %vm371_vm1, %v625_v35, 0.0  ;;  %v3333_v4 = vld [vmem:[%s4479_s5 + $0xf8] sm:$0xff]   ;;  %v3973_v49 = vld [vmem:[%s4479_s5] sm:$0xff]  }
 0x1f2   : > { %v649_v56 = vadd.f32 %v648_v54, %v647_v51  ;;  %v634_v16 = vadd.f32 %v633_v52, %v622_v58  ;;  %v810_v50 = vld [vmem:[%s4475_s1] sm:$0x1] }
 0x1f3   : > { %v3986_v54 = vld [vmem:[%s4476_s2] ss:$0 sm:$0xff] }
 0x1f4   : > { %v651_v28 = vadd.f32 %v650_v24, %v649_v56  ;;  %v635_v29 = vadd.f32 %v634_v16, %v624_v60 }
 0x1f6   : > { %v653_v32 = vadd.f32 %v652_v61, %v651_v28 }
 0x1f8   : > { %v656_v62 = vsel %vm371_vm1, %v653_v32, 0.0 }
 0x1f9   : > { %v657_v63 = vadd.f32 %v656_v62, %v635_v29 }
 0x1fb   : > { %v658_v1 = vrot.slane %v657_v63, 4 }
 0x1fd   : > { %v659_v2 = vadd.f32 %v658_v1, %v657_v63 }
 0x1ff   : > { %v660_v5 = vrot.slane %v659_v2, 2 }
 0x201   : > { %v661_v8 = vadd.f32 %v660_v5, %v659_v2 }
 0x203   : > { %v662_v43 = vrot.slane %v661_v8, 1 }
 0x205   : > { %v663_v53 = vadd.f32 %v662_v43, %v661_v8 }
 0x207   : > { %2953 = vmatmul.mubr.f32.vlgmr.msra.gmra.mrb[4].mxu1 %v663_v53 }
 0x208   : > { %3238 = vmatpush3.bf16.msra.mxu1 %v3729_v39  ;;  %2963 = vmatprep.mubr.msk.f32.mxu1 %vm3502_vm0, %v3503_v6  ;;  %v3319_v6 = vld [vmem:[%s4479_s5 + $0xc0] sm:$0xff]   ;;  %v3321_v39 = vld [vmem:[%s4479_s5 + $0xc8] sm:$0xff]  }
 0x209   : > { %3239 = vmatprep.subr.bf16.mxu1 %v3501_v3  ;;  %v3320_v3 = vld [vmem:[%s4479_s5 + $0x48] sm:$0xff]   ;;  %3038 = vmatprep.subr.bf16.mxu0 %v3319_v6 }
 0x20a   : > { %3039 = vmatpush3.bf16.msra.mxu0 %v3319_v6 }
 0x20b   : > { %3040 = vmatprep.subr.bf16.mxu0 %v3321_v39 }
 0x20c   : > { %3241 = vmatpush3.bf16.msra.mxu1 %v3741_v44  ;;  %v3322_v44 = vld [vmem:[%s4479_s5 + $0x50] sm:$0xff]  }
 0x20d   : > { %2966 = vmatprep.subr.bf16.mxu1 %v3318_v20 }
 0x20e   : > { %3041 = vmatpush3.bf16.msra.mxu0 %v3321_v39 }
 0x20f   : > { %3042 = vmatprep.subr.bf16.mxu0 %v3323_v21 }
 0x212   : > { %3043 = vmatpush3.bf16.msra.mxu0 %v3323_v21 }
 0x213   : > { %3044 = vmatprep.subr.bf16.mxu0 %v3325_v25 }
 0x216   : > { %3045 = vmatpush3.bf16.msra.mxu0 %v3325_v25 }
 0x217   : > { %3046 = vmatprep.subr.bf16.mxu0 %v3327_v31 }
 0x21a   : > { %3047 = vmatpush3.bf16.msra.mxu0 %v3327_v31 }
 0x21b   : > { %3048 = vmatprep.subr.bf16.mxu0 %v3329_v40 }
 0x21e   : > { %3049 = vmatpush3.bf16.msra.mxu0 %v3329_v40 }
 0x21f   : > { %3050 = vmatprep.subr.bf16.mxu0 %v3331_v42 }
 0x222   : > { %3051 = vmatpush3.bf16.msra.mxu0 %v3331_v42 }
 0x223   : > { %3052 = vmatprep.subr.bf16.mxu0 %v3333_v4 }
 0x226   : > { %3053 = vmatpush3.bf16.msra.mxu0 %v3333_v4 }
 0x227   : > { %3062 = vmatprep.subr.bf16.mxu0 %v3967_v27 }
 0x2da   : > { %v730_v9 = vpop.f32.mrb[4].mxu1 }
 0x2db   : > { %v734_v10 = vmul.f32 0.00390625, %v730_v9  ;;  %v2954_v11 = vpop.f32.mrb[5].mxu1 }
 0x2dd   : > { %v735_v37 = vadd.f32 1e-05, %v734_v10 }
 0x2df   : > { %3390 = vrsqrt.f32 %v735_v37 }
 0x2e9   : > { %v3391_v15 = vpop.eup %3390 }
 0x2ea   : > { %2964 = vmatmul.mubr.msk.f32.vlgmr.msra.gmra.mrb[6].mxu1 %vm490_vm2, %v3391_v15 }
 0x2eb   : > { %2967 = vmatpush3.bf16.msra.mxu1 %v3318_v20 }
 0x2ec   : > { %2968 = vmatprep.subr.bf16.mxu1 %v3320_v3 }
 0x2ef   : > { %2969 = vmatpush3.bf16.msra.mxu1 %v3320_v3 }
 0x2f0   : > { %2970 = vmatprep.subr.bf16.mxu1 %v3322_v44 }
 0x2f3   : > { %2971 = vmatpush3.bf16.msra.mxu1 %v3322_v44 }
 0x2f4   : > { %2972 = vmatprep.subr.bf16.mxu1 %v3324_v22 }
 0x2f7   : > { %2973 = vmatpush3.bf16.msra.mxu1 %v3324_v22 }
 0x2f8   : > { %2974 = vmatprep.subr.bf16.mxu1 %v3326_v30 }
 0x2fb   : > { %2975 = vmatpush3.bf16.msra.mxu1 %v3326_v30 }
 0x2fc   : > { %2976 = vmatprep.subr.bf16.mxu1 %v3328_v34 }
 0x2ff   : > { %2977 = vmatpush3.bf16.msra.mxu1 %v3328_v34 }
 0x300   : > { %2978 = vmatprep.subr.bf16.mxu1 %v3330_v41 }
 0x303   : > { %2979 = vmatpush3.bf16.msra.mxu1 %v3330_v41 }
 0x304   : > { %2980 = vmatprep.subr.bf16.mxu1 %v3332_v47 }
 0x307   : > { %2981 = vmatpush3.bf16.msra.mxu1 %v3332_v47 }
 0x308   : > { %2990 = vmatprep.subr.bf16.mxu1 %v3973_v49 }
 0x3bd   : > { %v806_v51 = vpop.f32.mrb[6].mxu1 }
 0x3be   : > { %v811_v58 = vmul.f32 %v810_v50, %v806_v51  ;;  %v2965_v35 = vpop.f32.mrb[7].mxu1 }
 0x3c0   : > { %v3981_v52 = vrot.slane %v811_v58, %v566_v12 }
 0x3c2   : > { %v818_v56 = vmul.f32 %v3981_v52, %v3789_v17  ;;  %v819_v16 = vmul.f32 %v3981_v52, %v3793_v18  ;;  %v820_v24 = vmul.f32 %v3981_v52, %v3797_v19  ;;  %v821_v28 = vmul.f32 %v3981_v52, %v3801_v23 }
 0x3c3   : > { %v822_v12 = vmul.f32 %v3981_v52, %v3809_v57  ;;  %v823_v60 = vmul.f32 %v3981_v52, %v3813_v59  ;;  %v824_v61 = vmul.f32 %v3981_v52, %v3841_v36  ;;  %v825_v17 = vmul.f32 %v3981_v52, %v3829_v0 }
 0x3c4   : > { %v4005_v18 = vadd.f32 %v3986_v54, %v818_v56  ;;  %v4008_v19 = vadd.f32 %v3986_v54, %v819_v16  ;;  %v4011_v23 = vadd.f32 %v3986_v54, %v820_v24  ;;  %v4014_v57 = vadd.f32 %v3986_v54, %v821_v28 }
 0x3c5   : > { %v4017_v59 = vadd.f32 %v3986_v54, %v822_v12  ;;  %v4020_v36 = vadd.f32 %v3986_v54, %v823_v60  ;;  %v4023_v0 = vadd.f32 %v3986_v54, %v824_v61  ;;  %v826_v32 = vmul.f32 %v3981_v52, %v3857_v13 }
 0x3c6   : > { %v2499_v29 = vmul.f32 -1.442695, %v4005_v18  ;;  %v2500_v62 = vmul.f32 -1.442695, %v4008_v19  ;;  %v2501_v63 = vmul.f32 -1.442695, %v4011_v23  ;;  %v827_v1 = vmul.f32 %v3981_v52, %v3845_v33 }
 0x3c7   : > { %v2502_v2 = vmul.f32 -1.442695, %v4014_v57  ;;  %v4034_v5 = vadd.f32 %v3986_v54, %v825_v17  ;;  %v2503_v8 = vmul.f32 -1.442695, %v4017_v59  ;;  %v2504_v43 = vmul.f32 -1.442695, %v4020_v36 }
 0x3c8   : > { %3392 = vpow2.f32 %v2499_v29  ;;  %v4039_v13 = vadd.f32 %v3986_v54, %v826_v32  ;;  %v4042_v53 = vadd.f32 %v3986_v54, %v827_v1  ;;  %v828_v33 = vmul.f32 %v3981_v52, %v3870_v38 }
 0x3c9   : > { %3394 = vpow2.f32 %v2500_v62  ;;  %v829_v9 = vmul.f32 %v3981_v52, %v3861_v14  ;;  %v2505_v10 = vmul.f32 -1.442695, %v4023_v0  ;;  %v830_v11 = vmul.f32 %v3981_v52, %v3885_v45 }
 0x3ca   : > { %3396 = vpow2.f32 %v2501_v63  ;;  %v2506_v37 = vmul.f32 -1.442695, %v4034_v5  ;;  %v4053_v15 = vadd.f32 %v3986_v54, %v828_v33  ;;  %v2507_v38 = vmul.f32 -1.442695, %v4039_v13 }
 0x3cb   : > { %3398 = vpow2.f32 %v2502_v2  ;;  %v4056_v20 = vadd.f32 %v3986_v54, %v829_v9  ;;  %v4060_v14 = vadd.f32 %v3986_v54, %v830_v11  ;;  %v2508_v6 = vmul.f32 -1.442695, %v4042_v53 }
 0x3cc   : > { %3400 = vpow2.f32 %v2503_v8  ;;  %v2509_v45 = vmul.f32 -1.442695, %v4053_v15  ;;  %v831_v31 = vmul.f32 %v3981_v52, %v3874_v26  ;;  %v832_v50 = vmul.f32 %v3981_v52, %v3903_v55 }
 0x3cd   : > { %3402 = vpow2.f32 %v2504_v43  ;;  %v2510_v3 = vmul.f32 -1.442695, %v4056_v20  ;;  %v2511_v39 = vmul.f32 -1.442695, %v4060_v14  ;;  %v833_v26 = vmul.f32 %v3981_v52, %v3889_v46 }
 0x3ce   : > { %3404 = vpow2.f32 %v2505_v10  ;;  %v4071_v35 = vadd.f32 %v3986_v54, %v831_v31  ;;  %v4076_v55 = vadd.f32 %v3986_v54, %v832_v50 }
 0x3cf   : > { %3406 = vpow2.f32 %v2506_v37  ;;  %v4080_v29 = vadd.f32 %v3986_v54, %v833_v26 }
 0x3d0   : > { %3408 = vpow2.f32 %v2507_v38  ;;  %v2512_v32 = vmul.f32 -1.442695, %v4071_v35  ;;  %v2513_v8 = vmul.f32 -1.442695, %v4076_v55 }
 0x3d1   : > { %3410 = vpow2.f32 %v2508_v6  ;;  %v2514_v9 = vmul.f32 -1.442695, %v4080_v29 }
 0x3d2   : > { %v3393_v44 = vpop.eup %3392  ;;  %3412 = vpow2.f32 %v2509_v45 }
 0x3d3   : > { %v3395_v21 = vpop.eup %3394  ;;  %v925_v22 = vadd.f32 1.0, %v3393_v44  ;;  %3414 = vpow2.f32 %v2510_v3 }
 0x3d4   : > { %v3397_v25 = vpop.eup %3396  ;;  %v926_v30 = vadd.f32 1.0, %v3395_v21  ;;  %3416 = vpow2.f32 %v2511_v39 }
 0x3d5   : > { %v3399_v34 = vpop.eup %3398  ;;  %3418 = vrcp.f32 %v925_v22  ;;  %v927_v40 = vadd.f32 1.0, %v3397_v25 }
 0x3d6   : > { %v3401_v41 = vpop.eup %3400  ;;  %3420 = vrcp.f32 %v926_v30  ;;  %v928_v42 = vadd.f32 1.0, %v3399_v34 }
 0x3d7   : > { %v3403_v47 = vpop.eup %3402  ;;  %3422 = vrcp.f32 %v927_v40  ;;  %v929_v4 = vadd.f32 1.0, %v3401_v41 }
 0x3d8   : > { %v3405_v51 = vpop.eup %3404  ;;  %v930_v58 = vadd.f32 1.0, %v3403_v47  ;;  %3424 = vrcp.f32 %v928_v42  ;;  %v1071_v47 = vld [vmem:[#allocation2 + $0x1] sm:$0xff] }
 0x3d9   : > { %v3407_v56 = vpop.eup %3406  ;;  %3426 = vrcp.f32 %v929_v4  ;;  %v931_v16 = vadd.f32 1.0, %v3405_v51 }
 0x3da   : > { %v3409_v24 = vpop.eup %3408  ;;  %3428 = vrcp.f32 %v930_v58  ;;  %v932_v28 = vadd.f32 1.0, %v3407_v56 }
 0x3db   : > { %v3411_v12 = vpop.eup %3410  ;;  %3430 = vrcp.f32 %v931_v16  ;;  %v933_v60 = vadd.f32 1.0, %v3409_v24 }
 0x3dc   : > { %v3413_v61 = vpop.eup %3412  ;;  %v934_v17 = vadd.f32 1.0, %v3411_v12  ;;  %3432 = vrcp.f32 %v932_v28 }
 0x3dd   : > { %v3415_v46 = vpop.eup %3414  ;;  %3434 = vrcp.f32 %v933_v60  ;;  %v935_v52 = vadd.f32 1.0, %v3413_v61 }
 0x3de   : > { %v3417_v62 = vpop.eup %3416  ;;  %3436 = vrcp.f32 %v934_v17  ;;  %v936_v63 = vadd.f32 1.0, %v3415_v46 }
 0x3df   : > { %v3419_v1 = vpop.eup %3418  ;;  %3438 = vrcp.f32 %v935_v52  ;;  %v937_v2 = vadd.f32 1.0, %v3417_v62 }
 0x3e0   : > { %v3421_v43 = vpop.eup %3420  ;;  %v4084_v33 = vmul.f32 %v3419_v1, %v4005_v18  ;;  %3440 = vpow2.f32 %v2512_v32  ;;  %v3339_v32 = vld [vmem:[%s4479_s5 + $0x110] sm:$0xff]  }
 0x3e1   : > { %v3423_v54 = vpop.eup %3422  ;;  %v986_v10 = vmul.f32 %v3421_v43, %v4008_v19  ;;  %3442 = vrcp.f32 %v936_v63 }
 0x3e2   : > { %v3425_v11 = vpop.eup %3424  ;;  %v1005_v37 = vsel %vm350_vm3, %v4084_v33, 0.0  ;;  %v4092_v38 = vmul.f32 %v3423_v54, %v4011_v23  ;;  %3444 = vrcp.f32 %v937_v2 }
 0x3e3   : > { %v3427_v6 = vpop.eup %3426  ;;  %v1006_v18 = vsel %vm357_vm4, %v986_v10, 0.0  ;;  %1025 = vst [vmem:[#allocation2 + $0x10] sm:$0xff] %v1005_v37  ;;  %v988_v45 = vmul.f32 %v3425_v11, %v4014_v57  ;;  %3446 = vpow2.f32 %v2513_v8  ;;  %v3336_v8 = vld [vmem:[%s4479_s5 + $0x8] sm:$0xff]   ;;  %v3338_v11 = vld [vmem:[%s4479_s5 + $0x10] sm:$0xff]   ;;  %v3343_v37 = vld [vmem:[%s4479_s5 + $0x120] sm:$0xff]  }
 0x3e4   : > { %v3429_v3 = vpop.eup %3428  ;;  %1026 = vst [vmem:[#allocation2 + $0x18] sm:$0x3] %v1006_v18  ;;  %v1007_v19 = vsel %vm350_vm3, %v4092_v38, 0.0  ;;  %v4101_v39 = vmul.f32 %v3427_v6, %v4017_v59  ;;  %3448 = vpow2.f32 %v2514_v9  ;;  %v3341_v9 = vld [vmem:[%s4479_s5 + $0x118] sm:$0xff]  }
 0x3e5   : > { %v3431_v23 = vpop.eup %3430  ;;  %1027 = vst [vmem:[#allocation2 + $0x20] sm:$0xff] %v1007_v19  ;;  %v990_v44 = vmul.f32 %v3429_v3, %v4020_v36  ;;  %v1008_v21 = vsel %vm357_vm4, %v988_v45, 0.0  ;;  %v3458_v36 = vpack.c.bf16 %v4092_v38, %v4084_v33  ;;  %v3340_v18 = vld [vmem:[%s4479_s5 + $0x18] sm:$0xff]   ;;  %v3345_v45 = vld [vmem:[%s4479_s5 + $0x128] sm:$0xff]  }
 0x3e6   : > { %v3433_v22 = vpop.eup %3432  ;;  %v1009_v57 = vsel %vm350_vm3, %v4101_v39, 0.0  ;;  %1028 = vst [vmem:[#allocation2 + $0x28] sm:$0x3] %v1008_v21  ;;  %v4110_v25 = vmul.f32 %v3431_v23, %v4023_v0 }
 0x3e7   : > { %v3435_v30 = vpop.eup %3434  ;;  %3459 = vmatprep.mubr.msk.bf16.mxu0 %vm4115_vm5, %v3458_v36  ;;  %v1010_v31 = vsel %vm357_vm4, %v990_v44, 0.0  ;;  %1029 = vst [vmem:[#allocation2 + $0x30] sm:$0xff] %v1009_v57  ;;  %v992_v0 = vmul.f32 %v3433_v22, %v4034_v5  ;;  %v3337_v5 = vld [vmem:[%s4479_s5 + $0x108] sm:$0xff]   ;;  %v3347_v57 = vld [vmem:[%s4479_s5 + $0x130] sm:$0xff]  }
 0x3e8   : > { %v3437_v34 = vpop.eup %3436  ;;  %1030 = vst [vmem:[#allocation2 + $0x38] sm:$0x3] %v1010_v31  ;;  %v1011_v40 = vsel %vm350_vm3, %v4110_v25, 0.0  ;;  %v4130_v41 = vmul.f32 %v3435_v30, %v4039_v13  ;;  %v3344_v31 = vld [vmem:[%s4479_s5 + $0x28] sm:$0xff]  }
 0x3e9   : > { %v3439_v42 = vpop.eup %3438  ;;  %1031 = vst [vmem:[#allocation2 + $0x40] sm:$0xff] %v1011_v40  ;;  %v994_v4 = vmul.f32 %v3437_v34, %v4042_v53  ;;  %v1012_v50 = vsel %vm357_vm4, %v992_v0, 0.0  ;;  %v3461_v53 = vpack.c.bf16 %v4110_v25, %v4101_v39  ;;  %v3349_v0 = vld [vmem:[%s4479_s5 + $0x138] sm:$0xff]   ;;  %v4242_v40 = vld [vmem:[#allocation2] sm:$0xff] }
 0x3ea   : > { %v3441_v51 = vpop.eup %3440  ;;  %v1013_v58 = vsel %vm350_vm3, %v4130_v41, 0.0  ;;  %1032 = vst [vmem:[#allocation2 + $0x48] sm:$0x3] %v1012_v50  ;;  %v4142_v13 = vmul.f32 %v3439_v42, %v4053_v15  ;;  %v3346_v42 = vld [vmem:[%s4479_s5 + $0x30] sm:$0xff]   ;;  %v3348_v50 = vld [vmem:[%s4479_s5 + $0x38] sm:$0xff]  }
 0x3eb   : > { %v3443_v26 = vpop.eup %3442  ;;  %v4144_v56 = vld [vmem:[#allocation2 + $0x11] sm:$0xff]  ;;  %3462 = vmatmul.mubr.msk.bf16.vlgmr.msra.gmra.mrb[0].mxu0 %vm4115_vm5, %v3461_v53  ;;  %v1014_v16 = vsel %vm357_vm4, %v994_v4, 0.0  ;;  %1033 = vst [vmem:[#allocation2 + $0x50] sm:$0xff] %v1013_v58  ;;  %v938_v24 = vadd.f32 1.0, %v3441_v51  ;;  %v3351_v4 = vld [vmem:[%s4479_s5 + $0x140] sm:$0xff]   ;;  %v3352_v53 = vld [vmem:[%s4479_s5 + $0x88] sm:$0xff]  }
 0x3ec   : > { %v3445_v28 = vpop.eup %3444  ;;  %v1079_v12 = vpack.c.bf16 %v4144_v56, %v1071_v47  ;;  %3063 = vmatpush3.bf16.msra.mxu0 %v3967_v27  ;;  %1034 = vst [vmem:[#allocation2 + $0x58] sm:$0x3] %v1014_v16  ;;  %v1015_v15 = vsel %vm350_vm3, %v4142_v13, 0.0  ;;  %v996_v60 = vmul.f32 %v3443_v26, %v4056_v20  ;;  %v3464_v63 = vpack.c.bf16 %v4142_v13, %v4130_v41  ;;  %v3350_v58 = vld [vmem:[%s4479_s5 + $0x80] sm:$0xff]   ;;  %v3355_v26 = vld [vmem:[%s4479_s5 + $0x150] sm:$0xff]  }
 0x3ed   : > { %v3447_v61 = vpop.eup %3446  ;;  %v4158_v17 = vld [vmem:[#allocation2 + $0x21] sm:$0xff]  ;;  %1035 = vst [vmem:[#allocation2 + $0x60] sm:$0xff] %v1015_v15  ;;  %3064 = vmatprep.subr.bf16.mxu0 %v3337_v5  ;;  %3450 = vrcp.f32 %v938_v24  ;;  %v4164_v46 = vmul.f32 %v3445_v28, %v4060_v14  ;;  %v3470_v47 = vpack.c.bf16 %v4084_v33, %v4242_v40  ;;  %v1327_v16 = vld [vmem:[#allocation2 + $0x12] sm:$0xff]  ;;  %v4280_v28 = vpack.c.bf16 %v4101_v39, %v4092_v38 }
 0x3ee   : > { %v3449_v27 = vpop.eup %3448  ;;  %2982 = vmatprep.mubr.bf16.mxu1 %v1079_v12  ;;  %v1016_v52 = vsel %vm357_vm4, %v996_v60, 0.0  ;;  %v939_v62 = vadd.f32 1.0, %v3447_v61  ;;  %3465 = vmatprep.mubr.msk.bf16.mxu0 %vm4115_vm5, %v3464_v63  ;;  %v1635_v30 = vpack.c.bf16 %v4158_v17, %v4144_v56  ;;  %v3353_v33 = vld [vmem:[%s4479_s5 + $0x148] sm:$0xff]   ;;  %v3357_v15 = vld [vmem:[%s4479_s5 + $0x158] sm:$0xff]   ;;  %v4291_v60 = vpack.c.bf16 %v4130_v41, %v4110_v25  ;;  %v3354_v39 = vld [vmem:[%s4479_s5 + $0x90] sm:$0xff]  }
 0x3ef   : > { %v4168_v20 = vld [vmem:[#allocation2 + $0x31] sm:$0xff]  ;;  %v1017_v1 = vsel %vm350_vm3, %v4164_v46, 0.0  ;;  %1036 = vst [vmem:[#allocation2 + $0x68] sm:$0x3] %v1016_v52  ;;  %v940_v14 = vadd.f32 1.0, %v3449_v27  ;;  %v4276_v24 = vld [vmem:[#allocation2 + $0x22] sm:$0xff] }
 0x3f0   : > { %v4179_v2 = vpack.c.bf16 %v4168_v20, %v4158_v17  ;;  %3065 = vmatpush3.bf16.msra.mxu0 %v3337_v5  ;;  %1037 = vst [vmem:[#allocation2 + $0x70] sm:$0xff] %v1017_v1  ;;  %3452 = vrcp.f32 %v939_v62  ;;  %v1785_v38 = vpack.c.bf16 %v4276_v24, %v1327_v16  ;;  %v1326_v61 = vld [vmem:[#allocation2 + $0x2] sm:$0xff]  ;;  %v3356_v41 = vld [vmem:[%s4479_s5 + $0x98] sm:$0xff]  }
 0x3f1   : > { %v4184_v43 = vld [vmem:[#allocation2 + $0x41] sm:$0xff]  ;;  %3066 = vmatprep.subr.bf16.mxu0 %v3339_v32  ;;  %3454 = vrcp.f32 %v940_v14  ;;  %v1334_v17 = vpack.c.bf16 %v1327_v16, %v1326_v61  ;;  %v3365_v62 = vld [vmem:[%s4479_s5 + $0x178] sm:$0xff]  }
 0x3f2   : > { %2983 = vmatmul.mubr.bf16.vlgmr.msra.gmra.mrb[8].mxu1 %v4179_v2  ;;  %v1636_v5 = vpack.c.bf16 %v4184_v43, %v4168_v20  ;;  %v3359_v25 = vld [vmem:[%s4479_s5 + $0x160] sm:$0xff]   ;;  %v3361_v27 = vld [vmem:[%s4479_s5 + $0x168] sm:$0xff]   ;;  %v3362_v20 = vld [vmem:[%s4479_s5 + $0xb0] sm:$0xff]  }
 0x3f3   : > { %2991 = vmatpush3.bf16.msra.mxu1 %v3973_v49  ;;  %v4191_v54 = vld [vmem:[#allocation2 + $0x51] sm:$0xff]  ;;  %v3358_v52 = vld [vmem:[%s4479_s5 + $0xa0] sm:$0xff]  }
 0x3f4   : > { %v4195_v10 = vpack.c.bf16 %v4191_v54, %v4184_v43  ;;  %2992 = vmatprep.subr.bf16.mxu1 %v3336_v8  ;;  %3067 = vmatpush3.bf16.msra.mxu0 %v3339_v32  ;;  %v4308_v32 = vpack.c.bf16 %v4164_v46, %v4142_v13  ;;  %v3363_v13 = vld [vmem:[%s4479_s5 + $0x170] sm:$0xff]   ;;  %v3366_v63 = vld [vmem:[%s4479_s5 + $0x180] sm:$0xff]  }
 0x3f5   : > { %3068 = vmatprep.subr.bf16.mxu0 %v3341_v9  ;;  %v1329_v1 = vld [vmem:[#allocation2 + $0x32] sm:$0xff]  ;;  %v1780_v14 = vld [vmem:[#allocation2 + $0x42] sm:$0xff] }
 0x3f6   : > { %2986 = vmatprep.mubr.bf16.mxu1 %v4195_v10  ;;  %v1077_v36 = vld [vmem:[#allocation2 + $0x61] sm:$0xff]  ;;  %v1331_v43 = vld [vmem:[#allocation2 + $0x52] sm:$0xff] }
 0x3f7   : > { %v3451_v49 = vpop.eup %3450  ;;  %2993 = vmatpush3.bf16.msra.mxu1 %v3336_v8  ;;  %v1637_v51 = vpack.c.bf16 %v1077_v36, %v4191_v54  ;;  %v3364_v8 = vld [vmem:[%s4479_s5 + $0xb8] sm:$0xff]   ;;  %v1786_v54 = vpack.c.bf16 %v1780_v14, %v1329_v1 }
 0x3f8   : > { %2994 = vmatprep.subr.bf16.mxu1 %v3338_v11  ;;  %v998_v6 = vmul.f32 %v3451_v49, %v4071_v35  ;;  %3069 = vmatpush3.bf16.msra.mxu0 %v3341_v9  ;;  %v3342_v35 = vld [vmem:[%s4479_s5 + $0x20] sm:$0xff]   ;;  %v3368_v49 = vld [vmem:[%s4479_s5 + $0x190] sm:$0xff]  }
 0x3f9   : > { %3070 = vmatprep.subr.bf16.mxu0 %v3343_v37  ;;  %v1782_v9 = vld [vmem:[#allocation2 + $0x62] sm:$0xff] }
 0x3fa   : > { %v3453_v3 = vpop.eup %3452  ;;  %v1018_v19 = vsel %vm357_vm4, %v998_v6, 0.0 }
 0x3fb   : > { %v3455_v23 = vpop.eup %3454  ;;  %1038 = vst [vmem:[#allocation2 + $0x78] sm:$0x3] %v1018_v19  ;;  %2995 = vmatpush3.bf16.msra.mxu1 %v3338_v11  ;;  %v4214_v44 = vmul.f32 %v3453_v3, %v4076_v55  ;;  %v3367_v11 = vld [vmem:[%s4479_s5 + $0x188] sm:$0xff]   ;;  %v4348_v3 = vpack.c.bf16 %v1331_v43, %v1780_v14 }
 0x3fc   : > { %2996 = vmatprep.subr.bf16.mxu1 %v3340_v18  ;;  %3071 = vmatpush3.bf16.msra.mxu0 %v3343_v37  ;;  %v1000_v21 = vmul.f32 %v3455_v23, %v4080_v29  ;;  %v1787_v37 = vpack.c.bf16 %v1782_v9, %v1331_v43  ;;  %v3369_v23 = vld [vmem:[%s4479_s5 + $0x198] sm:$0xff]   ;;  %v2394_v14 = vld [vmem:[%s4445_s22 + $0x8] sm:$0xff] }
 0x3fd   : > { %v1019_v22 = vsel %vm350_vm3, %v4214_v44, 0.0  ;;  %3072 = vmatprep.subr.bf16.mxu0 %v3345_v45  ;;  %v3467_v29 = vpack.c.bf16 %v4214_v44, %v4164_v46  ;;  %v3360_v46 = vld [vmem:[%s4479_s5 + $0xa8] sm:$0xff]   ;;  %v3491_v59 = vpack.c.bf16 %v4242_v40, %v4214_v44  ;;  %v3380_v44 = vld [vmem:[%s4479_s5 + $0x1f0] sm:$0xff]  }
 0x3fe   : > { %1039 = vst [vmem:[#allocation2 + $0x80] sm:$0xff] %v1019_v22  ;;  %v1020_v55 = vsel %vm357_vm4, %v1000_v21, 0.0  ;;  %v3371_v22 = vld [vmem:[%s4479_s5 + $0x1a8] sm:$0xff]  }
 0x3ff   : > { %2997 = vmatpush3.bf16.msra.mxu1 %v3340_v18  ;;  %1040 = vst [vmem:[#allocation2 + $0x88] sm:$0x3] %v1020_v55  ;;  %3468 = vmatmul.mubr.msk.bf16.gmra.mrb[4].mxu0 %vm4115_vm5, %v3467_v29  ;;  %v3373_v55 = vld [vmem:[%s4479_s5 + $0x1b8] sm:$0xff]   ;;  %v3376_v29 = vld [vmem:[%s4479_s5 + $0x1d0] sm:$0xff]   ;;  %v3383_v40 = vld [vmem:[%s4479_s5 + $0x208] sm:$0xff]  }
 0x400   : > { %2998 = vmatprep.subr.bf16.mxu1 %v3342_v35  ;;  %3078 = vmatprep.mubr.bf16.mxu0 %v1635_v30  ;;  %v3374_v30 = vld [vmem:[%s4479_s5 + $0x1c0] sm:$0xff]  }
 0x401   : > { %3073 = vmatpush3.bf16.msra.mxu0 %v3345_v45  ;;  %v4346_v45 = vpack.c.bf16 %v1329_v1, %v4276_v24 }
 0x402   : > { %v1078_v48 = vld [vmem:[#allocation2 + $0x71] sm:$0xff]  ;;  %3074 = vmatprep.subr.bf16.mxu0 %v3347_v57 }
 0x403   : > { %v4240_v34 = vpack.c.bf16 %v1078_v48, %v1077_v36  ;;  %2999 = vmatpush3.bf16.msra.mxu1 %v3342_v35  ;;  %v1333_v6 = vld [vmem:[#allocation2 + $0x72] sm:$0xff]  ;;  %v3370_v35 = vld [vmem:[%s4479_s5 + $0x1a0] sm:$0xff]   ;;  %v3375_v36 = vld [vmem:[%s4479_s5 + $0x1c8] sm:$0xff]  }
 0x404   : > { %3000 = vmatprep.subr.bf16.mxu1 %v3344_v31  ;;  %v4362_v21 = vpack.c.bf16 %v1333_v6, %v1782_v9 }
 0x405   : > { %2987 = vmatmul.mubr.bf16.gmra.mrb[12].mxu1 %v4240_v34  ;;  %3075 = vmatpush3.bf16.msra.mxu0 %v3347_v57  ;;  %v3372_v57 = vld [vmem:[%s4479_s5 + $0x1b0] sm:$0xff]  }
 0x406   : > { %3471 = vmatprep.mubr.msk.bf16.mxu1 %vm3469_vm7, %v3470_v47  ;;  %3076 = vmatprep.subr.bf16.mxu0 %v3349_v0  ;;  %v4271_v56 = vld [vmem:[#allocation2 + $0x81] sm:$0xff]  ;;  %v2085_v47 = vld [vmem:[#allocation2 + $0x91] sm:$0xff] }
 0x407   : > { %3001 = vmatpush3.bf16.msra.mxu1 %v3344_v31  ;;  %v1638_v12 = vpack.c.bf16 %v4271_v56, %v1078_v48  ;;  %v4343_v18 = vld [vmem:[#allocation2 + $0x82] sm:$0xff]  ;;  %v3377_v31 = vld [vmem:[%s4479_s5 + $0x1d8] sm:$0xff]  }
 0x408   : > { %3002 = vmatprep.subr.bf16.mxu1 %v3346_v42  ;;  %v1788_v19 = vpack.c.bf16 %v4343_v18, %v1333_v6  ;;  %v3378_v48 = vld [vmem:[%s4479_s5 + $0x1e0] sm:$0xff]   ;;  %v2399_v6 = vld [vmem:[%s4445_s22 + $0x30] sm:$0xff] }
 0x409   : > { %3077 = vmatpush3.bf16.msra.mxu0 %v3349_v0  ;;  %v3382_v0 = vld [vmem:[%s4479_s5 + $0x200] sm:$0xff]  }
 0x40a   : > { %3086 = vmatprep.subr.bf16.mxu0 %v3351_v4 }
 0x40b   : > { %3003 = vmatpush3.bf16.msra.mxu1 %v3346_v42  ;;  %v3384_v42 = vld [vmem:[%s4479_s5 + $0x210] sm:$0xff]  }
 0x40c   : > { %3004 = vmatprep.subr.bf16.mxu1 %v3348_v50  ;;  %3079 = vmatmul.mubr.bf16.vlgmr.msra.gmra.mrb[0].mxu0 %v1636_v5  ;;  %v3388_v5 = vld [vmem:[%s4479_s5 + $0x230] sm:$0xff]  }
 0x40d   : > { %3082 = vmatprep.mubr.bf16.mxu0 %v1637_v51  ;;  %3087 = vmatpush3.bf16.msra.mxu0 %v3351_v4  ;;  %v2089_v4 = vpack.c.bf16 %v2085_v47, %v4271_v56  ;;  %v2235_v51 = vld [vmem:[#allocation2 + $0x92] sm:$0xff] }
 0x40e   : > { %3088 = vmatprep.subr.bf16.mxu0 %v3353_v33 }
 0x40f   : > { %3005 = vmatpush3.bf16.msra.mxu1 %v3348_v50  ;;  %v3385_v50 = vld [vmem:[%s4479_s5 + $0x218] sm:$0xff]  }
 0x410   : > { %3014 = vmatprep.subr.bf16.mxu1 %v3350_v58 }
 0x411   : > { %3089 = vmatpush3.bf16.msra.mxu0 %v3353_v33  ;;  %v3389_v33 = vld [vmem:[%s4479_s5 + $0x238] sm:$0xff]  }
 0x412   : > { %3474 = vmatmul.mubr.msk.bf16.vlgmr.msra.gmra.mrb[8].mxu1 %vm4115_vm5, %v4280_v28  ;;  %3090 = vmatprep.subr.bf16.mxu0 %v3355_v26 }
 0x413   : > { %3477 = vmatprep.mubr.msk.bf16.mxu1 %vm4115_vm5, %v4291_v60  ;;  %3015 = vmatpush3.bf16.msra.mxu1 %v3350_v58  ;;  %v2239_v58 = vpack.c.bf16 %v2235_v51, %v4343_v18 }
 0x414   : > { %3016 = vmatprep.subr.bf16.mxu1 %v3352_v53  ;;  %3083 = vmatmul.mubr.bf16.gmra.mrb[4].mxu0 %v1638_v12 }
 0x415   : > { %3091 = vmatpush3.bf16.msra.mxu0 %v3355_v26  ;;  %3102 = vmatprep.mubr.bf16.mxu0 %v1785_v38  ;;  %v2717_v38 = vld [vmem:[%s4480_s6] ss:$0 sm:$0xff] }
 0x416   : > { %3092 = vmatprep.subr.bf16.mxu0 %v3357_v15 }
 0x417   : > { %3017 = vmatpush3.bf16.msra.mxu1 %v3352_v53 }
 0x418   : > { %3018 = vmatprep.subr.bf16.mxu1 %v3354_v39 }
 0x419   : > { %3093 = vmatpush3.bf16.msra.mxu0 %v3357_v15 }
 0x41a   : > { %3480 = vmatmul.mubr.msk.bf16.gmra.mrb[12].mxu1 %vm4115_vm5, %v4308_v32  ;;  %3094 = vmatprep.subr.bf16.mxu0 %v3359_v25 }
 0x41b   : > { %3019 = vmatpush3.bf16.msra.mxu1 %v3354_v39  ;;  %3030 = vmatprep.mubr.bf16.mxu1 %v1334_v17 }
 0x41c   : > { %3020 = vmatprep.subr.bf16.mxu1 %v3356_v41 }
 0x41d   : > { %3095 = vmatpush3.bf16.msra.mxu0 %v3359_v25  ;;  %v2395_v25 = vld [vmem:[%s4445_s22 + $0x10] sm:$0xff] }
 0x41e   : > { %3096 = vmatprep.subr.bf16.mxu0 %v3361_v27 }
 0x41f   : > { %3021 = vmatpush3.bf16.msra.mxu1 %v3356_v41 }
 0x420   : > { %3022 = vmatprep.subr.bf16.mxu1 %v3358_v52 }
 0x421   : > { %3097 = vmatpush3.bf16.msra.mxu0 %v3361_v27  ;;  %v2393_v27 = vld [vmem:[%s4445_s22] sm:$0xff] }
 0x422   : > { %3098 = vmatprep.subr.bf16.mxu0 %v3363_v13 }
 0x423   : > { %3023 = vmatpush3.bf16.msra.mxu1 %v3358_v52 }
 0x424   : > { %3024 = vmatprep.subr.bf16.mxu1 %v3360_v46 }
 0x425   : > { %3099 = vmatpush3.bf16.msra.mxu0 %v3363_v13 }
 0x426   : > { %3100 = vmatprep.subr.bf16.mxu0 %v3365_v62 }
 0x427   : > { %3025 = vmatpush3.bf16.msra.mxu1 %v3360_v46 }
 0x428   : > { %3026 = vmatprep.subr.bf16.mxu1 %v3362_v20 }
 0x429   : > { %3101 = vmatpush3.bf16.msra.mxu0 %v3365_v62  ;;  %v2396_v62 = vld [vmem:[%s4445_s22 + $0x18] sm:$0xff] }
 0x42a   : > { %3110 = vmatprep.subr.bf16.mxu0 %v3366_v63 }
 0x42b   : > { %3027 = vmatpush3.bf16.msra.mxu1 %v3362_v20 }
 0x42c   : > { %3028 = vmatprep.subr.bf16.mxu1 %v3364_v8  ;;  %3103 = vmatmul.mubr.bf16.vlgmr.msra.gmra.mrb[0].mxu0 %v1786_v54 }
 0x42d   : > { %3106 = vmatprep.mubr.bf16.mxu0 %v1787_v37  ;;  %3111 = vmatpush3.bf16.msra.mxu0 %v3366_v63 }
 0x42e   : > { %3112 = vmatprep.subr.bf16.mxu0 %v3367_v11 }
 0x42f   : > { %3029 = vmatpush3.bf16.msra.mxu1 %v3364_v8 }
 0x431   : > { %3113 = vmatpush3.bf16.msra.mxu0 %v3367_v11 }
 0x432   : > { %3031 = vmatmul.mubr.bf16.vlgmr.msra.gmra.mrb[8].mxu1 %v4346_v45  ;;  %3114 = vmatprep.subr.bf16.mxu0 %v3368_v49 }
 0x433   : > { %3034 = vmatprep.mubr.bf16.mxu1 %v4348_v3 }
 0x434   : > { %3107 = vmatmul.mubr.bf16.gmra.mrb[4].mxu0 %v1788_v19  ;;  %v2397_v19 = vld [vmem:[%s4445_s22 + $0x20] sm:$0xff] }
 0x435   : > { %3115 = vmatpush3.bf16.msra.mxu0 %v3368_v49  ;;  %3483 = vmatprep.mubr.msk.bf16.mxu0 %vm4115_vm5, %v4280_v28 }
 0x436   : > { %3116 = vmatprep.subr.bf16.mxu0 %v3369_v23 }
 0x439   : > { %3117 = vmatpush3.bf16.msra.mxu0 %v3369_v23 }
 0x43a   : > { %3035 = vmatmul.mubr.bf16.gmra.mrb[12].mxu1 %v4362_v21  ;;  %3118 = vmatprep.subr.bf16.mxu0 %v3370_v35 }
 0x43d   : > { %3119 = vmatpush3.bf16.msra.mxu0 %v3370_v35 }
 0x43e   : > { %3120 = vmatprep.subr.bf16.mxu0 %v3371_v22 }
 0x441   : > { %3121 = vmatpush3.bf16.msra.mxu0 %v3371_v22  ;;  %v2400_v22 = vld [vmem:[%s4445_s22 + $0x38] sm:$0xff] }
 0x442   : > { %3122 = vmatprep.subr.bf16.mxu0 %v3372_v57 }
 0x445   : > { %3123 = vmatpush3.bf16.msra.mxu0 %v3372_v57 }
 0x446   : > { %3124 = vmatprep.subr.bf16.mxu0 %v3373_v55 }
 0x449   : > { %3125 = vmatpush3.bf16.msra.mxu0 %v3373_v55 }
 0x44a   : > { %3134 = vmatprep.subr.bf16.mxu0 %v3374_v30 }
 0x44c   : > { %3486 = vmatmul.mubr.msk.bf16.vlgmr.msra.gmra.mrb[0].mxu0 %vm4115_vm5, %v4291_v60 }
 0x44d   : > { %3489 = vmatprep.mubr.msk.bf16.mxu0 %vm4115_vm5, %v4308_v32  ;;  %3135 = vmatpush3.bf16.msra.mxu0 %v3374_v30 }
 0x44e   : > { %3136 = vmatprep.subr.bf16.mxu0 %v3375_v36 }
 0x451   : > { %3137 = vmatpush3.bf16.msra.mxu0 %v3375_v36  ;;  %v2398_v36 = vld [vmem:[%s4445_s22 + $0x28] sm:$0xff] }
 0x452   : > { %3138 = vmatprep.subr.bf16.mxu0 %v3376_v29 }
 0x454   : > { %3492 = vmatmul.mubr.msk.bf16.gmra.mrb[4].mxu0 %vm3490_vm8, %v3491_v59 }
 0x455   : > { %3139 = vmatpush3.bf16.msra.mxu0 %v3376_v29  ;;  %3150 = vmatprep.mubr.bf16.mxu0 %v4179_v2  ;;  %v3381_v2 = vld [vmem:[%s4479_s5 + $0x1f8] sm:$0xff]  }
 0x456   : > { %3140 = vmatprep.subr.bf16.mxu0 %v3377_v31 }
 0x459   : > { %3141 = vmatpush3.bf16.msra.mxu0 %v3377_v31 }
 0x45a   : > { %3142 = vmatprep.subr.bf16.mxu0 %v3378_v48 }
 0x45d   : > { %3143 = vmatpush3.bf16.msra.mxu0 %v3378_v48 }
 0x45e   : > { %3144 = vmatprep.subr.bf16.mxu0 %v3379_v7 }
 0x461   : > { %3145 = vmatpush3.bf16.msra.mxu0 %v3379_v7 }
 0x462   : > { %3146 = vmatprep.subr.bf16.mxu0 %v3380_v44 }
 0x465   : > { %3147 = vmatpush3.bf16.msra.mxu0 %v3380_v44 }
 0x466   : > { %3148 = vmatprep.subr.bf16.mxu0 %v3381_v2 }
 0x469   : > { %3149 = vmatpush3.bf16.msra.mxu0 %v3381_v2 }
 0x46a   : > { %3158 = vmatprep.subr.bf16.mxu0 %v3382_v0 }
 0x46c   : > { %3151 = vmatmul.mubr.bf16.vlgmr.msra.gmra.mrb[0].mxu0 %v4195_v10  ;;  %v3386_v10 = vld [vmem:[%s4479_s5 + $0x220] sm:$0xff]  }
 0x46d   : > { %3154 = vmatprep.mubr.bf16.mxu0 %v4240_v34  ;;  %3159 = vmatpush3.bf16.msra.mxu0 %v3382_v0  ;;  %v3387_v34 = vld [vmem:[%s4479_s5 + $0x228] sm:$0xff]  }
 0x46e   : > { %3160 = vmatprep.subr.bf16.mxu0 %v3383_v40 }
 0x471   : > { %3161 = vmatpush3.bf16.msra.mxu0 %v3383_v40 }
 0x472   : > { %3162 = vmatprep.subr.bf16.mxu0 %v3384_v42 }
 0x474   : > { %3155 = vmatmul.mubr.bf16.gmra.mrb[4].mxu0 %v2089_v4 }
 0x475   : > { %3163 = vmatpush3.bf16.msra.mxu0 %v3384_v42  ;;  %3174 = vmatprep.mubr.bf16.mxu0 %v4346_v45 }
 0x476   : > { %3164 = vmatprep.subr.bf16.mxu0 %v3385_v50 }
 0x479   : > { %3165 = vmatpush3.bf16.msra.mxu0 %v3385_v50 }
 0x47a   : > { %3166 = vmatprep.subr.bf16.mxu0 %v3386_v10 }
 0x47d   : > { %3167 = vmatpush3.bf16.msra.mxu0 %v3386_v10 }
 0x47e   : > { %3168 = vmatprep.subr.bf16.mxu0 %v3387_v34 }
 0x481   : > { %3169 = vmatpush3.bf16.msra.mxu0 %v3387_v34 }
 0x482   : > { %3170 = vmatprep.subr.bf16.mxu0 %v3388_v5 }
 0x485   : > { %3171 = vmatpush3.bf16.msra.mxu0 %v3388_v5 }
 0x486   : > { %3172 = vmatprep.subr.bf16.mxu0 %v3389_v33 }
 0x489   : > { %3173 = vmatpush3.bf16.msra.mxu0 %v3389_v33 }
 0x48c   : > { %3175 = vmatmul.mubr.bf16.vlgmr.msra.gmra.mrb[0].mxu0 %v4348_v3 }
 0x48d   : > { %3178 = vmatprep.mubr.bf16.mxu0 %v4362_v21 }
 0x494   : > { %3179 = vmatmul.mubr.bf16.gmra.mrb[4].mxu0 %v2239_v58 }
 0x505   : > { %v3032_v26 = vpop.f32.mrb[8].mxu1 }
 0x506   : > { %v1437_v56 = vpop.f32.mrb[9].mxu1 }
 0x507   : > { %v3033_v53 = vpop.f32.mrb[10].mxu1 }
 0x508   : > { %v1440_v16 = vpop.f32.mrb[11].mxu1 }
 0x50d   : > { %v3036_v24 = vpop.f32.mrb[12].mxu1 }
 0x50e   : > { %v1453_v28 = vpop.f32.mrb[13].mxu1 }
 0x50f   : > { %v3037_v12 = vpop.f32.mrb[14].mxu1 }
 0x510   : > { %v1456_v15 = vpop.f32.mrb[15].mxu1 }
 0x55f   : > { %v3176_v60 = vpop.f32.mrb[0].mxu0 }
 0x560   : > { %v3242_v39 = vadd.f32 %v3176_v60, %v3032_v26  ;;  %v2339_v61 = vpop.f32.mrb[1].mxu0 }
 0x561   : > { %v3243_v41 = vadd.f32 %v2339_v61, %v1437_v56  ;;  %v3177_v17 = vpop.f32.mrb[2].mxu0 }
 0x562   : > { %v2387_v32 = vadd.f32 %v3242_v39, %v2717_v38  ;;  %v3244_v52 = vadd.f32 %v3177_v17, %v3033_v53  ;;  %v2342_v13 = vpop.f32.mrb[3].mxu0 }
 0x563   : > { %v2385_v46 = vadd.f32 %v3243_v41, %v2717_v38  ;;  %v3245_v20 = vadd.f32 %v2342_v13, %v1440_v16 }
 0x564   : > { %v2403_v63 = vadd.f32 %v2395_v25, %v2387_v32  ;;  %v2388_v1 = vadd.f32 %v3244_v52, %v2717_v38 }
 0x565   : > { %v2401_v8 = vadd.f32 %v2393_v27, %v2385_v46  ;;  %v2386_v43 = vadd.f32 %v3245_v20, %v2717_v38 }
 0x566   : > { %2411 = vst [vmem:[%s4455_s26 + $0x10] sm:$0xff] %v2403_v63  ;;  %v2404_v9 = vadd.f32 %v2396_v62, %v2388_v1 }
 0x567   : > { %2409 = vst [vmem:[%s4455_s26] sm:$0xff] %v2401_v8  ;;  %v2402_v54 = vadd.f32 %v2394_v14, %v2386_v43  ;;  %v3180_v11 = vpop.f32.mrb[4].mxu0 }
 0x568   : > { %2412 = vst [vmem:[%s4455_s26 + $0x18] sm:$0xff] %v2404_v9  ;;  %v3246_v37 = vadd.f32 %v3180_v11, %v3036_v24  ;;  %v2355_v49 = vpop.f32.mrb[5].mxu0 }
 0x569   : > { %2410 = vst [vmem:[%s4455_s26 + $0x8] sm:$0xff] %v2402_v54  ;;  %v3247_v18 = vadd.f32 %v2355_v49, %v1453_v28  ;;  %v3181_v45 = vpop.f32.mrb[6].mxu0 }
 0x56a   : > { %v2391_v3 = vadd.f32 %v3246_v37, %v2717_v38  ;;  %v3248_v23 = vadd.f32 %v3181_v45, %v3037_v12  ;;  %v2358_v35 = vpop.f32.mrb[7].mxu0 }
 0x56b   : > { %v2389_v21 = vadd.f32 %v3247_v18, %v2717_v38  ;;  %v3249_v57 = vadd.f32 %v2358_v35, %v1456_v15 }
 0x56c   : > { %v2407_v55 = vadd.f32 %v2399_v6, %v2391_v3  ;;  %v2392_v30 = vadd.f32 %v3248_v23, %v2717_v38 }
 0x56d   : > { %v2405_v29 = vadd.f32 %v2397_v19, %v2389_v21  ;;  %v2390_v31 = vadd.f32 %v3249_v57, %v2717_v38 }
 0x56e   : > { %2415 = vst [vmem:[%s4455_s26 + $0x30] sm:$0xff] %v2407_v55  ;;  %v2408_v59 = vadd.f32 %v2400_v22, %v2392_v30 }
 0x56f   : > { %2413 = vst [vmem:[%s4455_s26 + $0x20] sm:$0xff] %v2405_v29  ;;  %v2406_v48 = vadd.f32 %v2398_v36, %v2390_v31 }
 0x570   : > { %2416 = vst [vmem:[%s4455_s26 + $0x38] sm:$0xff] %v2408_v59 }
 0x571   : > { %2414 = vst [vmem:[%s4455_s26 + $0x28] sm:$0xff] %v2406_v48 }
 0x572 PF: > { %s18_s27 = sadd.s32 1, %s3499_s27  }
 0x573   : > { %p15_p4 = scmp.ge.s32.totalorder %s18_s27, 4  }
 0x575   :  { %17 = sbr.rel (!%p15_p4) target bundleno = 1 (0x1), region = 95 }

// kernel: _lambda_.21
= control target key start
LH: loop header
LB: loop body
LE: loop exit
PB: predicated region body
PF: predicated region fallthrough
CT: control target
= control target key end

     0   :  { %9 = vsyncpa [#allocation3], 0  ;;  %s1259_s0 = inlined_call_operand.vmem [shape: f32[2,64,384], index: 0, kind: input, shape index: {}]   ;;  %s1260_s1 = inlined_call_operand.vmem [shape: f32[2,64,128], index: 1, kind: input, shape index: {}]   ;;  %s1261_s2 = inlined_call_operand.vmem [shape: bf16[128,128], index: 2, kind: input, shape index: {}]   ;;  %s1262_s3 = inlined_call_operand.vmem [shape: f32[1,128], index: 3, kind: input, shape index: {}]   ;;  %s1263_s4 = inlined_call_operand.hbm [shape: f32[2,64,128], index: 4, kind: output, shape index: {}]  }
   0x1   :  { %11 = vsyncpa [#allocation3 + $0x1], 0  ;;  %s1034_s15 = smov 0   ;;  %s1036_s16 = smov 0  }
   0x2   :  { %s1038_s17 = smov 0   ;;  %s1040_s18 = smov 0  }
   0x3 LB: > { %s1055_s19 = sadd.s32 4294967295, %s1004_s18   ;;  %s748_s20 = sadd.s32 4294967294, %s1004_s18   ;;  %s1004_s18 = sphi %s1040_s18, %s1269_s18   ;;  %s1000_s17 = sphi %s1038_s17, %s1268_s17   ;;  %s996_s16 = sphi %s1036_s16, %s1267_s16   ;;  %s992_s15 = sphi %s1034_s15, %s1266_s15  }
   0x4   : > { %s1059_s21 = sadd.s32 1, %s1004_s18   ;;  %s118_s22 = sadd.s32 1, %s1000_s17 }
   0x5   : > { %s115_s23 = ssub.s32 %s1004_s18, %s1059_s21  ;;  %p128_p0 = scmp.ne.s32.totalorder %s1000_s17, %s996_s16 }
   0x6   : > { %p116_p1 = scmp.eq.s32.totalorder %s115_s23, 0  ;;  %p129_p2 = scmp.eq.s32.totalorder %s1055_s19, 1 }
   0x7   : > { %p134_p3 = scmp.ne.s32.totalorder %s996_s16, %s992_s15  ;;  %p135_p4 = scmp.eq.s32.totalorder %s748_s20, 1 }
   0x8   : > { %s1070_s24 = scalar_select %p116_p1, %s1000_s17, %s118_s22  }
   0x9   : > { %p1072_p5 = por %p129_p2, %p128_p0  ;;  %p1076_p6 = por %p135_p4, %p134_p3 }
   0xa   : > { %p751_p7 = scmp.ge.s32.totalorder %s1004_s18, 1  ;;  %p175_p8 = scmp.lt.s32.totalorder %s1004_s18, 3 }
   0xc   : > { %p176_p9 = pnand %p751_p7, %p175_p8 }
   0xd   : > { %p206_p10 = scmp.lt.s32.totalorder (!%p176_p9), %s1055_s19, 1  ;;  %vm326_vm0 = vcmask (!%p176_p9), 523264   ;;  %s203_s7 = sand.u32 (!%p176_p9), 1, %s996_s16  }
   0xe   : > { %179 = sbr.rel (%p176_p9) target bundleno = 1058 (0x422), region = 36  ;;  %s752_s13 = sshll.u32 (!%p176_p9), %s203_s7, 6 }
   0xf   : > { %s775_s14 = sshll.u32 (!%p176_p9), %s1055_s19, 10  ;;  %s1006_s30 = smov (!%p176_p9), [#allocation2]  }
  0x15   : > { %s1084_s27 = scalar_select %p206_p10, %s1055_s19, 1 }
  0x16   : > { %s1218_s19 = scalar_lea.sflag [#allocation3], %s203_s7 }
  0x17   : > { %s860_s28 = smul.u32 192, %s1084_s27  ;;  %s774_s6 = sshll.u32 %s1084_s27, 6 }
  0x18   : > { %s1193_s10 = scalar_lea.vmem %s1260_s1, %s774_s6  ;;  %s205_s27 = scalar_lea.vmem [#allocation2], %s752_s13 }
  0x19   : > { %s1090_s5 = scalar_lea.vmem %s1259_s0, %s860_s28  ;;  %s674_s20 = sshll.u32 %s205_s27, 4  ;;  %s1214_s20 = int_to_ptr.vmem [resolvable:$true] %s674_s20 }
  0x1a   : > { %v237_v0 = vld [vmem:[%s1090_s5 + $0x8] sm:$0xff]  ;;  %v238_v1 = vld [vmem:[%s1090_s5 + $0x20] sm:$0xff]  ;;  %v239_v2 = vld [vmem:[%s1090_s5 + $0x38] sm:$0xff]  ;;  %s1212_s28 = scalar_lea.hbm %s1263_s4, %s775_s14  ;;  %s942_s29 = scalar_lea.vmem %s1214_s20, 1024 }
  0x1b   : > { %v245_v3 = vpack.c.bf16 %v238_v1, %v237_v0  ;;  %v240_v4 = vld [vmem:[%s1090_s5 + $0x50] sm:$0xff]  ;;  %v217_v6 = vld [vmem:[%s1090_s5] sm:$0xff]  ;;  %v218_v7 = vld [vmem:[%s1090_s5 + $0x18] sm:$0xff]  ;;  %p943_p11 = scmp.ne.s32.totalorder %s1214_s20, %s942_s29 }
  0x1c   : > { %v246_v5 = vpack.c.bf16 %v240_v4, %v239_v2  ;;  %v225_v8 = vmul.f32 0.088388346, %v217_v6  ;;  %v226_v9 = vmul.f32 0.088388346, %v218_v7  ;;  %v241_v10 = vld [vmem:[%s1090_s5 + $0x68] sm:$0xff]  ;;  %v242_v11 = vld [vmem:[%s1090_s5 + $0x80] sm:$0xff] }
  0x1d   : > { %804 = vmatprep.subr.bf16.mxu0 %v245_v3  ;;  %v247_v13 = vpack.c.bf16 %v242_v11, %v241_v10  ;;  %v243_v14 = vld [vmem:[%s1090_s5 + $0x98] sm:$0xff]  ;;  %v244_v15 = vld [vmem:[%s1090_s5 + $0xb0] sm:$0xff]  ;;  %v220_v18 = vld [vmem:[%s1090_s5 + $0x48] sm:$0xff]  ;;  %p944_p12 = pnand %p943_p11, %p1072_p5 }
  0x1e   : > { %805 = vmatpush3.bf16.xpose.msra.mxu0 %v245_v3  ;;  %v233_v12 = vpack.c.bf16 %v226_v9, %v225_v8  ;;  %v248_v16 = vpack.c.bf16 %v244_v15, %v243_v14  ;;  %v219_v17 = vld [vmem:[%s1090_s5 + $0x30] sm:$0xff]  ;;  %v221_v19 = vld [vmem:[%s1090_s5 + $0x60] sm:$0xff]  ;;  %v222_v20 = vld [vmem:[%s1090_s5 + $0x78] sm:$0xff]  ;;  %v228_v22 = vmul.f32 0.088388346, %v220_v18 }
  0x1f   : > { %806 = vmatprep.subr.bf16.mxu0 %v246_v5  ;;  %v227_v21 = vmul.f32 0.088388346, %v219_v17  ;;  %v229_v23 = vmul.f32 0.088388346, %v221_v19  ;;  %v230_v24 = vmul.f32 0.088388346, %v222_v20  ;;  %p945_p13 = pneg %p944_p12 }
  0x20   : > { %812 = vmatprep.mubr.bf16.mxu0 %v233_v12  ;;  %v223_v27 = vld [vmem:[%s1090_s5 + $0x90] sm:$0xff]  ;;  %v224_v28 = vld [vmem:[%s1090_s5 + $0xa8] sm:$0xff] }
  0x21   : > { %v234_v25 = vpack.c.bf16 %v228_v22, %v227_v21  ;;  %v235_v26 = vpack.c.bf16 %v230_v24, %v229_v23  ;;  %v231_v29 = vmul.f32 0.088388346, %v223_v27  ;;  %v232_v30 = vmul.f32 0.088388346, %v224_v28  ;;  %v249_v24 = vld [vmem:[%s1090_s5 + $0x10] sm:$0xff]  ;;  %v251_v27 = vld [vmem:[%s1090_s5 + $0x40] sm:$0xff] }
  0x22   : > { %v252_v28 = vld [vmem:[%s1090_s5 + $0x58] sm:$0xff] }
  0x23   : > { %v236_v31 = vpack.c.bf16 %v232_v30, %v231_v29  ;;  %v258_v29 = vpack.c.bf16 %v252_v28, %v251_v27  ;;  %v253_v30 = vld [vmem:[%s1090_s5 + $0x70] sm:$0xff]  ;;  %v639_v28 = vld [vmem:[%s1193_s10 + $0x18] sm:$0xff] }
  0x26   : > { %807 = vmatpush3.bf16.xpose.msra.mxu0 %v246_v5 }
  0x27   : > { %808 = vmatprep.subr.bf16.mxu0 %v247_v13 }
  0x2e   : > { %809 = vmatpush3.bf16.xpose.msra.mxu0 %v247_v13 }
  0x2f   : > { %810 = vmatprep.subr.bf16.mxu0 %v248_v16 }
  0x36   : > { %811 = vmatpush3.bf16.xpose.msra.mxu0 %v248_v16 }
  0x3d   : > { %813 = vmatmul.mubr.bf16.vlgmr.msra.gmra.mrb[0].mxu0 %v234_v25  ;;  %v250_v25 = vld [vmem:[%s1090_s5 + $0x28] sm:$0xff] }
  0x3e   : > { %816 = vmatprep.mubr.bf16.mxu0 %v235_v26  ;;  %v257_v26 = vpack.c.bf16 %v250_v25, %v249_v24  ;;  %v636_v25 = vld [vmem:[%s1193_s10] sm:$0xff] }
  0x40   : > { %820 = vmatprep.subr.bf16.mxu1 %v257_v26 }
  0x41   : > { %821 = vmatpush3.bf16.msra.mxu1 %v257_v26 }
  0x42   : > { %822 = vmatprep.subr.bf16.mxu1 %v258_v29 }
  0x45   : > { %817 = vmatmul.mubr.bf16.gmra.mrb[4].mxu0 %v236_v31  ;;  %823 = vmatpush3.bf16.msra.mxu1 %v258_v29  ;;  %v254_v31 = vld [vmem:[%s1090_s5 + $0x88] sm:$0xff] }
 0x110   : > { %v814_v32 = vpop.f32.mrb[0].mxu0 }
 0x111   : > { %v295_v33 = vpop.f32.mrb[1].mxu0  ;;  %v333_v34 = vsel %vm326_vm0, %v814_v32, -inf }
 0x112   : > { %334 = vmax.xlane.f32.xlu1 %v333_v34  ;;  %v815_v35 = vpop.f32.mrb[2].mxu0  ;;  %v327_v36 = vsel %vm326_vm0, %v295_v33, -inf  ;;  %v256_v34 = vld [vmem:[%s1090_s5 + $0xb8] sm:$0xff] }
 0x113   : > { %328 = vmax.xlane.f32.xlu0 %v327_v36  ;;  %v298_v37 = vpop.f32.mrb[3].mxu0  ;;  %v336_v38 = vsel %vm326_vm0, %v815_v35, -inf  ;;  %v902_v36 = vld [vmem:[%s1261_s2] sm:$0xff]  }
 0x114   : > { %v330_v39 = vsel %vm326_vm0, %v298_v37, -inf }
 0x116   : > { %337 = vmax.xlane.f32.xlu1 %v336_v38 }
 0x117   : > { %331 = vmax.xlane.f32.xlu0 %v330_v39 }
 0x118   : > { %v818_v40 = vpop.f32.mrb[4].mxu0 }
 0x119   : > { %v311_v41 = vpop.f32.mrb[5].mxu0  ;;  %v345_v46 = vsel %vm326_vm0, %v818_v40, -inf }
 0x11a   : > { %v819_v42 = vpop.f32.mrb[6].mxu0  ;;  %v339_v43 = vsel %vm326_vm0, %v311_v41, -inf }
 0x11b   : > { %340 = vmax.xlane.f32.xlu0 %v339_v43  ;;  %v314_v44 = vpop.f32.mrb[7].mxu0  ;;  %v348_v47 = vsel %vm326_vm0, %v819_v42, -inf }
 0x11c   : > { %v342_v45 = vsel %vm326_vm0, %v314_v44, -inf }
 0x11d   : > { %343 = vmax.xlane.f32.xlu1 %v342_v45 }
 0x11f   : > { %346 = vmax.xlane.f32.xlu0 %v345_v46 }
 0x121   : > { %349 = vmax.xlane.f32.xlu1 %v348_v47 }
 0x19f   : > { %v335_v48 = vpop.xlane.xlu1 %334 }
 0x1a0   : > { %v353_v49 = vsub.f32 %v814_v32, %v335_v48  ;;  %v329_v50 = vpop.xlane.xlu0 %328  ;;  %v259_v32 = vpack.c.bf16 %v254_v31, %v253_v30 }
 0x1a1   : > { %v351_v51 = vsub.f32 %v295_v33, %v329_v50  ;;  %v255_v33 = vld [vmem:[%s1090_s5 + $0xa0] sm:$0xff]  ;;  %s946_s5 = sshll.u32 %s1006_s30, 4  ;;  %s947_s5 = int_to_ptr.vmem [resolvable:$false] %s946_s5 }
 0x1a2   : > { %v363_v52 = vmul.f32 1.442695, %v353_v49  ;;  %824 = vmatprep.subr.bf16.mxu1 %v259_v32  ;;  %s948_s6 = scalar_lea.vmem %s947_s5, 2048  ;;  %p949_p0 = scmp.lt.s32.totalorder %s1214_s20, %s947_s5 }
 0x1a3   : > { %v359_v53 = vmul.f32 1.442695, %v351_v51  ;;  %v338_v54 = vpop.xlane.xlu1 %337  ;;  %825 = vmatpush3.bf16.msra.mxu1 %v259_v32  ;;  %v637_v32 = vld [vmem:[%s1193_s10 + $0x8] sm:$0xff]  ;;  %p950_p1 = scmp.lt.s32.totalorder %s948_s6, %s942_s29 }
 0x1a4   : > { %v354_v55 = vsub.f32 %v815_v35, %v338_v54  ;;  %v332_v56 = vpop.xlane.xlu0 %331  ;;  %v260_v35 = vpack.c.bf16 %v256_v34, %v255_v33 }
 0x1a5   : > { %910 = vpow2.f32 %v359_v53  ;;  %v352_v57 = vsub.f32 %v298_v37, %v332_v56  ;;  %v903_v56 = vld [vmem:[%s1261_s2 + $0x8] sm:$0xff]   ;;  %p951_p2 = por %p950_p1, %p949_p0 }
 0x1a6   : > { %912 = vpow2.f32 %v363_v52  ;;  %v365_v58 = vmul.f32 1.442695, %v354_v55  ;;  %826 = vmatprep.subr.bf16.mxu1 %v260_v35 }
 0x1a7   : > { %v361_v59 = vmul.f32 1.442695, %v352_v57  ;;  %827 = vmatpush3.bf16.msra.mxu1 %v260_v35  ;;  %p952_p3 = pnand %p951_p2, %p945_p13 }
 0x1a8   : > { %v341_v60 = vpop.xlane.xlu0 %340  ;;  %836 = vmatprep.subr.bf16.mxu1 %v902_v36 }
 0x1a9   : > { %914 = vpow2.f32 %v361_v59  ;;  %v355_v61 = vsub.f32 %v311_v41, %v341_v60 }
 0x1aa   : > { %v344_v62 = vpop.xlane.xlu1 %343  ;;  %916 = vpow2.f32 %v365_v58 }
 0x1ab   : > { %v367_v63 = vmul.f32 1.442695, %v355_v61  ;;  %v356_v0 = vsub.f32 %v314_v44, %v344_v62 }
 0x1ac   : > { %v347_v1 = vpop.xlane.xlu0 %346 }
 0x1ad   : > { %918 = vpow2.f32 %v367_v63  ;;  %v369_v2 = vmul.f32 1.442695, %v356_v0  ;;  %v357_v3 = vsub.f32 %v818_v40, %v347_v1  ;;  %v904_v63 = vld [vmem:[%s1261_s2 + $0x10] sm:$0xff]  }
 0x1ae   : > { %v350_v4 = vpop.xlane.xlu1 %349 }
 0x1af   : > { %v1116_v5 = vpop.eup %910  ;;  %920 = vpow2.f32 %v369_v2  ;;  %v371_v6 = vmul.f32 1.442695, %v357_v3  ;;  %v358_v7 = vsub.f32 %v819_v42, %v350_v4  ;;  %v905_v3 = vld [vmem:[%s1261_s2 + $0x18] sm:$0xff]   ;;  %v906_v4 = vld [vmem:[%s1261_s2 + $0x20] sm:$0xff]  }
 0x1b0   : > { %v375_v8 = vsel %vm326_vm0, %v1116_v5, 0.0  ;;  %v1120_v9 = vpop.eup %912 }
 0x1b1   : > { %922 = vpow2.f32 %v371_v6  ;;  %v373_v10 = vmul.f32 1.442695, %v358_v7  ;;  %376 = vadd.xlane.f32.xlu0 %v375_v8  ;;  %v381_v12 = vsel %vm326_vm0, %v1120_v9, 0.0  ;;  %v908_v6 = vld [vmem:[%s1261_s2 + $0x30] sm:$0xff]   ;;  %v909_v7 = vld [vmem:[%s1261_s2 + $0x38] sm:$0xff]  }
 0x1b3   : > { %v915_v11 = vpop.eup %914  ;;  %924 = vpow2.f32 %v373_v10 }
 0x1b4   : > { %v378_v13 = vsel %vm326_vm0, %v915_v11, 0.0  ;;  %v1125_v14 = vpop.eup %916 }
 0x1b5   : > { %382 = vadd.xlane.f32.xlu0 %v381_v12  ;;  %379 = vadd.xlane.f32.xlu1 %v378_v13  ;;  %v384_v17 = vsel %vm326_vm0, %v1125_v14, 0.0 }
 0x1b7   : > { %v1127_v15 = vpop.eup %918 }
 0x1b8   : > { %v387_v16 = vsel %vm326_vm0, %v1127_v15, 0.0 }
 0x1b9   : > { %v1133_v18 = vpop.eup %920  ;;  %388 = vadd.xlane.f32.xlu0 %v387_v16  ;;  %385 = vadd.xlane.f32.xlu1 %v384_v17 }
 0x1ba   : > { %v390_v21 = vsel %vm326_vm0, %v1133_v18, 0.0 }
 0x1bb   : > { %v1135_v19 = vpop.eup %922 }
 0x1bc   : > { %v393_v20 = vsel %vm326_vm0, %v1135_v19, 0.0 }
 0x1bd   : > { %v1141_v22 = vpop.eup %924  ;;  %394 = vadd.xlane.f32.xlu0 %v393_v20  ;;  %391 = vadd.xlane.f32.xlu1 %v390_v21  ;;  %v760_v20 = vld [vmem:[%s1262_s3] ss:$0 sm:$0xff] }
 0x1be   : > { %v396_v23 = vsel %vm326_vm0, %v1141_v22, 0.0 }
 0x1c1   : > { %397 = vadd.xlane.f32.xlu1 %v396_v23 }
 0x23e   : > { %v377_v37 = vpop.xlane.xlu0 %376 }
 0x23f   : > { %926 = vrcp.f32 %v377_v37 }
 0x242   : > { %v383_v38 = vpop.xlane.xlu0 %382  ;;  %v380_v39 = vpop.xlane.xlu1 %379 }
 0x243   : > { %928 = vrcp.f32 %v380_v39 }
 0x244   : > { %930 = vrcp.f32 %v383_v38  ;;  %v642_v38 = vld [vmem:[%s1193_s10 + $0x30] sm:$0xff] }
 0x246   : > { %v389_v40 = vpop.xlane.xlu0 %388  ;;  %v386_v41 = vpop.xlane.xlu1 %385 }
 0x247   : > { %932 = vrcp.f32 %v386_v41  ;;  %v640_v41 = vld [vmem:[%s1193_s10 + $0x20] sm:$0xff] }
 0x248   : > { %934 = vrcp.f32 %v389_v40 }
 0x249   : > { %v927_v44 = vpop.eup %926 }
 0x24a   : > { %v395_v42 = vpop.xlane.xlu0 %394  ;;  %v392_v43 = vpop.xlane.xlu1 %391  ;;  %v407_v47 = vmul.f32 %v927_v44, %v1116_v5  ;;  %v907_v5 = vld [vmem:[%s1261_s2 + $0x28] sm:$0xff]   ;;  %v643_v44 = vld [vmem:[%s1193_s10 + $0x38] sm:$0xff] }
 0x24b   : > { %936 = vrcp.f32 %v392_v43 }
 0x24c   : > { %938 = vrcp.f32 %v395_v42 }
 0x24d   : > { %v929_v45 = vpop.eup %928 }
 0x24e   : > { %v398_v46 = vpop.xlane.xlu1 %397  ;;  %v408_v48 = vmul.f32 %v929_v45, %v915_v11  ;;  %v931_v49 = vpop.eup %930 }
 0x24f   : > { %940 = vrcp.f32 %v398_v46  ;;  %v409_v52 = vmul.f32 %v931_v49, %v1120_v9 }
 0x250   : > { %v415_v50 = vpack.c.bf16 %v408_v48, %v407_v47  ;;  %v641_v48 = vld [vmem:[%s1193_s10 + $0x28] sm:$0xff] }
 0x251   : > { %v933_v51 = vpop.eup %932 }
 0x252   : > { %828 = vmatprep.mubr.msk.bf16.mxu1 %vm326_vm0, %v415_v50  ;;  %v410_v53 = vmul.f32 %v933_v51, %v1125_v14  ;;  %v935_v54 = vpop.eup %934 }
 0x253   : > { %v411_v59 = vmul.f32 %v935_v54, %v1127_v15 }
 0x254   : > { %v416_v55 = vpack.c.bf16 %v410_v53, %v409_v52 }
 0x255   : > { %v937_v57 = vpop.eup %936 }
 0x256   : > { %v939_v58 = vpop.eup %938  ;;  %829 = vmatmul.mubr.msk.bf16.vlgmr.msra.gmra.mrb[0].mxu1 %vm326_vm0, %v416_v55  ;;  %v412_v60 = vmul.f32 %v937_v57, %v1133_v18 }
 0x257   : > { %837 = vmatpush3.bf16.msra.mxu1 %v902_v36  ;;  %v413_v0 = vmul.f32 %v939_v58, %v1135_v19 }
 0x258   : > { %v417_v62 = vpack.c.bf16 %v412_v60, %v411_v59  ;;  %838 = vmatprep.subr.bf16.mxu1 %v903_v56 }
 0x259   : > { %v941_v61 = vpop.eup %940 }
 0x25a   : > { %v414_v1 = vmul.f32 %v941_v61, %v1141_v22  ;;  %832 = vmatprep.mubr.msk.bf16.mxu1 %vm326_vm0, %v417_v62  ;;  %v638_v22 = vld [vmem:[%s1193_s10 + $0x10] sm:$0xff] }
 0x25b   : > { %839 = vmatpush3.bf16.msra.mxu1 %v903_v56 }
 0x25c   : > { %v418_v2 = vpack.c.bf16 %v414_v1, %v413_v0  ;;  %840 = vmatprep.subr.bf16.mxu1 %v904_v63 }
 0x25e   : > { %833 = vmatmul.mubr.msk.bf16.gmra.mrb[4].mxu1 %vm326_vm0, %v418_v2 }
 0x25f   : > { %841 = vmatpush3.bf16.msra.mxu1 %v904_v63 }
 0x260   : > { %842 = vmatprep.subr.bf16.mxu1 %v905_v3 }
 0x263   : > { %843 = vmatpush3.bf16.msra.mxu1 %v905_v3 }
 0x264   : > { %844 = vmatprep.subr.bf16.mxu1 %v906_v4 }
 0x267   : > { %845 = vmatpush3.bf16.msra.mxu1 %v906_v4 }
 0x268   : > { %846 = vmatprep.subr.bf16.mxu1 %v907_v5 }
 0x26b   : > { %847 = vmatpush3.bf16.msra.mxu1 %v907_v5 }
 0x26c   : > { %848 = vmatprep.subr.bf16.mxu1 %v908_v6 }
 0x26f   : > { %849 = vmatpush3.bf16.msra.mxu1 %v908_v6 }
 0x270   : > { %850 = vmatprep.subr.bf16.mxu1 %v909_v7 }
 0x273   : > { %851 = vmatpush3.bf16.msra.mxu1 %v909_v7 }
 0x329   : > { %v830_v8 = vpop.f32.mrb[0].mxu1 }
 0x32a   : > { %v465_v9 = vpop.f32.mrb[1].mxu1 }
 0x32b   : > { %v831_v10 = vpop.f32.mrb[2].mxu1 }
 0x32c   : > { %v497_v11 = vpack.c.bf16 %v831_v10, %v830_v8  ;;  %v468_v12 = vpop.f32.mrb[3].mxu1 }
 0x32d   : > { %v496_v13 = vpack.c.bf16 %v468_v12, %v465_v9 }
 0x32f   : > { %852 = vmatprep.mubr.bf16.mxu1 %v496_v13 }
 0x330   : > { %853 = vmatmul.mubr.bf16.vlgmr.msra.gmra.mrb[8].mxu1 %v497_v11 }
 0x331   : > { %v834_v14 = vpop.f32.mrb[4].mxu1 }
 0x332   : > { %v481_v15 = vpop.f32.mrb[5].mxu1 }
 0x333   : > { %v835_v16 = vpop.f32.mrb[6].mxu1 }
 0x334   : > { %v499_v17 = vpack.c.bf16 %v835_v16, %v834_v14  ;;  %v484_v18 = vpop.f32.mrb[7].mxu1 }
 0x335   : > { %v498_v19 = vpack.c.bf16 %v484_v18, %v481_v15 }
 0x337   : > { %856 = vmatprep.mubr.bf16.mxu1 %v498_v19 }
 0x338   : > { %857 = vmatmul.mubr.bf16.gmra.mrb[12].mxu1 %v499_v17 }
 0x403   : > { %v854_v21 = vpop.f32.mrb[8].mxu1 }
 0x404   : > { %v614_v23 = vadd.f32 %v854_v21, %v760_v20  ;;  %v605_v24 = vpop.f32.mrb[9].mxu1 }
 0x405   : > { %v606_v26 = vadd.f32 %v760_v20, %v605_v24  ;;  %v855_v27 = vpop.f32.mrb[10].mxu1 }
 0x406   : > { %v646_v29 = vadd.f32 %v638_v22, %v614_v23  ;;  %v617_v30 = vadd.f32 %v855_v27, %v760_v20  ;;  %v608_v31 = vpop.f32.mrb[11].mxu1 }
 0x407   : > { %v644_v33 = vadd.f32 %v636_v25, %v606_v26  ;;  %v609_v34 = vadd.f32 %v760_v20, %v608_v31 }
 0x408   : > { %654 = vst [vmem:[%s205_s27 + $0x10] sm:$0xff] %v646_v29  ;;  %v647_v35 = vadd.f32 %v639_v28, %v617_v30 }
 0x409   : > { %652 = vst [vmem:[%s205_s27] sm:$0xff] %v644_v33  ;;  %v645_v36 = vadd.f32 %v637_v32, %v609_v34 }
 0x40a   : > { %655 = vst [vmem:[%s205_s27 + $0x18] sm:$0xff] %v647_v35 }
 0x40b   : > { %653 = vst [vmem:[%s205_s27 + $0x8] sm:$0xff] %v645_v36  ;;  %v858_v37 = vpop.f32.mrb[12].mxu1 }
 0x40c   : > { %v630_v39 = vadd.f32 %v858_v37, %v760_v20  ;;  %v621_v40 = vpop.f32.mrb[13].mxu1 }
 0x40d   : > { %v622_v42 = vadd.f32 %v760_v20, %v621_v40  ;;  %v859_v43 = vpop.f32.mrb[14].mxu1 }
 0x40e   : > { %v650_v45 = vadd.f32 %v642_v38, %v630_v39  ;;  %v633_v46 = vadd.f32 %v859_v43, %v760_v20  ;;  %v624_v47 = vpop.f32.mrb[15].mxu1 }
 0x40f   : > { %v648_v49 = vadd.f32 %v640_v41, %v622_v42  ;;  %v625_v50 = vadd.f32 %v760_v20, %v624_v47 }
 0x410   : > { %658 = vst [vmem:[%s205_s27 + $0x30] sm:$0xff] %v650_v45  ;;  %v651_v51 = vadd.f32 %v643_v44, %v633_v46 }
 0x411   : > { %656 = vst [vmem:[%s205_s27 + $0x20] sm:$0xff] %v648_v49  ;;  %v649_v52 = vadd.f32 %v641_v48, %v625_v50 }
 0x412   : > { %659 = vst [vmem:[%s205_s27 + $0x38] sm:$0xff] %v651_v51 }
 0x413   : > { %657 = vst [vmem:[%s205_s27 + $0x28] sm:$0xff] %v649_v52 }
 0x414   : > { %955 = shalt.err (!%p952_p3)
}
 0x415   : > { %s956_s7 = scalar_lea.hbm %s1212_s28, 1024  ;;  %s960_s10 = scalar_lea.hbm %s1263_s4, 2048 }
 0x416   : > { %p957_p4 = scmp.ne.s32.totalorder %s1212_s28, %s956_s7  ;;  %p961_p9 = scmp.lt.u32.totalorder %s1212_s28, %s1263_s4 }
 0x417   : > { %p962_p10 = scmp.lt.u32.totalorder %s960_s10, %s956_s7  ;;  %p964_p12 = scmp.lt.u32.totalorder %s956_s7, %s1212_s28 }
 0x418   : > { %p958_p7 = pnand %p957_p4, %p1072_p5 }
 0x419   : > { %p963_p11 = por %p962_p10, %p961_p9 }
 0x41a   : > { %p959_p8 = pneg %p958_p7 }
 0x41b   : > { %p965_p13 = por %p964_p12, %p963_p11 }
 0x41d   : > { %p966_p0 = pnand %p965_p13, %p959_p8 }
 0x41f   : > { %969 = shalt.err (!%p966_p0)
}
 0x420   : > { %s1007_s13 = smov 128   ;;  %s1008_s27 = smov 8  }
 0x421   : > { %861 = dma.vmem_to_hbm [thread:$0]  (%p1072_p5), %s1214_s20, 1024, %s1212_s28, %s1218_s19, %s1007_s13, %s1007_s13, %s1008_s27  }
 0x422 PF: > { %p867_p1 = scmp.ge.s32.totalorder %s1004_s18, 2  ;;  %s689_s14 = sand.u32 1, %s992_s15  }
 0x423   : > { %s690_s22 = scalar_lea.sflag [#allocation3], %s689_s14 }
 0x424   : > { %p864_p2 = pnand %p867_p1, %p1076_p6 }
 0x426   : > { %987 = dma.done.wait (!%p864_p2), %s690_s22, 1024  }
 0x427   : > { %989 = vsyncadd (!%p864_p2), %s690_s22, 4294966272  ;;  %p14_p3 = scmp.ge.s32.totalorder %s1059_s21, 4   ;;  %s1266_s15 = smov %s996_s16 }
 0x428   : > { %s1267_s16 = smov %s1000_s17  ;;  %s1268_s17 = smov %s1070_s24 }
 0x429   : > { %s1269_s18 = smov %s1059_s21  ;;  %16 = sbr.rel (!%p14_p3) target bundleno = 3 (0x3), region = 74 }
 0x430   :  { %695 = vsyncpa [#allocation3], 1 }
 0x431   :  { %697 = vsyncpa [#allocation3 + $0x1], 1 }

// kernel: _lambda_.18
= control target key start
LH: loop header
LB: loop body
LE: loop exit
PB: predicated region body
PF: predicated region fallthrough
CT: control target
= control target key end

     0   :  { %s3538_s27 = smov 0   ;;  %s4453_s0 = inlined_call_operand.vmem [shape: f32[2,10,10,128], index: 0, kind: input, shape index: {}]   ;;  %s4454_s1 = inlined_call_operand.vmem [shape: f32[1,128], index: 1, kind: input, shape index: {}]   ;;  %s4455_s2 = inlined_call_operand.vmem [shape: f32[1,128], index: 2, kind: input, shape index: {}]   ;;  %s4456_s3 = inlined_call_operand.vmem [shape: f32[128,32], index: 3, kind: input, shape index: {}]   ;;  %s4457_s4 = inlined_call_operand.vmem [shape: f32[32,128], index: 4, kind: input, shape index: {}]   ;;  %s4458_s5 = inlined_call_operand.vmem [shape: bf16[9,128,128], index: 5, kind: input, shape index: {}]   ;;  %s4459_s6 = inlined_call_operand.vmem [shape: f32[1,128], index: 6, kind: input, shape index: {}]   ;;  %s4460_s7 = inlined_call_operand.vmem [shape: f32[2,1,128], index: 7, kind: input, shape index: {}]   ;;  %s4461_s8 = inlined_call_operand.vmem [shape: f32[2,64,128], index: 8, kind: output, shape index: {}]  }
   0x1 LB: > { %s2474_s28 = sadd.s32 4294967295, %s3487_s27   ;;  %p2478_p0 = scmp.ge.s32.totalorder %s3487_s27, 1  ;;  %s3487_s27 = sphi %s3538_s27, %s18_s27  }
   0x2   : > { %p270_p1 = scmp.lt.s32.totalorder %s3487_s27, 3 }
   0x4   : > { %p271_p2 = pnand %p2478_p0, %p270_p1 }
   0x5   : > { %v393_v0 = vld [vmem:[%s4456_s3] sm:$0xff] (!%p271_p2)  ;;  %v394_v1 = vld [vmem:[%s4456_s3 + $0x8] sm:$0xff] (!%p271_p2)  ;;  %v395_v2 = vld [vmem:[%s4456_s3 + $0x10] sm:$0xff] (!%p271_p2)  ;;  %v3489_v3 = vmov (!%p271_p2), 0.0|0.0   ;;  %vm3490_vm0 = vmmov (!%p271_p2), 0   ;;  %v3491_v6 = vmov (!%p271_p2), 0.0  }
   0x6   : > { %274 = sbr.rel (%p271_p2) target bundleno = 1394 (0x572), region = 52  ;;  %3170 = vmatprep.subr.bf16.mxu1 (!%p271_p2), %v3489_v3  ;;  %v3556_v4 = vpack.c.bf16 (!%p271_p2), %v394_v1, %v393_v0  ;;  %v396_v5 = vld [vmem:[%s4456_s3 + $0x18] sm:$0xff] (!%p271_p2)  ;;  %2894 = vmatprep.mubr.msk.f32.mxu1 (!%p271_p2), %vm3490_vm0, %v3491_v6  ;;  %1017 = vst [vmem:[#allocation2] sm:$0xff] (!%p271_p2), %v3491_v6  ;;  %1018 = vst [vmem:[#allocation2 + $0x8] sm:$0x3] (!%p271_p2), %v3491_v6  ;;  %p307_p3 = scmp.lt.s32.totalorder (!%p271_p2), %s2474_s28, 1 }
   0x7   : > { %1035 = vst [vmem:[#allocation2 + $0x90] sm:$0xff] (!%p271_p2), %v3491_v6  ;;  %1036 = vst [vmem:[#allocation2 + $0x98] sm:$0x3] (!%p271_p2), %v3491_v6  ;;  %v3568_v7 = vpack.c.bf16 (!%p271_p2), %v396_v5, %v395_v2  ;;  %v397_v8 = vld [vmem:[%s4456_s3 + $0x20] sm:$0xff] (!%p271_p2)  ;;  %v398_v9 = vld [vmem:[%s4456_s3 + $0x28] sm:$0xff] (!%p271_p2)  ;;  %vm365_vm1 = vcmask (!%p271_p2), 1041408  }
   0x8   : > { %3172 = vmatpush3.bf16.msra.mxu1 (!%p271_p2), %v3556_v4  ;;  %v399_v10 = vld [vmem:[%s4456_s3 + $0x30] sm:$0xff] (!%p271_p2)  ;;  %v400_v11 = vld [vmem:[%s4456_s3 + $0x38] sm:$0xff] (!%p271_p2)  ;;  %v3587_v12 = vpack.c.bf16 (!%p271_p2), %v398_v9, %v397_v8  ;;  %v401_v13 = vld [vmem:[%s4456_s3 + $0x40] sm:$0xff] (!%p271_p2)  ;;  %vm484_vm2 = vcmask (!%p271_p2), 261120   ;;  %vm3492_vm6 = vmmov (!%p271_p2), 1  }
   0x9   : > { %3173 = vmatprep.subr.bf16.mxu1 (!%p271_p2), %v3489_v3  ;;  %v402_v22 = vld [vmem:[%s4456_s3 + $0x48] sm:$0xff] (!%p271_p2)  ;;  %v3628_v27 = vpack.c.bf16 (!%p271_p2), %v400_v11, %v399_v10  ;;  %v403_v41 = vld [vmem:[%s4456_s3 + $0x50] sm:$0xff] (!%p271_p2)  ;;  %v404_v42 = vld [vmem:[%s4456_s3 + $0x58] sm:$0xff] (!%p271_p2) }
   0xa   : > { %v3646_v35 = vpack.c.bf16 (!%p271_p2), %v402_v22, %v401_v13  ;;  %v405_v56 = vld [vmem:[%s4456_s3 + $0x60] sm:$0xff] (!%p271_p2)  ;;  %v406_v57 = vld [vmem:[%s4456_s3 + $0x68] sm:$0xff] (!%p271_p2)  ;;  %v3186_v59 = vpack.c.bf16 (!%p271_p2), %v404_v42, %v403_v41  ;;  %v407_v1 = vld [vmem:[%s4456_s3 + $0x70] sm:$0xff] (!%p271_p2) }
   0xb   : > { %v408_v2 = vld [vmem:[%s4456_s3 + $0x78] sm:$0xff] (!%p271_p2)  ;;  %v3189_v5 = vpack.c.bf16 (!%p271_p2), %v406_v57, %v405_v56  ;;  %v482_v41 = vld [vmem:[%s4457_s4 + $0x10] sm:$0xff] (!%p271_p2) }
   0xc   : > { %3175 = vmatpush3.bf16.msra.mxu1 (!%p271_p2), %v3568_v7  ;;  %v3192_v13 = vpack.c.bf16 (!%p271_p2), %v408_v2, %v407_v1  ;;  %v483_v42 = vld [vmem:[%s4457_s4 + $0x18] sm:$0xff] (!%p271_p2) }
   0xd   : > { %s4465_s28 = smov (!%p307_p3, %s2474_s28), 1  ;;  %3176 = vmatprep.subr.bf16.mxu1 %v3489_v3 }
   0xe   : > { %s3294_s19 = smul.u32 160, %s4465_s28  ;;  %s314_s21 = scalar_lea.vmem %s4460_s7, %s4465_s28 }
   0xf   : > { %s2709_s24 = sshll.u32 %s4465_s28, 6 }
  0x10   : > { %s3592_s26 = scalar_lea.vmem %s4453_s0, %s3294_s19  ;;  %3178 = vmatpush3.bf16.msra.mxu1 %v3587_v12  ;;  %s4440_s29 = scalar_lea.vmem %s4461_s8, %s2709_s24 }
  0x11   : > { %v321_v14 = vld [vmem:[%s3592_s26] sm:$0xff]  ;;  %v322_v15 = vld [vmem:[%s3592_s26 + $0x8] sm:$0x3]  ;;  %v3601_v16 = vld [vmem:[%s3592_s26 + $0x10] sm:$0xff]  ;;  %3179 = vmatprep.subr.bf16.mxu1 %v3489_v3 }
  0x12   : > { %v3604_v17 = vld [vmem:[%s3592_s26 + $0x18] sm:$0x3]  ;;  %v3607_v18 = vld [vmem:[%s3592_s26 + $0x20] sm:$0xff]  ;;  %v3610_v19 = vld [vmem:[%s3592_s26 + $0x28] sm:$0x3]  ;;  %v356_v20 = vadd.f32 %v3601_v16, %v321_v14  ;;  %v366_v21 = vsel %vm365_vm1, %v322_v15, 0.0 }
  0x13   : > { %v3618_v23 = vld [vmem:[%s3592_s26 + $0x30] sm:$0xff]  ;;  %v3621_v24 = vld [vmem:[%s3592_s26 + $0x38] sm:$0x3]  ;;  %v367_v25 = vsel %vm365_vm1, %v3604_v17, 0.0  ;;  %v369_v26 = vsel %vm365_vm1, %v3610_v19, 0.0  ;;  %v3639_v32 = vld [vmem:[%s3592_s26 + $0x40] sm:$0xff] }
  0x14   : > { %v3631_v28 = vld [vmem:[%s3592_s26 + $0x48] sm:$0x3]  ;;  %v3634_v29 = vld [vmem:[%s3592_s26 + $0x58] sm:$0x3]  ;;  %v357_v30 = vadd.f32 %v356_v20, %v3607_v18  ;;  %v368_v31 = vadd.f32 %v367_v25, %v366_v21  ;;  %v371_v34 = vsel %vm365_vm1, %v3621_v24, 0.0  ;;  %v3649_v36 = vld [vmem:[%s3592_s26 + $0x50] sm:$0xff]  ;;  %3181 = vmatpush3.bf16.msra.mxu1 %v3628_v27 }
  0x15   : > { %v3642_v33 = vld [vmem:[%s3592_s26 + $0x68] sm:$0x3]  ;;  %v3652_v37 = vld [vmem:[%s3592_s26 + $0x78] sm:$0x3]  ;;  %v3665_v43 = vld [vmem:[%s3592_s26 + $0x60] sm:$0xff]  ;;  %v373_v45 = vsel %vm365_vm1, %v3631_v28, 0.0  ;;  %3182 = vmatprep.subr.bf16.mxu1 %v3489_v3 }
  0x16   : > { %v3655_v38 = vld [vmem:[%s3592_s26 + $0x88] sm:$0x3]  ;;  %v358_v39 = vadd.f32 %v357_v30, %v3618_v23  ;;  %v370_v40 = vadd.f32 %v369_v26, %v368_v31  ;;  %v340_v44 = vld [vmem:[%s3592_s26 + $0x98] sm:$0x3]  ;;  %v375_v46 = vsel %vm365_vm1, %v3634_v29, 0.0  ;;  %v377_v47 = vsel %vm365_vm1, %v3642_v33, 0.0 }
  0x17   : > { %v379_v48 = vsel %vm365_vm1, %v3652_v37, 0.0  ;;  %v381_v51 = vsel %vm365_vm1, %v3655_v38, 0.0  ;;  %v383_v52 = vsel %vm365_vm1, %v340_v44, 0.0  ;;  %v3683_v53 = vld [vmem:[%s3592_s26 + $0x70] sm:$0xff]  ;;  %v3693_v58 = vld [vmem:[%s3592_s26 + $0x80] sm:$0xff]  ;;  %v481_v30 = vld [vmem:[%s4457_s4 + $0x8] sm:$0xff]  ;;  %v3729_v44 = vpack.c.bf16 %v483_v42, %v482_v41 }
  0x18   : > { %v359_v49 = vadd.f32 %v358_v39, %v3639_v32  ;;  %v372_v50 = vadd.f32 %v371_v34, %v370_v40  ;;  %3184 = vmatpush3.bf16.msra.mxu1 %v3646_v35  ;;  %v339_v62 = vld [vmem:[%s3592_s26 + $0x90] sm:$0xff]  ;;  %v480_v26 = vld [vmem:[%s4457_s4] sm:$0xff] }
  0x19   : > { %3185 = vmatprep.subr.bf16.mxu1 %v3489_v3  ;;  %v3717_v39 = vpack.c.bf16 %v481_v30, %v480_v26 }
  0x1a   : > { %v360_v54 = vadd.f32 %v359_v49, %v3649_v36  ;;  %v374_v55 = vadd.f32 %v373_v45, %v372_v50 }
  0x1c   : > { %v361_v60 = vadd.f32 %v360_v54, %v3665_v43  ;;  %v376_v61 = vadd.f32 %v375_v46, %v374_v55  ;;  %3187 = vmatpush3.bf16.msra.mxu1 %v3186_v59 }
  0x1d   : > { %3188 = vmatprep.subr.bf16.mxu1 %v3489_v3 }
  0x1e   : > { %v362_v63 = vadd.f32 %v361_v60, %v3683_v53  ;;  %v378_v0 = vadd.f32 %v377_v47, %v376_v61 }
  0x20   : > { %v363_v8 = vadd.f32 %v362_v63, %v3693_v58  ;;  %v380_v9 = vadd.f32 %v379_v48, %v378_v0  ;;  %3190 = vmatpush3.bf16.msra.mxu1 %v3189_v5 }
  0x21   : > { %3191 = vmatprep.subr.bf16.mxu1 %v3489_v3 }
  0x22   : > { %v382_v10 = vadd.f32 %v381_v51, %v380_v9  ;;  %v364_v11 = vadd.f32 %v363_v8, %v339_v62 }
  0x24   : > { %v384_v14 = vadd.f32 %v383_v52, %v382_v10  ;;  %3193 = vmatpush3.bf16.msra.mxu1 %v3192_v13 }
  0x25   : > { %3194 = vmatprep.subr.bf16.mxu1 %v3489_v3 }
  0x26   : > { %v385_v15 = vsel %vm365_vm1, %v384_v14, 0.0 }
  0x27   : > { %v386_v20 = vadd.f32 %v385_v15, %v364_v11 }
  0x29   : > { %v387_v21 = vrot.slane %v386_v20, 4 }
  0x2b   : > { %v388_v22 = vadd.f32 %v387_v21, %v386_v20 }
  0x2d   : > { %v389_v25 = vrot.slane %v388_v22, 2 }
  0x2f   : > { %v390_v31 = vadd.f32 %v389_v25, %v388_v22 }
  0x31   : > { %v391_v34 = vrot.slane %v390_v31, 1 }
  0x33   : > { %v392_v40 = vadd.f32 %v391_v34, %v390_v31 }
  0x35   : > { %2895 = vmatmul.mubr.f32.vlgmr.msra.gmra.mrb[0].mxu1 %v392_v40 }
  0x36   : > { %3196 = vmatpush3.bf16.msra.mxu1 %v3717_v39  ;;  %2905 = vmatprep.mubr.msk.f32.mxu1 %vm3490_vm0, %v3491_v6 }
  0x37   : > { %3197 = vmatprep.subr.bf16.mxu1 %v3489_v3 }
  0x3a   : > { %3199 = vmatpush3.bf16.msra.mxu1 %v3729_v44 }
  0x3b   : > { %3200 = vmatprep.subr.bf16.mxu1 %v3489_v3 }
 0x108   : > { %v475_v45 = vpop.f32.mrb[0].mxu1 }
 0x109   : > { %v479_v46 = vmul.f32 0.00390625, %v475_v45  ;;  %v2896_v47 = vpop.f32.mrb[1].mxu1 }
 0x10b   : > { %2906 = vmatmul.mubr.msk.f32.vlgmr.msra.gmra.mrb[2].mxu1 %vm484_vm2, %v479_v46 }
 0x10c   : > { %3202 = vmatpush3.bf16.msra.mxu1 %v3556_v4  ;;  %2940 = vmatprep.mubr.msk.f32.mxu1 %vm3490_vm0, %v3491_v6  ;;  %v341_v4 = vlaneseq }
 0x10d   : > { %3203 = vmatprep.subr.bf16.mxu1 %v3489_v3 }
 0x110   : > { %3205 = vmatpush3.bf16.msra.mxu1 %v3568_v7  ;;  %v3749_v7 = vshrl.u32 %v341_v4, 7 }
 0x111   : > { %3206 = vmatprep.subr.bf16.mxu1 %v3489_v3 }
 0x112   : > { %v3753_v48 = vadd.s32 8, %v3749_v7  ;;  %vm344_vm3 = vcmp.ge.s32.totalorder %v3749_v7, 1 }
 0x113   : > { %vm4103_vm5 = vmpackc.low %vm344_vm3, %vm344_vm3 }
 0x114   : > { %3208 = vmatpush3.bf16.msra.mxu1 %v3587_v12  ;;  %v560_v12 = vsub.s32 0, %v3749_v7  ;;  %vm351_vm4 = vcmp.le.s32.totalorder %v3753_v48, 8  ;;  %vm3457_vm7 = vmpackc.low %vm344_vm3, %vm3492_vm6  ;;  %v3367_v7 = vld [vmem:[%s4458_s5 + $0x1e8] sm:$0xff]  }
 0x115   : > { %3209 = vmatprep.subr.bf16.mxu1 %v3489_v3  ;;  %vm3478_vm8 = vmpackc.low %vm3492_vm6, %vm344_vm3 }
 0x118   : > { %3211 = vmatpush3.bf16.msra.mxu1 %v3628_v27 }
 0x119   : > { %3212 = vmatprep.subr.bf16.mxu1 %v3489_v3 }
 0x11c   : > { %3214 = vmatpush3.bf16.msra.mxu1 %v3646_v35 }
 0x11d   : > { %3215 = vmatprep.subr.bf16.mxu1 %v3489_v3 }
 0x120   : > { %3217 = vmatpush3.bf16.msra.mxu1 %v3186_v59 }
 0x121   : > { %3218 = vmatprep.subr.bf16.mxu1 %v3489_v3 }
 0x124   : > { %3220 = vmatpush3.bf16.msra.mxu1 %v3189_v5 }
 0x125   : > { %3221 = vmatprep.subr.bf16.mxu1 %v3489_v3 }
 0x128   : > { %3223 = vmatpush3.bf16.msra.mxu1 %v3192_v13 }
 0x129   : > { %3224 = vmatprep.subr.bf16.mxu1 %v3489_v3 }
 0x1de   : > { %v554_v27 = vpop.f32.mrb[2].mxu1 }
 0x1df   : > { %v3757_v35 = vrot.slane %v554_v27, %v560_v12  ;;  %v2907_v49 = vpop.f32.mrb[3].mxu1 }
 0x1e1   : > { %v564_v50 = vsub.f32 %v3601_v16, %v3757_v35  ;;  %v565_v51 = vsub.f32 %v3604_v17, %v3757_v35  ;;  %v566_v52 = vsub.f32 %v3607_v18, %v3757_v35  ;;  %v567_v54 = vsub.f32 %v3610_v19, %v3757_v35 }
 0x1e2   : > { %v568_v55 = vsub.f32 %v3618_v23, %v3757_v35  ;;  %v569_v56 = vsub.f32 %v3621_v24, %v3757_v35  ;;  %v571_v16 = vsub.f32 %v3631_v28, %v3757_v35  ;;  %v570_v24 = vsub.f32 %v3639_v32, %v3757_v35 }
 0x1e3   : > { %v3777_v17 = vsel %vm344_vm3, %v564_v50, 0.0  ;;  %v3781_v18 = vsel %vm351_vm4, %v565_v51, 0.0  ;;  %v3785_v19 = vsel %vm344_vm3, %v566_v52, 0.0  ;;  %v3789_v23 = vsel %vm351_vm4, %v567_v54, 0.0 }
 0x1e4   : > { %v573_v28 = vsub.f32 %v3634_v29, %v3757_v35  ;;  %v3797_v57 = vsel %vm344_vm3, %v568_v55, 0.0  ;;  %v3801_v59 = vsel %vm351_vm4, %v569_v56, 0.0  ;;  %v604_v60 = vmul.f32 %v3777_v17, %v3777_v17 }
 0x1e5   : > { %v605_v61 = vmul.f32 %v3781_v18, %v3781_v18  ;;  %v606_v32 = vmul.f32 %v3785_v19, %v3785_v19  ;;  %v607_v29 = vmul.f32 %v3789_v23, %v3789_v23  ;;  %v572_v62 = vsub.f32 %v3649_v36, %v3757_v35 }
 0x1e6   : > { %v575_v63 = vsub.f32 %v3642_v33, %v3757_v35  ;;  %v3817_v0 = vsel %vm351_vm4, %v571_v16, 0.0  ;;  %v574_v1 = vsub.f32 %v3665_v43, %v3757_v35  ;;  %v576_v2 = vsub.f32 %v3683_v53, %v3757_v35 }
 0x1e7   : > { %v609_v5 = vmul.f32 %v3801_v59, %v3801_v59  ;;  %v577_v8 = vsub.f32 %v3652_v37, %v3757_v35  ;;  %v3829_v36 = vsel %vm344_vm3, %v570_v24, 0.0  ;;  %v3833_v33 = vsel %vm351_vm4, %v573_v28, 0.0 }
 0x1e8   : > { %v608_v43 = vmul.f32 %v3797_v57, %v3797_v57  ;;  %v611_v53 = vmul.f32 %v3817_v0, %v3817_v0  ;;  %v623_v9 = vadd.f32 %v606_v32, %v604_v60  ;;  %v632_v10 = vsel %vm365_vm1, %v605_v61, 0.0 }
 0x1e9   : > { %v634_v11 = vsel %vm365_vm1, %v607_v29, 0.0  ;;  %v579_v37 = vsub.f32 %v3655_v38, %v3757_v35  ;;  %v3845_v13 = vsel %vm344_vm3, %v572_v62, 0.0  ;;  %v3849_v14 = vsel %vm351_vm4, %v575_v63, 0.0 }
 0x1ea   : > { %v635_v15 = vadd.f32 %v634_v11, %v632_v10  ;;  %v610_v20 = vmul.f32 %v3829_v36, %v3829_v36  ;;  %v613_v21 = vmul.f32 %v3833_v33, %v3833_v33  ;;  %v624_v22 = vadd.f32 %v623_v9, %v608_v43 }
 0x1eb   : > { %v636_v25 = vsel %vm365_vm1, %v609_v5, 0.0  ;;  %v3858_v38 = vsel %vm344_vm3, %v574_v1, 0.0  ;;  %v3862_v26 = vsel %vm351_vm4, %v577_v8, 0.0  ;;  %v612_v31 = vmul.f32 %v3845_v13, %v3845_v13 }
 0x1ec   : > { %v637_v30 = vadd.f32 %v636_v25, %v635_v15  ;;  %v615_v34 = vmul.f32 %v3849_v14, %v3849_v14  ;;  %v625_v40 = vadd.f32 %v624_v22, %v610_v20  ;;  %v638_v41 = vsel %vm365_vm1, %v611_v53, 0.0  ;;  %v3306_v20 = vld [vmem:[%s4458_s5 + $0x40] sm:$0xff]   ;;  %v3312_v22 = vld [vmem:[%s4458_s5 + $0x58] sm:$0xff]  }
 0x1ed   : > { %v578_v42 = vsub.f32 %v3693_v58, %v3757_v35  ;;  %v3873_v45 = vsel %vm344_vm3, %v576_v2, 0.0  ;;  %v3877_v46 = vsel %vm351_vm4, %v579_v37, 0.0  ;;  %v614_v4 = vmul.f32 %v3858_v38, %v3858_v38  ;;  %v3313_v25 = vld [vmem:[%s4458_s5 + $0xd8] sm:$0xff]  }
 0x1ee   : > { %v639_v47 = vadd.f32 %v638_v41, %v637_v30  ;;  %v617_v27 = vmul.f32 %v3862_v26, %v3862_v26  ;;  %v626_v49 = vadd.f32 %v625_v40, %v612_v31  ;;  %v640_v50 = vsel %vm365_vm1, %v613_v21, 0.0  ;;  %v3311_v21 = vld [vmem:[%s4458_s5 + $0xd0] sm:$0xff]   ;;  %v3314_v30 = vld [vmem:[%s4458_s5 + $0x60] sm:$0xff]   ;;  %v3317_v40 = vld [vmem:[%s4458_s5 + $0xe8] sm:$0xff]  }
 0x1ef   : > { %v616_v58 = vmul.f32 %v3873_v45, %v3873_v45  ;;  %v619_v35 = vmul.f32 %v3877_v46, %v3877_v46  ;;  %v642_v54 = vsel %vm365_vm1, %v615_v34, 0.0  ;;  %v3891_v55 = vsel %vm344_vm3, %v578_v42, 0.0  ;;  %v3315_v31 = vld [vmem:[%s4458_s5 + $0xe0] sm:$0xff]   ;;  %v3316_v34 = vld [vmem:[%s4458_s5 + $0x68] sm:$0xff]   ;;  %v3318_v41 = vld [vmem:[%s4458_s5 + $0x70] sm:$0xff]  }
 0x1f0   : > { %v641_v51 = vadd.f32 %v640_v50, %v639_v47  ;;  %v627_v52 = vadd.f32 %v626_v49, %v614_v4  ;;  %v644_v24 = vsel %vm365_vm1, %v617_v27, 0.0  ;;  %v618_v60 = vmul.f32 %v3891_v55, %v3891_v55  ;;  %v3319_v42 = vld [vmem:[%s4458_s5 + $0xf0] sm:$0xff]   ;;  %v3320_v47 = vld [vmem:[%s4458_s5 + $0x78] sm:$0xff]   ;;  %v3955_v27 = vld [vmem:[%s4458_s5 + $0x100] sm:$0xff]  }
 0x1f1   : > { %v646_v61 = vsel %vm365_vm1, %v619_v35, 0.0  ;;  %v3321_v4 = vld [vmem:[%s4458_s5 + $0xf8] sm:$0xff]   ;;  %v3961_v49 = vld [vmem:[%s4458_s5] sm:$0xff]  }
 0x1f2   : > { %v643_v56 = vadd.f32 %v642_v54, %v641_v51  ;;  %v628_v16 = vadd.f32 %v627_v52, %v616_v58  ;;  %v804_v50 = vld [vmem:[%s4454_s1] sm:$0x1] }
 0x1f3   : > { %v3974_v54 = vld [vmem:[%s4455_s2] ss:$0 sm:$0xff] }
 0x1f4   : > { %v645_v28 = vadd.f32 %v644_v24, %v643_v56  ;;  %v629_v29 = vadd.f32 %v628_v16, %v618_v60 }
 0x1f6   : > { %v647_v32 = vadd.f32 %v646_v61, %v645_v28 }
 0x1f8   : > { %v650_v62 = vsel %vm365_vm1, %v647_v32, 0.0 }
 0x1f9   : > { %v651_v63 = vadd.f32 %v650_v62, %v629_v29 }
 0x1fb   : > { %v652_v1 = vrot.slane %v651_v63, 4 }
 0x1fd   : > { %v653_v2 = vadd.f32 %v652_v1, %v651_v63 }
 0x1ff   : > { %v654_v5 = vrot.slane %v653_v2, 2 }
 0x201   : > { %v655_v8 = vadd.f32 %v654_v5, %v653_v2 }
 0x203   : > { %v656_v43 = vrot.slane %v655_v8, 1 }
 0x205   : > { %v657_v53 = vadd.f32 %v656_v43, %v655_v8 }
 0x207   : > { %2941 = vmatmul.mubr.f32.vlgmr.msra.gmra.mrb[4].mxu1 %v657_v53 }
 0x208   : > { %3226 = vmatpush3.bf16.msra.mxu1 %v3717_v39  ;;  %2951 = vmatprep.mubr.msk.f32.mxu1 %vm3490_vm0, %v3491_v6  ;;  %v3307_v6 = vld [vmem:[%s4458_s5 + $0xc0] sm:$0xff]   ;;  %v3309_v39 = vld [vmem:[%s4458_s5 + $0xc8] sm:$0xff]  }
 0x209   : > { %3227 = vmatprep.subr.bf16.mxu1 %v3489_v3  ;;  %v3308_v3 = vld [vmem:[%s4458_s5 + $0x48] sm:$0xff]   ;;  %3026 = vmatprep.subr.bf16.mxu0 %v3307_v6 }
 0x20a   : > { %3027 = vmatpush3.bf16.msra.mxu0 %v3307_v6 }
 0x20b   : > { %3028 = vmatprep.subr.bf16.mxu0 %v3309_v39 }
 0x20c   : > { %3229 = vmatpush3.bf16.msra.mxu1 %v3729_v44  ;;  %v3310_v44 = vld [vmem:[%s4458_s5 + $0x50] sm:$0xff]  }
 0x20d   : > { %2954 = vmatprep.subr.bf16.mxu1 %v3306_v20 }
 0x20e   : > { %3029 = vmatpush3.bf16.msra.mxu0 %v3309_v39 }
 0x20f   : > { %3030 = vmatprep.subr.bf16.mxu0 %v3311_v21 }
 0x212   : > { %3031 = vmatpush3.bf16.msra.mxu0 %v3311_v21 }
 0x213   : > { %3032 = vmatprep.subr.bf16.mxu0 %v3313_v25 }
 0x216   : > { %3033 = vmatpush3.bf16.msra.mxu0 %v3313_v25 }
 0x217   : > { %3034 = vmatprep.subr.bf16.mxu0 %v3315_v31 }
 0x21a   : > { %3035 = vmatpush3.bf16.msra.mxu0 %v3315_v31 }
 0x21b   : > { %3036 = vmatprep.subr.bf16.mxu0 %v3317_v40 }
 0x21e   : > { %3037 = vmatpush3.bf16.msra.mxu0 %v3317_v40 }
 0x21f   : > { %3038 = vmatprep.subr.bf16.mxu0 %v3319_v42 }
 0x222   : > { %3039 = vmatpush3.bf16.msra.mxu0 %v3319_v42 }
 0x223   : > { %3040 = vmatprep.subr.bf16.mxu0 %v3321_v4 }
 0x226   : > { %3041 = vmatpush3.bf16.msra.mxu0 %v3321_v4 }
 0x227   : > { %3050 = vmatprep.subr.bf16.mxu0 %v3955_v27 }
 0x2da   : > { %v724_v9 = vpop.f32.mrb[4].mxu1 }
 0x2db   : > { %v728_v10 = vmul.f32 0.00390625, %v724_v9  ;;  %v2942_v11 = vpop.f32.mrb[5].mxu1 }
 0x2dd   : > { %v729_v37 = vadd.f32 1e-05, %v728_v10 }
 0x2df   : > { %3378 = vrsqrt.f32 %v729_v37 }
 0x2e9   : > { %v3379_v15 = vpop.eup %3378 }
 0x2ea   : > { %2952 = vmatmul.mubr.msk.f32.vlgmr.msra.gmra.mrb[6].mxu1 %vm484_vm2, %v3379_v15 }
 0x2eb   : > { %2955 = vmatpush3.bf16.msra.mxu1 %v3306_v20 }
 0x2ec   : > { %2956 = vmatprep.subr.bf16.mxu1 %v3308_v3 }
 0x2ef   : > { %2957 = vmatpush3.bf16.msra.mxu1 %v3308_v3 }
 0x2f0   : > { %2958 = vmatprep.subr.bf16.mxu1 %v3310_v44 }
 0x2f3   : > { %2959 = vmatpush3.bf16.msra.mxu1 %v3310_v44 }
 0x2f4   : > { %2960 = vmatprep.subr.bf16.mxu1 %v3312_v22 }
 0x2f7   : > { %2961 = vmatpush3.bf16.msra.mxu1 %v3312_v22 }
 0x2f8   : > { %2962 = vmatprep.subr.bf16.mxu1 %v3314_v30 }
 0x2fb   : > { %2963 = vmatpush3.bf16.msra.mxu1 %v3314_v30 }
 0x2fc   : > { %2964 = vmatprep.subr.bf16.mxu1 %v3316_v34 }
 0x2ff   : > { %2965 = vmatpush3.bf16.msra.mxu1 %v3316_v34 }
 0x300   : > { %2966 = vmatprep.subr.bf16.mxu1 %v3318_v41 }
 0x303   : > { %2967 = vmatpush3.bf16.msra.mxu1 %v3318_v41 }
 0x304   : > { %2968 = vmatprep.subr.bf16.mxu1 %v3320_v47 }
 0x307   : > { %2969 = vmatpush3.bf16.msra.mxu1 %v3320_v47 }
 0x308   : > { %2978 = vmatprep.subr.bf16.mxu1 %v3961_v49 }
 0x3bd   : > { %v800_v51 = vpop.f32.mrb[6].mxu1 }
 0x3be   : > { %v805_v58 = vmul.f32 %v804_v50, %v800_v51  ;;  %v2953_v35 = vpop.f32.mrb[7].mxu1 }
 0x3c0   : > { %v3969_v52 = vrot.slane %v805_v58, %v560_v12 }
 0x3c2   : > { %v812_v56 = vmul.f32 %v3969_v52, %v3777_v17  ;;  %v813_v16 = vmul.f32 %v3969_v52, %v3781_v18  ;;  %v814_v24 = vmul.f32 %v3969_v52, %v3785_v19  ;;  %v815_v28 = vmul.f32 %v3969_v52, %v3789_v23 }
 0x3c3   : > { %v816_v12 = vmul.f32 %v3969_v52, %v3797_v57  ;;  %v817_v60 = vmul.f32 %v3969_v52, %v3801_v59  ;;  %v818_v61 = vmul.f32 %v3969_v52, %v3829_v36  ;;  %v819_v17 = vmul.f32 %v3969_v52, %v3817_v0 }
 0x3c4   : > { %v3993_v18 = vadd.f32 %v3974_v54, %v812_v56  ;;  %v3996_v19 = vadd.f32 %v3974_v54, %v813_v16  ;;  %v3999_v23 = vadd.f32 %v3974_v54, %v814_v24  ;;  %v4002_v57 = vadd.f32 %v3974_v54, %v815_v28 }
 0x3c5   : > { %v4005_v59 = vadd.f32 %v3974_v54, %v816_v12  ;;  %v4008_v36 = vadd.f32 %v3974_v54, %v817_v60  ;;  %v4011_v0 = vadd.f32 %v3974_v54, %v818_v61  ;;  %v820_v32 = vmul.f32 %v3969_v52, %v3845_v13 }
 0x3c6   : > { %v2487_v29 = vmul.f32 -1.442695, %v3993_v18  ;;  %v2488_v62 = vmul.f32 -1.442695, %v3996_v19  ;;  %v2489_v63 = vmul.f32 -1.442695, %v3999_v23  ;;  %v821_v1 = vmul.f32 %v3969_v52, %v3833_v33 }
 0x3c7   : > { %v2490_v2 = vmul.f32 -1.442695, %v4002_v57  ;;  %v4022_v5 = vadd.f32 %v3974_v54, %v819_v17  ;;  %v2491_v8 = vmul.f32 -1.442695, %v4005_v59  ;;  %v2492_v43 = vmul.f32 -1.442695, %v4008_v36 }
 0x3c8   : > { %3380 = vpow2.f32 %v2487_v29  ;;  %v4027_v13 = vadd.f32 %v3974_v54, %v820_v32  ;;  %v4030_v53 = vadd.f32 %v3974_v54, %v821_v1  ;;  %v822_v33 = vmul.f32 %v3969_v52, %v3858_v38 }
 0x3c9   : > { %3382 = vpow2.f32 %v2488_v62  ;;  %v823_v9 = vmul.f32 %v3969_v52, %v3849_v14  ;;  %v2493_v10 = vmul.f32 -1.442695, %v4011_v0  ;;  %v824_v11 = vmul.f32 %v3969_v52, %v3873_v45 }
 0x3ca   : > { %3384 = vpow2.f32 %v2489_v63  ;;  %v2494_v37 = vmul.f32 -1.442695, %v4022_v5  ;;  %v4041_v15 = vadd.f32 %v3974_v54, %v822_v33  ;;  %v2495_v38 = vmul.f32 -1.442695, %v4027_v13 }
 0x3cb   : > { %3386 = vpow2.f32 %v2490_v2  ;;  %v4044_v20 = vadd.f32 %v3974_v54, %v823_v9  ;;  %v4048_v14 = vadd.f32 %v3974_v54, %v824_v11  ;;  %v2496_v6 = vmul.f32 -1.442695, %v4030_v53 }
 0x3cc   : > { %3388 = vpow2.f32 %v2491_v8  ;;  %v2497_v45 = vmul.f32 -1.442695, %v4041_v15  ;;  %v825_v31 = vmul.f32 %v3969_v52, %v3862_v26  ;;  %v826_v50 = vmul.f32 %v3969_v52, %v3891_v55 }
 0x3cd   : > { %3390 = vpow2.f32 %v2492_v43  ;;  %v2498_v3 = vmul.f32 -1.442695, %v4044_v20  ;;  %v2499_v39 = vmul.f32 -1.442695, %v4048_v14  ;;  %v827_v26 = vmul.f32 %v3969_v52, %v3877_v46 }
 0x3ce   : > { %3392 = vpow2.f32 %v2493_v10  ;;  %v4059_v35 = vadd.f32 %v3974_v54, %v825_v31  ;;  %v4064_v55 = vadd.f32 %v3974_v54, %v826_v50 }
 0x3cf   : > { %3394 = vpow2.f32 %v2494_v37  ;;  %v4068_v29 = vadd.f32 %v3974_v54, %v827_v26 }
 0x3d0   : > { %3396 = vpow2.f32 %v2495_v38  ;;  %v2500_v32 = vmul.f32 -1.442695, %v4059_v35  ;;  %v2501_v8 = vmul.f32 -1.442695, %v4064_v55 }
 0x3d1   : > { %3398 = vpow2.f32 %v2496_v6  ;;  %v2502_v9 = vmul.f32 -1.442695, %v4068_v29 }
 0x3d2   : > { %v3381_v44 = vpop.eup %3380  ;;  %3400 = vpow2.f32 %v2497_v45 }
 0x3d3   : > { %v3383_v21 = vpop.eup %3382  ;;  %v919_v22 = vadd.f32 1.0, %v3381_v44  ;;  %3402 = vpow2.f32 %v2498_v3 }
 0x3d4   : > { %v3385_v25 = vpop.eup %3384  ;;  %v920_v30 = vadd.f32 1.0, %v3383_v21  ;;  %3404 = vpow2.f32 %v2499_v39 }
 0x3d5   : > { %v3387_v34 = vpop.eup %3386  ;;  %3406 = vrcp.f32 %v919_v22  ;;  %v921_v40 = vadd.f32 1.0, %v3385_v25 }
 0x3d6   : > { %v3389_v41 = vpop.eup %3388  ;;  %3408 = vrcp.f32 %v920_v30  ;;  %v922_v42 = vadd.f32 1.0, %v3387_v34 }
 0x3d7   : > { %v3391_v47 = vpop.eup %3390  ;;  %3410 = vrcp.f32 %v921_v40  ;;  %v923_v4 = vadd.f32 1.0, %v3389_v41 }
 0x3d8   : > { %v3393_v51 = vpop.eup %3392  ;;  %v924_v58 = vadd.f32 1.0, %v3391_v47  ;;  %3412 = vrcp.f32 %v922_v42  ;;  %v1065_v47 = vld [vmem:[#allocation2 + $0x1] sm:$0xff] }
 0x3d9   : > { %v3395_v56 = vpop.eup %3394  ;;  %3414 = vrcp.f32 %v923_v4  ;;  %v925_v16 = vadd.f32 1.0, %v3393_v51 }
 0x3da   : > { %v3397_v24 = vpop.eup %3396  ;;  %3416 = vrcp.f32 %v924_v58  ;;  %v926_v28 = vadd.f32 1.0, %v3395_v56 }
 0x3db   : > { %v3399_v12 = vpop.eup %3398  ;;  %3418 = vrcp.f32 %v925_v16  ;;  %v927_v60 = vadd.f32 1.0, %v3397_v24 }
 0x3dc   : > { %v3401_v61 = vpop.eup %3400  ;;  %v928_v17 = vadd.f32 1.0, %v3399_v12  ;;  %3420 = vrcp.f32 %v926_v28 }
 0x3dd   : > { %v3403_v46 = vpop.eup %3402  ;;  %3422 = vrcp.f32 %v927_v60  ;;  %v929_v52 = vadd.f32 1.0, %v3401_v61 }
 0x3de   : > { %v3405_v62 = vpop.eup %3404  ;;  %3424 = vrcp.f32 %v928_v17  ;;  %v930_v63 = vadd.f32 1.0, %v3403_v46 }
 0x3df   : > { %v3407_v1 = vpop.eup %3406  ;;  %3426 = vrcp.f32 %v929_v52  ;;  %v931_v2 = vadd.f32 1.0, %v3405_v62 }
 0x3e0   : > { %v3409_v43 = vpop.eup %3408  ;;  %v4072_v33 = vmul.f32 %v3407_v1, %v3993_v18  ;;  %3428 = vpow2.f32 %v2500_v32  ;;  %v3327_v32 = vld [vmem:[%s4458_s5 + $0x110] sm:$0xff]  }
 0x3e1   : > { %v3411_v54 = vpop.eup %3410  ;;  %v980_v10 = vmul.f32 %v3409_v43, %v3996_v19  ;;  %3430 = vrcp.f32 %v930_v63 }
 0x3e2   : > { %v3413_v11 = vpop.eup %3412  ;;  %v999_v37 = vsel %vm344_vm3, %v4072_v33, 0.0  ;;  %v4080_v38 = vmul.f32 %v3411_v54, %v3999_v23  ;;  %3432 = vrcp.f32 %v931_v2 }
 0x3e3   : > { %v3415_v6 = vpop.eup %3414  ;;  %v1000_v18 = vsel %vm351_vm4, %v980_v10, 0.0  ;;  %1019 = vst [vmem:[#allocation2 + $0x10] sm:$0xff] %v999_v37  ;;  %v982_v45 = vmul.f32 %v3413_v11, %v4002_v57  ;;  %3434 = vpow2.f32 %v2501_v8  ;;  %v3324_v8 = vld [vmem:[%s4458_s5 + $0x8] sm:$0xff]   ;;  %v3326_v11 = vld [vmem:[%s4458_s5 + $0x10] sm:$0xff]   ;;  %v3331_v37 = vld [vmem:[%s4458_s5 + $0x120] sm:$0xff]  }
 0x3e4   : > { %v3417_v3 = vpop.eup %3416  ;;  %1020 = vst [vmem:[#allocation2 + $0x18] sm:$0x3] %v1000_v18  ;;  %v1001_v19 = vsel %vm344_vm3, %v4080_v38, 0.0  ;;  %v4089_v39 = vmul.f32 %v3415_v6, %v4005_v59  ;;  %3436 = vpow2.f32 %v2502_v9  ;;  %v3329_v9 = vld [vmem:[%s4458_s5 + $0x118] sm:$0xff]  }
 0x3e5   : > { %v3419_v23 = vpop.eup %3418  ;;  %1021 = vst [vmem:[#allocation2 + $0x20] sm:$0xff] %v1001_v19  ;;  %v984_v44 = vmul.f32 %v3417_v3, %v4008_v36  ;;  %v1002_v21 = vsel %vm351_vm4, %v982_v45, 0.0  ;;  %v3446_v36 = vpack.c.bf16 %v4080_v38, %v4072_v33  ;;  %v3328_v18 = vld [vmem:[%s4458_s5 + $0x18] sm:$0xff]   ;;  %v3333_v45 = vld [vmem:[%s4458_s5 + $0x128] sm:$0xff]  }
 0x3e6   : > { %v3421_v22 = vpop.eup %3420  ;;  %v1003_v57 = vsel %vm344_vm3, %v4089_v39, 0.0  ;;  %1022 = vst [vmem:[#allocation2 + $0x28] sm:$0x3] %v1002_v21  ;;  %v4098_v25 = vmul.f32 %v3419_v23, %v4011_v0 }
 0x3e7   : > { %v3423_v30 = vpop.eup %3422  ;;  %3447 = vmatprep.mubr.msk.bf16.mxu0 %vm4103_vm5, %v3446_v36  ;;  %v1004_v31 = vsel %vm351_vm4, %v984_v44, 0.0  ;;  %1023 = vst [vmem:[#allocation2 + $0x30] sm:$0xff] %v1003_v57  ;;  %v986_v0 = vmul.f32 %v3421_v22, %v4022_v5  ;;  %v3325_v5 = vld [vmem:[%s4458_s5 + $0x108] sm:$0xff]   ;;  %v3335_v57 = vld [vmem:[%s4458_s5 + $0x130] sm:$0xff]  }
 0x3e8   : > { %v3425_v34 = vpop.eup %3424  ;;  %1024 = vst [vmem:[#allocation2 + $0x38] sm:$0x3] %v1004_v31  ;;  %v1005_v40 = vsel %vm344_vm3, %v4098_v25, 0.0  ;;  %v4118_v41 = vmul.f32 %v3423_v30, %v4027_v13  ;;  %v3332_v31 = vld [vmem:[%s4458_s5 + $0x28] sm:$0xff]  }
 0x3e9   : > { %v3427_v42 = vpop.eup %3426  ;;  %1025 = vst [vmem:[#allocation2 + $0x40] sm:$0xff] %v1005_v40  ;;  %v988_v4 = vmul.f32 %v3425_v34, %v4030_v53  ;;  %v1006_v50 = vsel %vm351_vm4, %v986_v0, 0.0  ;;  %v3449_v53 = vpack.c.bf16 %v4098_v25, %v4089_v39  ;;  %v3337_v0 = vld [vmem:[%s4458_s5 + $0x138] sm:$0xff]   ;;  %v4230_v40 = vld [vmem:[#allocation2] sm:$0xff] }
 0x3ea   : > { %v3429_v51 = vpop.eup %3428  ;;  %v1007_v58 = vsel %vm344_vm3, %v4118_v41, 0.0  ;;  %1026 = vst [vmem:[#allocation2 + $0x48] sm:$0x3] %v1006_v50  ;;  %v4130_v13 = vmul.f32 %v3427_v42, %v4041_v15  ;;  %v3334_v42 = vld [vmem:[%s4458_s5 + $0x30] sm:$0xff]   ;;  %v3336_v50 = vld [vmem:[%s4458_s5 + $0x38] sm:$0xff]  }
 0x3eb   : > { %v3431_v26 = vpop.eup %3430  ;;  %v4132_v56 = vld [vmem:[#allocation2 + $0x11] sm:$0xff]  ;;  %3450 = vmatmul.mubr.msk.bf16.vlgmr.msra.gmra.mrb[0].mxu0 %vm4103_vm5, %v3449_v53  ;;  %v1008_v16 = vsel %vm351_vm4, %v988_v4, 0.0  ;;  %1027 = vst [vmem:[#allocation2 + $0x50] sm:$0xff] %v1007_v58  ;;  %v932_v24 = vadd.f32 1.0, %v3429_v51  ;;  %v3339_v4 = vld [vmem:[%s4458_s5 + $0x140] sm:$0xff]   ;;  %v3340_v53 = vld [vmem:[%s4458_s5 + $0x88] sm:$0xff]  }
 0x3ec   : > { %v3433_v28 = vpop.eup %3432  ;;  %v1073_v12 = vpack.c.bf16 %v4132_v56, %v1065_v47  ;;  %3051 = vmatpush3.bf16.msra.mxu0 %v3955_v27  ;;  %1028 = vst [vmem:[#allocation2 + $0x58] sm:$0x3] %v1008_v16  ;;  %v1009_v15 = vsel %vm344_vm3, %v4130_v13, 0.0  ;;  %v990_v60 = vmul.f32 %v3431_v26, %v4044_v20  ;;  %v3452_v63 = vpack.c.bf16 %v4130_v13, %v4118_v41  ;;  %v3338_v58 = vld [vmem:[%s4458_s5 + $0x80] sm:$0xff]   ;;  %v3343_v26 = vld [vmem:[%s4458_s5 + $0x150] sm:$0xff]  }
 0x3ed   : > { %v3435_v61 = vpop.eup %3434  ;;  %v4146_v17 = vld [vmem:[#allocation2 + $0x21] sm:$0xff]  ;;  %1029 = vst [vmem:[#allocation2 + $0x60] sm:$0xff] %v1009_v15  ;;  %3052 = vmatprep.subr.bf16.mxu0 %v3325_v5  ;;  %3438 = vrcp.f32 %v932_v24  ;;  %v4152_v46 = vmul.f32 %v3433_v28, %v4048_v14  ;;  %v3458_v47 = vpack.c.bf16 %v4072_v33, %v4230_v40  ;;  %v1321_v16 = vld [vmem:[#allocation2 + $0x12] sm:$0xff]  ;;  %v4268_v28 = vpack.c.bf16 %v4089_v39, %v4080_v38 }
 0x3ee   : > { %v3437_v27 = vpop.eup %3436  ;;  %2970 = vmatprep.mubr.bf16.mxu1 %v1073_v12  ;;  %v1010_v52 = vsel %vm351_vm4, %v990_v60, 0.0  ;;  %v933_v62 = vadd.f32 1.0, %v3435_v61  ;;  %3453 = vmatprep.mubr.msk.bf16.mxu0 %vm4103_vm5, %v3452_v63  ;;  %v1629_v30 = vpack.c.bf16 %v4146_v17, %v4132_v56  ;;  %v3341_v33 = vld [vmem:[%s4458_s5 + $0x148] sm:$0xff]   ;;  %v3345_v15 = vld [vmem:[%s4458_s5 + $0x158] sm:$0xff]   ;;  %v4279_v60 = vpack.c.bf16 %v4118_v41, %v4098_v25  ;;  %v3342_v39 = vld [vmem:[%s4458_s5 + $0x90] sm:$0xff]  }
 0x3ef   : > { %v4156_v20 = vld [vmem:[#allocation2 + $0x31] sm:$0xff]  ;;  %v1011_v1 = vsel %vm344_vm3, %v4152_v46, 0.0  ;;  %1030 = vst [vmem:[#allocation2 + $0x68] sm:$0x3] %v1010_v52  ;;  %v934_v14 = vadd.f32 1.0, %v3437_v27  ;;  %v4264_v24 = vld [vmem:[#allocation2 + $0x22] sm:$0xff] }
 0x3f0   : > { %v4167_v2 = vpack.c.bf16 %v4156_v20, %v4146_v17  ;;  %3053 = vmatpush3.bf16.msra.mxu0 %v3325_v5  ;;  %1031 = vst [vmem:[#allocation2 + $0x70] sm:$0xff] %v1011_v1  ;;  %3440 = vrcp.f32 %v933_v62  ;;  %v1779_v38 = vpack.c.bf16 %v4264_v24, %v1321_v16  ;;  %v1320_v61 = vld [vmem:[#allocation2 + $0x2] sm:$0xff]  ;;  %v3344_v41 = vld [vmem:[%s4458_s5 + $0x98] sm:$0xff]  }
 0x3f1   : > { %v4172_v43 = vld [vmem:[#allocation2 + $0x41] sm:$0xff]  ;;  %3054 = vmatprep.subr.bf16.mxu0 %v3327_v32  ;;  %3442 = vrcp.f32 %v934_v14  ;;  %v1328_v17 = vpack.c.bf16 %v1321_v16, %v1320_v61  ;;  %v3353_v62 = vld [vmem:[%s4458_s5 + $0x178] sm:$0xff]  }
 0x3f2   : > { %2971 = vmatmul.mubr.bf16.vlgmr.msra.gmra.mrb[8].mxu1 %v4167_v2  ;;  %v1630_v5 = vpack.c.bf16 %v4172_v43, %v4156_v20  ;;  %v3347_v25 = vld [vmem:[%s4458_s5 + $0x160] sm:$0xff]   ;;  %v3349_v27 = vld [vmem:[%s4458_s5 + $0x168] sm:$0xff]   ;;  %v3350_v20 = vld [vmem:[%s4458_s5 + $0xb0] sm:$0xff]  }
 0x3f3   : > { %2979 = vmatpush3.bf16.msra.mxu1 %v3961_v49  ;;  %v4179_v54 = vld [vmem:[#allocation2 + $0x51] sm:$0xff]  ;;  %v3346_v52 = vld [vmem:[%s4458_s5 + $0xa0] sm:$0xff]  }
 0x3f4   : > { %v4183_v10 = vpack.c.bf16 %v4179_v54, %v4172_v43  ;;  %2980 = vmatprep.subr.bf16.mxu1 %v3324_v8  ;;  %3055 = vmatpush3.bf16.msra.mxu0 %v3327_v32  ;;  %v4296_v32 = vpack.c.bf16 %v4152_v46, %v4130_v13  ;;  %v3351_v13 = vld [vmem:[%s4458_s5 + $0x170] sm:$0xff]   ;;  %v3354_v63 = vld [vmem:[%s4458_s5 + $0x180] sm:$0xff]  }
 0x3f5   : > { %3056 = vmatprep.subr.bf16.mxu0 %v3329_v9  ;;  %v1323_v1 = vld [vmem:[#allocation2 + $0x32] sm:$0xff]  ;;  %v1774_v14 = vld [vmem:[#allocation2 + $0x42] sm:$0xff] }
 0x3f6   : > { %2974 = vmatprep.mubr.bf16.mxu1 %v4183_v10  ;;  %v1071_v36 = vld [vmem:[#allocation2 + $0x61] sm:$0xff]  ;;  %v1325_v43 = vld [vmem:[#allocation2 + $0x52] sm:$0xff] }
 0x3f7   : > { %v3439_v49 = vpop.eup %3438  ;;  %2981 = vmatpush3.bf16.msra.mxu1 %v3324_v8  ;;  %v1631_v51 = vpack.c.bf16 %v1071_v36, %v4179_v54  ;;  %v3352_v8 = vld [vmem:[%s4458_s5 + $0xb8] sm:$0xff]   ;;  %v1780_v54 = vpack.c.bf16 %v1774_v14, %v1323_v1 }
 0x3f8   : > { %2982 = vmatprep.subr.bf16.mxu1 %v3326_v11  ;;  %v992_v6 = vmul.f32 %v3439_v49, %v4059_v35  ;;  %3057 = vmatpush3.bf16.msra.mxu0 %v3329_v9  ;;  %v3330_v35 = vld [vmem:[%s4458_s5 + $0x20] sm:$0xff]   ;;  %v3356_v49 = vld [vmem:[%s4458_s5 + $0x190] sm:$0xff]  }
 0x3f9   : > { %3058 = vmatprep.subr.bf16.mxu0 %v3331_v37  ;;  %v1776_v9 = vld [vmem:[#allocation2 + $0x62] sm:$0xff] }
 0x3fa   : > { %v3441_v3 = vpop.eup %3440  ;;  %v1012_v19 = vsel %vm351_vm4, %v992_v6, 0.0 }
 0x3fb   : > { %v3443_v23 = vpop.eup %3442  ;;  %1032 = vst [vmem:[#allocation2 + $0x78] sm:$0x3] %v1012_v19  ;;  %2983 = vmatpush3.bf16.msra.mxu1 %v3326_v11  ;;  %v4202_v44 = vmul.f32 %v3441_v3, %v4064_v55  ;;  %v3355_v11 = vld [vmem:[%s4458_s5 + $0x188] sm:$0xff]   ;;  %v4336_v3 = vpack.c.bf16 %v1325_v43, %v1774_v14 }
 0x3fc   : > { %2984 = vmatprep.subr.bf16.mxu1 %v3328_v18  ;;  %3059 = vmatpush3.bf16.msra.mxu0 %v3331_v37  ;;  %v994_v21 = vmul.f32 %v3443_v23, %v4068_v29  ;;  %v1781_v37 = vpack.c.bf16 %v1776_v9, %v1325_v43  ;;  %v3357_v23 = vld [vmem:[%s4458_s5 + $0x198] sm:$0xff]  }
 0x3fd   : > { %v1013_v22 = vsel %vm344_vm3, %v4202_v44, 0.0  ;;  %3060 = vmatprep.subr.bf16.mxu0 %v3333_v45  ;;  %v3455_v29 = vpack.c.bf16 %v4202_v44, %v4152_v46  ;;  %v3348_v46 = vld [vmem:[%s4458_s5 + $0xa8] sm:$0xff]   ;;  %v3479_v59 = vpack.c.bf16 %v4230_v40, %v4202_v44  ;;  %v3368_v44 = vld [vmem:[%s4458_s5 + $0x1f0] sm:$0xff]  }
 0x3fe   : > { %1033 = vst [vmem:[#allocation2 + $0x80] sm:$0xff] %v1013_v22  ;;  %v1014_v55 = vsel %vm351_vm4, %v994_v21, 0.0  ;;  %v3359_v22 = vld [vmem:[%s4458_s5 + $0x1a8] sm:$0xff]  }
 0x3ff   : > { %2985 = vmatpush3.bf16.msra.mxu1 %v3328_v18  ;;  %1034 = vst [vmem:[#allocation2 + $0x88] sm:$0x3] %v1014_v55  ;;  %3456 = vmatmul.mubr.msk.bf16.gmra.mrb[4].mxu0 %vm4103_vm5, %v3455_v29  ;;  %v3361_v55 = vld [vmem:[%s4458_s5 + $0x1b8] sm:$0xff]   ;;  %v3364_v29 = vld [vmem:[%s4458_s5 + $0x1d0] sm:$0xff]   ;;  %v3371_v40 = vld [vmem:[%s4458_s5 + $0x208] sm:$0xff]  }
 0x400   : > { %2986 = vmatprep.subr.bf16.mxu1 %v3330_v35  ;;  %3066 = vmatprep.mubr.bf16.mxu0 %v1629_v30  ;;  %v3362_v30 = vld [vmem:[%s4458_s5 + $0x1c0] sm:$0xff]  }
 0x401   : > { %3061 = vmatpush3.bf16.msra.mxu0 %v3333_v45  ;;  %v4334_v45 = vpack.c.bf16 %v1323_v1, %v4264_v24 }
 0x402   : > { %v1072_v48 = vld [vmem:[#allocation2 + $0x71] sm:$0xff]  ;;  %3062 = vmatprep.subr.bf16.mxu0 %v3335_v57 }
 0x403   : > { %v4228_v34 = vpack.c.bf16 %v1072_v48, %v1071_v36  ;;  %2987 = vmatpush3.bf16.msra.mxu1 %v3330_v35  ;;  %v1327_v6 = vld [vmem:[#allocation2 + $0x72] sm:$0xff]  ;;  %v3358_v35 = vld [vmem:[%s4458_s5 + $0x1a0] sm:$0xff]   ;;  %v3363_v36 = vld [vmem:[%s4458_s5 + $0x1c8] sm:$0xff]  }
 0x404   : > { %2988 = vmatprep.subr.bf16.mxu1 %v3332_v31  ;;  %v4350_v21 = vpack.c.bf16 %v1327_v6, %v1776_v9 }
 0x405   : > { %2975 = vmatmul.mubr.bf16.gmra.mrb[12].mxu1 %v4228_v34  ;;  %3063 = vmatpush3.bf16.msra.mxu0 %v3335_v57  ;;  %v3360_v57 = vld [vmem:[%s4458_s5 + $0x1b0] sm:$0xff]  }
 0x406   : > { %3459 = vmatprep.mubr.msk.bf16.mxu1 %vm3457_vm7, %v3458_v47  ;;  %3064 = vmatprep.subr.bf16.mxu0 %v3337_v0  ;;  %v4259_v56 = vld [vmem:[#allocation2 + $0x81] sm:$0xff]  ;;  %v2079_v47 = vld [vmem:[#allocation2 + $0x91] sm:$0xff] }
 0x407   : > { %2989 = vmatpush3.bf16.msra.mxu1 %v3332_v31  ;;  %v1632_v12 = vpack.c.bf16 %v4259_v56, %v1072_v48  ;;  %v4331_v18 = vld [vmem:[#allocation2 + $0x82] sm:$0xff]  ;;  %v3365_v31 = vld [vmem:[%s4458_s5 + $0x1d8] sm:$0xff]  }
 0x408   : > { %2990 = vmatprep.subr.bf16.mxu1 %v3334_v42  ;;  %v1782_v19 = vpack.c.bf16 %v4331_v18, %v1327_v6  ;;  %v3366_v48 = vld [vmem:[%s4458_s5 + $0x1e0] sm:$0xff]  }
 0x409   : > { %3065 = vmatpush3.bf16.msra.mxu0 %v3337_v0  ;;  %v3370_v0 = vld [vmem:[%s4458_s5 + $0x200] sm:$0xff]  }
 0x40a   : > { %3074 = vmatprep.subr.bf16.mxu0 %v3339_v4 }
 0x40b   : > { %2991 = vmatpush3.bf16.msra.mxu1 %v3334_v42  ;;  %v3372_v42 = vld [vmem:[%s4458_s5 + $0x210] sm:$0xff]  }
 0x40c   : > { %2992 = vmatprep.subr.bf16.mxu1 %v3336_v50  ;;  %3067 = vmatmul.mubr.bf16.vlgmr.msra.gmra.mrb[0].mxu0 %v1630_v5  ;;  %v3376_v5 = vld [vmem:[%s4458_s5 + $0x230] sm:$0xff]  }
 0x40d   : > { %3070 = vmatprep.mubr.bf16.mxu0 %v1631_v51  ;;  %3075 = vmatpush3.bf16.msra.mxu0 %v3339_v4  ;;  %v2083_v4 = vpack.c.bf16 %v2079_v47, %v4259_v56  ;;  %v2229_v51 = vld [vmem:[#allocation2 + $0x92] sm:$0xff] }
 0x40e   : > { %3076 = vmatprep.subr.bf16.mxu0 %v3341_v33 }
 0x40f   : > { %2993 = vmatpush3.bf16.msra.mxu1 %v3336_v50  ;;  %v3373_v50 = vld [vmem:[%s4458_s5 + $0x218] sm:$0xff]  }
 0x410   : > { %3002 = vmatprep.subr.bf16.mxu1 %v3338_v58 }
 0x411   : > { %3077 = vmatpush3.bf16.msra.mxu0 %v3341_v33  ;;  %v3377_v33 = vld [vmem:[%s4458_s5 + $0x238] sm:$0xff]  }
 0x412   : > { %3462 = vmatmul.mubr.msk.bf16.vlgmr.msra.gmra.mrb[8].mxu1 %vm4103_vm5, %v4268_v28  ;;  %3078 = vmatprep.subr.bf16.mxu0 %v3343_v26 }
 0x413   : > { %3465 = vmatprep.mubr.msk.bf16.mxu1 %vm4103_vm5, %v4279_v60  ;;  %3003 = vmatpush3.bf16.msra.mxu1 %v3338_v58  ;;  %v2233_v58 = vpack.c.bf16 %v2229_v51, %v4331_v18 }
 0x414   : > { %3004 = vmatprep.subr.bf16.mxu1 %v3340_v53  ;;  %3071 = vmatmul.mubr.bf16.gmra.mrb[4].mxu0 %v1632_v12 }
 0x415   : > { %3079 = vmatpush3.bf16.msra.mxu0 %v3343_v26  ;;  %3090 = vmatprep.mubr.bf16.mxu0 %v1779_v38  ;;  %v2705_v38 = vld [vmem:[%s4459_s6] ss:$0 sm:$0xff] }
 0x416   : > { %3080 = vmatprep.subr.bf16.mxu0 %v3345_v15 }
 0x417   : > { %3005 = vmatpush3.bf16.msra.mxu1 %v3340_v53 }
 0x418   : > { %3006 = vmatprep.subr.bf16.mxu1 %v3342_v39 }
 0x419   : > { %3081 = vmatpush3.bf16.msra.mxu0 %v3345_v15 }
 0x41a   : > { %3468 = vmatmul.mubr.msk.bf16.gmra.mrb[12].mxu1 %vm4103_vm5, %v4296_v32  ;;  %3082 = vmatprep.subr.bf16.mxu0 %v3347_v25 }
 0x41b   : > { %3007 = vmatpush3.bf16.msra.mxu1 %v3342_v39  ;;  %3018 = vmatprep.mubr.bf16.mxu1 %v1328_v17 }
 0x41c   : > { %3008 = vmatprep.subr.bf16.mxu1 %v3344_v41 }
 0x41d   : > { %3083 = vmatpush3.bf16.msra.mxu0 %v3347_v25  ;;  %v2706_v25 = vld [vmem:[%s314_s21] ss:$0 sm:$0xff] }
 0x41e   : > { %3084 = vmatprep.subr.bf16.mxu0 %v3349_v27 }
 0x41f   : > { %3009 = vmatpush3.bf16.msra.mxu1 %v3344_v41 }
 0x420   : > { %3010 = vmatprep.subr.bf16.mxu1 %v3346_v52 }
 0x421   : > { %3085 = vmatpush3.bf16.msra.mxu0 %v3349_v27 }
 0x422   : > { %3086 = vmatprep.subr.bf16.mxu0 %v3351_v13 }
 0x423   : > { %3011 = vmatpush3.bf16.msra.mxu1 %v3346_v52 }
 0x424   : > { %3012 = vmatprep.subr.bf16.mxu1 %v3348_v46 }
 0x425   : > { %3087 = vmatpush3.bf16.msra.mxu0 %v3351_v13 }
 0x426   : > { %3088 = vmatprep.subr.bf16.mxu0 %v3353_v62 }
 0x427   : > { %3013 = vmatpush3.bf16.msra.mxu1 %v3348_v46 }
 0x428   : > { %3014 = vmatprep.subr.bf16.mxu1 %v3350_v20 }
 0x429   : > { %3089 = vmatpush3.bf16.msra.mxu0 %v3353_v62 }
 0x42a   : > { %3098 = vmatprep.subr.bf16.mxu0 %v3354_v63 }
 0x42b   : > { %3015 = vmatpush3.bf16.msra.mxu1 %v3350_v20 }
 0x42c   : > { %3016 = vmatprep.subr.bf16.mxu1 %v3352_v8  ;;  %3091 = vmatmul.mubr.bf16.vlgmr.msra.gmra.mrb[0].mxu0 %v1780_v54 }
 0x42d   : > { %3094 = vmatprep.mubr.bf16.mxu0 %v1781_v37  ;;  %3099 = vmatpush3.bf16.msra.mxu0 %v3354_v63 }
 0x42e   : > { %3100 = vmatprep.subr.bf16.mxu0 %v3355_v11 }
 0x42f   : > { %3017 = vmatpush3.bf16.msra.mxu1 %v3352_v8 }
 0x431   : > { %3101 = vmatpush3.bf16.msra.mxu0 %v3355_v11 }
 0x432   : > { %3019 = vmatmul.mubr.bf16.vlgmr.msra.gmra.mrb[8].mxu1 %v4334_v45  ;;  %3102 = vmatprep.subr.bf16.mxu0 %v3356_v49 }
 0x433   : > { %3022 = vmatprep.mubr.bf16.mxu1 %v4336_v3 }
 0x434   : > { %3095 = vmatmul.mubr.bf16.gmra.mrb[4].mxu0 %v1782_v19 }
 0x435   : > { %3103 = vmatpush3.bf16.msra.mxu0 %v3356_v49  ;;  %3471 = vmatprep.mubr.msk.bf16.mxu0 %vm4103_vm5, %v4268_v28 }
 0x436   : > { %3104 = vmatprep.subr.bf16.mxu0 %v3357_v23 }
 0x439   : > { %3105 = vmatpush3.bf16.msra.mxu0 %v3357_v23 }
 0x43a   : > { %3023 = vmatmul.mubr.bf16.gmra.mrb[12].mxu1 %v4350_v21  ;;  %3106 = vmatprep.subr.bf16.mxu0 %v3358_v35 }
 0x43d   : > { %3107 = vmatpush3.bf16.msra.mxu0 %v3358_v35 }
 0x43e   : > { %3108 = vmatprep.subr.bf16.mxu0 %v3359_v22 }
 0x441   : > { %3109 = vmatpush3.bf16.msra.mxu0 %v3359_v22 }
 0x442   : > { %3110 = vmatprep.subr.bf16.mxu0 %v3360_v57 }
 0x445   : > { %3111 = vmatpush3.bf16.msra.mxu0 %v3360_v57 }
 0x446   : > { %3112 = vmatprep.subr.bf16.mxu0 %v3361_v55 }
 0x449   : > { %3113 = vmatpush3.bf16.msra.mxu0 %v3361_v55 }
 0x44a   : > { %3122 = vmatprep.subr.bf16.mxu0 %v3362_v30 }
 0x44c   : > { %3474 = vmatmul.mubr.msk.bf16.vlgmr.msra.gmra.mrb[0].mxu0 %vm4103_vm5, %v4279_v60 }
 0x44d   : > { %3477 = vmatprep.mubr.msk.bf16.mxu0 %vm4103_vm5, %v4296_v32  ;;  %3123 = vmatpush3.bf16.msra.mxu0 %v3362_v30 }
 0x44e   : > { %3124 = vmatprep.subr.bf16.mxu0 %v3363_v36 }
 0x451   : > { %3125 = vmatpush3.bf16.msra.mxu0 %v3363_v36 }
 0x452   : > { %3126 = vmatprep.subr.bf16.mxu0 %v3364_v29 }
 0x454   : > { %3480 = vmatmul.mubr.msk.bf16.gmra.mrb[4].mxu0 %vm3478_vm8, %v3479_v59 }
 0x455   : > { %3127 = vmatpush3.bf16.msra.mxu0 %v3364_v29  ;;  %3138 = vmatprep.mubr.bf16.mxu0 %v4167_v2  ;;  %v3369_v2 = vld [vmem:[%s4458_s5 + $0x1f8] sm:$0xff]  }
 0x456   : > { %3128 = vmatprep.subr.bf16.mxu0 %v3365_v31 }
 0x459   : > { %3129 = vmatpush3.bf16.msra.mxu0 %v3365_v31 }
 0x45a   : > { %3130 = vmatprep.subr.bf16.mxu0 %v3366_v48 }
 0x45d   : > { %3131 = vmatpush3.bf16.msra.mxu0 %v3366_v48 }
 0x45e   : > { %3132 = vmatprep.subr.bf16.mxu0 %v3367_v7 }
 0x461   : > { %3133 = vmatpush3.bf16.msra.mxu0 %v3367_v7 }
 0x462   : > { %3134 = vmatprep.subr.bf16.mxu0 %v3368_v44 }
 0x465   : > { %3135 = vmatpush3.bf16.msra.mxu0 %v3368_v44 }
 0x466   : > { %3136 = vmatprep.subr.bf16.mxu0 %v3369_v2 }
 0x469   : > { %3137 = vmatpush3.bf16.msra.mxu0 %v3369_v2 }
 0x46a   : > { %3146 = vmatprep.subr.bf16.mxu0 %v3370_v0 }
 0x46c   : > { %3139 = vmatmul.mubr.bf16.vlgmr.msra.gmra.mrb[0].mxu0 %v4183_v10  ;;  %v3374_v10 = vld [vmem:[%s4458_s5 + $0x220] sm:$0xff]  }
 0x46d   : > { %3142 = vmatprep.mubr.bf16.mxu0 %v4228_v34  ;;  %3147 = vmatpush3.bf16.msra.mxu0 %v3370_v0  ;;  %v3375_v34 = vld [vmem:[%s4458_s5 + $0x228] sm:$0xff]  }
 0x46e   : > { %3148 = vmatprep.subr.bf16.mxu0 %v3371_v40 }
 0x471   : > { %3149 = vmatpush3.bf16.msra.mxu0 %v3371_v40 }
 0x472   : > { %3150 = vmatprep.subr.bf16.mxu0 %v3372_v42 }
 0x474   : > { %3143 = vmatmul.mubr.bf16.gmra.mrb[4].mxu0 %v2083_v4 }
 0x475   : > { %3151 = vmatpush3.bf16.msra.mxu0 %v3372_v42  ;;  %3162 = vmatprep.mubr.bf16.mxu0 %v4334_v45 }
 0x476   : > { %3152 = vmatprep.subr.bf16.mxu0 %v3373_v50 }
 0x479   : > { %3153 = vmatpush3.bf16.msra.mxu0 %v3373_v50 }
 0x47a   : > { %3154 = vmatprep.subr.bf16.mxu0 %v3374_v10 }
 0x47d   : > { %3155 = vmatpush3.bf16.msra.mxu0 %v3374_v10 }
 0x47e   : > { %3156 = vmatprep.subr.bf16.mxu0 %v3375_v34 }
 0x481   : > { %3157 = vmatpush3.bf16.msra.mxu0 %v3375_v34 }
 0x482   : > { %3158 = vmatprep.subr.bf16.mxu0 %v3376_v5 }
 0x485   : > { %3159 = vmatpush3.bf16.msra.mxu0 %v3376_v5 }
 0x486   : > { %3160 = vmatprep.subr.bf16.mxu0 %v3377_v33 }
 0x489   : > { %3161 = vmatpush3.bf16.msra.mxu0 %v3377_v33 }
 0x48c   : > { %3163 = vmatmul.mubr.bf16.vlgmr.msra.gmra.mrb[0].mxu0 %v4336_v3 }
 0x48d   : > { %3166 = vmatprep.mubr.bf16.mxu0 %v4350_v21 }
 0x494   : > { %3167 = vmatmul.mubr.bf16.gmra.mrb[4].mxu0 %v2233_v58 }
 0x505   : > { %v3020_v26 = vpop.f32.mrb[8].mxu1 }
 0x506   : > { %v1431_v56 = vpop.f32.mrb[9].mxu1 }
 0x507   : > { %v3021_v53 = vpop.f32.mrb[10].mxu1 }
 0x508   : > { %v1434_v16 = vpop.f32.mrb[11].mxu1 }
 0x50d   : > { %v3024_v24 = vpop.f32.mrb[12].mxu1 }
 0x50e   : > { %v1447_v28 = vpop.f32.mrb[13].mxu1 }
 0x50f   : > { %v3025_v12 = vpop.f32.mrb[14].mxu1 }
 0x510   : > { %v1450_v15 = vpop.f32.mrb[15].mxu1 }
 0x55f   : > { %v3164_v60 = vpop.f32.mrb[0].mxu0 }
 0x560   : > { %v3230_v39 = vadd.f32 %v3164_v60, %v3020_v26  ;;  %v2333_v61 = vpop.f32.mrb[1].mxu0 }
 0x561   : > { %v3231_v41 = vadd.f32 %v2333_v61, %v1431_v56  ;;  %v3165_v17 = vpop.f32.mrb[2].mxu0 }
 0x562   : > { %v2381_v32 = vadd.f32 %v3230_v39, %v2705_v38  ;;  %v3232_v27 = vadd.f32 %v3165_v17, %v3021_v53  ;;  %v2336_v52 = vpop.f32.mrb[3].mxu0 }
 0x563   : > { %v2379_v13 = vadd.f32 %v3231_v41, %v2705_v38  ;;  %v3233_v46 = vadd.f32 %v2336_v52, %v1434_v16 }
 0x564   : > { %v2396_v62 = vadd.f32 %v2706_v25, %v2381_v32  ;;  %v2382_v20 = vadd.f32 %v3232_v27, %v2705_v38 }
 0x565   : > { %v2394_v63 = vadd.f32 %v2706_v25, %v2379_v13  ;;  %v2380_v1 = vadd.f32 %v3233_v46, %v2705_v38 }
 0x566   : > { %2404 = vst [vmem:[%s4440_s29 + $0x10] sm:$0xff] %v2396_v62  ;;  %v2397_v14 = vadd.f32 %v2706_v25, %v2382_v20 }
 0x567   : > { %2402 = vst [vmem:[%s4440_s29] sm:$0xff] %v2394_v63  ;;  %v2395_v8 = vadd.f32 %v2706_v25, %v2380_v1  ;;  %v3168_v43 = vpop.f32.mrb[4].mxu0 }
 0x568   : > { %2405 = vst [vmem:[%s4440_s29 + $0x18] sm:$0xff] %v2397_v14  ;;  %v3234_v9 = vadd.f32 %v3168_v43, %v3024_v24  ;;  %v2349_v54 = vpop.f32.mrb[5].mxu0 }
 0x569   : > { %2403 = vst [vmem:[%s4440_s29 + $0x8] sm:$0xff] %v2395_v8  ;;  %v3235_v11 = vadd.f32 %v2349_v54, %v1447_v28  ;;  %v3169_v37 = vpop.f32.mrb[6].mxu0 }
 0x56a   : > { %v2385_v49 = vadd.f32 %v3234_v9, %v2705_v38  ;;  %v3236_v6 = vadd.f32 %v3169_v37, %v3025_v12  ;;  %v2352_v18 = vpop.f32.mrb[7].mxu0 }
 0x56b   : > { %v2383_v45 = vadd.f32 %v3235_v11, %v2705_v38  ;;  %v3237_v3 = vadd.f32 %v2352_v18, %v1450_v15 }
 0x56c   : > { %v2400_v19 = vadd.f32 %v2706_v25, %v2385_v49  ;;  %v2386_v23 = vadd.f32 %v3236_v6, %v2705_v38 }
 0x56d   : > { %v2398_v35 = vadd.f32 %v2706_v25, %v2383_v45  ;;  %v2384_v21 = vadd.f32 %v3237_v3, %v2705_v38 }
 0x56e   : > { %2408 = vst [vmem:[%s4440_s29 + $0x30] sm:$0xff] %v2400_v19  ;;  %v2401_v22 = vadd.f32 %v2706_v25, %v2386_v23 }
 0x56f   : > { %2406 = vst [vmem:[%s4440_s29 + $0x20] sm:$0xff] %v2398_v35  ;;  %v2399_v57 = vadd.f32 %v2706_v25, %v2384_v21 }
 0x570   : > { %2409 = vst [vmem:[%s4440_s29 + $0x38] sm:$0xff] %v2401_v22 }
 0x571   : > { %2407 = vst [vmem:[%s4440_s29 + $0x28] sm:$0xff] %v2399_v57 }
 0x572 PF: > { %s18_s27 = sadd.s32 1, %s3487_s27  }
 0x573   : > { %p15_p4 = scmp.ge.s32.totalorder %s18_s27, 4  }
 0x575   :  { %17 = sbr.rel (!%p15_p4) target bundleno = 1 (0x1), region = 95 }

</bundles_post_ra>
